<compile_context>
chip_gen: v5e
topology: v5e:2x2
jax: 0.10.0
libtpu: 0.0.40
codegen_flags: <defaults>
</compile_context>

<pallas_src>
import functools

import jax
import jax.numpy as jnp
from jax.experimental import pallas as pl
from jax.experimental.pallas import tpu as pltpu


def _round_up(x, m):
    return (x + m - 1) // m * m


# ---------------------------------------------------------------------------
# Fused conv (im2col matmul) + bias + 2x2 max-pool + ReLU.
# qa..qd hold the im2col rows of the four 2x2 pool quadrants.  Since the bias is
# shared across the window and ReLU is monotone:
#     maxpool(relu(conv + b)) == relu(max_q(matmul_q) + b)
# ---------------------------------------------------------------------------
def _conv_pool_relu_kernel(qa_ref, qb_ref, qc_ref, qd_ref, w_ref, b_ref, o_ref):
    w = w_ref[...]
    ya = jnp.dot(qa_ref[0], w, preferred_element_type=jnp.float32)
    yb = jnp.dot(qb_ref[0], w, preferred_element_type=jnp.float32)
    yc = jnp.dot(qc_ref[0], w, preferred_element_type=jnp.float32)
    yd = jnp.dot(qd_ref[0], w, preferred_element_type=jnp.float32)
    y = jnp.maximum(jnp.maximum(ya, yb), jnp.maximum(yc, yd)) + b_ref[...]
    o_ref[0] = jnp.maximum(y, 0.0)


def conv_relu_pool_pallas(x_nhwc, w_oihw, b, stride):
    """Conv2d(valid, square stride) + ReLU + MaxPool2d(2).  Weight layout (Cout,Cin,kh,kw)."""
    N, H, W, Cin = x_nhwc.shape
    Cout, Cin_w, kh, kw = w_oihw.shape
    assert Cin == Cin_w
    Ho = (H - kh) // stride + 1
    Wo = (W - kw) // stride + 1
    Hp, Wp = Ho // 2, Wo // 2                       # PyTorch MaxPool2d floors
    K = kh * kw * Cin
    Kp = _round_up(K, 128)                          # zero-pad contraction dim (aligned MXU)

    # tap-stacked patches, in the same order as the (kh, kw, Cin, Cout) weight reshape
    taps = []
    for i in range(kh):
        for j in range(kw):
            taps.append(
                x_nhwc[:, i: i + stride * (Ho - 1) + 1: stride,
                          j: j + stride * (Wo - 1) + 1: stride, :])
    p = jnp.concatenate(taps, axis=-1).astype(jnp.bfloat16)       # (N, Ho, Wo, K)
    if Kp != K:
        p = jnp.pad(p, ((0, 0), (0, 0), (0, 0), (0, Kp - K)))

    Mb = Hp * Wp
    quads = [p[:, di: 2 * Hp: 2, dj: 2 * Wp: 2, :].reshape(N, Mb, Kp)
             for di in range(2) for dj in range(2)]

    wm = jnp.transpose(w_oihw, (2, 3, 1, 0)).reshape(K, Cout).astype(jnp.bfloat16)
    wm = jnp.zeros((Kp, Cout), jnp.bfloat16).at[:K, :].set(wm)
    bm = b.reshape(1, Cout).astype(jnp.float32)

    out = pl.pallas_call(
        _conv_pool_relu_kernel,
        out_shape=jax.ShapeDtypeStruct((N, Mb, Cout), jnp.float32),
        grid=(N,),
        in_specs=[pl.BlockSpec((1, Mb, Kp), lambda n: (n, 0, 0))] * 4 + [
            pl.BlockSpec((Kp, Cout), lambda n: (0, 0)),
            pl.BlockSpec((1, Cout), lambda n: (0, 0)),
        ],
        out_specs=pl.BlockSpec((1, Mb, Cout), lambda n: (n, 0, 0)),
        compiler_params=pltpu.CompilerParams(dimension_semantics=("parallel",)),
    )(*quads, wm, bm)
    return out.reshape(N, Hp, Wp, Cout)


# ---------------------------------------------------------------------------
# Fused tail MLP: feature Linear+ReLU, other_fc (12->128->256->32, ReLU), concat,
# critic_linear — all in one Pallas kernel.
# ---------------------------------------------------------------------------
def _tail_mlp_kernel(feat_ref, oth_ref, fw_ref, fb_ref, w1_ref, b1_ref,
                     w2_ref, b2_ref, w3_ref, b3_ref, cw_ref, cb_ref,
                     x_out_ref, v_out_ref, *, feat_dim, half):
    # image-feature branch
    f = jnp.dot(feat_ref[...], fw_ref[...], preferred_element_type=jnp.float32)
    f = jnp.maximum(f + fb_ref[...], 0.0)                        # (M, feat_dim)

    # other_fc branch
    h = jnp.dot(oth_ref[...], w1_ref[...], preferred_element_type=jnp.float32)
    h = jnp.maximum(h + b1_ref[...], 0.0)
    h = jnp.dot(h.astype(jnp.bfloat16), w2_ref[...], preferred_element_type=jnp.float32)
    h = jnp.maximum(h + b2_ref[...], 0.0)
    h = jnp.dot(h.astype(jnp.bfloat16), w3_ref[...], preferred_element_type=jnp.float32)
    h = jnp.maximum(h + b3_ref[...], 0.0)                        # (M, half)

    # concat into the (lane-padded, zeroed) feature output buffer
    x_out_ref[...] = jnp.zeros(x_out_ref.shape, x_out_ref.dtype)
    x_out_ref[:, 0:feat_dim] = f
    x_out_ref[:, feat_dim:feat_dim + half] = h

    # critic_linear: padded lanes of x/cw are exactly zero, so a 128-wide reduce is exact
    x = x_out_ref[...]
    v_out_ref[...] = jnp.sum(x * cw_ref[...], axis=1, keepdims=True) + cb_ref[...]


def tail_mlp_pallas(feat_in, others, params):
    N, Kf = feat_in.shape                      # Kf = 32*2*2 = 128
    Ko = others.shape[1]                       # 12
    feat_dim = params["feat_w"].shape[1]       # 32
    half = params["fc3_w"].shape[1]            # 32
    hidden = feat_dim + half                   # 64
    M = _round_up(N, 8)
    Kf_p = _round_up(Kf, 128)
    Ko_p = _round_up(Ko, 128)
    H_p = _round_up(hidden, 128)

    feat_p = jnp.zeros((M, Kf_p), jnp.bfloat16).at[:N, :Kf].set(feat_in.astype(jnp.bfloat16))
    oth_p = jnp.zeros((M, Ko_p), jnp.bfloat16).at[:N, :Ko].set(others.astype(jnp.bfloat16))

    fw = jnp.zeros((Kf_p, feat_dim), jnp.bfloat16).at[:Kf, :].set(
        params["feat_w"].astype(jnp.bfloat16))
    fb = params["feat_b"].reshape(1, -1).astype(jnp.float32)
    w1 = jnp.zeros((Ko_p, params["fc1_w"].shape[1]), jnp.bfloat16).at[:Ko, :].set(
        params["fc1_w"].astype(jnp.bfloat16))
    b1 = params["fc1_b"].reshape(1, -1).astype(jnp.float32)
    w2 = params["fc2_w"].astype(jnp.bfloat16)
    b2 = params["fc2_b"].reshape(1, -1).astype(jnp.float32)
    w3 = params["fc3_w"].astype(jnp.bfloat16)
    b3 = params["fc3_b"].reshape(1, -1).astype(jnp.float32)
    cw = jnp.zeros((1, H_p), jnp.float32).at[0, :hidden].set(
        params["critic_w"].reshape(-1).astype(jnp.float32))
    cb = params["critic_b"].reshape(1, 1).astype(jnp.float32)

    def full_spec(shape):
        nd = len(shape)
        return pl.BlockSpec(shape, lambda i, _nd=nd: (0,) * _nd)

    operands = (feat_p, oth_p, fw, fb, w1, b1, w2, b2, w3, b3, cw, cb)
    x_out, v_out = pl.pallas_call(
        functools.partial(_tail_mlp_kernel, feat_dim=feat_dim, half=half),
        out_shape=(jax.ShapeDtypeStruct((M, H_p), jnp.float32),
                   jax.ShapeDtypeStruct((M, 1), jnp.float32)),
        grid=(1,),
        in_specs=[full_spec(op.shape) for op in operands],
        out_specs=(full_spec((M, H_p)), full_spec((M, 1))),
        compiler_params=pltpu.CompilerParams(dimension_semantics=("arbitrary",)),
    )(*operands)
    return x_out[:N, :hidden], v_out[:N]


# ---------------------------------------------------------------------------
# Parameter construction (deterministic, synthetic — same shapes as NavBase
# with arch='small', feat_dim=32, hidden_size=64, extra obs dim = 12).
# ---------------------------------------------------------------------------
def make_params(key, feat_dim=32, hidden_size=64, other_in=12):
    keys = jax.random.split(key, 10)

    def w(k, shape, fan_in):
        return jax.random.normal(k, shape, jnp.float32) / jnp.sqrt(jnp.float32(fan_in))

    p = {}
    # image_cnn (arch='small'): Conv(3,32,8,s4) -> Conv(32,64,4,s2) -> Conv(64,32,3,s1)
    p["conv1_w"] = w(keys[0], (32, 3, 8, 8), 3 * 8 * 8)
    p["conv1_b"] = jnp.zeros((32,), jnp.float32)
    p["conv2_w"] = w(keys[1], (64, 32, 4, 4), 32 * 4 * 4)
    p["conv2_b"] = jnp.zeros((64,), jnp.float32)
    p["conv3_w"] = w(keys[2], (32, 64, 3, 3), 64 * 3 * 3)
    p["conv3_b"] = jnp.zeros((32,), jnp.float32)
    # Linear(32*2*2, feat_dim)  — stored (in, out)
    p["feat_w"] = w(keys[3], (32 * 2 * 2, feat_dim), 32 * 2 * 2)
    p["feat_b"] = jnp.zeros((feat_dim,), jnp.float32)
    # other_fc: Linear(12,128) -> Linear(128,256) -> Linear(256, hidden//2)
    p["fc1_w"] = w(keys[4], (other_in, 128), other_in)
    p["fc1_b"] = jnp.zeros((128,), jnp.float32)
    p["fc2_w"] = w(keys[5], (128, 256), 128)
    p["fc2_b"] = jnp.zeros((256,), jnp.float32)
    p["fc3_w"] = w(keys[6], (256, hidden_size // 2), 256)
    p["fc3_b"] = jnp.zeros((hidden_size // 2,), jnp.float32)
    # critic_linear: Linear(hidden_size, 1)
    p["critic_w"] = w(keys[7], (hidden_size, 1), hidden_size)
    p["critic_b"] = jnp.zeros((1,), jnp.float32)
    return p


# ---------------------------------------------------------------------------
# NavBase.forward (recurrent=False -> GRU branch skipped; rnn_hxs/masks pass
# through, matching the PyTorch control flow).  Whole forward is jit'ed.
# ---------------------------------------------------------------------------
@jax.jit
def nav_base_forward(params, inputs, rnn_hxs, masks):
    del masks  # unused when not recurrent
    view = inputs["view"]                              # NCHW, like PyTorch
    x = jnp.transpose(view, (0, 2, 3, 1))              # -> NHWC for the conv kernels

    x = conv_relu_pool_pallas(x, params["conv1_w"], params["conv1_b"], stride=4)  # (N,26,26,32)
    x = conv_relu_pool_pallas(x, params["conv2_w"], params["conv2_b"], stride=2)  # (N, 6, 6,64)
    x = conv_relu_pool_pallas(x, params["conv3_w"], params["conv3_b"], stride=1)  # (N, 2, 2,32)

    N = x.shape[0]
    # Flatten in PyTorch's NCHW order (C, H, W)
    x = jnp.transpose(x, (0, 3, 1, 2)).reshape(N, -1)                              # (N, 128)

    # other_fc branch input: concat all non-'view' obs in sorted key order
    ks = sorted(set(inputs.keys()) - {"view"})
    others = jnp.concatenate([inputs[k] for k in ks], axis=1)

    feat, value = tail_mlp_pallas(x, others, params)   # (N,64), (N,1)

    # TODO(synk): recurrent=True GRU path (_forward_gru) not exercised here.
    return value, feat, rnn_hxs


if __name__ == "__main__":
    key = jax.random.PRNGKey(0)
    k_params, k_view, k_goal, k_pose = jax.random.split(key, 4)

    FEAT_DIM = 32
    HIDDEN = 64
    BATCH = 2
    # 212x212 is the smallest spatial size for which the 'small' CNN flattens
    # to exactly 32*2*2 = 128, as required by the module's Linear layer.
    H = W = 212

    params = make_params(k_params, feat_dim=FEAT_DIM, hidden_size=HIDDEN, other_in=12)

    inputs = {
        "view": jax.random.normal(k_view, (BATCH, 3, H, W), jnp.float32),
        "goal": jax.random.normal(k_goal, (BATCH, 8), jnp.float32),
        "pose": jax.random.normal(k_pose, (BATCH, 4), jnp.float32),
    }
    rnn_hxs = jnp.zeros((BATCH, 1), jnp.float32)   # recurrent_hidden_state_size == 1
    masks = jnp.ones((BATCH, 1), jnp.float32)

    value, feat, hxs = nav_base_forward(params, inputs, rnn_hxs, masks)
    jax.block_until_ready((value, feat, hxs))

    assert value.shape == (BATCH, 1)
    assert feat.shape == (BATCH, HIDDEN)
    assert hxs.shape == (BATCH, 1)
    print("KERNEL_OK")
</pallas_src>

<mosaic_0001>
module attributes {stable_mosaic.version = 11 : i64} {
  func.func @_conv_pool_relu_kernel(%arg0: i32, %arg1: memref<1x676x256xbf16, #tpu.memory_space<vmem>>, %arg2: memref<1x676x256xbf16, #tpu.memory_space<vmem>>, %arg3: memref<1x676x256xbf16, #tpu.memory_space<vmem>>, %arg4: memref<1x676x256xbf16, #tpu.memory_space<vmem>>, %arg5: memref<256x32xbf16, #tpu.memory_space<vmem>>, %arg6: memref<1x32xf32, #tpu.memory_space<vmem>>, %arg7: memref<1x676x32xf32, #tpu.memory_space<vmem>>) attributes {dimension_semantics = [#tpu.dimension_semantics<parallel>], iteration_bounds = array<i64: 2>, scalar_prefetch = 0 : i64, scratch_operands = 0 : i64, tpu.core_type = #tpu.core_type<tc>, window_params = [{transform_indices = @transform_0, window_bounds = array<i64: 1, 676, 256>}, {transform_indices = @transform_1, window_bounds = array<i64: 1, 676, 256>}, {transform_indices = @transform_2, window_bounds = array<i64: 1, 676, 256>}, {transform_indices = @transform_3, window_bounds = array<i64: 1, 676, 256>}, {pipeline_mode = #tpu.pipeline_mode<synchronous>, transform_indices = @transform_4, window_bounds = array<i64: 256, 32>}, {pipeline_mode = #tpu.pipeline_mode<synchronous>, transform_indices = @transform_5, window_bounds = array<i64: 1, 32>}, {transform_indices = @transform_6, window_bounds = array<i64: 1, 676, 32>}]} {
    %c0 = arith.constant 0 : index
    %c0_0 = arith.constant 0 : index
    %0 = vector.load %arg5[%c0, %c0_0] : memref<256x32xbf16, #tpu.memory_space<vmem>>, vector<256x32xbf16>
    %c0_1 = arith.constant 0 : index
    %c0_2 = arith.constant 0 : index
    %c0_3 = arith.constant 0 : index
    %1 = vector.load %arg1[%c0_1, %c0_2, %c0_3] : memref<1x676x256xbf16, #tpu.memory_space<vmem>>, vector<1x676x256xbf16>
    %2 = vector.shape_cast %1 : vector<1x676x256xbf16> to vector<676x256xbf16>
    %cst = arith.constant dense<0.000000e+00> : vector<676x32xf32>
    %3 = tpu.matmul %2, %0, %cst {dimension_numbers = #tpu.dot_dimension_numbers<[1], [0], [0], [1], [0, 0, 1, 1], [], []>} : vector<676x256xbf16>, vector<256x32xbf16>, vector<676x32xf32> -> vector<676x32xf32>
    %c0_4 = arith.constant 0 : index
    %c0_5 = arith.constant 0 : index
    %c0_6 = arith.constant 0 : index
    %4 = vector.load %arg2[%c0_4, %c0_5, %c0_6] : memref<1x676x256xbf16, #tpu.memory_space<vmem>>, vector<1x676x256xbf16>
    %5 = vector.shape_cast %4 : vector<1x676x256xbf16> to vector<676x256xbf16>
    %cst_7 = arith.constant dense<0.000000e+00> : vector<676x32xf32>
    %6 = tpu.matmul %5, %0, %cst_7 {dimension_numbers = #tpu.dot_dimension_numbers<[1], [0], [0], [1], [0, 0, 1, 1], [], []>} : vector<676x256xbf16>, vector<256x32xbf16>, vector<676x32xf32> -> vector<676x32xf32>
    %c0_8 = arith.constant 0 : index
    %c0_9 = arith.constant 0 : index
    %c0_10 = arith.constant 0 : index
    %7 = vector.load %arg3[%c0_8, %c0_9, %c0_10] : memref<1x676x256xbf16, #tpu.memory_space<vmem>>, vector<1x676x256xbf16>
    %8 = vector.shape_cast %7 : vector<1x676x256xbf16> to vector<676x256xbf16>
    %cst_11 = arith.constant dense<0.000000e+00> : vector<676x32xf32>
    %9 = tpu.matmul %8, %0, %cst_11 {dimension_numbers = #tpu.dot_dimension_numbers<[1], [0], [0], [1], [0, 0, 1, 1], [], []>} : vector<676x256xbf16>, vector<256x32xbf16>, vector<676x32xf32> -> vector<676x32xf32>
    %c0_12 = arith.constant 0 : index
    %c0_13 = arith.constant 0 : index
    %c0_14 = arith.constant 0 : index
    %10 = vector.load %arg4[%c0_12, %c0_13, %c0_14] : memref<1x676x256xbf16, #tpu.memory_space<vmem>>, vector<1x676x256xbf16>
    %11 = vector.shape_cast %10 : vector<1x676x256xbf16> to vector<676x256xbf16>
    %cst_15 = arith.constant dense<0.000000e+00> : vector<676x32xf32>
    %12 = tpu.matmul %11, %0, %cst_15 {dimension_numbers = #tpu.dot_dimension_numbers<[1], [0], [0], [1], [0, 0, 1, 1], [], []>} : vector<676x256xbf16>, vector<256x32xbf16>, vector<676x32xf32> -> vector<676x32xf32>
    %13 = arith.maximumf %3, %6 : vector<676x32xf32>
    %14 = arith.maximumf %9, %12 : vector<676x32xf32>
    %15 = arith.maximumf %13, %14 : vector<676x32xf32>
    %c0_16 = arith.constant 0 : index
    %c0_17 = arith.constant 0 : index
    %16 = vector.load %arg6[%c0_16, %c0_17] : memref<1x32xf32, #tpu.memory_space<vmem>>, vector<1x32xf32>
    %17 = vector.broadcast %16 : vector<1x32xf32> to vector<676x32xf32>
    %18 = arith.addf %15, %17 : vector<676x32xf32>
    %cst_18 = arith.constant 0.000000e+00 : f32
    %19 = vector.broadcast %cst_18 : f32 to vector<676x32xf32>
    %20 = arith.maximumf %18, %19 : vector<676x32xf32>
    %c0_19 = arith.constant 0 : index
    %c0_20 = arith.constant 0 : index
    %c0_21 = arith.constant 0 : index
    %21 = vector.load %arg7[%c0_19, %c0_20, %c0_21] : memref<1x676x32xf32, #tpu.memory_space<vmem>>, vector<1x676x32xf32>
    %22 = vector.shape_cast %21 : vector<1x676x32xf32> to vector<676x32xf32>
    %23 = vector.shape_cast %20 : vector<676x32xf32> to vector<1x676x32xf32>
    tpu.vector_store %arg7[%c0_19, %c0_20, %c0_21], %23 {strides = array<i32>} : memref<1x676x32xf32, #tpu.memory_space<vmem>>, vector<1x676x32xf32>,
    return
  }
  func.func @transform_0(%arg0: i32) -> (i32, i32, i32) {
    %c0_i32 = arith.constant 0 : i32
    %c0_i32_0 = arith.constant 0 : i32
    %c0_i32_1 = arith.constant 0 : i32
    return %arg0, %c0_i32, %c0_i32_0 : i32, i32, i32
  }
  func.func @transform_1(%arg0: i32) -> (i32, i32, i32) {
    %c0_i32 = arith.constant 0 : i32
    %c0_i32_0 = arith.constant 0 : i32
    %c0_i32_1 = arith.constant 0 : i32
    return %arg0, %c0_i32, %c0_i32_0 : i32, i32, i32
  }
  func.func @transform_2(%arg0: i32) -> (i32, i32, i32) {
    %c0_i32 = arith.constant 0 : i32
    %c0_i32_0 = arith.constant 0 : i32
    %c0_i32_1 = arith.constant 0 : i32
    return %arg0, %c0_i32, %c0_i32_0 : i32, i32, i32
  }
  func.func @transform_3(%arg0: i32) -> (i32, i32, i32) {
    %c0_i32 = arith.constant 0 : i32
    %c0_i32_0 = arith.constant 0 : i32
    %c0_i32_1 = arith.constant 0 : i32
    return %arg0, %c0_i32, %c0_i32_0 : i32, i32, i32
  }
  func.func @transform_4(%arg0: i32) -> (i32, i32) {
    %c0_i32 = arith.constant 0 : i32
    %c0_i32_0 = arith.constant 0 : i32
    %c0_i32_1 = arith.constant 0 : i32
    return %c0_i32, %c0_i32_0 : i32, i32
  }
  func.func @transform_5(%arg0: i32) -> (i32, i32) {
    %c0_i32 = arith.constant 0 : i32
    %c0_i32_0 = arith.constant 0 : i32
    %c0_i32_1 = arith.constant 0 : i32
    return %c0_i32, %c0_i32_0 : i32, i32
  }
  func.func @transform_6(%arg0: i32) -> (i32, i32, i32) {
    %c0_i32 = arith.constant 0 : i32
    %c0_i32_0 = arith.constant 0 : i32
    %c0_i32_1 = arith.constant 0 : i32
    return %arg0, %c0_i32, %c0_i32_0 : i32, i32, i32
  }
}

module attributes {stable_mosaic.version = 11 : i64} {
  func.func @_conv_pool_relu_kernel(%arg0: i32, %arg1: memref<1x36x512xbf16, #tpu.memory_space<vmem>>, %arg2: memref<1x36x512xbf16, #tpu.memory_space<vmem>>, %arg3: memref<1x36x512xbf16, #tpu.memory_space<vmem>>, %arg4: memref<1x36x512xbf16, #tpu.memory_space<vmem>>, %arg5: memref<512x64xbf16, #tpu.memory_space<vmem>>, %arg6: memref<1x64xf32, #tpu.memory_space<vmem>>, %arg7: memref<1x36x64xf32, #tpu.memory_space<vmem>>) attributes {dimension_semantics = [#tpu.dimension_semantics<parallel>], iteration_bounds = array<i64: 2>, scalar_prefetch = 0 : i64, scratch_operands = 0 : i64, tpu.core_type = #tpu.core_type<tc>, window_params = [{transform_indices = @transform_0, window_bounds = array<i64: 1, 36, 512>}, {transform_indices = @transform_1, window_bounds = array<i64: 1, 36, 512>}, {transform_indices = @transform_2, window_bounds = array<i64: 1, 36, 512>}, {transform_indices = @transform_3, window_bounds = array<i64: 1, 36, 512>}, {pipeline_mode = #tpu.pipeline_mode<synchronous>, transform_indices = @transform_4, window_bounds = array<i64: 512, 64>}, {pipeline_mode = #tpu.pipeline_mode<synchronous>, transform_indices = @transform_5, window_bounds = array<i64: 1, 64>}, {transform_indices = @transform_6, window_bounds = array<i64: 1, 36, 64>}]} {
    %c0 = arith.constant 0 : index
    %c0_0 = arith.constant 0 : index
    %0 = vector.load %arg5[%c0, %c0_0] : memref<512x64xbf16, #tpu.memory_space<vmem>>, vector<512x64xbf16>
    %c0_1 = arith.constant 0 : index
    %c0_2 = arith.constant 0 : index
    %c0_3 = arith.constant 0 : index
    %1 = vector.load %arg1[%c0_1, %c0_2, %c0_3] : memref<1x36x512xbf16, #tpu.memory_space<vmem>>, vector<1x36x512xbf16>
    %2 = vector.shape_cast %1 : vector<1x36x512xbf16> to vector<36x512xbf16>
    %cst = arith.constant dense<0.000000e+00> : vector<36x64xf32>
    %3 = tpu.matmul %2, %0, %cst {dimension_numbers = #tpu.dot_dimension_numbers<[1], [0], [0], [1], [0, 0, 1, 1], [], []>} : vector<36x512xbf16>, vector<512x64xbf16>, vector<36x64xf32> -> vector<36x64xf32>
    %c0_4 = arith.constant 0 : index
    %c0_5 = arith.constant 0 : index
    %c0_6 = arith.constant 0 : index
    %4 = vector.load %arg2[%c0_4, %c0_5, %c0_6] : memref<1x36x512xbf16, #tpu.memory_space<vmem>>, vector<1x36x512xbf16>
    %5 = vector.shape_cast %4 : vector<1x36x512xbf16> to vector<36x512xbf16>
    %cst_7 = arith.constant dense<0.000000e+00> : vector<36x64xf32>
    %6 = tpu.matmul %5, %0, %cst_7 {dimension_numbers = #tpu.dot_dimension_numbers<[1], [0], [0], [1], [0, 0, 1, 1], [], []>} : vector<36x512xbf16>, vector<512x64xbf16>, vector<36x64xf32> -> vector<36x64xf32>
    %c0_8 = arith.constant 0 : index
    %c0_9 = arith.constant 0 : index
    %c0_10 = arith.constant 0 : index
    %7 = vector.load %arg3[%c0_8, %c0_9, %c0_10] : memref<1x36x512xbf16, #tpu.memory_space<vmem>>, vector<1x36x512xbf16>
    %8 = vector.shape_cast %7 : vector<1x36x512xbf16> to vector<36x512xbf16>
    %cst_11 = arith.constant dense<0.000000e+00> : vector<36x64xf32>
    %9 = tpu.matmul %8, %0, %cst_11 {dimension_numbers = #tpu.dot_dimension_numbers<[1], [0], [0], [1], [0, 0, 1, 1], [], []>} : vector<36x512xbf16>, vector<512x64xbf16>, vector<36x64xf32> -> vector<36x64xf32>
    %c0_12 = arith.constant 0 : index
    %c0_13 = arith.constant 0 : index
    %c0_14 = arith.constant 0 : index
    %10 = vector.load %arg4[%c0_12, %c0_13, %c0_14] : memref<1x36x512xbf16, #tpu.memory_space<vmem>>, vector<1x36x512xbf16>
    %11 = vector.shape_cast %10 : vector<1x36x512xbf16> to vector<36x512xbf16>
    %cst_15 = arith.constant dense<0.000000e+00> : vector<36x64xf32>
    %12 = tpu.matmul %11, %0, %cst_15 {dimension_numbers = #tpu.dot_dimension_numbers<[1], [0], [0], [1], [0, 0, 1, 1], [], []>} : vector<36x512xbf16>, vector<512x64xbf16>, vector<36x64xf32> -> vector<36x64xf32>
    %13 = arith.maximumf %3, %6 : vector<36x64xf32>
    %14 = arith.maximumf %9, %12 : vector<36x64xf32>
    %15 = arith.maximumf %13, %14 : vector<36x64xf32>
    %c0_16 = arith.constant 0 : index
    %c0_17 = arith.constant 0 : index
    %16 = vector.load %arg6[%c0_16, %c0_17] : memref<1x64xf32, #tpu.memory_space<vmem>>, vector<1x64xf32>
    %17 = vector.broadcast %16 : vector<1x64xf32> to vector<36x64xf32>
    %18 = arith.addf %15, %17 : vector<36x64xf32>
    %cst_18 = arith.constant 0.000000e+00 : f32
    %19 = vector.broadcast %cst_18 : f32 to vector<36x64xf32>
    %20 = arith.maximumf %18, %19 : vector<36x64xf32>
    %c0_19 = arith.constant 0 : index
    %c0_20 = arith.constant 0 : index
    %c0_21 = arith.constant 0 : index
    %21 = vector.load %arg7[%c0_19, %c0_20, %c0_21] : memref<1x36x64xf32, #tpu.memory_space<vmem>>, vector<1x36x64xf32>
    %22 = vector.shape_cast %21 : vector<1x36x64xf32> to vector<36x64xf32>
    %23 = vector.shape_cast %20 : vector<36x64xf32> to vector<1x36x64xf32>
    tpu.vector_store %arg7[%c0_19, %c0_20, %c0_21], %23 {strides = array<i32>} : memref<1x36x64xf32, #tpu.memory_space<vmem>>, vector<1x36x64xf32>,
    return
  }
  func.func @transform_0(%arg0: i32) -> (i32, i32, i32) {
    %c0_i32 = arith.constant 0 : i32
    %c0_i32_0 = arith.constant 0 : i32
    %c0_i32_1 = arith.constant 0 : i32
    return %arg0, %c0_i32, %c0_i32_0 : i32, i32, i32
  }
  func.func @transform_1(%arg0: i32) -> (i32, i32, i32) {
    %c0_i32 = arith.constant 0 : i32
    %c0_i32_0 = arith.constant 0 : i32
    %c0_i32_1 = arith.constant 0 : i32
    return %arg0, %c0_i32, %c0_i32_0 : i32, i32, i32
  }
  func.func @transform_2(%arg0: i32) -> (i32, i32, i32) {
    %c0_i32 = arith.constant 0 : i32
    %c0_i32_0 = arith.constant 0 : i32
    %c0_i32_1 = arith.constant 0 : i32
    return %arg0, %c0_i32, %c0_i32_0 : i32, i32, i32
  }
  func.func @transform_3(%arg0: i32) -> (i32, i32, i32) {
    %c0_i32 = arith.constant 0 : i32
    %c0_i32_0 = arith.constant 0 : i32
    %c0_i32_1 = arith.constant 0 : i32
    return %arg0, %c0_i32, %c0_i32_0 : i32, i32, i32
  }
  func.func @transform_4(%arg0: i32) -> (i32, i32) {
    %c0_i32 = arith.constant 0 : i32
    %c0_i32_0 = arith.constant 0 : i32
    %c0_i32_1 = arith.constant 0 : i32
    return %c0_i32, %c0_i32_0 : i32, i32
  }
  func.func @transform_5(%arg0: i32) -> (i32, i32) {
    %c0_i32 = arith.constant 0 : i32
    %c0_i32_0 = arith.constant 0 : i32
    %c0_i32_1 = arith.constant 0 : i32
    return %c0_i32, %c0_i32_0 : i32, i32
  }
  func.func @transform_6(%arg0: i32) -> (i32, i32, i32) {
    %c0_i32 = arith.constant 0 : i32
    %c0_i32_0 = arith.constant 0 : i32
    %c0_i32_1 = arith.constant 0 : i32
    return %arg0, %c0_i32, %c0_i32_0 : i32, i32, i32
  }
}

module attributes {stable_mosaic.version = 11 : i64} {
  func.func @_conv_pool_relu_kernel(%arg0: i32, %arg1: memref<1x4x640xbf16, #tpu.memory_space<vmem>>, %arg2: memref<1x4x640xbf16, #tpu.memory_space<vmem>>, %arg3: memref<1x4x640xbf16, #tpu.memory_space<vmem>>, %arg4: memref<1x4x640xbf16, #tpu.memory_space<vmem>>, %arg5: memref<640x32xbf16, #tpu.memory_space<vmem>>, %arg6: memref<1x32xf32, #tpu.memory_space<vmem>>, %arg7: memref<1x4x32xf32, #tpu.memory_space<vmem>>) attributes {dimension_semantics = [#tpu.dimension_semantics<parallel>], iteration_bounds = array<i64: 2>, scalar_prefetch = 0 : i64, scratch_operands = 0 : i64, tpu.core_type = #tpu.core_type<tc>, window_params = [{transform_indices = @transform_0, window_bounds = array<i64: 1, 4, 640>}, {transform_indices = @transform_1, window_bounds = array<i64: 1, 4, 640>}, {transform_indices = @transform_2, window_bounds = array<i64: 1, 4, 640>}, {transform_indices = @transform_3, window_bounds = array<i64: 1, 4, 640>}, {pipeline_mode = #tpu.pipeline_mode<synchronous>, transform_indices = @transform_4, window_bounds = array<i64: 640, 32>}, {pipeline_mode = #tpu.pipeline_mode<synchronous>, transform_indices = @transform_5, window_bounds = array<i64: 1, 32>}, {transform_indices = @transform_6, window_bounds = array<i64: 1, 4, 32>}]} {
    %c0 = arith.constant 0 : index
    %c0_0 = arith.constant 0 : index
    %0 = vector.load %arg5[%c0, %c0_0] : memref<640x32xbf16, #tpu.memory_space<vmem>>, vector<640x32xbf16>
    %c0_1 = arith.constant 0 : index
    %c0_2 = arith.constant 0 : index
    %c0_3 = arith.constant 0 : index
    %1 = vector.load %arg1[%c0_1, %c0_2, %c0_3] : memref<1x4x640xbf16, #tpu.memory_space<vmem>>, vector<1x4x640xbf16>
    %2 = vector.shape_cast %1 : vector<1x4x640xbf16> to vector<4x640xbf16>
    %cst = arith.constant dense<0.000000e+00> : vector<4x32xf32>
    %3 = tpu.matmul %2, %0, %cst {dimension_numbers = #tpu.dot_dimension_numbers<[1], [0], [0], [1], [0, 0, 1, 1], [], []>} : vector<4x640xbf16>, vector<640x32xbf16>, vector<4x32xf32> -> vector<4x32xf32>
    %c0_4 = arith.constant 0 : index
    %c0_5 = arith.constant 0 : index
    %c0_6 = arith.constant 0 : index
    %4 = vector.load %arg2[%c0_4, %c0_5, %c0_6] : memref<1x4x640xbf16, #tpu.memory_space<vmem>>, vector<1x4x640xbf16>
    %5 = vector.shape_cast %4 : vector<1x4x640xbf16> to vector<4x640xbf16>
    %cst_7 = arith.constant dense<0.000000e+00> : vector<4x32xf32>
    %6 = tpu.matmul %5, %0, %cst_7 {dimension_numbers = #tpu.dot_dimension_numbers<[1], [0], [0], [1], [0, 0, 1, 1], [], []>} : vector<4x640xbf16>, vector<640x32xbf16>, vector<4x32xf32> -> vector<4x32xf32>
    %c0_8 = arith.constant 0 : index
    %c0_9 = arith.constant 0 : index
    %c0_10 = arith.constant 0 : index
    %7 = vector.load %arg3[%c0_8, %c0_9, %c0_10] : memref<1x4x640xbf16, #tpu.memory_space<vmem>>, vector<1x4x640xbf16>
    %8 = vector.shape_cast %7 : vector<1x4x640xbf16> to vector<4x640xbf16>
    %cst_11 = arith.constant dense<0.000000e+00> : vector<4x32xf32>
    %9 = tpu.matmul %8, %0, %cst_11 {dimension_numbers = #tpu.dot_dimension_numbers<[1], [0], [0], [1], [0, 0, 1, 1], [], []>} : vector<4x640xbf16>, vector<640x32xbf16>, vector<4x32xf32> -> vector<4x32xf32>
    %c0_12 = arith.constant 0 : index
    %c0_13 = arith.constant 0 : index
    %c0_14 = arith.constant 0 : index
    %10 = vector.load %arg4[%c0_12, %c0_13, %c0_14] : memref<1x4x640xbf16, #tpu.memory_space<vmem>>, vector<1x4x640xbf16>
    %11 = vector.shape_cast %10 : vector<1x4x640xbf16> to vector<4x640xbf16>
    %cst_15 = arith.constant dense<0.000000e+00> : vector<4x32xf32>
    %12 = tpu.matmul %11, %0, %cst_15 {dimension_numbers = #tpu.dot_dimension_numbers<[1], [0], [0], [1], [0, 0, 1, 1], [], []>} : vector<4x640xbf16>, vector<640x32xbf16>, vector<4x32xf32> -> vector<4x32xf32>
    %13 = arith.maximumf %3, %6 : vector<4x32xf32>
    %14 = arith.maximumf %9, %12 : vector<4x32xf32>
    %15 = arith.maximumf %13, %14 : vector<4x32xf32>
    %c0_16 = arith.constant 0 : index
    %c0_17 = arith.constant 0 : index
    %16 = vector.load %arg6[%c0_16, %c0_17] : memref<1x32xf32, #tpu.memory_space<vmem>>, vector<1x32xf32>
    %17 = vector.broadcast %16 : vector<1x32xf32> to vector<4x32xf32>
    %18 = arith.addf %15, %17 : vector<4x32xf32>
    %cst_18 = arith.constant 0.000000e+00 : f32
    %19 = vector.broadcast %cst_18 : f32 to vector<4x32xf32>
    %20 = arith.maximumf %18, %19 : vector<4x32xf32>
    %c0_19 = arith.constant 0 : index
    %c0_20 = arith.constant 0 : index
    %c0_21 = arith.constant 0 : index
    %21 = vector.load %arg7[%c0_19, %c0_20, %c0_21] : memref<1x4x32xf32, #tpu.memory_space<vmem>>, vector<1x4x32xf32>
    %22 = vector.shape_cast %21 : vector<1x4x32xf32> to vector<4x32xf32>
    %23 = vector.shape_cast %20 : vector<4x32xf32> to vector<1x4x32xf32>
    tpu.vector_store %arg7[%c0_19, %c0_20, %c0_21], %23 {strides = array<i32>} : memref<1x4x32xf32, #tpu.memory_space<vmem>>, vector<1x4x32xf32>,
    return
  }
  func.func @transform_0(%arg0: i32) -> (i32, i32, i32) {
    %c0_i32 = arith.constant 0 : i32
    %c0_i32_0 = arith.constant 0 : i32
    %c0_i32_1 = arith.constant 0 : i32
    return %arg0, %c0_i32, %c0_i32_0 : i32, i32, i32
  }
  func.func @transform_1(%arg0: i32) -> (i32, i32, i32) {
    %c0_i32 = arith.constant 0 : i32
    %c0_i32_0 = arith.constant 0 : i32
    %c0_i32_1 = arith.constant 0 : i32
    return %arg0, %c0_i32, %c0_i32_0 : i32, i32, i32
  }
  func.func @transform_2(%arg0: i32) -> (i32, i32, i32) {
    %c0_i32 = arith.constant 0 : i32
    %c0_i32_0 = arith.constant 0 : i32
    %c0_i32_1 = arith.constant 0 : i32
    return %arg0, %c0_i32, %c0_i32_0 : i32, i32, i32
  }
  func.func @transform_3(%arg0: i32) -> (i32, i32, i32) {
    %c0_i32 = arith.constant 0 : i32
    %c0_i32_0 = arith.constant 0 : i32
    %c0_i32_1 = arith.constant 0 : i32
    return %arg0, %c0_i32, %c0_i32_0 : i32, i32, i32
  }
  func.func @transform_4(%arg0: i32) -> (i32, i32) {
    %c0_i32 = arith.constant 0 : i32
    %c0_i32_0 = arith.constant 0 : i32
    %c0_i32_1 = arith.constant 0 : i32
    return %c0_i32, %c0_i32_0 : i32, i32
  }
  func.func @transform_5(%arg0: i32) -> (i32, i32) {
    %c0_i32 = arith.constant 0 : i32
    %c0_i32_0 = arith.constant 0 : i32
    %c0_i32_1 = arith.constant 0 : i32
    return %c0_i32, %c0_i32_0 : i32, i32
  }
  func.func @transform_6(%arg0: i32) -> (i32, i32, i32) {
    %c0_i32 = arith.constant 0 : i32
    %c0_i32_0 = arith.constant 0 : i32
    %c0_i32_1 = arith.constant 0 : i32
    return %arg0, %c0_i32, %c0_i32_0 : i32, i32, i32
  }
}

module attributes {stable_mosaic.version = 11 : i64} {
  func.func @_tail_mlp_kernel(%arg0: i32, %arg1: memref<8x128xbf16, #tpu.memory_space<vmem>>, %arg2: memref<8x128xbf16, #tpu.memory_space<vmem>>, %arg3: memref<128x32xbf16, #tpu.memory_space<vmem>>, %arg4: memref<1x32xf32, #tpu.memory_space<vmem>>, %arg5: memref<128x128xbf16, #tpu.memory_space<vmem>>, %arg6: memref<1x128xf32, #tpu.memory_space<vmem>>, %arg7: memref<128x256xbf16, #tpu.memory_space<vmem>>, %arg8: memref<1x256xf32, #tpu.memory_space<vmem>>, %arg9: memref<256x32xbf16, #tpu.memory_space<vmem>>, %arg10: memref<1x32xf32, #tpu.memory_space<vmem>>, %arg11: memref<1x128xf32, #tpu.memory_space<vmem>>, %arg12: memref<1x1xf32, #tpu.memory_space<vmem>>, %arg13: memref<8x128xf32, #tpu.memory_space<vmem>>, %arg14: memref<8x1xf32, #tpu.memory_space<vmem>>) attributes {dimension_semantics = [#tpu.dimension_semantics<arbitrary>], iteration_bounds = array<i64: 1>, scalar_prefetch = 0 : i64, scratch_operands = 0 : i64, tpu.core_type = #tpu.core_type<tc>, window_params = [{pipeline_mode = #tpu.pipeline_mode<synchronous>, transform_indices = @transform_0, window_bounds = array<i64: 8, 128>}, {pipeline_mode = #tpu.pipeline_mode<synchronous>, transform_indices = @transform_1, window_bounds = array<i64: 8, 128>}, {pipeline_mode = #tpu.pipeline_mode<synchronous>, transform_indices = @transform_2, window_bounds = array<i64: 128, 32>}, {pipeline_mode = #tpu.pipeline_mode<synchronous>, transform_indices = @transform_3, window_bounds = array<i64: 1, 32>}, {pipeline_mode = #tpu.pipeline_mode<synchronous>, transform_indices = @transform_4, window_bounds = array<i64: 128, 128>}, {pipeline_mode = #tpu.pipeline_mode<synchronous>, transform_indices = @transform_5, window_bounds = array<i64: 1, 128>}, {pipeline_mode = #tpu.pipeline_mode<synchronous>, transform_indices = @transform_6, window_bounds = array<i64: 128, 256>}, {pipeline_mode = #tpu.pipeline_mode<synchronous>, transform_indices = @transform_7, window_bounds = array<i64: 1, 256>}, {pipeline_mode = #tpu.pipeline_mode<synchronous>, transform_indices = @transform_8, window_bounds = array<i64: 256, 32>}, {pipeline_mode = #tpu.pipeline_mode<synchronous>, transform_indices = @transform_9, window_bounds = array<i64: 1, 32>}, {pipeline_mode = #tpu.pipeline_mode<synchronous>, transform_indices = @transform_10, window_bounds = array<i64: 1, 128>}, {pipeline_mode = #tpu.pipeline_mode<synchronous>, transform_indices = @transform_11, window_bounds = array<i64: 1, 1>}, {pipeline_mode = #tpu.pipeline_mode<synchronous>, transform_indices = @transform_12, window_bounds = array<i64: 8, 128>}, {pipeline_mode = #tpu.pipeline_mode<synchronous>, transform_indices = @transform_13, window_bounds = array<i64: 8, 1>}]} {
    %c0 = arith.constant 0 : index
    %c0_0 = arith.constant 0 : index
    %0 = vector.load %arg1[%c0, %c0_0] : memref<8x128xbf16, #tpu.memory_space<vmem>>, vector<8x128xbf16>
    %c0_1 = arith.constant 0 : index
    %c0_2 = arith.constant 0 : index
    %1 = vector.load %arg3[%c0_1, %c0_2] : memref<128x32xbf16, #tpu.memory_space<vmem>>, vector<128x32xbf16>
    %cst = arith.constant dense<0.000000e+00> : vector<8x32xf32>
    %2 = tpu.matmul %0, %1, %cst {dimension_numbers = #tpu.dot_dimension_numbers<[1], [0], [0], [1], [0, 0, 1, 1], [], []>} : vector<8x128xbf16>, vector<128x32xbf16>, vector<8x32xf32> -> vector<8x32xf32>
    %c0_3 = arith.constant 0 : index
    %c0_4 = arith.constant 0 : index
    %3 = vector.load %arg4[%c0_3, %c0_4] : memref<1x32xf32, #tpu.memory_space<vmem>>, vector<1x32xf32>
    %4 = vector.broadcast %3 : vector<1x32xf32> to vector<8x32xf32>
    %5 = arith.addf %2, %4 : vector<8x32xf32>
    %cst_5 = arith.constant 0.000000e+00 : f32
    %6 = vector.broadcast %cst_5 : f32 to vector<8x32xf32>
    %7 = arith.maximumf %5, %6 : vector<8x32xf32>
    %c0_6 = arith.constant 0 : index
    %c0_7 = arith.constant 0 : index
    %8 = vector.load %arg2[%c0_6, %c0_7] : memref<8x128xbf16, #tpu.memory_space<vmem>>, vector<8x128xbf16>
    %c0_8 = arith.constant 0 : index
    %c0_9 = arith.constant 0 : index
    %9 = vector.load %arg5[%c0_8, %c0_9] : memref<128x128xbf16, #tpu.memory_space<vmem>>, vector<128x128xbf16>
    %cst_10 = arith.constant dense<0.000000e+00> : vector<8x128xf32>
    %10 = tpu.matmul %8, %9, %cst_10 {dimension_numbers = #tpu.dot_dimension_numbers<[1], [0], [0], [1], [0, 0, 1, 1], [], []>} : vector<8x128xbf16>, vector<128x128xbf16>, vector<8x128xf32> -> vector<8x128xf32>
    %c0_11 = arith.constant 0 : index
    %c0_12 = arith.constant 0 : index
    %11 = vector.load %arg6[%c0_11, %c0_12] : memref<1x128xf32, #tpu.memory_space<vmem>>, vector<1x128xf32>
    %12 = vector.broadcast %11 : vector<1x128xf32> to vector<8x128xf32>
    %13 = arith.addf %10, %12 : vector<8x128xf32>
    %cst_13 = arith.constant 0.000000e+00 : f32
    %14 = vector.broadcast %cst_13 : f32 to vector<8x128xf32>
    %15 = arith.maximumf %13, %14 : vector<8x128xf32>
    %16 = arith.truncf %15 : vector<8x128xf32> to vector<8x128xbf16>
    %c0_14 = arith.constant 0 : index
    %c0_15 = arith.constant 0 : index
    %17 = vector.load %arg7[%c0_14, %c0_15] : memref<128x256xbf16, #tpu.memory_space<vmem>>, vector<128x256xbf16>
    %cst_16 = arith.constant dense<0.000000e+00> : vector<8x256xf32>
    %18 = tpu.matmul %16, %17, %cst_16 {dimension_numbers = #tpu.dot_dimension_numbers<[1], [0], [0], [1], [0, 0, 1, 1], [], []>} : vector<8x128xbf16>, vector<128x256xbf16>, vector<8x256xf32> -> vector<8x256xf32>
    %c0_17 = arith.constant 0 : index
    %c0_18 = arith.constant 0 : index
    %19 = vector.load %arg8[%c0_17, %c0_18] : memref<1x256xf32, #tpu.memory_space<vmem>>, vector<1x256xf32>
    %20 = vector.broadcast %19 : vector<1x256xf32> to vector<8x256xf32>
    %21 = arith.addf %18, %20 : vector<8x256xf32>
    %cst_19 = arith.constant 0.000000e+00 : f32
    %22 = vector.broadcast %cst_19 : f32 to vector<8x256xf32>
    %23 = arith.maximumf %21, %22 : vector<8x256xf32>
    %24 = arith.truncf %23 : vector<8x256xf32> to vector<8x256xbf16>
    %c0_20 = arith.constant 0 : index
    %c0_21 = arith.constant 0 : index
    %25 = vector.load %arg9[%c0_20, %c0_21] : memref<256x32xbf16, #tpu.memory_space<vmem>>, vector<256x32xbf16>
    %cst_22 = arith.constant dense<0.000000e+00> : vector<8x32xf32>
    %26 = tpu.matmul %24, %25, %cst_22 {dimension_numbers = #tpu.dot_dimension_numbers<[1], [0], [0], [1], [0, 0, 1, 1], [], []>} : vector<8x256xbf16>, vector<256x32xbf16>, vector<8x32xf32> -> vector<8x32xf32>
    %c0_23 = arith.constant 0 : index
    %c0_24 = arith.constant 0 : index
    %27 = vector.load %arg10[%c0_23, %c0_24] : memref<1x32xf32, #tpu.memory_space<vmem>>, vector<1x32xf32>
    %28 = vector.broadcast %27 : vector<1x32xf32> to vector<8x32xf32>
    %29 = arith.addf %26, %28 : vector<8x32xf32>
    %cst_25 = arith.constant 0.000000e+00 : f32
    %30 = vector.broadcast %cst_25 : f32 to vector<8x32xf32>
    %31 = arith.maximumf %29, %30 : vector<8x32xf32>
    %cst_26 = arith.constant 0.000000e+00 : f32
    %32 = vector.broadcast %cst_26 : f32 to vector<8x128xf32>
    %c0_27 = arith.constant 0 : index
    %c0_28 = arith.constant 0 : index
    %33 = vector.load %arg13[%c0_27, %c0_28] : memref<8x128xf32, #tpu.memory_space<vmem>>, vector<8x128xf32>
    tpu.vector_store %arg13[%c0_27, %c0_28], %32 {strides = array<i32>} : memref<8x128xf32, #tpu.memory_space<vmem>>, vector<8x128xf32>,
    %c0_29 = arith.constant 0 : index
    %c0_30 = arith.constant 0 : index
    %34 = vector.load %arg13[%c0_29, %c0_30] : memref<8x128xf32, #tpu.memory_space<vmem>>, vector<8x32xf32>
    tpu.vector_store %arg13[%c0_29, %c0_30], %7 {strides = array<i32>} : memref<8x128xf32, #tpu.memory_space<vmem>>, vector<8x32xf32>,
    %c0_31 = arith.constant 0 : index
    %c32 = arith.constant 32 : index
    %35 = vector.load %arg13[%c0_31, %c32] : memref<8x128xf32, #tpu.memory_space<vmem>>, vector<8x32xf32>
    tpu.vector_store %arg13[%c0_31, %c32], %31 {strides = array<i32>} : memref<8x128xf32, #tpu.memory_space<vmem>>, vector<8x32xf32>,
    %c0_32 = arith.constant 0 : index
    %c0_33 = arith.constant 0 : index
    %36 = vector.load %arg13[%c0_32, %c0_33] : memref<8x128xf32, #tpu.memory_space<vmem>>, vector<8x128xf32>
    %c0_34 = arith.constant 0 : index
    %c0_35 = arith.constant 0 : index
    %37 = vector.load %arg11[%c0_34, %c0_35] : memref<1x128xf32, #tpu.memory_space<vmem>>, vector<1x128xf32>
    %38 = vector.broadcast %37 : vector<1x128xf32> to vector<8x128xf32>
    %39 = arith.mulf %36, %38 : vector<8x128xf32>
    %cst_36 = arith.constant dense<0.000000e+00> : vector<8xf32>
    %40 = vector.multi_reduction <add>, %39, %cst_36 [1] : vector<8x128xf32> to vector<8xf32>
    %41 = vector.shape_cast %40 : vector<8xf32> to vector<8x1xf32>
    %c0_37 = arith.constant 0 : index
    %c0_38 = arith.constant 0 : index
    %42 = vector.load %arg12[%c0_37, %c0_38] : memref<1x1xf32, #tpu.memory_space<vmem>>, vector<1x1xf32>
    %43 = vector.broadcast %42 : vector<1x1xf32> to vector<8x1xf32>
    %44 = arith.addf %41, %43 : vector<8x1xf32>
    %c0_39 = arith.constant 0 : index
    %c0_40 = arith.constant 0 : index
    %45 = vector.load %arg14[%c0_39, %c0_40] : memref<8x1xf32, #tpu.memory_space<vmem>>, vector<8x1xf32>
    tpu.vector_store %arg14[%c0_39, %c0_40], %44 {strides = array<i32>} : memref<8x1xf32, #tpu.memory_space<vmem>>, vector<8x1xf32>,
    return
  }
  func.func @transform_0(%arg0: i32) -> (i32, i32) {
    %c0_i32 = arith.constant 0 : i32
    %c0_i32_0 = arith.constant 0 : i32
    %c0_i32_1 = arith.constant 0 : i32
    return %c0_i32, %c0_i32_0 : i32, i32
  }
  func.func @transform_1(%arg0: i32) -> (i32, i32) {
    %c0_i32 = arith.constant 0 : i32
    %c0_i32_0 = arith.constant 0 : i32
    %c0_i32_1 = arith.constant 0 : i32
    return %c0_i32, %c0_i32_0 : i32, i32
  }
  func.func @transform_2(%arg0: i32) -> (i32, i32) {
    %c0_i32 = arith.constant 0 : i32
    %c0_i32_0 = arith.constant 0 : i32
    %c0_i32_1 = arith.constant 0 : i32
    return %c0_i32, %c0_i32_0 : i32, i32
  }
  func.func @transform_3(%arg0: i32) -> (i32, i32) {
    %c0_i32 = arith.constant 0 : i32
    %c0_i32_0 = arith.constant 0 : i32
    %c0_i32_1 = arith.constant 0 : i32
    return %c0_i32, %c0_i32_0 : i32, i32
  }
  func.func @transform_4(%arg0: i32) -> (i32, i32) {
    %c0_i32 = arith.constant 0 : i32
    %c0_i32_0 = arith.constant 0 : i32
    %c0_i32_1 = arith.constant 0 : i32
    return %c0_i32, %c0_i32_0 : i32, i32
  }
  func.func @transform_5(%arg0: i32) -> (i32, i32) {
    %c0_i32 = arith.constant 0 : i32
    %c0_i32_0 = arith.constant 0 : i32
    %c0_i32_1 = arith.constant 0 : i32
    return %c0_i32, %c0_i32_0 : i32, i32
  }
  func.func @transform_6(%arg0: i32) -> (i32, i32) {
    %c0_i32 = arith.constant 0 : i32
    %c0_i32_0 = arith.constant 0 : i32
    %c0_i32_1 = arith.constant 0 : i32
    return %c0_i32, %c0_i32_0 : i32, i32
  }
  func.func @transform_7(%arg0: i32) -> (i32, i32) {
    %c0_i32 = arith.constant 0 : i32
    %c0_i32_0 = arith.constant 0 : i32
    %c0_i32_1 = arith.constant 0 : i32
    return %c0_i32, %c0_i32_0 : i32, i32
  }
  func.func @transform_8(%arg0: i32) -> (i32, i32) {
    %c0_i32 = arith.constant 0 : i32
    %c0_i32_0 = arith.constant 0 : i32
    %c0_i32_1 = arith.constant 0 : i32
    return %c0_i32, %c0_i32_0 : i32, i32
  }
  func.func @transform_9(%arg0: i32) -> (i32, i32) {
    %c0_i32 = arith.constant 0 : i32
    %c0_i32_0 = arith.constant 0 : i32
    %c0_i32_1 = arith.constant 0 : i32
    return %c0_i32, %c0_i32_0 : i32, i32
  }
  func.func @transform_10(%arg0: i32) -> (i32, i32) {
    %c0_i32 = arith.constant 0 : i32
    %c0_i32_0 = arith.constant 0 : i32
    %c0_i32_1 = arith.constant 0 : i32
    return %c0_i32, %c0_i32_0 : i32, i32
  }
  func.func @transform_11(%arg0: i32) -> (i32, i32) {
    %c0_i32 = arith.constant 0 : i32
    %c0_i32_0 = arith.constant 0 : i32
    %c0_i32_1 = arith.constant 0 : i32
    return %c0_i32, %c0_i32_0 : i32, i32
  }
  func.func @transform_12(%arg0: i32) -> (i32, i32) {
    %c0_i32 = arith.constant 0 : i32
    %c0_i32_0 = arith.constant 0 : i32
    %c0_i32_1 = arith.constant 0 : i32
    return %c0_i32, %c0_i32_0 : i32, i32
  }
  func.func @transform_13(%arg0: i32) -> (i32, i32) {
    %c0_i32 = arith.constant 0 : i32
    %c0_i32_0 = arith.constant 0 : i32
    %c0_i32_1 = arith.constant 0 : i32
    return %c0_i32, %c0_i32_0 : i32, i32
  }
}

</mosaic_0001>

<bundles_post_ra>
// kernel: nav_base_forward.4
= control target key start
LH: loop header
LB: loop body
LE: loop exit
PB: predicated region body
PF: predicated region fallthrough
CT: control target
= control target key end

     0   :  { %s6706_s21 = smov 0   ;;  %s8607_s0 = inlined_call_operand.vmem [shape: bf16[2,676,256], index: 0, kind: input, shape index: {}]   ;;  %s8608_s1 = inlined_call_operand.vmem [shape: bf16[2,676,256], index: 1, kind: input, shape index: {}]   ;;  %s8609_s2 = inlined_call_operand.vmem [shape: bf16[2,676,256], index: 2, kind: input, shape index: {}]   ;;  %s8610_s3 = inlined_call_operand.vmem [shape: bf16[2,676,256], index: 3, kind: input, shape index: {}]   ;;  %s8611_s4 = inlined_call_operand.vmem [shape: bf16[256,32], index: 4, kind: input, shape index: {}]   ;;  %s8612_s5 = inlined_call_operand.vmem [shape: f32[1,32], index: 5, kind: input, shape index: {}]   ;;  %s8613_s6 = inlined_call_operand.vmem [shape: f32[2,676,32], index: 6, kind: output, shape index: {}]  }
   0x1 LB: > { %s4879_s22 = sadd.s32 4294967295, %s6669_s21   ;;  %p4883_p0 = scmp.ge.s32.totalorder %s6669_s21, 1  ;;  %s6669_s21 = sphi %s6706_s21, %s16_s21  }
   0x2   : > { %p242_p1 = scmp.lt.s32.totalorder %s6669_s21, 3 }
   0x4   : > { %p243_p2 = pnand %p4883_p0, %p242_p1 }
   0x6   : > { %246 = sbr.rel (%p243_p2) target bundleno = 1549 (0x60d), region = 44 }
   0xb   : > { %v6717_v0 = vld [vmem:[%s8611_s4 + $0x38] sm:$0xff]  ;;  %v6729_v2 = vld [vmem:[%s8611_s4 + $0x30] sm:$0xff]  ;;  %v6743_v4 = vld [vmem:[%s8611_s4 + $0x28] sm:$0xff]  ;;  %p287_p3 = scmp.lt.s32.totalorder %s4879_s22, 1  ;;  %vm4701_vm0 = vcmask 261120   ;;  %vm4786_vm1 = vcmask 257024  }
   0xc   : > { %v6722_v1 = vld [vmem:[%s8611_s4 + $0x78] sm:$0xff]  ;;  %952 = vmatpush.bf16.msra.mxu0 %v6717_v0  ;;  %v6734_v3 = vld [vmem:[%s8611_s4 + $0x70] sm:$0xff]  ;;  %1910 = vmatpush.bf16.msra.mxu2 %v6717_v0  ;;  %v6748_v5 = vld [vmem:[%s8611_s4 + $0x68] sm:$0xff] }
   0xd   : > { %1175 = vmatpush.bf16.msra.mxu1 %v6722_v1  ;;  %2133 = vmatpush.bf16.msra.mxu3 %v6722_v1  ;;  %v6757_v6 = vld [vmem:[%s8611_s4 + $0x20] sm:$0xff]  ;;  %v6773_v8 = vld [vmem:[%s8611_s4 + $0x18] sm:$0xff]  ;;  %s9087_s22 = smov (!%p287_p3, %s4879_s22), 1  ;;  %v6789_v10 = vld [vmem:[%s8611_s4 + $0x10] sm:$0xff] }
   0xe   : > { %v6762_v7 = vld [vmem:[%s8611_s4 + $0x60] sm:$0xff]  ;;  %v6778_v9 = vld [vmem:[%s8611_s4 + $0x58] sm:$0xff]  ;;  %v6794_v11 = vld [vmem:[%s8611_s4 + $0x50] sm:$0xff]  ;;  %s6796_s25 = smul.u32 680, %s9087_s22 }
   0xf   : > { %v6805_v12 = vld [vmem:[%s8611_s4 + $0x8] sm:$0xff]  ;;  %v6829_v14 = vld [vmem:[%s8611_s4] sm:$0xff] }
  0x10   : > { %953 = vmatpush.bf16.msra.mxu0 %v6729_v2  ;;  %1911 = vmatpush.bf16.msra.mxu2 %v6729_v2  ;;  %v6810_v13 = vld [vmem:[%s8611_s4 + $0x48] sm:$0xff]  ;;  %s6816_s7 = scalar_lea.vmem %s8607_s0, %s6796_s25  ;;  %s6824_s10 = scalar_lea.vmem %s8608_s1, %s6796_s25  ;;  %v6834_v15 = vld [vmem:[%s8611_s4 + $0x40] sm:$0xff] }
  0x11   : > { %1176 = vmatpush.bf16.msra.mxu1 %v6734_v3  ;;  %2134 = vmatpush.bf16.msra.mxu3 %v6734_v3  ;;  %v4891_v16 = vld [vmem:[%s6816_s7] sm:$0xf]  ;;  %v6316_v17 = vld [vmem:[%s6816_s7 + $0x4] sm:$0xf0]  ;;  %v6315_v18 = vld [vmem:[%s6816_s7 + $0x4] sm:$0xf]  ;;  %s7630_s17 = scalar_lea.vmem %s8609_s2, %s6796_s25  ;;  %s7638_s20 = scalar_lea.vmem %s8610_s3, %s6796_s25 }
  0x12   : > { %v4893_v19 = vld [vmem:[%s6816_s7 + $0x8] sm:$0xf0]  ;;  %v5291_v20 = vld [vmem:[%s6824_s10] sm:$0xf]  ;;  %v6400_v21 = vld [vmem:[%s6824_s10 + $0x4] sm:$0xf0]  ;;  %v4892_v24 = vor.u32 %v6316_v17, %v4891_v16  ;;  %s7829_s28 = scalar_lea.vmem %s8613_s6, %s6796_s25 }
  0x13   : > { %v6399_v22 = vld [vmem:[%s6824_s10 + $0x4] sm:$0xf]  ;;  %v5293_v23 = vld [vmem:[%s6824_s10 + $0x8] sm:$0xf0]  ;;  %v4896_v25 = vor.u32 %v6315_v18, %v4893_v19  ;;  %v5292_v26 = vor.u32 %v6400_v21, %v5291_v20  ;;  %v4899_v28 = vld [vmem:[%s6816_s7 + $0x10] sm:$0xf] }
  0x14   : > { %954 = vmatpush.bf16.msra.mxu0 %v6743_v4  ;;  %1912 = vmatpush.bf16.msra.mxu2 %v6743_v4  ;;  %v5296_v27 = vor.u32 %v6399_v22, %v5293_v23  ;;  %v6318_v29 = vld [vmem:[%s6816_s7 + $0x14] sm:$0xf0]  ;;  %v6317_v30 = vld [vmem:[%s6816_s7 + $0x14] sm:$0xf]  ;;  %v4901_v31 = vld [vmem:[%s6816_s7 + $0x18] sm:$0xf0] }
  0x15   : > { %1177 = vmatpush.bf16.msra.mxu1 %v6748_v5  ;;  %2135 = vmatpush.bf16.msra.mxu3 %v6748_v5  ;;  %v5299_v32 = vld [vmem:[%s6824_s10 + $0x10] sm:$0xf]  ;;  %v6402_v33 = vld [vmem:[%s6824_s10 + $0x14] sm:$0xf0]  ;;  %v6401_v34 = vld [vmem:[%s6824_s10 + $0x14] sm:$0xf]  ;;  %v4900_v36 = vor.u32 %v6318_v29, %v4899_v28  ;;  %v4904_v37 = vor.u32 %v6317_v30, %v4901_v31 }
  0x16   : > { %v5301_v35 = vld [vmem:[%s6824_s10 + $0x18] sm:$0xf0]  ;;  %v5300_v38 = vor.u32 %v6402_v33, %v5299_v32  ;;  %v4907_v40 = vld [vmem:[%s6816_s7 + $0x20] sm:$0xf]  ;;  %v6320_v41 = vld [vmem:[%s6816_s7 + $0x24] sm:$0xf0] }
  0x17   : > { %v5304_v39 = vor.u32 %v6401_v34, %v5301_v35  ;;  %v6319_v42 = vld [vmem:[%s6816_s7 + $0x24] sm:$0xf]  ;;  %v4909_v43 = vld [vmem:[%s6816_s7 + $0x28] sm:$0xf0]  ;;  %v5307_v44 = vld [vmem:[%s6824_s10 + $0x20] sm:$0xf]  ;;  %v4908_v48 = vor.u32 %v6320_v41, %v4907_v40 }
  0x18   : > { %955 = vmatpush.bf16.msra.mxu0 %v6757_v6  ;;  %1913 = vmatpush.bf16.msra.mxu2 %v6757_v6  ;;  %v6404_v45 = vld [vmem:[%s6824_s10 + $0x24] sm:$0xf0]  ;;  %v6403_v46 = vld [vmem:[%s6824_s10 + $0x24] sm:$0xf]  ;;  %v5309_v47 = vld [vmem:[%s6824_s10 + $0x28] sm:$0xf0]  ;;  %v4912_v49 = vor.u32 %v6319_v42, %v4909_v43 }
  0x19   : > { %1178 = vmatpush.bf16.msra.mxu1 %v6762_v7  ;;  %2136 = vmatpush.bf16.msra.mxu3 %v6762_v7  ;;  %v5308_v50 = vor.u32 %v6404_v45, %v5307_v44  ;;  %v5312_v51 = vor.u32 %v6403_v46, %v5309_v47  ;;  %v4915_v52 = vld [vmem:[%s6816_s7 + $0x30] sm:$0xf]  ;;  %v6322_v53 = vld [vmem:[%s6816_s7 + $0x34] sm:$0xf0]  ;;  %v6321_v54 = vld [vmem:[%s6816_s7 + $0x34] sm:$0xf] }
  0x1a   : > { %v4917_v55 = vld [vmem:[%s6816_s7 + $0x38] sm:$0xf0]  ;;  %v5315_v56 = vld [vmem:[%s6824_s10 + $0x30] sm:$0xf]  ;;  %v6406_v57 = vld [vmem:[%s6824_s10 + $0x34] sm:$0xf0]  ;;  %v4916_v60 = vor.u32 %v6322_v53, %v4915_v52 }
  0x1b   : > { %v6405_v58 = vld [vmem:[%s6824_s10 + $0x34] sm:$0xf]  ;;  %v5317_v59 = vld [vmem:[%s6824_s10 + $0x38] sm:$0xf0]  ;;  %v4920_v61 = vor.u32 %v6321_v54, %v4917_v55  ;;  %v5316_v62 = vor.u32 %v6406_v57, %v5315_v56  ;;  %v5331_v16 = vld [vmem:[%s6824_s10 + $0x50] sm:$0xf] }
  0x1c   : > { %956 = vmatpush.bf16.msra.mxu0 %v6773_v8  ;;  %1914 = vmatpush.bf16.msra.mxu2 %v6773_v8  ;;  %v5320_v63 = vor.u32 %v6405_v58, %v5317_v59  ;;  %v6410_v17 = vld [vmem:[%s6824_s10 + $0x54] sm:$0xf0]  ;;  %v6409_v18 = vld [vmem:[%s6824_s10 + $0x54] sm:$0xf]  ;;  %v5333_v19 = vld [vmem:[%s6824_s10 + $0x58] sm:$0xf0] }
  0x1d   : > { %1179 = vmatpush.bf16.msra.mxu1 %v6778_v9  ;;  %2137 = vmatpush.bf16.msra.mxu3 %v6778_v9  ;;  %v5332_v22 = vor.u32 %v6410_v17, %v5331_v16  ;;  %v5336_v23 = vor.u32 %v6409_v18, %v5333_v19  ;;  %v5339_v28 = vld [vmem:[%s6824_s10 + $0x60] sm:$0xf]  ;;  %v6412_v29 = vld [vmem:[%s6824_s10 + $0x64] sm:$0xf0]  ;;  %v6411_v30 = vld [vmem:[%s6824_s10 + $0x64] sm:$0xf] }
  0x1e   : > { %v5341_v31 = vld [vmem:[%s6824_s10 + $0x68] sm:$0xf0]  ;;  %v5340_v34 = vor.u32 %v6412_v29, %v5339_v28  ;;  %v5347_v40 = vld [vmem:[%s6824_s10 + $0x70] sm:$0xf]  ;;  %v6414_v41 = vld [vmem:[%s6824_s10 + $0x74] sm:$0xf0] }
  0x1f   : > { %v5344_v35 = vor.u32 %v6411_v30, %v5341_v31  ;;  %v6413_v42 = vld [vmem:[%s6824_s10 + $0x74] sm:$0xf]  ;;  %v5349_v43 = vld [vmem:[%s6824_s10 + $0x78] sm:$0xf0]  ;;  %v5348_v46 = vor.u32 %v6414_v41, %v5347_v40  ;;  %v5355_v52 = vld [vmem:[%s6824_s10 + $0x80] sm:$0xf] }
  0x20   : > { %957 = vmatpush.bf16.msra.mxu0 %v6789_v10  ;;  %1915 = vmatpush.bf16.msra.mxu2 %v6789_v10  ;;  %v5352_v47 = vor.u32 %v6413_v42, %v5349_v43  ;;  %v6416_v53 = vld [vmem:[%s6824_s10 + $0x84] sm:$0xf0]  ;;  %v6415_v54 = vld [vmem:[%s6824_s10 + $0x84] sm:$0xf]  ;;  %v5357_v55 = vld [vmem:[%s6824_s10 + $0x88] sm:$0xf0] }
  0x21   : > { %1180 = vmatpush.bf16.msra.mxu1 %v6794_v11  ;;  %2138 = vmatpush.bf16.msra.mxu3 %v6794_v11 }
  0x24   : > { %958 = vmatpush.bf16.msra.mxu0 %v6805_v12  ;;  %1916 = vmatpush.bf16.msra.mxu2 %v6805_v12 }
  0x25   : > { %1181 = vmatpush.bf16.msra.mxu1 %v6810_v13  ;;  %2139 = vmatpush.bf16.msra.mxu3 %v6810_v13 }
  0x28   : > { %959 = vmatpush.bf16.msra.mxu0 %v6829_v14  ;;  %1917 = vmatpush.bf16.msra.mxu2 %v6829_v14 }
  0x29   : > { %1182 = vmatpush.bf16.msra.mxu1 %v6834_v15  ;;  %2140 = vmatpush.bf16.msra.mxu3 %v6834_v15 }
  0x2b   : > { %960 = vmatmul.bf16.vlgmr.msra.gmra.mxu0 %v4892_v24  ;;  %1918 = vmatmul.bf16.vlgmr.msra.gmra.mxu2 %v5292_v26  ;;  %v4939_v24 = vld [vmem:[%s6816_s7 + $0x60] sm:$0xf]  ;;  %v6327_v26 = vld [vmem:[%s6816_s7 + $0x64] sm:$0xf] }
  0x2c   : > { %3826 = vmatpush.bf16.msrb.mxu2 %v6717_v0  ;;  %1183 = vmatmul.bf16.vlgmr.msra.gmra.mxu1 %v4896_v25  ;;  %v6328_v25 = vld [vmem:[%s6816_s7 + $0x64] sm:$0xf0] }
  0x2d   : > { %4049 = vmatpush.bf16.msrb.mxu3 %v6722_v1  ;;  %2868 = vmatpush.bf16.msrb.mxu0 %v6717_v0  ;;  %v4923_v0 = vld [vmem:[%s6816_s7 + $0x40] sm:$0xf]  ;;  %v4940_v32 = vor.u32 %v6328_v25, %v4939_v24 }
  0x2e   : > { %2141 = vmatmul.bf16.vlgmr.msra.gmra.mxu3 %v5296_v27  ;;  %3091 = vmatpush.bf16.msrb.mxu1 %v6722_v1  ;;  %v6324_v1 = vld [vmem:[%s6816_s7 + $0x44] sm:$0xf0]  ;;  %v4941_v27 = vld [vmem:[%s6816_s7 + $0x68] sm:$0xf0] }
  0x2f   : > { %v4944_v33 = vor.u32 %v6327_v26, %v4941_v27 }
  0x30   : > { %3827 = vmatpush.bf16.msrb.mxu2 %v6729_v2 }
  0x31   : > { %4050 = vmatpush.bf16.msrb.mxu3 %v6734_v3  ;;  %2869 = vmatpush.bf16.msrb.mxu0 %v6729_v2  ;;  %v6323_v2 = vld [vmem:[%s6816_s7 + $0x44] sm:$0xf] }
  0x32   : > { %3092 = vmatpush.bf16.msrb.mxu1 %v6734_v3  ;;  %v4925_v3 = vld [vmem:[%s6816_s7 + $0x48] sm:$0xf0] }
  0x34   : > { %3828 = vmatpush.bf16.msrb.mxu2 %v6743_v4 }
  0x35   : > { %4051 = vmatpush.bf16.msrb.mxu3 %v6748_v5  ;;  %2870 = vmatpush.bf16.msrb.mxu0 %v6743_v4  ;;  %v5323_v4 = vld [vmem:[%s6824_s10 + $0x40] sm:$0xf] }
  0x36   : > { %3093 = vmatpush.bf16.msrb.mxu1 %v6748_v5  ;;  %v6408_v5 = vld [vmem:[%s6824_s10 + $0x44] sm:$0xf0] }
  0x38   : > { %3829 = vmatpush.bf16.msrb.mxu2 %v6757_v6 }
  0x39   : > { %4052 = vmatpush.bf16.msrb.mxu3 %v6762_v7  ;;  %2871 = vmatpush.bf16.msrb.mxu0 %v6757_v6  ;;  %v6407_v6 = vld [vmem:[%s6824_s10 + $0x44] sm:$0xf] }
  0x3a   : > { %3094 = vmatpush.bf16.msrb.mxu1 %v6762_v7  ;;  %v5325_v7 = vld [vmem:[%s6824_s10 + $0x48] sm:$0xf0] }
  0x3b   : > { %965 = vmatmul.bf16.gmra.mxu0 %v4900_v36  ;;  %1923 = vmatmul.bf16.gmra.mxu2 %v5300_v38  ;;  %v4947_v36 = vld [vmem:[%s6816_s7 + $0x70] sm:$0xf]  ;;  %v6329_v38 = vld [vmem:[%s6816_s7 + $0x74] sm:$0xf] }
  0x3c   : > { %3830 = vmatpush.bf16.msrb.mxu2 %v6773_v8  ;;  %1188 = vmatmul.bf16.gmra.mxu1 %v4904_v37  ;;  %v6330_v37 = vld [vmem:[%s6816_s7 + $0x74] sm:$0xf0] }
  0x3d   : > { %4053 = vmatpush.bf16.msrb.mxu3 %v6778_v9  ;;  %2872 = vmatpush.bf16.msrb.mxu0 %v6773_v8  ;;  %v4924_v8 = vor.u32 %v6324_v1, %v4923_v0  ;;  %v4948_v44 = vor.u32 %v6330_v37, %v4947_v36  ;;  %v5371_v36 = vld [vmem:[%s6824_s10 + $0xa0] sm:$0xf]  ;;  %v6420_v37 = vld [vmem:[%s6824_s10 + $0xa4] sm:$0xf0] }
  0x3e   : > { %2146 = vmatmul.bf16.gmra.mxu3 %v5304_v39  ;;  %3095 = vmatpush.bf16.msrb.mxu1 %v6778_v9  ;;  %v4928_v9 = vor.u32 %v6323_v2, %v4925_v3  ;;  %v4949_v39 = vld [vmem:[%s6816_s7 + $0x78] sm:$0xf0] }
  0x3f   : > { %v4952_v45 = vor.u32 %v6329_v38, %v4949_v39  ;;  %v6419_v38 = vld [vmem:[%s6824_s10 + $0xa4] sm:$0xf]  ;;  %v5373_v39 = vld [vmem:[%s6824_s10 + $0xa8] sm:$0xf0] }
  0x40   : > { %3831 = vmatpush.bf16.msrb.mxu2 %v6789_v10 }
  0x41   : > { %4054 = vmatpush.bf16.msrb.mxu3 %v6794_v11  ;;  %2873 = vmatpush.bf16.msrb.mxu0 %v6789_v10  ;;  %v5324_v10 = vor.u32 %v6408_v5, %v5323_v4 }
  0x42   : > { %3096 = vmatpush.bf16.msrb.mxu1 %v6794_v11  ;;  %v5328_v11 = vor.u32 %v6407_v6, %v5325_v7  ;;  %v4963_v6 = vld [vmem:[%s6816_s7 + $0x90] sm:$0xf]  ;;  %v6334_v7 = vld [vmem:[%s6816_s7 + $0x94] sm:$0xf0] }
  0x43   : > { %v4964_v16 = vor.u32 %v6334_v7, %v4963_v6 }
  0x44   : > { %3832 = vmatpush.bf16.msrb.mxu2 %v6805_v12 }
  0x45   : > { %4055 = vmatpush.bf16.msrb.mxu3 %v6810_v13  ;;  %2874 = vmatpush.bf16.msrb.mxu0 %v6805_v12  ;;  %v4931_v12 = vld [vmem:[%s6816_s7 + $0x50] sm:$0xf] }
  0x46   : > { %3097 = vmatpush.bf16.msrb.mxu1 %v6810_v13  ;;  %v6326_v13 = vld [vmem:[%s6816_s7 + $0x54] sm:$0xf0] }
  0x47   : > { %v4932_v20 = vor.u32 %v6326_v13, %v4931_v12  ;;  %v6417_v12 = vld [vmem:[%s6824_s10 + $0x94] sm:$0xf]  ;;  %v5365_v13 = vld [vmem:[%s6824_s10 + $0x98] sm:$0xf0] }
  0x48   : > { %3833 = vmatpush.bf16.msrb.mxu2 %v6829_v14 }
  0x49   : > { %4056 = vmatpush.bf16.msrb.mxu3 %v6834_v15  ;;  %2875 = vmatpush.bf16.msrb.mxu0 %v6829_v14  ;;  %v6325_v14 = vld [vmem:[%s6816_s7 + $0x54] sm:$0xf] }
  0x4a   : > { %3098 = vmatpush.bf16.msrb.mxu1 %v6834_v15  ;;  %v4933_v15 = vld [vmem:[%s6816_s7 + $0x58] sm:$0xf0] }
  0x4b   : > { %970 = vmatmul.bf16.gmra.mxu0 %v4908_v48  ;;  %1928 = vmatmul.bf16.gmra.mxu2 %v5308_v50  ;;  %v4936_v21 = vor.u32 %v6325_v14, %v4933_v15  ;;  %v4955_v48 = vld [vmem:[%s6816_s7 + $0x80] sm:$0xf]  ;;  %v6331_v50 = vld [vmem:[%s6816_s7 + $0x84] sm:$0xf] }
  0x4c   : > { %1193 = vmatmul.bf16.gmra.mxu1 %v4912_v49  ;;  %v6332_v49 = vld [vmem:[%s6816_s7 + $0x84] sm:$0xf0] }
  0x4d   : > { %v4956_v56 = vor.u32 %v6332_v49, %v4955_v48  ;;  %v5376_v48 = vor.u32 %v6419_v38, %v5373_v39 }
  0x4e   : > { %2151 = vmatmul.bf16.gmra.mxu3 %v5312_v51  ;;  %v4957_v51 = vld [vmem:[%s6816_s7 + $0x88] sm:$0xf0] }
  0x4f   : > { %v4960_v57 = vor.u32 %v6331_v50, %v4957_v51 }
  0x5b   : > { %975 = vmatmul.bf16.gmra.mxu0 %v4916_v60  ;;  %1933 = vmatmul.bf16.gmra.mxu2 %v5316_v62  ;;  %v5356_v60 = vor.u32 %v6416_v53, %v5355_v52 }
  0x5c   : > { %1198 = vmatmul.bf16.gmra.mxu1 %v4920_v61  ;;  %v5360_v61 = vor.u32 %v6415_v54, %v5357_v55 }
  0x5e   : > { %2156 = vmatmul.bf16.gmra.mxu3 %v5320_v63 }
  0x6b   : > { %980 = vmatmul.bf16.gmra.mxu0 %v4924_v8  ;;  %1938 = vmatmul.bf16.gmra.mxu2 %v5324_v10  ;;  %v6333_v8 = vld [vmem:[%s6816_s7 + $0x94] sm:$0xf]  ;;  %v5363_v10 = vld [vmem:[%s6824_s10 + $0x90] sm:$0xf] }
  0x6c   : > { %1203 = vmatmul.bf16.gmra.mxu1 %v4928_v9  ;;  %v4965_v9 = vld [vmem:[%s6816_s7 + $0x98] sm:$0xf0] }
  0x6d   : > { %v4968_v17 = vor.u32 %v6333_v8, %v4965_v9 }
  0x6e   : > { %2161 = vmatmul.bf16.gmra.mxu3 %v5328_v11  ;;  %v6418_v11 = vld [vmem:[%s6824_s10 + $0x94] sm:$0xf0] }
  0x7b   : > { %985 = vmatmul.bf16.gmra.mxu0 %v4932_v20  ;;  %1943 = vmatmul.bf16.gmra.mxu2 %v5332_v22  ;;  %v5368_v22 = vor.u32 %v6417_v12, %v5365_v13 }
  0x7c   : > { %1208 = vmatmul.bf16.gmra.mxu1 %v4936_v21  ;;  %v5364_v21 = vor.u32 %v6418_v11, %v5363_v10 }
  0x7e   : > { %2166 = vmatmul.bf16.gmra.mxu3 %v5336_v23 }
  0x8b   : > { %990 = vmatmul.bf16.gmra.mxu0 %v4940_v32  ;;  %1948 = vmatmul.bf16.gmra.mxu2 %v5340_v34  ;;  %v4971_v32 = vld [vmem:[%s6816_s7 + $0xa0] sm:$0xf]  ;;  %v6335_v34 = vld [vmem:[%s6816_s7 + $0xa4] sm:$0xf] }
  0x8c   : > { %1213 = vmatmul.bf16.gmra.mxu1 %v4944_v33  ;;  %v6336_v33 = vld [vmem:[%s6816_s7 + $0xa4] sm:$0xf0] }
  0x8d   : > { %v4972_v42 = vor.u32 %v6336_v33, %v4971_v32  ;;  %v6339_v32 = vld [vmem:[%s6816_s7 + $0xc4] sm:$0xf]  ;;  %v4989_v33 = vld [vmem:[%s6816_s7 + $0xc8] sm:$0xf0] }
  0x8e   : > { %2171 = vmatmul.bf16.gmra.mxu3 %v5344_v35  ;;  %v4973_v35 = vld [vmem:[%s6816_s7 + $0xa8] sm:$0xf0] }
  0x8f   : > { %v4976_v43 = vor.u32 %v6335_v34, %v4973_v35  ;;  %v5387_v34 = vld [vmem:[%s6824_s10 + $0xc0] sm:$0xf]  ;;  %v6424_v35 = vld [vmem:[%s6824_s10 + $0xc4] sm:$0xf0] }
  0x9b   : > { %995 = vmatmul.bf16.gmra.mxu0 %v4948_v44  ;;  %1953 = vmatmul.bf16.gmra.mxu2 %v5348_v46 }
  0x9c   : > { %1218 = vmatmul.bf16.gmra.mxu1 %v4952_v45 }
  0x9e   : > { %2176 = vmatmul.bf16.gmra.mxu3 %v5352_v47  ;;  %v5372_v47 = vor.u32 %v6420_v37, %v5371_v36  ;;  %v6423_v36 = vld [vmem:[%s6824_s10 + $0xc4] sm:$0xf]  ;;  %v5389_v37 = vld [vmem:[%s6824_s10 + $0xc8] sm:$0xf0] }
  0xa8   : > { %v961_v58 = vpop.f32.mrf.mxu0 }
  0xa9   : > { %v1184_v59 = vpop.f32.mrf.mxu1 }
  0xaa   : > { %v6948_v62 = vadd.f32 %v1184_v59, %v961_v58  ;;  %v4979_v58 = vld [vmem:[%s6816_s7 + $0xb0] sm:$0xf]  ;;  %v6338_v59 = vld [vmem:[%s6816_s7 + $0xb4] sm:$0xf0] }
  0xab   : > { %1000 = vmatmul.bf16.gmra.mxu0 %v4956_v56  ;;  %1958 = vmatmul.bf16.gmra.mxu2 %v5356_v60  ;;  %v6337_v60 = vld [vmem:[%s6816_s7 + $0xb4] sm:$0xf]  ;;  %v4980_v8 = vor.u32 %v6338_v59, %v4979_v58 }
  0xac   : > { %1223 = vmatmul.bf16.gmra.mxu1 %v4960_v57 }
  0xae   : > { %2181 = vmatmul.bf16.gmra.mxu3 %v5360_v61  ;;  %v1919_v63 = vpop.f32.mrf.mxu2  ;;  %v4981_v61 = vld [vmem:[%s6816_s7 + $0xb8] sm:$0xf0] }
  0xaf   : > { %v4984_v9 = vor.u32 %v6337_v60, %v4981_v61 }
  0xb0   : > { %v963_v2 = vpop.f32.mrf.mxu0 }
  0xb1   : > { %v2142_v0 = vpop.f32.mrf.mxu3  ;;  %v1186_v3 = vpop.f32.mrf.mxu1 }
  0xb2   : > { %v6950_v1 = vadd.f32 %v2142_v0, %v1919_v63  ;;  %v6952_v4 = vadd.f32 %v1186_v3, %v963_v2  ;;  %v5379_v63 = vld [vmem:[%s6824_s10 + $0xb0] sm:$0xf]  ;;  %v6422_v0 = vld [vmem:[%s6824_s10 + $0xb4] sm:$0xf0]  ;;  %v6421_v2 = vld [vmem:[%s6824_s10 + $0xb4] sm:$0xf] }
  0xb3   : > { %v5381_v3 = vld [vmem:[%s6824_s10 + $0xb8] sm:$0xf0]  ;;  %v5380_v13 = vor.u32 %v6422_v0, %v5379_v63  ;;  %v4995_v63 = vld [vmem:[%s6816_s7 + $0xd0] sm:$0xf]  ;;  %v6342_v0 = vld [vmem:[%s6816_s7 + $0xd4] sm:$0xf0] }
  0xb6   : > { %v1921_v14 = vpop.f32.mrf.mxu2 }
  0xb8   : > { %v966_v19 = vpop.f32.mrf.mxu0 }
  0xb9   : > { %v2144_v15 = vpop.f32.mrf.mxu3  ;;  %v1189_v20 = vpop.f32.mrf.mxu1 }
  0xba   : > { %v6964_v18 = vadd.f32 %v2144_v15, %v1921_v14  ;;  %v6966_v23 = vadd.f32 %v1189_v20, %v966_v19  ;;  %v5384_v14 = vor.u32 %v6421_v2, %v5381_v3  ;;  %v6341_v2 = vld [vmem:[%s6816_s7 + $0xd4] sm:$0xf]  ;;  %v4997_v3 = vld [vmem:[%s6816_s7 + $0xd8] sm:$0xf0] }
  0xbb   : > { %1005 = vmatmul.bf16.gmra.mxu0 %v4964_v16  ;;  %1963 = vmatmul.bf16.gmra.mxu2 %v5364_v21 }
  0xbc   : > { %1228 = vmatmul.bf16.gmra.mxu1 %v4968_v17 }
  0xbe   : > { %2186 = vmatmul.bf16.gmra.mxu3 %v5368_v22  ;;  %v1924_v25 = vpop.f32.mrf.mxu2 }
  0xc0   : > { %v968_v28 = vpop.f32.mrf.mxu0 }
  0xc1   : > { %v2147_v26 = vpop.f32.mrf.mxu3  ;;  %v1191_v29 = vpop.f32.mrf.mxu1 }
  0xc2   : > { %v6970_v27 = vadd.f32 %v2147_v26, %v1924_v25  ;;  %v6972_v30 = vadd.f32 %v1191_v29, %v968_v28  ;;  %v4987_v28 = vld [vmem:[%s6816_s7 + $0xc0] sm:$0xf]  ;;  %v6340_v29 = vld [vmem:[%s6816_s7 + $0xc4] sm:$0xf0] }
  0xc6   : > { %v1926_v40 = vpop.f32.mrf.mxu2 }
  0xc8   : > { %v971_v45 = vpop.f32.mrf.mxu0 }
  0xc9   : > { %v2149_v41 = vpop.f32.mrf.mxu3  ;;  %v1194_v46 = vpop.f32.mrf.mxu1 }
  0xca   : > { %v6984_v44 = vadd.f32 %v2149_v41, %v1926_v40  ;;  %v6986_v49 = vadd.f32 %v1194_v46, %v971_v45  ;;  %v4988_v40 = vor.u32 %v6340_v29, %v4987_v28  ;;  %v4992_v41 = vor.u32 %v6339_v32, %v4989_v33 }
  0xcb   : > { %1010 = vmatmul.bf16.gmra.mxu0 %v4972_v42  ;;  %1968 = vmatmul.bf16.gmra.mxu2 %v5372_v47  ;;  %v5388_v46 = vor.u32 %v6424_v35, %v5387_v34  ;;  %v5392_v47 = vor.u32 %v6423_v36, %v5389_v37 }
  0xcc   : > { %1233 = vmatmul.bf16.gmra.mxu1 %v4976_v43 }
  0xce   : > { %2191 = vmatmul.bf16.gmra.mxu3 %v5376_v48  ;;  %v1929_v51 = vpop.f32.mrf.mxu2 }
  0xd0   : > { %v973_v54 = vpop.f32.mrf.mxu0 }
  0xd1   : > { %v2152_v52 = vpop.f32.mrf.mxu3  ;;  %v1196_v55 = vpop.f32.mrf.mxu1 }
  0xd2   : > { %v6990_v53 = vadd.f32 %v2152_v52, %v1929_v51  ;;  %v6992_v56 = vadd.f32 %v1196_v55, %v973_v54 }
  0xd6   : > { %v1931_v6 = vpop.f32.mrf.mxu2 }
  0xd8   : > { %v976_v11 = vpop.f32.mrf.mxu0 }
  0xd9   : > { %v2154_v7 = vpop.f32.mrf.mxu3  ;;  %v1199_v12 = vpop.f32.mrf.mxu1 }
  0xda   : > { %v7004_v10 = vadd.f32 %v2154_v7, %v1931_v6  ;;  %v7006_v15 = vadd.f32 %v1199_v12, %v976_v11  ;;  %v5395_v6 = vld [vmem:[%s6824_s10 + $0xd0] sm:$0xf]  ;;  %v6426_v7 = vld [vmem:[%s6824_s10 + $0xd4] sm:$0xf0] }
  0xdb   : > { %1015 = vmatmul.bf16.gmra.mxu0 %v4980_v8  ;;  %1973 = vmatmul.bf16.gmra.mxu2 %v5380_v13  ;;  %v6425_v8 = vld [vmem:[%s6824_s10 + $0xd4] sm:$0xf]  ;;  %v4996_v13 = vor.u32 %v6342_v0, %v4995_v63 }
  0xdc   : > { %1238 = vmatmul.bf16.gmra.mxu1 %v4984_v9  ;;  %v5397_v9 = vld [vmem:[%s6824_s10 + $0xd8] sm:$0xf0] }
  0xdd   : > { %v5400_v28 = vor.u32 %v6425_v8, %v5397_v9 }
  0xde   : > { %2196 = vmatmul.bf16.gmra.mxu3 %v5384_v14  ;;  %v1934_v17 = vpop.f32.mrf.mxu2  ;;  %v5000_v14 = vor.u32 %v6341_v2, %v4997_v3 }
  0xe0   : > { %v978_v21 = vpop.f32.mrf.mxu0 }
  0xe1   : > { %v2157_v19 = vpop.f32.mrf.mxu3  ;;  %v1201_v22 = vpop.f32.mrf.mxu1 }
  0xe2   : > { %v7010_v20 = vadd.f32 %v2157_v19, %v1934_v17  ;;  %v7012_v25 = vadd.f32 %v1201_v22, %v978_v21  ;;  %v5396_v22 = vor.u32 %v6426_v7, %v5395_v6 }
  0xe6   : > { %v1936_v38 = vpop.f32.mrf.mxu2 }
  0xe8   : > { %v981_v43 = vpop.f32.mrf.mxu0 }
  0xe9   : > { %v2159_v39 = vpop.f32.mrf.mxu3  ;;  %v1204_v45 = vpop.f32.mrf.mxu1 }
  0xea   : > { %v7024_v42 = vadd.f32 %v2159_v39, %v1936_v38  ;;  %v7026_v48 = vadd.f32 %v1204_v45, %v981_v43  ;;  %v6343_v43 = vld [vmem:[%s6816_s7 + $0xe4] sm:$0xf]  ;;  %v5005_v45 = vld [vmem:[%s6816_s7 + $0xe8] sm:$0xf0] }
  0xeb   : > { %1020 = vmatmul.bf16.gmra.mxu0 %v4988_v40  ;;  %1978 = vmatmul.bf16.gmra.mxu2 %v5388_v46  ;;  %v5003_v40 = vld [vmem:[%s6816_s7 + $0xe0] sm:$0xf]  ;;  %v5008_v0 = vor.u32 %v6343_v43, %v5005_v45  ;;  %v6429_v43 = vld [vmem:[%s6824_s10 + $0xf4] sm:$0xf]  ;;  %v5413_v45 = vld [vmem:[%s6824_s10 + $0xf8] sm:$0xf0] }
  0xec   : > { %1243 = vmatmul.bf16.gmra.mxu1 %v4992_v41  ;;  %v6344_v41 = vld [vmem:[%s6816_s7 + $0xe4] sm:$0xf0]  ;;  %v5403_v46 = vld [vmem:[%s6824_s10 + $0xe0] sm:$0xf] }
  0xed   : > { %v5004_v63 = vor.u32 %v6344_v41, %v5003_v40  ;;  %v5411_v40 = vld [vmem:[%s6824_s10 + $0xf0] sm:$0xf]  ;;  %v6430_v41 = vld [vmem:[%s6824_s10 + $0xf4] sm:$0xf0] }
  0xee   : > { %2201 = vmatmul.bf16.gmra.mxu3 %v5392_v47  ;;  %v1939_v52 = vpop.f32.mrf.mxu2  ;;  %v6428_v47 = vld [vmem:[%s6824_s10 + $0xe4] sm:$0xf0] }
  0xef   : > { %v5404_v7 = vor.u32 %v6428_v47, %v5403_v46 }
  0xf0   : > { %v983_v58 = vpop.f32.mrf.mxu0 }
  0xf1   : > { %v2162_v54 = vpop.f32.mrf.mxu3  ;;  %v1206_v59 = vpop.f32.mrf.mxu1 }
  0xf2   : > { %v7030_v55 = vadd.f32 %v2162_v54, %v1939_v52  ;;  %v7032_v60 = vadd.f32 %v1206_v59, %v983_v58  ;;  %v6427_v52 = vld [vmem:[%s6824_s10 + $0xe4] sm:$0xf]  ;;  %v5405_v54 = vld [vmem:[%s6824_s10 + $0xe8] sm:$0xf0] }
  0xf3   : > { %v5408_v8 = vor.u32 %v6427_v52, %v5405_v54 }
  0xf6   : > { %v1941_v11 = vpop.f32.mrf.mxu2 }
  0xf8   : > { %v986_v19 = vpop.f32.mrf.mxu0 }
  0xf9   : > { %v2164_v12 = vpop.f32.mrf.mxu3  ;;  %v1209_v21 = vpop.f32.mrf.mxu1 }
  0xfa   : > { %v7044_v17 = vadd.f32 %v2164_v12, %v1941_v11  ;;  %v7046_v29 = vadd.f32 %v1209_v21, %v986_v19 }
  0xfb   : > { %1025 = vmatmul.bf16.gmra.mxu0 %v4996_v13  ;;  %1983 = vmatmul.bf16.gmra.mxu2 %v5396_v22 }
  0xfc   : > { %1248 = vmatmul.bf16.gmra.mxu1 %v5000_v14 }
  0xfe   : > { %2206 = vmatmul.bf16.gmra.mxu3 %v5400_v28  ;;  %v1944_v33 = vpop.f32.mrf.mxu2 }
 0x100   : > { %v988_v36 = vpop.f32.mrf.mxu0 }
 0x101   : > { %v2167_v34 = vpop.f32.mrf.mxu3  ;;  %v1211_v37 = vpop.f32.mrf.mxu1 }
 0x102   : > { %v7050_v35 = vadd.f32 %v2167_v34, %v1944_v33  ;;  %v7052_v38 = vadd.f32 %v1211_v37, %v988_v36  ;;  %v5011_v33 = vld [vmem:[%s6816_s7 + $0xf0] sm:$0xf]  ;;  %v6346_v34 = vld [vmem:[%s6816_s7 + $0xf4] sm:$0xf0]  ;;  %v6345_v36 = vld [vmem:[%s6816_s7 + $0xf4] sm:$0xf] }
 0x103   : > { %v5013_v37 = vld [vmem:[%s6816_s7 + $0xf8] sm:$0xf0]  ;;  %v5012_v52 = vor.u32 %v6346_v34, %v5011_v33 }
 0x104   : > { %v5016_v54 = vor.u32 %v6345_v36, %v5013_v37  ;;  %v5019_v36 = vld [vmem:[%s6816_s7 + $0x100] sm:$0xf]  ;;  %v6348_v37 = vld [vmem:[%s6816_s7 + $0x104] sm:$0xf0] }
 0x106   : > { %v1946_v58 = vpop.f32.mrf.mxu2 }
 0x108   : > { %v991_v3 = vpop.f32.mrf.mxu0 }
 0x109   : > { %v2169_v59 = vpop.f32.mrf.mxu3  ;;  %v1214_v6 = vpop.f32.mrf.mxu1 }
 0x10a   : > { %v7064_v2 = vadd.f32 %v2169_v59, %v1946_v58  ;;  %v7066_v9 = vadd.f32 %v1214_v6, %v991_v3  ;;  %v5416_v3 = vor.u32 %v6429_v43, %v5413_v45  ;;  %v5419_v43 = vld [vmem:[%s6824_s10 + $0x100] sm:$0xf]  ;;  %v6432_v45 = vld [vmem:[%s6824_s10 + $0x104] sm:$0xf0] }
 0x10b   : > { %1030 = vmatmul.bf16.gmra.mxu0 %v5004_v63  ;;  %1988 = vmatmul.bf16.gmra.mxu2 %v5404_v7 }
 0x10c   : > { %1253 = vmatmul.bf16.gmra.mxu1 %v5008_v0  ;;  %v5412_v0 = vor.u32 %v6430_v41, %v5411_v40  ;;  %v6347_v40 = vld [vmem:[%s6816_s7 + $0x104] sm:$0xf]  ;;  %v5021_v41 = vld [vmem:[%s6816_s7 + $0x108] sm:$0xf0] }
 0x10e   : > { %2211 = vmatmul.bf16.gmra.mxu3 %v5408_v8  ;;  %v1949_v12 = vpop.f32.mrf.mxu2 }
 0x110   : > { %v993_v19 = vpop.f32.mrf.mxu0 }
 0x111   : > { %v2172_v13 = vpop.f32.mrf.mxu3  ;;  %v1216_v21 = vpop.f32.mrf.mxu1 }
 0x112   : > { %v7070_v14 = vadd.f32 %v2172_v13, %v1949_v12  ;;  %v7072_v22 = vadd.f32 %v1216_v21, %v993_v19 }
 0x116   : > { %v1951_v46 = vpop.f32.mrf.mxu2 }
 0x118   : > { %v996_v59 = vpop.f32.mrf.mxu0 }
 0x119   : > { %v2174_v47 = vpop.f32.mrf.mxu3  ;;  %v1219_v63 = vpop.f32.mrf.mxu1 }
 0x11a   : > { %v7084_v58 = vadd.f32 %v2174_v47, %v1951_v46  ;;  %v7086_v6 = vadd.f32 %v1219_v63, %v996_v59  ;;  %v6431_v46 = vld [vmem:[%s6824_s10 + $0x104] sm:$0xf]  ;;  %v5421_v47 = vld [vmem:[%s6824_s10 + $0x108] sm:$0xf0]  ;;  %v5020_v59 = vor.u32 %v6348_v37, %v5019_v36  ;;  %v5024_v63 = vor.u32 %v6347_v40, %v5021_v41 }
 0x11b   : > { %1035 = vmatmul.bf16.gmra.mxu0 %v5012_v52  ;;  %1993 = vmatmul.bf16.gmra.mxu2 %v5412_v0 }
 0x11c   : > { %1258 = vmatmul.bf16.gmra.mxu1 %v5016_v54 }
 0x11e   : > { %2216 = vmatmul.bf16.gmra.mxu3 %v5416_v3  ;;  %v1954_v8 = vpop.f32.mrf.mxu2 }
 0x120   : > { %v998_v19 = vpop.f32.mrf.mxu0 }
 0x121   : > { %v2177_v12 = vpop.f32.mrf.mxu3  ;;  %v1221_v21 = vpop.f32.mrf.mxu1 }
 0x122   : > { %v7090_v13 = vadd.f32 %v2177_v12, %v1954_v8  ;;  %v7092_v33 = vadd.f32 %v1221_v21, %v998_v19  ;;  %v5420_v12 = vor.u32 %v6432_v45, %v5419_v43  ;;  %v5424_v19 = vor.u32 %v6431_v46, %v5421_v47  ;;  %v5027_v47 = vld [vmem:[%s6816_s7 + $0x110] sm:$0xf] }
 0x126   : > { %v1956_v52 = vpop.f32.mrf.mxu2 }
 0x128   : > { %v1001_v3 = vpop.f32.mrf.mxu0 }
 0x129   : > { %v2179_v54 = vpop.f32.mrf.mxu3  ;;  %v1224_v8 = vpop.f32.mrf.mxu1 }
 0x12a   : > { %v7104_v0 = vadd.f32 %v2179_v54, %v1956_v52  ;;  %v7106_v21 = vadd.f32 %v1224_v8, %v1001_v3  ;;  %v6350_v52 = vld [vmem:[%s6816_s7 + $0x114] sm:$0xf0]  ;;  %v6349_v54 = vld [vmem:[%s6816_s7 + $0x114] sm:$0xf] }
 0x12b   : > { %1040 = vmatmul.bf16.gmra.mxu0 %v5020_v59  ;;  %1998 = vmatmul.bf16.gmra.mxu2 %v5420_v12  ;;  %v5029_v59 = vld [vmem:[%s6816_s7 + $0x118] sm:$0xf0]  ;;  %v6434_v3 = vld [vmem:[%s6824_s10 + $0x114] sm:$0xf0]  ;;  %v6433_v8 = vld [vmem:[%s6824_s10 + $0x114] sm:$0xf]  ;;  %v5028_v7 = vor.u32 %v6350_v52, %v5027_v47 }
 0x12c   : > { %1263 = vmatmul.bf16.gmra.mxu1 %v5024_v63  ;;  %v5427_v63 = vld [vmem:[%s6824_s10 + $0x110] sm:$0xf]  ;;  %v5429_v12 = vld [vmem:[%s6824_s10 + $0x118] sm:$0xf0] }
 0x12d   : > { %v5432_v46 = vor.u32 %v6433_v8, %v5429_v12  ;;  %v6352_v8 = vld [vmem:[%s6816_s7 + $0x124] sm:$0xf0]  ;;  %v5037_v12 = vld [vmem:[%s6816_s7 + $0x128] sm:$0xf0] }
 0x12e   : > { %2221 = vmatmul.bf16.gmra.mxu3 %v5424_v19  ;;  %v1959_v36 = vpop.f32.mrf.mxu2 }
 0x130   : > { %v1003_v41 = vpop.f32.mrf.mxu0 }
 0x131   : > { %v2182_v37 = vpop.f32.mrf.mxu3  ;;  %v1226_v43 = vpop.f32.mrf.mxu1 }
 0x132   : > { %v7110_v40 = vadd.f32 %v2182_v37, %v1959_v36  ;;  %v7112_v45 = vadd.f32 %v1226_v43, %v1003_v41  ;;  %v5032_v36 = vor.u32 %v6349_v54, %v5029_v59  ;;  %v5428_v43 = vor.u32 %v6434_v3, %v5427_v63  ;;  %v5035_v3 = vld [vmem:[%s6816_s7 + $0x120] sm:$0xf] }
 0x133   : > { %v5036_v32 = vor.u32 %v6352_v8, %v5035_v3 }
 0x136   : > { %v1961_v19 = vpop.f32.mrf.mxu2 }
 0x138   : > { %v1006_v28 = vpop.f32.mrf.mxu0 }
 0x139   : > { %v2184_v34 = vpop.f32.mrf.mxu3  ;;  %v1229_v41 = vpop.f32.mrf.mxu1 }
 0x13a   : > { %v7124_v37 = vadd.f32 %v2184_v34, %v1961_v19  ;;  %v7126_v11 = vadd.f32 %v1229_v41, %v1006_v28  ;;  %v5435_v19 = vld [vmem:[%s6824_s10 + $0x120] sm:$0xf]  ;;  %v6435_v41 = vld [vmem:[%s6824_s10 + $0x124] sm:$0xf] }
 0x13b   : > { %1045 = vmatmul.bf16.gmra.mxu0 %v5028_v7  ;;  %2003 = vmatmul.bf16.gmra.mxu2 %v5428_v43  ;;  %v6351_v7 = vld [vmem:[%s6816_s7 + $0x124] sm:$0xf]  ;;  %v5437_v43 = vld [vmem:[%s6824_s10 + $0x128] sm:$0xf0] }
 0x13c   : > { %1268 = vmatmul.bf16.gmra.mxu1 %v5032_v36  ;;  %v6436_v36 = vld [vmem:[%s6824_s10 + $0x124] sm:$0xf0]  ;;  %v5440_v63 = vor.u32 %v6435_v41, %v5437_v43  ;;  %v6354_v41 = vld [vmem:[%s6816_s7 + $0x134] sm:$0xf0]  ;;  %v5045_v43 = vld [vmem:[%s6816_s7 + $0x138] sm:$0xf0] }
 0x13e   : > { %2226 = vmatmul.bf16.gmra.mxu3 %v5432_v46  ;;  %v1964_v34 = vpop.f32.mrf.mxu2 }
 0x140   : > { %v1008_v54 = vpop.f32.mrf.mxu0 }
 0x141   : > { %v2187_v47 = vpop.f32.mrf.mxu3  ;;  %v1231_v59 = vpop.f32.mrf.mxu1 }
 0x142   : > { %v7130_v52 = vadd.f32 %v2187_v47, %v1964_v34  ;;  %v7132_v28 = vadd.f32 %v1231_v59, %v1008_v54  ;;  %v5040_v34 = vor.u32 %v6351_v7, %v5037_v12  ;;  %v5436_v59 = vor.u32 %v6436_v36, %v5435_v19  ;;  %v5043_v36 = vld [vmem:[%s6816_s7 + $0x130] sm:$0xf] }
 0x143   : > { %v5044_v16 = vor.u32 %v6354_v41, %v5043_v36 }
 0x146   : > { %v1966_v46 = vpop.f32.mrf.mxu2 }
 0x148   : > { %v1011_v61 = vpop.f32.mrf.mxu0 }
 0x149   : > { %v2189_v39 = vpop.f32.mrf.mxu3  ;;  %v1234_v54 = vpop.f32.mrf.mxu1 }
 0x14a   : > { %v7144_v47 = vadd.f32 %v2189_v39, %v1966_v46  ;;  %v7146_v51 = vadd.f32 %v1234_v54, %v1011_v61  ;;  %v5443_v46 = vld [vmem:[%s6824_s10 + $0x130] sm:$0xf]  ;;  %v6437_v54 = vld [vmem:[%s6824_s10 + $0x134] sm:$0xf] }
 0x14b   : > { %1050 = vmatmul.bf16.gmra.mxu0 %v5036_v32  ;;  %2008 = vmatmul.bf16.gmra.mxu2 %v5436_v59  ;;  %v6353_v32 = vld [vmem:[%s6816_s7 + $0x134] sm:$0xf]  ;;  %v5445_v59 = vld [vmem:[%s6824_s10 + $0x138] sm:$0xf0] }
 0x14c   : > { %1273 = vmatmul.bf16.gmra.mxu1 %v5040_v34  ;;  %v6438_v34 = vld [vmem:[%s6824_s10 + $0x134] sm:$0xf0]  ;;  %v5448_v19 = vor.u32 %v6437_v54, %v5445_v59  ;;  %v6356_v54 = vld [vmem:[%s6816_s7 + $0x144] sm:$0xf0]  ;;  %v5053_v59 = vld [vmem:[%s6816_s7 + $0x148] sm:$0xf0] }
 0x14e   : > { %2231 = vmatmul.bf16.gmra.mxu3 %v5440_v63  ;;  %v1969_v39 = vpop.f32.mrf.mxu2 }
 0x150   : > { %v1013_v7 = vpop.f32.mrf.mxu0 }
 0x151   : > { %v2192_v3 = vpop.f32.mrf.mxu3  ;;  %v1236_v12 = vpop.f32.mrf.mxu1 }
 0x152   : > { %v7150_v8 = vadd.f32 %v2192_v3, %v1969_v39  ;;  %v7152_v61 = vadd.f32 %v1236_v12, %v1013_v7  ;;  %v5048_v39 = vor.u32 %v6353_v32, %v5045_v43  ;;  %v5444_v12 = vor.u32 %v6438_v34, %v5443_v46  ;;  %v5051_v34 = vld [vmem:[%s6816_s7 + $0x140] sm:$0xf] }
 0x153   : > { %v5052_v24 = vor.u32 %v6356_v54, %v5051_v34 }
 0x154   : > { %8743 = vst [vmem:[#allocation2_spill] sm:$0xff] %v7150_v8  ;;  %v8873_v8 = vmax.f32 %v6952_v4, %v6964_v18  ;;  %v5707_v18 = vld [vmem:[%s7630_s17 + $0xa0] sm:$0xf] }
 0x155   : > { %8744 = vst [vmem:[#allocation3_spill] sm:$0xff] %v7152_v61 }
 0x156   : > { %v1971_v63 = vpop.f32.mrf.mxu2 }
 0x158   : > { %v1016_v57 = vpop.f32.mrf.mxu0 }
 0x159   : > { %v2194_v26 = vpop.f32.mrf.mxu3  ;;  %v1239_v7 = vpop.f32.mrf.mxu1 }
 0x15a   : > { %v7164_v3 = vadd.f32 %v2194_v26, %v1971_v63  ;;  %v7166_v50 = vadd.f32 %v1239_v7, %v1016_v57  ;;  %v5451_v63 = vld [vmem:[%s6824_s10 + $0x140] sm:$0xf]  ;;  %v6439_v7 = vld [vmem:[%s6824_s10 + $0x144] sm:$0xf] }
 0x15b   : > { %1055 = vmatmul.bf16.gmra.mxu0 %v5044_v16  ;;  %2013 = vmatmul.bf16.gmra.mxu2 %v5444_v12  ;;  %v6355_v16 = vld [vmem:[%s6816_s7 + $0x144] sm:$0xf]  ;;  %v5453_v12 = vld [vmem:[%s6824_s10 + $0x148] sm:$0xf0] }
 0x15c   : > { %8745 = vst [vmem:[#allocation4_spill] sm:$0xff] %v7164_v3  ;;  %1278 = vmatmul.bf16.gmra.mxu1 %v5048_v39  ;;  %v6440_v39 = vld [vmem:[%s6824_s10 + $0x144] sm:$0xf0]  ;;  %v5456_v46 = vor.u32 %v6439_v7, %v5453_v12  ;;  %v6358_v7 = vld [vmem:[%s6816_s7 + $0x154] sm:$0xf0] }
 0x15d   : > { %8746 = vst [vmem:[#allocation5_spill] sm:$0xff] %v7166_v50  ;;  %v5061_v12 = vld [vmem:[%s6816_s7 + $0x158] sm:$0xf0] }
 0x15e   : > { %2236 = vmatmul.bf16.gmra.mxu3 %v5448_v19  ;;  %v1974_v26 = vpop.f32.mrf.mxu2 }
 0x160   : > { %v1018_v32 = vpop.f32.mrf.mxu0 }
 0x161   : > { %v2197_v36 = vpop.f32.mrf.mxu3  ;;  %v1241_v43 = vpop.f32.mrf.mxu1 }
 0x162   : > { %v7170_v41 = vadd.f32 %v2197_v36, %v1974_v26  ;;  %v7172_v57 = vadd.f32 %v1241_v43, %v1018_v32  ;;  %v5056_v26 = vor.u32 %v6355_v16, %v5053_v59  ;;  %v5452_v43 = vor.u32 %v6440_v39, %v5451_v63  ;;  %v5059_v39 = vld [vmem:[%s6816_s7 + $0x150] sm:$0xf] }
 0x164   : > { %8747 = vst [vmem:[#allocation6_spill] sm:$0xff] %v7170_v41 }
 0x165   : > { %8748 = vst [vmem:[#allocation7_spill] sm:$0xff] %v7172_v57 }
 0x166   : > { %v1976_v19 = vpop.f32.mrf.mxu2 }
 0x168   : > { %v1021_v5 = vpop.f32.mrf.mxu0 }
 0x169   : > { %v2199_v31 = vpop.f32.mrf.mxu3  ;;  %v1244_v32 = vpop.f32.mrf.mxu1 }
 0x16a   : > { %v7184_v36 = vadd.f32 %v2199_v31, %v1976_v19  ;;  %v7186_v41 = vadd.f32 %v1244_v32, %v1021_v5  ;;  %v5459_v19 = vld [vmem:[%s6824_s10 + $0x150] sm:$0xf]  ;;  %v6441_v32 = vld [vmem:[%s6824_s10 + $0x154] sm:$0xf] }
 0x16b   : > { %1060 = vmatmul.bf16.gmra.mxu0 %v5052_v24  ;;  %2018 = vmatmul.bf16.gmra.mxu2 %v5452_v43  ;;  %v6357_v24 = vld [vmem:[%s6816_s7 + $0x154] sm:$0xf]  ;;  %v5461_v43 = vld [vmem:[%s6824_s10 + $0x158] sm:$0xf0] }
 0x16c   : > { %8749 = vst [vmem:[#allocation8_spill] sm:$0xff] %v7184_v36  ;;  %1283 = vmatmul.bf16.gmra.mxu1 %v5056_v26  ;;  %v6442_v26 = vld [vmem:[%s6824_s10 + $0x154] sm:$0xf0]  ;;  %v5060_v36 = vor.u32 %v6358_v7, %v5059_v39  ;;  %v5464_v63 = vor.u32 %v6441_v32, %v5461_v43  ;;  %v6360_v32 = vld [vmem:[%s6816_s7 + $0x164] sm:$0xf0] }
 0x16d   : > { %8750 = vst [vmem:[#allocation9_spill] sm:$0xff] %v7186_v41  ;;  %v5069_v43 = vld [vmem:[%s6816_s7 + $0x168] sm:$0xf0] }
 0x16e   : > { %2241 = vmatmul.bf16.gmra.mxu3 %v5456_v46  ;;  %v1979_v31 = vpop.f32.mrf.mxu2 }
 0x170   : > { %v1023_v16 = vpop.f32.mrf.mxu0 }
 0x171   : > { %v2202_v34 = vpop.f32.mrf.mxu3  ;;  %v1246_v59 = vpop.f32.mrf.mxu1 }
 0x172   : > { %v7190_v54 = vadd.f32 %v2202_v34, %v1979_v31  ;;  %v7192_v5 = vadd.f32 %v1246_v59, %v1023_v16  ;;  %v5064_v31 = vor.u32 %v6357_v24, %v5061_v12  ;;  %v5460_v59 = vor.u32 %v6442_v26, %v5459_v19  ;;  %v5067_v26 = vld [vmem:[%s6816_s7 + $0x160] sm:$0xf] }
 0x174   : > { %8751 = vst [vmem:[#allocation10_spill] sm:$0xff] %v7190_v54 }
 0x175   : > { %8752 = vst [vmem:[#allocation11_spill] sm:$0xff] %v7192_v5 }
 0x176   : > { %v1981_v46 = vpop.f32.mrf.mxu2 }
 0x178   : > { %v1026_v57 = vpop.f32.mrf.mxu0 }
 0x179   : > { %v2204_v50 = vpop.f32.mrf.mxu3  ;;  %v1249_v16 = vpop.f32.mrf.mxu1 }
 0x17a   : > { %v7204_v34 = vadd.f32 %v2204_v50, %v1981_v46  ;;  %v7206_v54 = vadd.f32 %v1249_v16, %v1026_v57  ;;  %v5467_v46 = vld [vmem:[%s6824_s10 + $0x160] sm:$0xf]  ;;  %v6443_v16 = vld [vmem:[%s6824_s10 + $0x164] sm:$0xf] }
 0x17b   : > { %1065 = vmatmul.bf16.gmra.mxu0 %v5060_v36  ;;  %2023 = vmatmul.bf16.gmra.mxu2 %v5460_v59  ;;  %v6359_v36 = vld [vmem:[%s6816_s7 + $0x164] sm:$0xf]  ;;  %v5469_v59 = vld [vmem:[%s6824_s10 + $0x168] sm:$0xf0] }
 0x17c   : > { %8753 = vst [vmem:[#allocation12_spill] sm:$0xff] %v7204_v34  ;;  %1288 = vmatmul.bf16.gmra.mxu1 %v5064_v31  ;;  %v6444_v31 = vld [vmem:[%s6824_s10 + $0x164] sm:$0xf0]  ;;  %v5068_v34 = vor.u32 %v6360_v32, %v5067_v26  ;;  %v5472_v19 = vor.u32 %v6443_v16, %v5469_v59  ;;  %v6362_v16 = vld [vmem:[%s6816_s7 + $0x174] sm:$0xf0] }
 0x17d   : > { %8754 = vst [vmem:[#allocation13_spill] sm:$0xff] %v7206_v54  ;;  %v5077_v59 = vld [vmem:[%s6816_s7 + $0x178] sm:$0xf0] }
 0x17e   : > { %2246 = vmatmul.bf16.gmra.mxu3 %v5464_v63  ;;  %v1984_v50 = vpop.f32.mrf.mxu2 }
 0x180   : > { %v1028_v24 = vpop.f32.mrf.mxu0 }
 0x181   : > { %v2207_v39 = vpop.f32.mrf.mxu3  ;;  %v1251_v12 = vpop.f32.mrf.mxu1 }
 0x182   : > { %v7210_v7 = vadd.f32 %v2207_v39, %v1984_v50  ;;  %v7212_v57 = vadd.f32 %v1251_v12, %v1028_v24  ;;  %v5072_v50 = vor.u32 %v6359_v36, %v5069_v43  ;;  %v5468_v12 = vor.u32 %v6444_v31, %v5467_v46  ;;  %v5075_v31 = vld [vmem:[%s6816_s7 + $0x170] sm:$0xf] }
 0x184   : > { %8755 = vst [vmem:[#allocation14_spill] sm:$0xff] %v7210_v7 }
 0x185   : > { %8756 = vst [vmem:[#allocation15_spill] sm:$0xff] %v7212_v57 }
 0x186   : > { %v1986_v63 = vpop.f32.mrf.mxu2 }
 0x188   : > { %v1031_v5 = vpop.f32.mrf.mxu0 }
 0x189   : > { %v2209_v41 = vpop.f32.mrf.mxu3  ;;  %v1254_v24 = vpop.f32.mrf.mxu1 }
 0x18a   : > { %v7224_v39 = vadd.f32 %v2209_v41, %v1986_v63  ;;  %v7226_v7 = vadd.f32 %v1254_v24, %v1031_v5  ;;  %v5475_v63 = vld [vmem:[%s6824_s10 + $0x170] sm:$0xf]  ;;  %v6445_v24 = vld [vmem:[%s6824_s10 + $0x174] sm:$0xf] }
 0x18b   : > { %1070 = vmatmul.bf16.gmra.mxu0 %v5068_v34  ;;  %2028 = vmatmul.bf16.gmra.mxu2 %v5468_v12  ;;  %v6361_v34 = vld [vmem:[%s6816_s7 + $0x174] sm:$0xf]  ;;  %v5477_v12 = vld [vmem:[%s6824_s10 + $0x178] sm:$0xf0] }
 0x18c   : > { %8757 = vst [vmem:[#allocation16_spill] sm:$0xff] %v7224_v39  ;;  %1293 = vmatmul.bf16.gmra.mxu1 %v5072_v50  ;;  %v6446_v50 = vld [vmem:[%s6824_s10 + $0x174] sm:$0xf0]  ;;  %v5076_v39 = vor.u32 %v6362_v16, %v5075_v31  ;;  %v5480_v46 = vor.u32 %v6445_v24, %v5477_v12  ;;  %v6364_v24 = vld [vmem:[%s6816_s7 + $0x184] sm:$0xf0] }
 0x18d   : > { %8758 = vst [vmem:[#allocation17_spill] sm:$0xff] %v7226_v7  ;;  %v5085_v12 = vld [vmem:[%s6816_s7 + $0x188] sm:$0xf0] }
 0x18e   : > { %2251 = vmatmul.bf16.gmra.mxu3 %v5472_v19  ;;  %v1989_v41 = vpop.f32.mrf.mxu2 }
 0x190   : > { %v1033_v36 = vpop.f32.mrf.mxu0 }
 0x191   : > { %v2212_v26 = vpop.f32.mrf.mxu3  ;;  %v1256_v43 = vpop.f32.mrf.mxu1 }
 0x192   : > { %v7230_v32 = vadd.f32 %v2212_v26, %v1989_v41  ;;  %v7232_v5 = vadd.f32 %v1256_v43, %v1033_v36  ;;  %v5080_v41 = vor.u32 %v6361_v34, %v5077_v59  ;;  %v5476_v43 = vor.u32 %v6446_v50, %v5475_v63  ;;  %v5083_v50 = vld [vmem:[%s6816_s7 + $0x180] sm:$0xf] }
 0x194   : > { %8759 = vst [vmem:[#allocation18_spill] sm:$0xff] %v7230_v32 }
 0x195   : > { %8760 = vst [vmem:[#allocation19_spill] sm:$0xff] %v7232_v5 }
 0x196   : > { %v1991_v19 = vpop.f32.mrf.mxu2 }
 0x198   : > { %v1036_v57 = vpop.f32.mrf.mxu0 }
 0x199   : > { %v2214_v54 = vpop.f32.mrf.mxu3  ;;  %v1259_v36 = vpop.f32.mrf.mxu1 }
 0x19a   : > { %v7244_v26 = vadd.f32 %v2214_v54, %v1991_v19  ;;  %v7246_v32 = vadd.f32 %v1259_v36, %v1036_v57  ;;  %v5483_v19 = vld [vmem:[%s6824_s10 + $0x180] sm:$0xf]  ;;  %v6447_v36 = vld [vmem:[%s6824_s10 + $0x184] sm:$0xf] }
 0x19b   : > { %1075 = vmatmul.bf16.gmra.mxu0 %v5076_v39  ;;  %2033 = vmatmul.bf16.gmra.mxu2 %v5476_v43  ;;  %v6363_v39 = vld [vmem:[%s6816_s7 + $0x184] sm:$0xf]  ;;  %v5485_v43 = vld [vmem:[%s6824_s10 + $0x188] sm:$0xf0] }
 0x19c   : > { %8761 = vst [vmem:[#allocation20_spill] sm:$0xff] %v7244_v26  ;;  %1298 = vmatmul.bf16.gmra.mxu1 %v5080_v41  ;;  %v6448_v41 = vld [vmem:[%s6824_s10 + $0x184] sm:$0xf0]  ;;  %v5084_v26 = vor.u32 %v6364_v24, %v5083_v50  ;;  %v5488_v63 = vor.u32 %v6447_v36, %v5485_v43  ;;  %v6366_v36 = vld [vmem:[%s6816_s7 + $0x194] sm:$0xf0] }
 0x19d   : > { %8762 = vst [vmem:[#allocation21_spill] sm:$0xff] %v7246_v32  ;;  %v5093_v43 = vld [vmem:[%s6816_s7 + $0x198] sm:$0xf0] }
 0x19e   : > { %2256 = vmatmul.bf16.gmra.mxu3 %v5480_v46  ;;  %v1994_v54 = vpop.f32.mrf.mxu2 }
 0x1a0   : > { %v1038_v34 = vpop.f32.mrf.mxu0 }
 0x1a1   : > { %v2217_v31 = vpop.f32.mrf.mxu3  ;;  %v1261_v59 = vpop.f32.mrf.mxu1 }
 0x1a2   : > { %v7250_v16 = vadd.f32 %v2217_v31, %v1994_v54  ;;  %v7252_v57 = vadd.f32 %v1261_v59, %v1038_v34  ;;  %v5088_v54 = vor.u32 %v6363_v39, %v5085_v12  ;;  %v5484_v59 = vor.u32 %v6448_v41, %v5483_v19  ;;  %v5091_v41 = vld [vmem:[%s6816_s7 + $0x190] sm:$0xf] }
 0x1a4   : > { %8763 = vst [vmem:[#allocation22_spill] sm:$0xff] %v7250_v16 }
 0x1a5   : > { %8764 = vst [vmem:[#allocation23_spill] sm:$0xff] %v7252_v57 }
 0x1a6   : > { %v1996_v46 = vpop.f32.mrf.mxu2 }
 0x1a8   : > { %v1041_v5 = vpop.f32.mrf.mxu0 }
 0x1a9   : > { %v2219_v7 = vpop.f32.mrf.mxu3  ;;  %v1264_v34 = vpop.f32.mrf.mxu1 }
 0x1aa   : > { %v7264_v31 = vadd.f32 %v2219_v7, %v1996_v46  ;;  %v7266_v16 = vadd.f32 %v1264_v34, %v1041_v5  ;;  %v5491_v46 = vld [vmem:[%s6824_s10 + $0x190] sm:$0xf]  ;;  %v6449_v34 = vld [vmem:[%s6824_s10 + $0x194] sm:$0xf] }
 0x1ab   : > { %1080 = vmatmul.bf16.gmra.mxu0 %v5084_v26  ;;  %2038 = vmatmul.bf16.gmra.mxu2 %v5484_v59  ;;  %v6365_v26 = vld [vmem:[%s6816_s7 + $0x194] sm:$0xf]  ;;  %v5493_v59 = vld [vmem:[%s6824_s10 + $0x198] sm:$0xf0] }
 0x1ac   : > { %8765 = vst [vmem:[#allocation24_spill] sm:$0xff] %v7264_v31  ;;  %1303 = vmatmul.bf16.gmra.mxu1 %v5088_v54  ;;  %v6450_v54 = vld [vmem:[%s6824_s10 + $0x194] sm:$0xf0]  ;;  %v5092_v31 = vor.u32 %v6366_v36, %v5091_v41  ;;  %v5496_v19 = vor.u32 %v6449_v34, %v5493_v59  ;;  %v6368_v34 = vld [vmem:[%s6816_s7 + $0x1a4] sm:$0xf0] }
 0x1ad   : > { %8766 = vst [vmem:[#allocation25_spill] sm:$0xff] %v7266_v16  ;;  %v5101_v59 = vld [vmem:[%s6816_s7 + $0x1a8] sm:$0xf0] }
 0x1ae   : > { %2261 = vmatmul.bf16.gmra.mxu3 %v5488_v63  ;;  %v1999_v7 = vpop.f32.mrf.mxu2 }
 0x1b0   : > { %v1043_v39 = vpop.f32.mrf.mxu0 }
 0x1b1   : > { %v2222_v50 = vpop.f32.mrf.mxu3  ;;  %v1266_v12 = vpop.f32.mrf.mxu1 }
 0x1b2   : > { %v7270_v24 = vadd.f32 %v2222_v50, %v1999_v7  ;;  %v7272_v5 = vadd.f32 %v1266_v12, %v1043_v39  ;;  %v5096_v7 = vor.u32 %v6365_v26, %v5093_v43  ;;  %v5492_v12 = vor.u32 %v6450_v54, %v5491_v46  ;;  %v5099_v54 = vld [vmem:[%s6816_s7 + $0x1a0] sm:$0xf] }
 0x1b4   : > { %8767 = vst [vmem:[#allocation26_spill] sm:$0xff] %v7270_v24 }
 0x1b5   : > { %8768 = vst [vmem:[#allocation27_spill] sm:$0xff] %v7272_v5 }
 0x1b6   : > { %v2001_v63 = vpop.f32.mrf.mxu2 }
 0x1b8   : > { %v1046_v57 = vpop.f32.mrf.mxu0 }
 0x1b9   : > { %v2224_v32 = vpop.f32.mrf.mxu3  ;;  %v1269_v39 = vpop.f32.mrf.mxu1 }
 0x1ba   : > { %v7284_v50 = vadd.f32 %v2224_v32, %v2001_v63  ;;  %v7286_v24 = vadd.f32 %v1269_v39, %v1046_v57  ;;  %v5499_v63 = vld [vmem:[%s6824_s10 + $0x1a0] sm:$0xf]  ;;  %v6451_v39 = vld [vmem:[%s6824_s10 + $0x1a4] sm:$0xf] }
 0x1bb   : > { %1085 = vmatmul.bf16.gmra.mxu0 %v5092_v31  ;;  %2043 = vmatmul.bf16.gmra.mxu2 %v5492_v12  ;;  %v6367_v31 = vld [vmem:[%s6816_s7 + $0x1a4] sm:$0xf]  ;;  %v5501_v12 = vld [vmem:[%s6824_s10 + $0x1a8] sm:$0xf0] }
 0x1bc   : > { %8769 = vst [vmem:[#allocation28_spill] sm:$0xff] %v7284_v50  ;;  %1308 = vmatmul.bf16.gmra.mxu1 %v5096_v7  ;;  %v6452_v7 = vld [vmem:[%s6824_s10 + $0x1a4] sm:$0xf0]  ;;  %v5100_v50 = vor.u32 %v6368_v34, %v5099_v54  ;;  %v5504_v46 = vor.u32 %v6451_v39, %v5501_v12  ;;  %v6370_v39 = vld [vmem:[%s6816_s7 + $0x1b4] sm:$0xf0] }
 0x1bd   : > { %8770 = vst [vmem:[#allocation29_spill] sm:$0xff] %v7286_v24  ;;  %v5109_v12 = vld [vmem:[%s6816_s7 + $0x1b8] sm:$0xf0] }
 0x1be   : > { %2266 = vmatmul.bf16.gmra.mxu3 %v5496_v19  ;;  %v2004_v32 = vpop.f32.mrf.mxu2 }
 0x1c0   : > { %v1048_v26 = vpop.f32.mrf.mxu0 }
 0x1c1   : > { %v2227_v41 = vpop.f32.mrf.mxu3  ;;  %v1271_v43 = vpop.f32.mrf.mxu1 }
 0x1c2   : > { %v7290_v36 = vadd.f32 %v2227_v41, %v2004_v32  ;;  %v7292_v57 = vadd.f32 %v1271_v43, %v1048_v26  ;;  %v5104_v32 = vor.u32 %v6367_v31, %v5101_v59  ;;  %v5500_v43 = vor.u32 %v6452_v7, %v5499_v63  ;;  %v5107_v7 = vld [vmem:[%s6816_s7 + $0x1b0] sm:$0xf] }
 0x1c4   : > { %8771 = vst [vmem:[#allocation30_spill] sm:$0xff] %v7290_v36 }
 0x1c5   : > { %8772 = vst [vmem:[#allocation31_spill] sm:$0xff] %v7292_v57 }
 0x1c6   : > { %v2006_v19 = vpop.f32.mrf.mxu2 }
 0x1c8   : > { %v1051_v5 = vpop.f32.mrf.mxu0 }
 0x1c9   : > { %v2229_v16 = vpop.f32.mrf.mxu3  ;;  %v1274_v26 = vpop.f32.mrf.mxu1 }
 0x1ca   : > { %v7304_v41 = vadd.f32 %v2229_v16, %v2006_v19  ;;  %v7306_v36 = vadd.f32 %v1274_v26, %v1051_v5  ;;  %v5507_v19 = vld [vmem:[%s6824_s10 + $0x1b0] sm:$0xf]  ;;  %v6453_v26 = vld [vmem:[%s6824_s10 + $0x1b4] sm:$0xf] }
 0x1cb   : > { %1090 = vmatmul.bf16.gmra.mxu0 %v5100_v50  ;;  %2048 = vmatmul.bf16.gmra.mxu2 %v5500_v43  ;;  %v6369_v50 = vld [vmem:[%s6816_s7 + $0x1b4] sm:$0xf]  ;;  %v5509_v43 = vld [vmem:[%s6824_s10 + $0x1b8] sm:$0xf0] }
 0x1cc   : > { %8773 = vst [vmem:[#allocation32_spill] sm:$0xff] %v7304_v41  ;;  %1313 = vmatmul.bf16.gmra.mxu1 %v5104_v32  ;;  %v6454_v32 = vld [vmem:[%s6824_s10 + $0x1b4] sm:$0xf0]  ;;  %v5108_v41 = vor.u32 %v6370_v39, %v5107_v7  ;;  %v5512_v63 = vor.u32 %v6453_v26, %v5509_v43  ;;  %v6372_v26 = vld [vmem:[%s6816_s7 + $0x1c4] sm:$0xf0] }
 0x1cd   : > { %8774 = vst [vmem:[#allocation33_spill] sm:$0xff] %v7306_v36  ;;  %v5117_v43 = vld [vmem:[%s6816_s7 + $0x1c8] sm:$0xf0] }
 0x1ce   : > { %2271 = vmatmul.bf16.gmra.mxu3 %v5504_v46  ;;  %v2009_v16 = vpop.f32.mrf.mxu2 }
 0x1d0   : > { %v1053_v31 = vpop.f32.mrf.mxu0 }
 0x1d1   : > { %v2232_v54 = vpop.f32.mrf.mxu3  ;;  %v1276_v59 = vpop.f32.mrf.mxu1 }
 0x1d2   : > { %v7310_v34 = vadd.f32 %v2232_v54, %v2009_v16  ;;  %v7312_v5 = vadd.f32 %v1276_v59, %v1053_v31  ;;  %v5112_v16 = vor.u32 %v6369_v50, %v5109_v12  ;;  %v5508_v59 = vor.u32 %v6454_v32, %v5507_v19  ;;  %v5115_v32 = vld [vmem:[%s6816_s7 + $0x1c0] sm:$0xf] }
 0x1d4   : > { %8775 = vst [vmem:[#allocation34_spill] sm:$0xff] %v7310_v34 }
 0x1d5   : > { %8776 = vst [vmem:[#allocation35_spill] sm:$0xff] %v7312_v5 }
 0x1d6   : > { %v2011_v46 = vpop.f32.mrf.mxu2 }
 0x1d8   : > { %v1056_v57 = vpop.f32.mrf.mxu0 }
 0x1d9   : > { %v2234_v24 = vpop.f32.mrf.mxu3  ;;  %v1279_v31 = vpop.f32.mrf.mxu1 }
 0x1da   : > { %v7324_v54 = vadd.f32 %v2234_v24, %v2011_v46  ;;  %v7326_v34 = vadd.f32 %v1279_v31, %v1056_v57  ;;  %v5515_v46 = vld [vmem:[%s6824_s10 + $0x1c0] sm:$0xf]  ;;  %v6455_v31 = vld [vmem:[%s6824_s10 + $0x1c4] sm:$0xf] }
 0x1db   : > { %1095 = vmatmul.bf16.gmra.mxu0 %v5108_v41  ;;  %2053 = vmatmul.bf16.gmra.mxu2 %v5508_v59  ;;  %v6371_v41 = vld [vmem:[%s6816_s7 + $0x1c4] sm:$0xf]  ;;  %v5517_v59 = vld [vmem:[%s6824_s10 + $0x1c8] sm:$0xf0] }
 0x1dc   : > { %8777 = vst [vmem:[#allocation36_spill] sm:$0xff] %v7324_v54  ;;  %1318 = vmatmul.bf16.gmra.mxu1 %v5112_v16  ;;  %v6456_v16 = vld [vmem:[%s6824_s10 + $0x1c4] sm:$0xf0]  ;;  %v5116_v54 = vor.u32 %v6372_v26, %v5115_v32  ;;  %v5520_v19 = vor.u32 %v6455_v31, %v5517_v59  ;;  %v6374_v31 = vld [vmem:[%s6816_s7 + $0x1d4] sm:$0xf0] }
 0x1dd   : > { %8778 = vst [vmem:[#allocation37_spill] sm:$0xff] %v7326_v34  ;;  %v5125_v59 = vld [vmem:[%s6816_s7 + $0x1d8] sm:$0xf0] }
 0x1de   : > { %2276 = vmatmul.bf16.gmra.mxu3 %v5512_v63  ;;  %v2014_v24 = vpop.f32.mrf.mxu2 }
 0x1e0   : > { %v1058_v50 = vpop.f32.mrf.mxu0 }
 0x1e1   : > { %v2237_v7 = vpop.f32.mrf.mxu3  ;;  %v1281_v12 = vpop.f32.mrf.mxu1 }
 0x1e2   : > { %v7330_v39 = vadd.f32 %v2237_v7, %v2014_v24  ;;  %v7332_v57 = vadd.f32 %v1281_v12, %v1058_v50  ;;  %v5120_v24 = vor.u32 %v6371_v41, %v5117_v43  ;;  %v5516_v12 = vor.u32 %v6456_v16, %v5515_v46  ;;  %v5123_v16 = vld [vmem:[%s6816_s7 + $0x1d0] sm:$0xf] }
 0x1e4   : > { %8779 = vst [vmem:[#allocation38_spill] sm:$0xff] %v7330_v39 }
 0x1e5   : > { %8780 = vst [vmem:[#allocation39_spill] sm:$0xff] %v7332_v57 }
 0x1e6   : > { %v2016_v63 = vpop.f32.mrf.mxu2 }
 0x1e8   : > { %v1061_v5 = vpop.f32.mrf.mxu0 }
 0x1e9   : > { %v2239_v36 = vpop.f32.mrf.mxu3  ;;  %v1284_v50 = vpop.f32.mrf.mxu1 }
 0x1ea   : > { %v7344_v7 = vadd.f32 %v2239_v36, %v2016_v63  ;;  %v7346_v39 = vadd.f32 %v1284_v50, %v1061_v5  ;;  %v5523_v63 = vld [vmem:[%s6824_s10 + $0x1d0] sm:$0xf]  ;;  %v6457_v50 = vld [vmem:[%s6824_s10 + $0x1d4] sm:$0xf] }
 0x1eb   : > { %1100 = vmatmul.bf16.gmra.mxu0 %v5116_v54  ;;  %2058 = vmatmul.bf16.gmra.mxu2 %v5516_v12  ;;  %v6373_v54 = vld [vmem:[%s6816_s7 + $0x1d4] sm:$0xf]  ;;  %v5525_v12 = vld [vmem:[%s6824_s10 + $0x1d8] sm:$0xf0] }
 0x1ec   : > { %8781 = vst [vmem:[#allocation40_spill] sm:$0xff] %v7344_v7  ;;  %1323 = vmatmul.bf16.gmra.mxu1 %v5120_v24  ;;  %v6458_v24 = vld [vmem:[%s6824_s10 + $0x1d4] sm:$0xf0]  ;;  %v5124_v7 = vor.u32 %v6374_v31, %v5123_v16  ;;  %v5528_v46 = vor.u32 %v6457_v50, %v5525_v12  ;;  %v6376_v50 = vld [vmem:[%s6816_s7 + $0x1e4] sm:$0xf0] }
 0x1ed   : > { %8782 = vst [vmem:[#allocation41_spill] sm:$0xff] %v7346_v39  ;;  %v5133_v12 = vld [vmem:[%s6816_s7 + $0x1e8] sm:$0xf0] }
 0x1ee   : > { %2281 = vmatmul.bf16.gmra.mxu3 %v5520_v19  ;;  %v2019_v36 = vpop.f32.mrf.mxu2 }
 0x1f0   : > { %v1063_v41 = vpop.f32.mrf.mxu0 }
 0x1f1   : > { %v2242_v32 = vpop.f32.mrf.mxu3  ;;  %v1286_v43 = vpop.f32.mrf.mxu1 }
 0x1f2   : > { %v7350_v26 = vadd.f32 %v2242_v32, %v2019_v36  ;;  %v7352_v5 = vadd.f32 %v1286_v43, %v1063_v41  ;;  %v5128_v36 = vor.u32 %v6373_v54, %v5125_v59  ;;  %v5524_v43 = vor.u32 %v6458_v24, %v5523_v63  ;;  %v5131_v24 = vld [vmem:[%s6816_s7 + $0x1e0] sm:$0xf] }
 0x1f4   : > { %8783 = vst [vmem:[#allocation42_spill] sm:$0xff] %v7350_v26 }
 0x1f5   : > { %8784 = vst [vmem:[#allocation43_spill] sm:$0xff] %v7352_v5 }
 0x1f6   : > { %v2021_v19 = vpop.f32.mrf.mxu2 }
 0x1f8   : > { %v1066_v57 = vpop.f32.mrf.mxu0 }
 0x1f9   : > { %v2244_v34 = vpop.f32.mrf.mxu3  ;;  %v1289_v41 = vpop.f32.mrf.mxu1 }
 0x1fa   : > { %v7364_v32 = vadd.f32 %v2244_v34, %v2021_v19  ;;  %v7366_v26 = vadd.f32 %v1289_v41, %v1066_v57  ;;  %v5531_v19 = vld [vmem:[%s6824_s10 + $0x1e0] sm:$0xf]  ;;  %v6459_v41 = vld [vmem:[%s6824_s10 + $0x1e4] sm:$0xf] }
 0x1fb   : > { %1105 = vmatmul.bf16.gmra.mxu0 %v5124_v7  ;;  %2063 = vmatmul.bf16.gmra.mxu2 %v5524_v43  ;;  %v6375_v7 = vld [vmem:[%s6816_s7 + $0x1e4] sm:$0xf]  ;;  %v5533_v43 = vld [vmem:[%s6824_s10 + $0x1e8] sm:$0xf0] }
 0x1fc   : > { %8785 = vst [vmem:[#allocation44_spill] sm:$0xff] %v7364_v32  ;;  %1328 = vmatmul.bf16.gmra.mxu1 %v5128_v36  ;;  %v6460_v36 = vld [vmem:[%s6824_s10 + $0x1e4] sm:$0xf0]  ;;  %v5132_v32 = vor.u32 %v6376_v50, %v5131_v24  ;;  %v5536_v63 = vor.u32 %v6459_v41, %v5533_v43  ;;  %v6378_v41 = vld [vmem:[%s6816_s7 + $0x1f4] sm:$0xf0] }
 0x1fd   : > { %8786 = vst [vmem:[#allocation45_spill] sm:$0xff] %v7366_v26  ;;  %v5141_v43 = vld [vmem:[%s6816_s7 + $0x1f8] sm:$0xf0] }
 0x1fe   : > { %2286 = vmatmul.bf16.gmra.mxu3 %v5528_v46  ;;  %v2024_v34 = vpop.f32.mrf.mxu2 }
 0x200   : > { %v1068_v54 = vpop.f32.mrf.mxu0 }
 0x201   : > { %v2247_v16 = vpop.f32.mrf.mxu3  ;;  %v1291_v59 = vpop.f32.mrf.mxu1 }
 0x202   : > { %v7370_v31 = vadd.f32 %v2247_v16, %v2024_v34  ;;  %v7372_v57 = vadd.f32 %v1291_v59, %v1068_v54  ;;  %v5136_v34 = vor.u32 %v6375_v7, %v5133_v12  ;;  %v5532_v59 = vor.u32 %v6460_v36, %v5531_v19  ;;  %v5139_v36 = vld [vmem:[%s6816_s7 + $0x1f0] sm:$0xf] }
 0x204   : > { %8787 = vst [vmem:[#allocation46_spill] sm:$0xff] %v7370_v31 }
 0x205   : > { %8788 = vst [vmem:[#allocation47_spill] sm:$0xff] %v7372_v57 }
 0x206   : > { %v2026_v46 = vpop.f32.mrf.mxu2 }
 0x208   : > { %v1071_v5 = vpop.f32.mrf.mxu0 }
 0x209   : > { %v2249_v39 = vpop.f32.mrf.mxu3  ;;  %v1294_v54 = vpop.f32.mrf.mxu1 }
 0x20a   : > { %v7384_v16 = vadd.f32 %v2249_v39, %v2026_v46  ;;  %v7386_v31 = vadd.f32 %v1294_v54, %v1071_v5  ;;  %v5539_v46 = vld [vmem:[%s6824_s10 + $0x1f0] sm:$0xf]  ;;  %v6461_v54 = vld [vmem:[%s6824_s10 + $0x1f4] sm:$0xf] }
 0x20b   : > { %1110 = vmatmul.bf16.gmra.mxu0 %v5132_v32  ;;  %2068 = vmatmul.bf16.gmra.mxu2 %v5532_v59  ;;  %v6377_v32 = vld [vmem:[%s6816_s7 + $0x1f4] sm:$0xf]  ;;  %v5541_v59 = vld [vmem:[%s6824_s10 + $0x1f8] sm:$0xf0] }
 0x20c   : > { %8789 = vst [vmem:[#allocation48_spill] sm:$0xff] %v7384_v16  ;;  %1333 = vmatmul.bf16.gmra.mxu1 %v5136_v34  ;;  %v6462_v34 = vld [vmem:[%s6824_s10 + $0x1f4] sm:$0xf0]  ;;  %v5140_v16 = vor.u32 %v6378_v41, %v5139_v36  ;;  %v5544_v19 = vor.u32 %v6461_v54, %v5541_v59  ;;  %v6380_v54 = vld [vmem:[%s6816_s7 + $0x204] sm:$0xf0] }
 0x20d   : > { %8790 = vst [vmem:[#allocation49_spill] sm:$0xff] %v7386_v31  ;;  %v5149_v59 = vld [vmem:[%s6816_s7 + $0x208] sm:$0xf0] }
 0x20e   : > { %2291 = vmatmul.bf16.gmra.mxu3 %v5536_v63  ;;  %v2029_v39 = vpop.f32.mrf.mxu2 }
 0x210   : > { %v1073_v7 = vpop.f32.mrf.mxu0 }
 0x211   : > { %v2252_v24 = vpop.f32.mrf.mxu3  ;;  %v1296_v12 = vpop.f32.mrf.mxu1 }
 0x212   : > { %v7390_v50 = vadd.f32 %v2252_v24, %v2029_v39  ;;  %v7392_v5 = vadd.f32 %v1296_v12, %v1073_v7  ;;  %v5144_v39 = vor.u32 %v6377_v32, %v5141_v43  ;;  %v5540_v12 = vor.u32 %v6462_v34, %v5539_v46  ;;  %v5147_v34 = vld [vmem:[%s6816_s7 + $0x200] sm:$0xf] }
 0x214   : > { %8791 = vst [vmem:[#allocation50_spill] sm:$0xff] %v7390_v50 }
 0x215   : > { %8792 = vst [vmem:[#allocation51_spill] sm:$0xff] %v7392_v5 }
 0x216   : > { %v2031_v63 = vpop.f32.mrf.mxu2 }
 0x218   : > { %v1076_v57 = vpop.f32.mrf.mxu0 }
 0x219   : > { %v2254_v26 = vpop.f32.mrf.mxu3  ;;  %v1299_v7 = vpop.f32.mrf.mxu1 }
 0x21a   : > { %v7404_v24 = vadd.f32 %v2254_v26, %v2031_v63  ;;  %v7406_v50 = vadd.f32 %v1299_v7, %v1076_v57  ;;  %v5547_v63 = vld [vmem:[%s6824_s10 + $0x200] sm:$0xf]  ;;  %v6463_v7 = vld [vmem:[%s6824_s10 + $0x204] sm:$0xf] }
 0x21b   : > { %1115 = vmatmul.bf16.gmra.mxu0 %v5140_v16  ;;  %2073 = vmatmul.bf16.gmra.mxu2 %v5540_v12  ;;  %v6379_v16 = vld [vmem:[%s6816_s7 + $0x204] sm:$0xf]  ;;  %v5549_v12 = vld [vmem:[%s6824_s10 + $0x208] sm:$0xf0] }
 0x21c   : > { %8793 = vst [vmem:[#allocation52_spill] sm:$0xff] %v7404_v24  ;;  %1338 = vmatmul.bf16.gmra.mxu1 %v5144_v39  ;;  %v6464_v39 = vld [vmem:[%s6824_s10 + $0x204] sm:$0xf0]  ;;  %v5148_v24 = vor.u32 %v6380_v54, %v5147_v34  ;;  %v5552_v46 = vor.u32 %v6463_v7, %v5549_v12  ;;  %v6382_v7 = vld [vmem:[%s6816_s7 + $0x214] sm:$0xf0] }
 0x21d   : > { %8794 = vst [vmem:[#allocation53_spill] sm:$0xff] %v7406_v50  ;;  %v5157_v12 = vld [vmem:[%s6816_s7 + $0x218] sm:$0xf0] }
 0x21e   : > { %2296 = vmatmul.bf16.gmra.mxu3 %v5544_v19  ;;  %v2034_v26 = vpop.f32.mrf.mxu2 }
 0x220   : > { %v1078_v32 = vpop.f32.mrf.mxu0 }
 0x221   : > { %v2257_v36 = vpop.f32.mrf.mxu3  ;;  %v1301_v43 = vpop.f32.mrf.mxu1 }
 0x222   : > { %v7410_v41 = vadd.f32 %v2257_v36, %v2034_v26  ;;  %v7412_v57 = vadd.f32 %v1301_v43, %v1078_v32  ;;  %v5152_v26 = vor.u32 %v6379_v16, %v5149_v59  ;;  %v5548_v43 = vor.u32 %v6464_v39, %v5547_v63  ;;  %v5155_v39 = vld [vmem:[%s6816_s7 + $0x210] sm:$0xf] }
 0x224   : > { %8795 = vst [vmem:[#allocation54_spill] sm:$0xff] %v7410_v41 }
 0x225   : > { %8796 = vst [vmem:[#allocation55_spill] sm:$0xff] %v7412_v57 }
 0x226   : > { %v2036_v19 = vpop.f32.mrf.mxu2 }
 0x228   : > { %v1081_v5 = vpop.f32.mrf.mxu0 }
 0x229   : > { %v2259_v31 = vpop.f32.mrf.mxu3  ;;  %v1304_v32 = vpop.f32.mrf.mxu1 }
 0x22a   : > { %v7424_v36 = vadd.f32 %v2259_v31, %v2036_v19  ;;  %v7426_v41 = vadd.f32 %v1304_v32, %v1081_v5  ;;  %v5555_v19 = vld [vmem:[%s6824_s10 + $0x210] sm:$0xf]  ;;  %v6465_v32 = vld [vmem:[%s6824_s10 + $0x214] sm:$0xf] }
 0x22b   : > { %1120 = vmatmul.bf16.gmra.mxu0 %v5148_v24  ;;  %2078 = vmatmul.bf16.gmra.mxu2 %v5548_v43  ;;  %v6381_v24 = vld [vmem:[%s6816_s7 + $0x214] sm:$0xf]  ;;  %v5557_v43 = vld [vmem:[%s6824_s10 + $0x218] sm:$0xf0] }
 0x22c   : > { %8797 = vst [vmem:[#allocation56_spill] sm:$0xff] %v7424_v36  ;;  %1343 = vmatmul.bf16.gmra.mxu1 %v5152_v26  ;;  %v6466_v26 = vld [vmem:[%s6824_s10 + $0x214] sm:$0xf0]  ;;  %v5156_v36 = vor.u32 %v6382_v7, %v5155_v39  ;;  %v5560_v63 = vor.u32 %v6465_v32, %v5557_v43  ;;  %v6384_v32 = vld [vmem:[%s6816_s7 + $0x224] sm:$0xf0] }
 0x22d   : > { %8798 = vst [vmem:[#allocation57_spill] sm:$0xff] %v7426_v41  ;;  %v5165_v43 = vld [vmem:[%s6816_s7 + $0x228] sm:$0xf0] }
 0x22e   : > { %2301 = vmatmul.bf16.gmra.mxu3 %v5552_v46  ;;  %v2039_v31 = vpop.f32.mrf.mxu2 }
 0x230   : > { %v1083_v16 = vpop.f32.mrf.mxu0 }
 0x231   : > { %v2262_v34 = vpop.f32.mrf.mxu3  ;;  %v1306_v59 = vpop.f32.mrf.mxu1 }
 0x232   : > { %v7430_v54 = vadd.f32 %v2262_v34, %v2039_v31  ;;  %v7432_v5 = vadd.f32 %v1306_v59, %v1083_v16  ;;  %v5160_v31 = vor.u32 %v6381_v24, %v5157_v12  ;;  %v5556_v59 = vor.u32 %v6466_v26, %v5555_v19  ;;  %v5163_v26 = vld [vmem:[%s6816_s7 + $0x220] sm:$0xf] }
 0x234   : > { %8799 = vst [vmem:[#allocation58_spill] sm:$0xff] %v7430_v54 }
 0x235   : > { %8800 = vst [vmem:[#allocation59_spill] sm:$0xff] %v7432_v5 }
 0x236   : > { %v2041_v46 = vpop.f32.mrf.mxu2 }
 0x238   : > { %v1086_v57 = vpop.f32.mrf.mxu0 }
 0x239   : > { %v2264_v50 = vpop.f32.mrf.mxu3  ;;  %v1309_v16 = vpop.f32.mrf.mxu1 }
 0x23a   : > { %v7444_v34 = vadd.f32 %v2264_v50, %v2041_v46  ;;  %v7446_v54 = vadd.f32 %v1309_v16, %v1086_v57  ;;  %v5563_v46 = vld [vmem:[%s6824_s10 + $0x220] sm:$0xf]  ;;  %v6467_v16 = vld [vmem:[%s6824_s10 + $0x224] sm:$0xf] }
 0x23b   : > { %1125 = vmatmul.bf16.gmra.mxu0 %v5156_v36  ;;  %2083 = vmatmul.bf16.gmra.mxu2 %v5556_v59  ;;  %v6383_v36 = vld [vmem:[%s6816_s7 + $0x224] sm:$0xf]  ;;  %v5565_v59 = vld [vmem:[%s6824_s10 + $0x228] sm:$0xf0] }
 0x23c   : > { %8801 = vst [vmem:[#allocation60_spill] sm:$0xff] %v7444_v34  ;;  %1348 = vmatmul.bf16.gmra.mxu1 %v5160_v31  ;;  %v6468_v31 = vld [vmem:[%s6824_s10 + $0x224] sm:$0xf0]  ;;  %v5164_v34 = vor.u32 %v6384_v32, %v5163_v26  ;;  %v5568_v19 = vor.u32 %v6467_v16, %v5565_v59  ;;  %v6386_v16 = vld [vmem:[%s6816_s7 + $0x234] sm:$0xf0] }
 0x23d   : > { %8802 = vst [vmem:[#allocation61_spill] sm:$0xff] %v7446_v54  ;;  %v5173_v59 = vld [vmem:[%s6816_s7 + $0x238] sm:$0xf0] }
 0x23e   : > { %2306 = vmatmul.bf16.gmra.mxu3 %v5560_v63  ;;  %v2044_v50 = vpop.f32.mrf.mxu2 }
 0x240   : > { %v1088_v24 = vpop.f32.mrf.mxu0 }
 0x241   : > { %v2267_v39 = vpop.f32.mrf.mxu3  ;;  %v1311_v12 = vpop.f32.mrf.mxu1 }
 0x242   : > { %v7450_v7 = vadd.f32 %v2267_v39, %v2044_v50  ;;  %v7452_v57 = vadd.f32 %v1311_v12, %v1088_v24  ;;  %v5168_v50 = vor.u32 %v6383_v36, %v5165_v43  ;;  %v5564_v12 = vor.u32 %v6468_v31, %v5563_v46  ;;  %v5171_v31 = vld [vmem:[%s6816_s7 + $0x230] sm:$0xf] }
 0x244   : > { %8803 = vst [vmem:[#allocation62_spill] sm:$0xff] %v7450_v7 }
 0x245   : > { %8804 = vst [vmem:[#allocation63_spill] sm:$0xff] %v7452_v57 }
 0x246   : > { %v2046_v63 = vpop.f32.mrf.mxu2 }
 0x248   : > { %v1091_v5 = vpop.f32.mrf.mxu0 }
 0x249   : > { %v2269_v41 = vpop.f32.mrf.mxu3  ;;  %v1314_v24 = vpop.f32.mrf.mxu1 }
 0x24a   : > { %v7464_v39 = vadd.f32 %v2269_v41, %v2046_v63  ;;  %v7466_v7 = vadd.f32 %v1314_v24, %v1091_v5  ;;  %v5571_v63 = vld [vmem:[%s6824_s10 + $0x230] sm:$0xf]  ;;  %v6469_v24 = vld [vmem:[%s6824_s10 + $0x234] sm:$0xf] }
 0x24b   : > { %1130 = vmatmul.bf16.gmra.mxu0 %v5164_v34  ;;  %2088 = vmatmul.bf16.gmra.mxu2 %v5564_v12  ;;  %v6385_v34 = vld [vmem:[%s6816_s7 + $0x234] sm:$0xf]  ;;  %v5573_v12 = vld [vmem:[%s6824_s10 + $0x238] sm:$0xf0] }
 0x24c   : > { %8805 = vst [vmem:[#allocation64_spill] sm:$0xff] %v7464_v39  ;;  %1353 = vmatmul.bf16.gmra.mxu1 %v5168_v50  ;;  %v6470_v50 = vld [vmem:[%s6824_s10 + $0x234] sm:$0xf0]  ;;  %v5172_v39 = vor.u32 %v6386_v16, %v5171_v31  ;;  %v5576_v46 = vor.u32 %v6469_v24, %v5573_v12  ;;  %v6388_v24 = vld [vmem:[%s6816_s7 + $0x244] sm:$0xf0] }
 0x24d   : > { %8806 = vst [vmem:[#allocation65_spill] sm:$0xff] %v7466_v7  ;;  %v5181_v12 = vld [vmem:[%s6816_s7 + $0x248] sm:$0xf0] }
 0x24e   : > { %2311 = vmatmul.bf16.gmra.mxu3 %v5568_v19  ;;  %v2049_v41 = vpop.f32.mrf.mxu2 }
 0x250   : > { %v1093_v36 = vpop.f32.mrf.mxu0 }
 0x251   : > { %v2272_v26 = vpop.f32.mrf.mxu3  ;;  %v1316_v43 = vpop.f32.mrf.mxu1 }
 0x252   : > { %v7470_v32 = vadd.f32 %v2272_v26, %v2049_v41  ;;  %v7472_v5 = vadd.f32 %v1316_v43, %v1093_v36  ;;  %v5176_v41 = vor.u32 %v6385_v34, %v5173_v59  ;;  %v5572_v43 = vor.u32 %v6470_v50, %v5571_v63  ;;  %v5179_v50 = vld [vmem:[%s6816_s7 + $0x240] sm:$0xf] }
 0x254   : > { %8807 = vst [vmem:[#allocation66_spill] sm:$0xff] %v7470_v32 }
 0x255   : > { %8808 = vst [vmem:[#allocation67_spill] sm:$0xff] %v7472_v5 }
 0x256   : > { %v2051_v19 = vpop.f32.mrf.mxu2 }
 0x258   : > { %v1096_v57 = vpop.f32.mrf.mxu0 }
 0x259   : > { %v2274_v54 = vpop.f32.mrf.mxu3  ;;  %v1319_v36 = vpop.f32.mrf.mxu1 }
 0x25a   : > { %v7484_v26 = vadd.f32 %v2274_v54, %v2051_v19  ;;  %v7486_v32 = vadd.f32 %v1319_v36, %v1096_v57  ;;  %v5579_v19 = vld [vmem:[%s6824_s10 + $0x240] sm:$0xf]  ;;  %v6471_v36 = vld [vmem:[%s6824_s10 + $0x244] sm:$0xf] }
 0x25b   : > { %1135 = vmatmul.bf16.gmra.mxu0 %v5172_v39  ;;  %2093 = vmatmul.bf16.gmra.mxu2 %v5572_v43  ;;  %v6387_v39 = vld [vmem:[%s6816_s7 + $0x244] sm:$0xf]  ;;  %v5581_v43 = vld [vmem:[%s6824_s10 + $0x248] sm:$0xf0] }
 0x25c   : > { %8809 = vst [vmem:[#allocation68_spill] sm:$0xff] %v7484_v26  ;;  %1358 = vmatmul.bf16.gmra.mxu1 %v5176_v41  ;;  %v6472_v41 = vld [vmem:[%s6824_s10 + $0x244] sm:$0xf0]  ;;  %v5180_v26 = vor.u32 %v6388_v24, %v5179_v50  ;;  %v5584_v63 = vor.u32 %v6471_v36, %v5581_v43  ;;  %v6390_v36 = vld [vmem:[%s6816_s7 + $0x254] sm:$0xf0] }
 0x25d   : > { %8810 = vst [vmem:[#allocation69_spill] sm:$0xff] %v7486_v32  ;;  %v5189_v43 = vld [vmem:[%s6816_s7 + $0x258] sm:$0xf0] }
 0x25e   : > { %2316 = vmatmul.bf16.gmra.mxu3 %v5576_v46  ;;  %v2054_v54 = vpop.f32.mrf.mxu2 }
 0x260   : > { %v1098_v34 = vpop.f32.mrf.mxu0 }
 0x261   : > { %v2277_v31 = vpop.f32.mrf.mxu3  ;;  %v1321_v59 = vpop.f32.mrf.mxu1 }
 0x262   : > { %v7490_v16 = vadd.f32 %v2277_v31, %v2054_v54  ;;  %v7492_v57 = vadd.f32 %v1321_v59, %v1098_v34  ;;  %v5184_v54 = vor.u32 %v6387_v39, %v5181_v12  ;;  %v5580_v59 = vor.u32 %v6472_v41, %v5579_v19  ;;  %v5187_v41 = vld [vmem:[%s6816_s7 + $0x250] sm:$0xf] }
 0x264   : > { %8811 = vst [vmem:[#allocation70_spill] sm:$0xff] %v7490_v16 }
 0x265   : > { %8812 = vst [vmem:[#allocation71_spill] sm:$0xff] %v7492_v57 }
 0x266   : > { %v2056_v46 = vpop.f32.mrf.mxu2 }
 0x268   : > { %v1101_v5 = vpop.f32.mrf.mxu0 }
 0x269   : > { %v2279_v7 = vpop.f32.mrf.mxu3  ;;  %v1324_v34 = vpop.f32.mrf.mxu1 }
 0x26a   : > { %v7504_v31 = vadd.f32 %v2279_v7, %v2056_v46  ;;  %v7506_v16 = vadd.f32 %v1324_v34, %v1101_v5  ;;  %v5587_v46 = vld [vmem:[%s6824_s10 + $0x250] sm:$0xf]  ;;  %v6473_v34 = vld [vmem:[%s6824_s10 + $0x254] sm:$0xf] }
 0x26b   : > { %1140 = vmatmul.bf16.gmra.mxu0 %v5180_v26  ;;  %2098 = vmatmul.bf16.gmra.mxu2 %v5580_v59  ;;  %v6389_v26 = vld [vmem:[%s6816_s7 + $0x254] sm:$0xf]  ;;  %v5589_v59 = vld [vmem:[%s6824_s10 + $0x258] sm:$0xf0] }
 0x26c   : > { %8813 = vst [vmem:[#allocation72_spill] sm:$0xff] %v7504_v31  ;;  %1363 = vmatmul.bf16.gmra.mxu1 %v5184_v54  ;;  %v6474_v54 = vld [vmem:[%s6824_s10 + $0x254] sm:$0xf0]  ;;  %v5188_v31 = vor.u32 %v6390_v36, %v5187_v41  ;;  %v5592_v19 = vor.u32 %v6473_v34, %v5589_v59  ;;  %v6392_v34 = vld [vmem:[%s6816_s7 + $0x264] sm:$0xf0] }
 0x26d   : > { %8814 = vst [vmem:[#allocation73_spill] sm:$0xff] %v7506_v16  ;;  %v5197_v59 = vld [vmem:[%s6816_s7 + $0x268] sm:$0xf0] }
 0x26e   : > { %2321 = vmatmul.bf16.gmra.mxu3 %v5584_v63  ;;  %v2059_v7 = vpop.f32.mrf.mxu2 }
 0x270   : > { %v1103_v39 = vpop.f32.mrf.mxu0 }
 0x271   : > { %v2282_v50 = vpop.f32.mrf.mxu3  ;;  %v1326_v12 = vpop.f32.mrf.mxu1 }
 0x272   : > { %v7510_v24 = vadd.f32 %v2282_v50, %v2059_v7  ;;  %v7512_v5 = vadd.f32 %v1326_v12, %v1103_v39  ;;  %v5192_v7 = vor.u32 %v6389_v26, %v5189_v43  ;;  %v5588_v12 = vor.u32 %v6474_v54, %v5587_v46  ;;  %v5195_v54 = vld [vmem:[%s6816_s7 + $0x260] sm:$0xf] }
 0x274   : > { %8815 = vst [vmem:[#allocation74_spill] sm:$0xff] %v7510_v24 }
 0x275   : > { %8816 = vst [vmem:[#allocation75_spill] sm:$0xff] %v7512_v5 }
 0x276   : > { %v2061_v63 = vpop.f32.mrf.mxu2 }
 0x278   : > { %v1106_v57 = vpop.f32.mrf.mxu0 }
 0x279   : > { %v2284_v32 = vpop.f32.mrf.mxu3  ;;  %v1329_v39 = vpop.f32.mrf.mxu1 }
 0x27a   : > { %v7524_v50 = vadd.f32 %v2284_v32, %v2061_v63  ;;  %v7526_v24 = vadd.f32 %v1329_v39, %v1106_v57  ;;  %v5595_v63 = vld [vmem:[%s6824_s10 + $0x260] sm:$0xf]  ;;  %v6475_v39 = vld [vmem:[%s6824_s10 + $0x264] sm:$0xf] }
 0x27b   : > { %1145 = vmatmul.bf16.gmra.mxu0 %v5188_v31  ;;  %2103 = vmatmul.bf16.gmra.mxu2 %v5588_v12  ;;  %v6391_v31 = vld [vmem:[%s6816_s7 + $0x264] sm:$0xf]  ;;  %v5597_v12 = vld [vmem:[%s6824_s10 + $0x268] sm:$0xf0] }
 0x27c   : > { %8817 = vst [vmem:[#allocation76_spill] sm:$0xff] %v7524_v50  ;;  %1368 = vmatmul.bf16.gmra.mxu1 %v5192_v7  ;;  %v6476_v7 = vld [vmem:[%s6824_s10 + $0x264] sm:$0xf0]  ;;  %v5196_v50 = vor.u32 %v6392_v34, %v5195_v54  ;;  %v5600_v46 = vor.u32 %v6475_v39, %v5597_v12  ;;  %v6394_v39 = vld [vmem:[%s6816_s7 + $0x274] sm:$0xf0] }
 0x27d   : > { %8818 = vst [vmem:[#allocation77_spill] sm:$0xff] %v7526_v24  ;;  %v5205_v12 = vld [vmem:[%s6816_s7 + $0x278] sm:$0xf0] }
 0x27e   : > { %2326 = vmatmul.bf16.gmra.mxu3 %v5592_v19  ;;  %v2064_v32 = vpop.f32.mrf.mxu2 }
 0x280   : > { %v1108_v26 = vpop.f32.mrf.mxu0 }
 0x281   : > { %v2287_v41 = vpop.f32.mrf.mxu3  ;;  %v1331_v43 = vpop.f32.mrf.mxu1 }
 0x282   : > { %v7530_v36 = vadd.f32 %v2287_v41, %v2064_v32  ;;  %v7532_v57 = vadd.f32 %v1331_v43, %v1108_v26  ;;  %v5200_v32 = vor.u32 %v6391_v31, %v5197_v59  ;;  %v5596_v43 = vor.u32 %v6476_v7, %v5595_v63  ;;  %v5203_v7 = vld [vmem:[%s6816_s7 + $0x270] sm:$0xf] }
 0x284   : > { %8819 = vst [vmem:[#allocation78_spill] sm:$0xff] %v7530_v36 }
 0x285   : > { %8820 = vst [vmem:[#allocation79_spill] sm:$0xff] %v7532_v57 }
 0x286   : > { %v2066_v19 = vpop.f32.mrf.mxu2 }
 0x288   : > { %v1111_v5 = vpop.f32.mrf.mxu0 }
 0x289   : > { %v2289_v16 = vpop.f32.mrf.mxu3  ;;  %v1334_v26 = vpop.f32.mrf.mxu1 }
 0x28a   : > { %v7544_v41 = vadd.f32 %v2289_v16, %v2066_v19  ;;  %v7546_v36 = vadd.f32 %v1334_v26, %v1111_v5  ;;  %v5603_v19 = vld [vmem:[%s6824_s10 + $0x270] sm:$0xf]  ;;  %v6477_v26 = vld [vmem:[%s6824_s10 + $0x274] sm:$0xf] }
 0x28b   : > { %1150 = vmatmul.bf16.gmra.mxu0 %v5196_v50  ;;  %2108 = vmatmul.bf16.gmra.mxu2 %v5596_v43  ;;  %v6393_v50 = vld [vmem:[%s6816_s7 + $0x274] sm:$0xf]  ;;  %v5605_v43 = vld [vmem:[%s6824_s10 + $0x278] sm:$0xf0] }
 0x28c   : > { %8821 = vst [vmem:[#allocation80_spill] sm:$0xff] %v7544_v41  ;;  %1373 = vmatmul.bf16.gmra.mxu1 %v5200_v32  ;;  %v6478_v32 = vld [vmem:[%s6824_s10 + $0x274] sm:$0xf0]  ;;  %v5204_v41 = vor.u32 %v6394_v39, %v5203_v7  ;;  %v5608_v63 = vor.u32 %v6477_v26, %v5605_v43  ;;  %v6396_v26 = vld [vmem:[%s6816_s7 + $0x284] sm:$0xf0] }
 0x28d   : > { %8822 = vst [vmem:[#allocation81_spill] sm:$0xff] %v7546_v36  ;;  %v5213_v43 = vld [vmem:[%s6816_s7 + $0x288] sm:$0xf0] }
 0x28e   : > { %2331 = vmatmul.bf16.gmra.mxu3 %v5600_v46  ;;  %v2069_v16 = vpop.f32.mrf.mxu2 }
 0x290   : > { %v1113_v31 = vpop.f32.mrf.mxu0 }
 0x291   : > { %v2292_v54 = vpop.f32.mrf.mxu3  ;;  %v1336_v59 = vpop.f32.mrf.mxu1 }
 0x292   : > { %v7550_v34 = vadd.f32 %v2292_v54, %v2069_v16  ;;  %v7552_v5 = vadd.f32 %v1336_v59, %v1113_v31  ;;  %v5208_v16 = vor.u32 %v6393_v50, %v5205_v12  ;;  %v5604_v59 = vor.u32 %v6478_v32, %v5603_v19  ;;  %v5211_v32 = vld [vmem:[%s6816_s7 + $0x280] sm:$0xf] }
 0x294   : > { %8823 = vst [vmem:[#allocation82_spill] sm:$0xff] %v7550_v34 }
 0x295   : > { %8824 = vst [vmem:[#allocation83_spill] sm:$0xff] %v7552_v5 }
 0x296   : > { %v2071_v46 = vpop.f32.mrf.mxu2 }
 0x298   : > { %v1116_v57 = vpop.f32.mrf.mxu0 }
 0x299   : > { %v2294_v24 = vpop.f32.mrf.mxu3  ;;  %v1339_v31 = vpop.f32.mrf.mxu1 }
 0x29a   : > { %v7564_v54 = vadd.f32 %v2294_v24, %v2071_v46  ;;  %v7566_v34 = vadd.f32 %v1339_v31, %v1116_v57  ;;  %v5611_v46 = vld [vmem:[%s6824_s10 + $0x280] sm:$0xf]  ;;  %v6479_v31 = vld [vmem:[%s6824_s10 + $0x284] sm:$0xf] }
 0x29b   : > { %1155 = vmatmul.bf16.gmra.mxu0 %v5204_v41  ;;  %2113 = vmatmul.bf16.gmra.mxu2 %v5604_v59  ;;  %v6395_v41 = vld [vmem:[%s6816_s7 + $0x284] sm:$0xf]  ;;  %v5613_v59 = vld [vmem:[%s6824_s10 + $0x288] sm:$0xf0] }
 0x29c   : > { %8825 = vst [vmem:[#allocation84_spill] sm:$0xff] %v7564_v54  ;;  %1378 = vmatmul.bf16.gmra.mxu1 %v5208_v16  ;;  %v6480_v16 = vld [vmem:[%s6824_s10 + $0x284] sm:$0xf0]  ;;  %v5212_v54 = vor.u32 %v6396_v26, %v5211_v32  ;;  %v5616_v19 = vor.u32 %v6479_v31, %v5613_v59  ;;  %v6398_v31 = vld [vmem:[%s6816_s7 + $0x294] sm:$0xf0] }
 0x29d   : > { %8826 = vst [vmem:[#allocation85_spill] sm:$0xff] %v7566_v34  ;;  %v5221_v59 = vld [vmem:[%s6816_s7 + $0x298] sm:$0xf0] }
 0x29e   : > { %2336 = vmatmul.bf16.gmra.mxu3 %v5608_v63  ;;  %v2074_v24 = vpop.f32.mrf.mxu2 }
 0x2a0   : > { %v1118_v50 = vpop.f32.mrf.mxu0 }
 0x2a1   : > { %v2297_v7 = vpop.f32.mrf.mxu3  ;;  %v1341_v12 = vpop.f32.mrf.mxu1 }
 0x2a2   : > { %v7570_v39 = vadd.f32 %v2297_v7, %v2074_v24  ;;  %v7572_v57 = vadd.f32 %v1341_v12, %v1118_v50  ;;  %v5216_v24 = vor.u32 %v6395_v41, %v5213_v43  ;;  %v5612_v12 = vor.u32 %v6480_v16, %v5611_v46  ;;  %v5219_v16 = vld [vmem:[%s6816_s7 + $0x290] sm:$0xf] }
 0x2a4   : > { %8827 = vst [vmem:[#allocation86_spill] sm:$0xff] %v7570_v39 }
 0x2a5   : > { %8828 = vst [vmem:[#allocation87_spill] sm:$0xff] %v7572_v57 }
 0x2a6   : > { %v2076_v63 = vpop.f32.mrf.mxu2 }
 0x2a8   : > { %v1121_v5 = vpop.f32.mrf.mxu0 }
 0x2a9   : > { %v2299_v36 = vpop.f32.mrf.mxu3  ;;  %v1344_v50 = vpop.f32.mrf.mxu1 }
 0x2aa   : > { %v7584_v7 = vadd.f32 %v2299_v36, %v2076_v63  ;;  %v7586_v39 = vadd.f32 %v1344_v50, %v1121_v5  ;;  %v5619_v63 = vld [vmem:[%s6824_s10 + $0x290] sm:$0xf]  ;;  %v6481_v50 = vld [vmem:[%s6824_s10 + $0x294] sm:$0xf] }
 0x2ab   : > { %1160 = vmatmul.bf16.gmra.mxu0 %v5212_v54  ;;  %2118 = vmatmul.bf16.gmra.mxu2 %v5612_v12  ;;  %v6397_v54 = vld [vmem:[%s6816_s7 + $0x294] sm:$0xf]  ;;  %v5621_v12 = vld [vmem:[%s6824_s10 + $0x298] sm:$0xf0] }
 0x2ac   : > { %8829 = vst [vmem:[#allocation88_spill] sm:$0xff] %v7584_v7  ;;  %1383 = vmatmul.bf16.gmra.mxu1 %v5216_v24  ;;  %v6482_v24 = vld [vmem:[%s6824_s10 + $0x294] sm:$0xf0]  ;;  %v5220_v7 = vor.u32 %v6398_v31, %v5219_v16  ;;  %v5624_v46 = vor.u32 %v6481_v50, %v5621_v12 }
 0x2ad   : > { %8830 = vst [vmem:[#allocation89_spill] sm:$0xff] %v7586_v39  ;;  %v5620_v57 = vor.u32 %v6482_v24, %v5619_v63  ;;  %v1482_v63 = vld [vmem:[%s6824_s10 + $0x2a0] sm:$0x33] }
 0x2ae   : > { %2341 = vmatmul.bf16.gmra.mxu3 %v5616_v19  ;;  %v2079_v36 = vpop.f32.mrf.mxu2 }
 0x2b0   : > { %v1123_v41 = vpop.f32.mrf.mxu0 }
 0x2b1   : > { %v2302_v32 = vpop.f32.mrf.mxu3  ;;  %v1346_v43 = vpop.f32.mrf.mxu1 }
 0x2b2   : > { %v7590_v26 = vadd.f32 %v2302_v32, %v2079_v36  ;;  %v7592_v5 = vadd.f32 %v1346_v43, %v1123_v41  ;;  %v5224_v36 = vor.u32 %v6397_v54, %v5221_v59  ;;  %v428_v59 = vld [vmem:[%s6816_s7 + $0x2a0] sm:$0x33] }
 0x2b3   : > { %v682_v50 = vunpack.c.l.b16 %v428_v59  ;;  %v683_v12 = vunpack.c.h.b16 %v428_v59 }
 0x2b4   : > { %8831 = vst [vmem:[#allocation90_spill] sm:$0xff] %v7590_v26 }
 0x2b5   : > { %8832 = vst [vmem:[#allocation91_spill] sm:$0xff] %v7592_v5 }
 0x2b6   : > { %v2081_v19 = vpop.f32.mrf.mxu2 }
 0x2b8   : > { %v1126_v41 = vpop.f32.mrf.mxu0 }
 0x2b9   : > { %v2304_v34 = vpop.f32.mrf.mxu3  ;;  %v1349_v43 = vpop.f32.mrf.mxu1 }
 0x2ba   : > { %v7604_v32 = vadd.f32 %v2304_v34, %v2081_v19  ;;  %v7606_v26 = vadd.f32 %v1349_v43, %v1126_v41  ;;  %v1736_v41 = vunpack.c.l.b16 %v1482_v63  ;;  %v769_v43 = vpack.c.b16 %v683_v12, %v683_v12 }
 0x2bb   : > { %1165 = vmatmul.bf16.gmra.mxu0 %v5220_v7  ;;  %2123 = vmatmul.bf16.gmra.mxu2 %v5620_v57  ;;  %v1737_v7 = vunpack.c.h.b16 %v1482_v63 }
 0x2bc   : > { %8833 = vst [vmem:[#allocation92_spill] sm:$0xff] %v7604_v32  ;;  %1388 = vmatmul.bf16.gmra.mxu1 %v5224_v36 }
 0x2bd   : > { %8834 = vst [vmem:[#allocation93_spill] sm:$0xff] %v7606_v26 }
 0x2be   : > { %2346 = vmatmul.bf16.gmra.mxu3 %v5624_v46  ;;  %v2084_v3 = vpop.f32.mrf.mxu2  ;;  %v768_v46 = vpack.c.b16 %v682_v50, %v682_v50 }
 0x2c0   : > { %v1128_v34 = vpop.f32.mrf.mxu0 }
 0x2c1   : > { %v2307_v16 = vpop.f32.mrf.mxu3  ;;  %v1351_v54 = vpop.f32.mrf.mxu1 }
 0x2c2   : > { %v7610_v31 = vadd.f32 %v2307_v16, %v2084_v3  ;;  %v7613_v19 = vadd.f32 %v1351_v54, %v1128_v34  ;;  %v1822_v34 = vpack.c.b16 %v1736_v41, %v1736_v41  ;;  %v1823_v54 = vpack.c.b16 %v1737_v7, %v1737_v7 }
 0x2c4   : > { %8835 = vst [vmem:[#allocation94_spill] sm:$0xff] %v7610_v31 }
 0x2c5   : > { %8836 = vst [vmem:[#allocation95_spill] sm:$0xff] %v7613_v19 }
 0x2c6   : > { %v2086_v36 = vpop.f32.mrf.mxu2 }
 0x2c8   : > { %v1131_v3 = vpop.f32.mrf.mxu0 }
 0x2c9   : > { %v2309_v57 = vpop.f32.mrf.mxu3  ;;  %v1354_v16 = vpop.f32.mrf.mxu1 }
 0x2ca   : > { %v7618_v39 = vadd.f32 %v2309_v57, %v2086_v36  ;;  %v7620_v32 = vadd.f32 %v1354_v16, %v1131_v3  ;;  %v5627_v57 = vld [vmem:[%s7630_s17] sm:$0xf]  ;;  %v5629_v3 = vld [vmem:[%s7630_s17 + $0x8] sm:$0xf0] }
 0x2cb   : > { %1170 = vmatmul.bf16.gmra.mxu0 %v768_v46  ;;  %2128 = vmatmul.bf16.gmra.mxu2 %v1822_v34  ;;  %v6484_v46 = vld [vmem:[%s7630_s17 + $0x4] sm:$0xf0]  ;;  %v5963_v16 = vld [vmem:[%s7638_s20] sm:$0xf] }
 0x2cc   : > { %8837 = vst [vmem:[#allocation96_spill] sm:$0xff] %v7618_v39  ;;  %1393 = vmatmul.bf16.gmra.mxu1 %v769_v43  ;;  %v6483_v43 = vld [vmem:[%s7630_s17 + $0x4] sm:$0xf]  ;;  %v6568_v34 = vld [vmem:[%s7638_s20 + $0x4] sm:$0xf0] }
 0x2cd   : > { %8838 = vst [vmem:[#allocation97_spill] sm:$0xff] %v7620_v32  ;;  %v5632_v24 = vor.u32 %v6483_v43, %v5629_v3  ;;  %v5964_v26 = vor.u32 %v6568_v34, %v5963_v16  ;;  %v5635_v34 = vld [vmem:[%s7630_s17 + $0x10] sm:$0xf] }
 0x2ce   : > { %2351 = vmatmul.bf16.gmra.mxu3 %v1823_v54  ;;  %v2089_v59 = vpop.f32.mrf.mxu2  ;;  %v6567_v54 = vld [vmem:[%s7638_s20 + $0x4] sm:$0xf] }
 0x2d0   : > { %v1133_v12 = vpop.f32.mrf.mxu0 }
 0x2d1   : > { %v2312_v63 = vpop.f32.mrf.mxu3  ;;  %v1356_v36 = vpop.f32.mrf.mxu1 }
 0x2d2   : > { %v7624_v50 = vadd.f32 %v2312_v63, %v2089_v59  ;;  %v7632_v41 = vadd.f32 %v1356_v36, %v1133_v12  ;;  %v5965_v59 = vld [vmem:[%s7638_s20 + $0x8] sm:$0xf0]  ;;  %v5628_v36 = vor.u32 %v6484_v46, %v5627_v57 }
 0x2d3   : > { %v5968_v7 = vor.u32 %v6567_v54, %v5965_v59  ;;  %v6486_v54 = vld [vmem:[%s7630_s17 + $0x14] sm:$0xf0]  ;;  %v6485_v59 = vld [vmem:[%s7630_s17 + $0x14] sm:$0xf] }
 0x2d4   : > { %8839 = vst [vmem:[#allocation98_spill] sm:$0xff] %v7624_v50 }
 0x2d5   : > { %8840 = vst [vmem:[#allocation99_spill] sm:$0xff] %v7632_v41 }
 0x2d6   : > { %v2091_v63 = vpop.f32.mrf.mxu2 }
 0x2d8   : > { %v1136_v19 = vpop.f32.mrf.mxu0 }
 0x2d9   : > { %v2314_v12 = vpop.f32.mrf.mxu3  ;;  %v1359_v31 = vpop.f32.mrf.mxu1 }
 0x2da   : > { %v7650_v39 = vadd.f32 %v2314_v12, %v2091_v63  ;;  %v7652_v50 = vadd.f32 %v1359_v31, %v1136_v19  ;;  %v5637_v63 = vld [vmem:[%s7630_s17 + $0x18] sm:$0xf0]  ;;  %v6570_v12 = vld [vmem:[%s7638_s20 + $0x14] sm:$0xf0] }
 0x2db   : > { %2876 = vmatmul.bf16.vlgmr.msrb.gmra.mxu0 %v5628_v36  ;;  %3834 = vmatmul.bf16.vlgmr.msrb.gmra.mxu2 %v5964_v26  ;;  %v6569_v26 = vld [vmem:[%s7638_s20 + $0x14] sm:$0xf]  ;;  %v5973_v36 = vld [vmem:[%s7638_s20 + $0x18] sm:$0xf0] }
 0x2dc   : > { %8841 = vst [vmem:[#allocation100_spill] sm:$0xff] %v7650_v39  ;;  %3099 = vmatmul.bf16.vlgmr.msrb.gmra.mxu1 %v5632_v24  ;;  %v5971_v24 = vld [vmem:[%s7638_s20 + $0x10] sm:$0xf]  ;;  %v5636_v39 = vor.u32 %v6486_v54, %v5635_v34  ;;  %v5976_v19 = vor.u32 %v6569_v26, %v5973_v36  ;;  %v6488_v26 = vld [vmem:[%s7630_s17 + $0x24] sm:$0xf0] }
 0x2dd   : > { %8842 = vst [vmem:[#allocation101_spill] sm:$0xff] %v7652_v50  ;;  %v5645_v36 = vld [vmem:[%s7630_s17 + $0x28] sm:$0xf0] }
 0x2de   : > { %4057 = vmatmul.bf16.vlgmr.msrb.gmra.mxu3 %v5968_v7  ;;  %v2094_v57 = vpop.f32.mrf.mxu2 }
 0x2e0   : > { %v1138_v3 = vpop.f32.mrf.mxu0 }
 0x2e1   : > { %v2317_v46 = vpop.f32.mrf.mxu3  ;;  %v1361_v16 = vpop.f32.mrf.mxu1 }
 0x2e2   : > { %v7656_v43 = vadd.f32 %v2317_v46, %v2094_v57  ;;  %v7658_v31 = vadd.f32 %v1361_v16, %v1138_v3  ;;  %v5640_v57 = vor.u32 %v6485_v59, %v5637_v63  ;;  %v5972_v16 = vor.u32 %v6570_v12, %v5971_v24  ;;  %v5643_v12 = vld [vmem:[%s7630_s17 + $0x20] sm:$0xf] }
 0x2e4   : > { %8843 = vst [vmem:[#allocation102_spill] sm:$0xff] %v7656_v43 }
 0x2e5   : > { %8844 = vst [vmem:[#allocation103_spill] sm:$0xff] %v7658_v31 }
 0x2e6   : > { %v2096_v7 = vpop.f32.mrf.mxu2 }
 0x2e8   : > { %v1141_v41 = vpop.f32.mrf.mxu0 }
 0x2e9   : > { %v2319_v32 = vpop.f32.mrf.mxu3  ;;  %v1364_v3 = vpop.f32.mrf.mxu1 }
 0x2ea   : > { %v7670_v46 = vadd.f32 %v2319_v32, %v2096_v7  ;;  %v7672_v43 = vadd.f32 %v1364_v3, %v1141_v41  ;;  %v5979_v7 = vld [vmem:[%s7638_s20 + $0x20] sm:$0xf]  ;;  %v6571_v3 = vld [vmem:[%s7638_s20 + $0x24] sm:$0xf] }
 0x2eb   : > { %2881 = vmatmul.bf16.gmra.mxu0 %v5636_v39  ;;  %3839 = vmatmul.bf16.gmra.mxu2 %v5972_v16  ;;  %v6487_v39 = vld [vmem:[%s7630_s17 + $0x24] sm:$0xf]  ;;  %v5981_v16 = vld [vmem:[%s7638_s20 + $0x28] sm:$0xf0] }
 0x2ec   : > { %8845 = vst [vmem:[#allocation104_spill] sm:$0xff] %v7670_v46  ;;  %3104 = vmatmul.bf16.gmra.mxu1 %v5640_v57  ;;  %v6572_v57 = vld [vmem:[%s7638_s20 + $0x24] sm:$0xf0]  ;;  %v5644_v46 = vor.u32 %v6488_v26, %v5643_v12  ;;  %v5984_v24 = vor.u32 %v6571_v3, %v5981_v16  ;;  %v6490_v3 = vld [vmem:[%s7630_s17 + $0x34] sm:$0xf0] }
 0x2ed   : > { %8846 = vst [vmem:[#allocation105_spill] sm:$0xff] %v7672_v43  ;;  %v5653_v16 = vld [vmem:[%s7630_s17 + $0x38] sm:$0xf0] }
 0x2ee   : > { %4062 = vmatmul.bf16.gmra.mxu3 %v5976_v19  ;;  %v2099_v32 = vpop.f32.mrf.mxu2 }
 0x2f0   : > { %v1143_v59 = vpop.f32.mrf.mxu0 }
 0x2f1   : > { %v2322_v34 = vpop.f32.mrf.mxu3  ;;  %v1366_v63 = vpop.f32.mrf.mxu1 }
 0x2f2   : > { %v7676_v54 = vadd.f32 %v2322_v34, %v2099_v32  ;;  %v7678_v41 = vadd.f32 %v1366_v63, %v1143_v59  ;;  %v5648_v32 = vor.u32 %v6487_v39, %v5645_v36  ;;  %v5980_v63 = vor.u32 %v6572_v57, %v5979_v7  ;;  %v5651_v57 = vld [vmem:[%s7630_s17 + $0x30] sm:$0xf] }
 0x2f4   : > { %8847 = vst [vmem:[#allocation106_spill] sm:$0xff] %v7676_v54 }
 0x2f5   : > { %8848 = vst [vmem:[#allocation107_spill] sm:$0xff] %v7678_v41 }
 0x2f6   : > { %v2101_v19 = vpop.f32.mrf.mxu2 }
 0x2f8   : > { %v1146_v31 = vpop.f32.mrf.mxu0 }
 0x2f9   : > { %v2324_v50 = vpop.f32.mrf.mxu3  ;;  %v1369_v59 = vpop.f32.mrf.mxu1 }
 0x2fa   : > { %v7690_v34 = vadd.f32 %v2324_v50, %v2101_v19  ;;  %v7692_v54 = vadd.f32 %v1369_v59, %v1146_v31  ;;  %v5987_v19 = vld [vmem:[%s7638_s20 + $0x30] sm:$0xf]  ;;  %v6573_v59 = vld [vmem:[%s7638_s20 + $0x34] sm:$0xf] }
 0x2fb   : > { %2886 = vmatmul.bf16.gmra.mxu0 %v5644_v46  ;;  %3844 = vmatmul.bf16.gmra.mxu2 %v5980_v63  ;;  %v6489_v46 = vld [vmem:[%s7630_s17 + $0x34] sm:$0xf]  ;;  %v5989_v63 = vld [vmem:[%s7638_s20 + $0x38] sm:$0xf0] }
 0x2fc   : > { %8849 = vst [vmem:[#allocation108_spill] sm:$0xff] %v7690_v34  ;;  %3109 = vmatmul.bf16.gmra.mxu1 %v5648_v32  ;;  %v6574_v32 = vld [vmem:[%s7638_s20 + $0x34] sm:$0xf0]  ;;  %v5652_v34 = vor.u32 %v6490_v3, %v5651_v57  ;;  %v5992_v7 = vor.u32 %v6573_v59, %v5989_v63  ;;  %v6492_v59 = vld [vmem:[%s7630_s17 + $0x44] sm:$0xf0] }
 0x2fd   : > { %8850 = vst [vmem:[#allocation109_spill] sm:$0xff] %v7692_v54  ;;  %v5661_v63 = vld [vmem:[%s7630_s17 + $0x48] sm:$0xf0] }
 0x2fe   : > { %4067 = vmatmul.bf16.gmra.mxu3 %v5984_v24  ;;  %v2104_v50 = vpop.f32.mrf.mxu2 }
 0x300   : > { %v1148_v39 = vpop.f32.mrf.mxu0 }
 0x301   : > { %v2327_v12 = vpop.f32.mrf.mxu3  ;;  %v1371_v36 = vpop.f32.mrf.mxu1 }
 0x302   : > { %v7696_v26 = vadd.f32 %v2327_v12, %v2104_v50  ;;  %v7698_v31 = vadd.f32 %v1371_v36, %v1148_v39  ;;  %v5656_v50 = vor.u32 %v6489_v46, %v5653_v16  ;;  %v5988_v36 = vor.u32 %v6574_v32, %v5987_v19  ;;  %v5659_v32 = vld [vmem:[%s7630_s17 + $0x40] sm:$0xf] }
 0x304   : > { %8851 = vst [vmem:[#allocation110_spill] sm:$0xff] %v7696_v26 }
 0x305   : > { %8852 = vst [vmem:[#allocation111_spill] sm:$0xff] %v7698_v31 }
 0x306   : > { %v2106_v24 = vpop.f32.mrf.mxu2 }
 0x308   : > { %v1151_v41 = vpop.f32.mrf.mxu0 }
 0x309   : > { %v2329_v43 = vpop.f32.mrf.mxu3  ;;  %v1374_v39 = vpop.f32.mrf.mxu1 }
 0x30a   : > { %v7710_v12 = vadd.f32 %v2329_v43, %v2106_v24  ;;  %v7712_v26 = vadd.f32 %v1374_v39, %v1151_v41  ;;  %v5995_v24 = vld [vmem:[%s7638_s20 + $0x40] sm:$0xf]  ;;  %v6575_v39 = vld [vmem:[%s7638_s20 + $0x44] sm:$0xf] }
 0x30b   : > { %2891 = vmatmul.bf16.gmra.mxu0 %v5652_v34  ;;  %3849 = vmatmul.bf16.gmra.mxu2 %v5988_v36  ;;  %v6491_v34 = vld [vmem:[%s7630_s17 + $0x44] sm:$0xf]  ;;  %v5997_v36 = vld [vmem:[%s7638_s20 + $0x48] sm:$0xf0] }
 0x30c   : > { %8853 = vst [vmem:[#allocation112_spill] sm:$0xff] %v7710_v12  ;;  %3114 = vmatmul.bf16.gmra.mxu1 %v5656_v50  ;;  %v6576_v50 = vld [vmem:[%s7638_s20 + $0x44] sm:$0xf0]  ;;  %v5660_v12 = vor.u32 %v6492_v59, %v5659_v32  ;;  %v6000_v19 = vor.u32 %v6575_v39, %v5997_v36  ;;  %v6494_v39 = vld [vmem:[%s7630_s17 + $0x54] sm:$0xf0] }
 0x30d   : > { %8854 = vst [vmem:[#allocation113_spill] sm:$0xff] %v7712_v26  ;;  %v5669_v36 = vld [vmem:[%s7630_s17 + $0x58] sm:$0xf0] }
 0x30e   : > { %4072 = vmatmul.bf16.gmra.mxu3 %v5992_v7  ;;  %v2109_v43 = vpop.f32.mrf.mxu2 }
 0x310   : > { %v1153_v46 = vpop.f32.mrf.mxu0 }
 0x311   : > { %v2332_v57 = vpop.f32.mrf.mxu3  ;;  %v1376_v16 = vpop.f32.mrf.mxu1 }
 0x312   : > { %v7716_v3 = vadd.f32 %v2332_v57, %v2109_v43  ;;  %v7718_v41 = vadd.f32 %v1376_v16, %v1153_v46  ;;  %v5664_v43 = vor.u32 %v6491_v34, %v5661_v63  ;;  %v5996_v16 = vor.u32 %v6576_v50, %v5995_v24  ;;  %v5667_v50 = vld [vmem:[%s7630_s17 + $0x50] sm:$0xf] }
 0x314   : > { %8855 = vst [vmem:[#allocation114_spill] sm:$0xff] %v7716_v3 }
 0x315   : > { %8856 = vst [vmem:[#allocation115_spill] sm:$0xff] %v7718_v41 }
 0x316   : > { %v2111_v7 = vpop.f32.mrf.mxu2 }
 0x318   : > { %v1156_v31 = vpop.f32.mrf.mxu0 }
 0x319   : > { %v2334_v54 = vpop.f32.mrf.mxu3  ;;  %v1379_v46 = vpop.f32.mrf.mxu1 }
 0x31a   : > { %v7730_v57 = vadd.f32 %v2334_v54, %v2111_v7  ;;  %v7732_v3 = vadd.f32 %v1379_v46, %v1156_v31  ;;  %v6003_v7 = vld [vmem:[%s7638_s20 + $0x50] sm:$0xf]  ;;  %v6577_v46 = vld [vmem:[%s7638_s20 + $0x54] sm:$0xf] }
 0x31b   : > { %2896 = vmatmul.bf16.gmra.mxu0 %v5660_v12  ;;  %3854 = vmatmul.bf16.gmra.mxu2 %v5996_v16  ;;  %v6493_v12 = vld [vmem:[%s7630_s17 + $0x54] sm:$0xf]  ;;  %v6005_v16 = vld [vmem:[%s7638_s20 + $0x58] sm:$0xf0] }
 0x31c   : > { %8857 = vst [vmem:[#allocation116_spill] sm:$0xff] %v7730_v57  ;;  %3119 = vmatmul.bf16.gmra.mxu1 %v5664_v43  ;;  %v6578_v43 = vld [vmem:[%s7638_s20 + $0x54] sm:$0xf0]  ;;  %v5668_v57 = vor.u32 %v6494_v39, %v5667_v50  ;;  %v6008_v24 = vor.u32 %v6577_v46, %v6005_v16  ;;  %v6496_v46 = vld [vmem:[%s7630_s17 + $0x64] sm:$0xf0] }
 0x31d   : > { %8858 = vst [vmem:[#allocation117_spill] sm:$0xff] %v7732_v3  ;;  %v5677_v16 = vld [vmem:[%s7630_s17 + $0x68] sm:$0xf0] }
 0x31e   : > { %4077 = vmatmul.bf16.gmra.mxu3 %v6000_v19  ;;  %v2114_v54 = vpop.f32.mrf.mxu2 }
 0x320   : > { %v1158_v34 = vpop.f32.mrf.mxu0 }
 0x321   : > { %v2337_v32 = vpop.f32.mrf.mxu3  ;;  %v1381_v63 = vpop.f32.mrf.mxu1 }
 0x322   : > { %v7736_v59 = vadd.f32 %v2337_v32, %v2114_v54  ;;  %v7738_v31 = vadd.f32 %v1381_v63, %v1158_v34  ;;  %v5672_v54 = vor.u32 %v6493_v12, %v5669_v36  ;;  %v6004_v63 = vor.u32 %v6578_v43, %v6003_v7  ;;  %v5675_v43 = vld [vmem:[%s7630_s17 + $0x60] sm:$0xf] }
 0x324   : > { %8859 = vst [vmem:[#allocation118_spill] sm:$0xff] %v7736_v59 }
 0x325   : > { %8860 = vst [vmem:[#allocation119_spill] sm:$0xff] %v7738_v31 }
 0x326   : > { %v2116_v19 = vpop.f32.mrf.mxu2 }
 0x328   : > { %v1161_v41 = vpop.f32.mrf.mxu0 }
 0x329   : > { %v2339_v26 = vpop.f32.mrf.mxu3  ;;  %v1384_v34 = vpop.f32.mrf.mxu1 }
 0x32a   : > { %v7750_v32 = vadd.f32 %v2339_v26, %v2116_v19  ;;  %v7752_v59 = vadd.f32 %v1384_v34, %v1161_v41  ;;  %v6011_v19 = vld [vmem:[%s7638_s20 + $0x60] sm:$0xf]  ;;  %v6579_v34 = vld [vmem:[%s7638_s20 + $0x64] sm:$0xf] }
 0x32b   : > { %2901 = vmatmul.bf16.gmra.mxu0 %v5668_v57  ;;  %3859 = vmatmul.bf16.gmra.mxu2 %v6004_v63  ;;  %v6495_v57 = vld [vmem:[%s7630_s17 + $0x64] sm:$0xf]  ;;  %v6013_v63 = vld [vmem:[%s7638_s20 + $0x68] sm:$0xf0] }
 0x32c   : > { %8861 = vst [vmem:[#allocation120_spill] sm:$0xff] %v7750_v32  ;;  %3124 = vmatmul.bf16.gmra.mxu1 %v5672_v54  ;;  %v6580_v54 = vld [vmem:[%s7638_s20 + $0x64] sm:$0xf0]  ;;  %v5676_v32 = vor.u32 %v6496_v46, %v5675_v43  ;;  %v6016_v7 = vor.u32 %v6579_v34, %v6013_v63  ;;  %v6498_v34 = vld [vmem:[%s7630_s17 + $0x74] sm:$0xf0] }
 0x32d   : > { %8862 = vst [vmem:[#allocation121_spill] sm:$0xff] %v7752_v59  ;;  %v5685_v63 = vld [vmem:[%s7630_s17 + $0x78] sm:$0xf0] }
 0x32e   : > { %4082 = vmatmul.bf16.gmra.mxu3 %v6008_v24  ;;  %v2119_v26 = vpop.f32.mrf.mxu2 }
 0x330   : > { %v1163_v12 = vpop.f32.mrf.mxu0 }
 0x331   : > { %v2342_v50 = vpop.f32.mrf.mxu3  ;;  %v1386_v36 = vpop.f32.mrf.mxu1 }
 0x332   : > { %v7756_v39 = vadd.f32 %v2342_v50, %v2119_v26  ;;  %v7758_v41 = vadd.f32 %v1386_v36, %v1163_v12  ;;  %v5680_v26 = vor.u32 %v6495_v57, %v5677_v16  ;;  %v6012_v36 = vor.u32 %v6580_v54, %v6011_v19  ;;  %v5683_v54 = vld [vmem:[%s7630_s17 + $0x70] sm:$0xf] }
 0x334   : > { %8863 = vst [vmem:[#allocation122_spill] sm:$0xff] %v7756_v39 }
 0x335   : > { %8864 = vst [vmem:[#allocation123_spill] sm:$0xff] %v7758_v41 }
 0x336   : > { %v2121_v24 = vpop.f32.mrf.mxu2 }
 0x338   : > { %v1166_v31 = vpop.f32.mrf.mxu0 }
 0x339   : > { %v2344_v3 = vpop.f32.mrf.mxu3  ;;  %v1389_v12 = vpop.f32.mrf.mxu1 }
 0x33a   : > { %v7770_v50 = vadd.f32 %v2344_v3, %v2121_v24  ;;  %v7772_v39 = vadd.f32 %v1389_v12, %v1166_v31  ;;  %v6019_v24 = vld [vmem:[%s7638_s20 + $0x70] sm:$0xf]  ;;  %v6581_v12 = vld [vmem:[%s7638_s20 + $0x74] sm:$0xf] }
 0x33b   : > { %2906 = vmatmul.bf16.gmra.mxu0 %v5676_v32  ;;  %3864 = vmatmul.bf16.gmra.mxu2 %v6012_v36  ;;  %v6497_v32 = vld [vmem:[%s7630_s17 + $0x74] sm:$0xf]  ;;  %v6021_v36 = vld [vmem:[%s7638_s20 + $0x78] sm:$0xf0] }
 0x33c   : > { %8865 = vst [vmem:[#allocation124_spill] sm:$0xff] %v7770_v50  ;;  %3129 = vmatmul.bf16.gmra.mxu1 %v5680_v26  ;;  %v6582_v26 = vld [vmem:[%s7638_s20 + $0x74] sm:$0xf0]  ;;  %v5684_v50 = vor.u32 %v6498_v34, %v5683_v54  ;;  %v6024_v19 = vor.u32 %v6581_v12, %v6021_v36  ;;  %v6499_v12 = vld [vmem:[%s7630_s17 + $0x84] sm:$0xf] }
 0x33d   : > { %8866 = vst [vmem:[#allocation125_spill] sm:$0xff] %v7772_v39  ;;  %v5693_v36 = vld [vmem:[%s7630_s17 + $0x88] sm:$0xf0] }
 0x33e   : > { %4087 = vmatmul.bf16.gmra.mxu3 %v6016_v7  ;;  %v2124_v3 = vpop.f32.mrf.mxu2 }
 0x340   : > { %v1168_v57 = vpop.f32.mrf.mxu0 }
 0x341   : > { %v2347_v43 = vpop.f32.mrf.mxu3  ;;  %v1391_v16 = vpop.f32.mrf.mxu1 }
 0x342   : > { %v7776_v46 = vadd.f32 %v2347_v43, %v2124_v3  ;;  %v7778_v31 = vadd.f32 %v1391_v16, %v1168_v57  ;;  %v5688_v3 = vor.u32 %v6497_v32, %v5685_v63  ;;  %v6020_v16 = vor.u32 %v6582_v26, %v6019_v24  ;;  %v5691_v24 = vld [vmem:[%s7630_s17 + $0x80] sm:$0xf]  ;;  %v6500_v26 = vld [vmem:[%s7630_s17 + $0x84] sm:$0xf0] }
 0x344   : > { %8867 = vst [vmem:[#allocation126_spill] sm:$0xff] %v7776_v46 }
 0x345   : > { %8868 = vst [vmem:[#allocation127_spill] sm:$0xff] %v7778_v31 }
 0x346   : > { %v2126_v7 = vpop.f32.mrf.mxu2 }
 0x348   : > { %v1171_v41 = vpop.f32.mrf.mxu0 }
 0x349   : > { %v2349_v59 = vpop.f32.mrf.mxu3  ;;  %v1394_v57 = vpop.f32.mrf.mxu1 }
 0x34a   : > { %v7790_v43 = vadd.f32 %v2349_v59, %v2126_v7  ;;  %v7792_v46 = vadd.f32 %v1394_v57, %v1171_v41  ;;  %v6027_v7 = vld [vmem:[%s7638_s20 + $0x80] sm:$0xf]  ;;  %v6583_v57 = vld [vmem:[%s7638_s20 + $0x84] sm:$0xf] }
 0x34b   : > { %2911 = vmatmul.bf16.gmra.mxu0 %v5684_v50  ;;  %3869 = vmatmul.bf16.gmra.mxu2 %v6020_v16  ;;  %v6584_v50 = vld [vmem:[%s7638_s20 + $0x84] sm:$0xf0] }
 0x34c   : > { %8869 = vst [vmem:[#allocation128_spill] sm:$0xff] %v7790_v43  ;;  %3134 = vmatmul.bf16.gmra.mxu1 %v5688_v3  ;;  %v6029_v3 = vld [vmem:[%s7638_s20 + $0x88] sm:$0xf0]  ;;  %v5696_v43 = vor.u32 %v6499_v12, %v5693_v36 }
 0x34d   : > { %8870 = vst [vmem:[#allocation129_spill] sm:$0xff] %v7792_v46 }
 0x34e   : > { %4092 = vmatmul.bf16.gmra.mxu3 %v6024_v19  ;;  %v2129_v59 = vpop.f32.mrf.mxu2  ;;  %v5692_v19 = vor.u32 %v6500_v26, %v5691_v24 }
 0x350   : > { %v1173_v32 = vpop.f32.mrf.mxu0 }
 0x351   : > { %v2352_v54 = vpop.f32.mrf.mxu3  ;;  %v1396_v63 = vpop.f32.mrf.mxu1  ;;  %v6032_v32 = vor.u32 %v6583_v57, %v6029_v3  ;;  %v6501_v57 = vld [vmem:[%s7630_s17 + $0x94] sm:$0xf]  ;;  %v8872_v3 = vmax.f32 %v6948_v62, %v6950_v1 }
 0x352   : > { %v7796_v34 = vadd.f32 %v2352_v54, %v2129_v59  ;;  %v6028_v54 = vor.u32 %v6584_v50, %v6027_v7  ;;  %v7811_v7 = vld [vmem:[%s8612_s5] ss:$0 sm:$0xff]  ;;  %v6502_v50 = vld [vmem:[%s7630_s17 + $0x94] sm:$0xf0] }
 0x354   : > { %8871 = vst [vmem:[#allocation130_spill] sm:$0xff] %v7796_v34 }
 0x356   : > { %v2131_v39 = vpop.f32.mrf.mxu2 }
 0x358   : > { %v2877_v31 = vpop.f32.mrf.mxu0 }
 0x359   : > { %v2354_v16 = vpop.f32.mrf.mxu3  ;;  %v3100_v59 = vpop.f32.mrf.mxu1 }
 0x35a   : > { %v3101_v63 = vadd.f32 %v3100_v59, %v2877_v31  ;;  %v6035_v59 = vld [vmem:[%s7638_s20 + $0x90] sm:$0xf] }
 0x35b   : > { %2916 = vmatmul.bf16.gmra.mxu0 %v5692_v19  ;;  %3874 = vmatmul.bf16.gmra.mxu2 %v6028_v54  ;;  %v5701_v19 = vld [vmem:[%s7630_s17 + $0x98] sm:$0xf0]  ;;  %v6586_v54 = vld [vmem:[%s7638_s20 + $0x94] sm:$0xf0] }
 0x35c   : > { %3139 = vmatmul.bf16.gmra.mxu1 %v5696_v43  ;;  %v5699_v43 = vld [vmem:[%s7630_s17 + $0x90] sm:$0xf]  ;;  %v5704_v34 = vor.u32 %v6501_v57, %v5701_v19  ;;  %v6036_v62 = vor.u32 %v6586_v54, %v6035_v59  ;;  %v6503_v54 = vld [vmem:[%s7630_s17 + $0xa4] sm:$0xf] }
 0x35d   : > { %v5700_v41 = vor.u32 %v6502_v50, %v5699_v43 }
 0x35e   : > { %4097 = vmatmul.bf16.gmra.mxu3 %v6032_v32  ;;  %v3835_v39 = vpop.f32.mrf.mxu2  ;;  %v6585_v32 = vld [vmem:[%s7638_s20 + $0x94] sm:$0xf] }
 0x360   : > { %v2879_v12 = vpop.f32.mrf.mxu0 }
 0x361   : > { %v4058_v24 = vpop.f32.mrf.mxu3  ;;  %v3102_v36 = vpop.f32.mrf.mxu1 }
 0x362   : > { %v4059_v26 = vadd.f32 %v4058_v24, %v3835_v39  ;;  %v6037_v39 = vld [vmem:[%s7638_s20 + $0x98] sm:$0xf0] }
 0x363   : > { %v6040_v61 = vor.u32 %v6585_v32, %v6037_v39  ;;  %v5709_v39 = vld [vmem:[%s7630_s17 + $0xa8] sm:$0xf0] }
 0x364   : > { %v4357_v16 = vmax.f32 %v3101_v63, %v4059_v26 }
 0x366   : > { %v4442_v31 = vmax.f32 %v8872_v3, %v4357_v16  ;;  %v3837_v63 = vpop.f32.mrf.mxu2  ;;  %v3103_v16 = vadd.f32 %v3102_v36, %v2879_v12 }
 0x368   : > { %v4531_v24 = vadd.f32 %v7811_v7, %v4442_v31  ;;  %v2882_v46 = vpop.f32.mrf.mxu0 }
 0x369   : > { %v4060_v26 = vpop.f32.mrf.mxu3  ;;  %v3105_v5 = vpop.f32.mrf.mxu1 }
 0x36a   : > { %v4616_v1 = vmax.f32 %v4531_v24, 0.0  ;;  %v4061_v3 = vadd.f32 %v4060_v26, %v3837_v63  ;;  %v3106_v36 = vadd.f32 %v3105_v5, %v2882_v46  ;;  %v6043_v5 = vld [vmem:[%s7638_s20 + $0xa0] sm:$0xf]  ;;  %v6588_v46 = vld [vmem:[%s7638_s20 + $0xa4] sm:$0xf0] }
 0x36b   : > { %2921 = vmatmul.bf16.gmra.mxu0 %v5700_v41  ;;  %3879 = vmatmul.bf16.gmra.mxu2 %v6036_v62  ;;  %v6587_v24 = vld [vmem:[%s7638_s20 + $0xa4] sm:$0xf]  ;;  %v6045_v63 = vld [vmem:[%s7638_s20 + $0xa8] sm:$0xf0] }
 0x36c   : > { %4702 = vst.msk [vmem:[%s7829_s28] sm:$0xff] %vm4701_vm0, %v4616_v1  ;;  %v4358_v31 = vmax.f32 %v3103_v16, %v4061_v3  ;;  %3144 = vmatmul.bf16.gmra.mxu1 %v5704_v34  ;;  %v5712_v3 = vor.u32 %v6503_v54, %v5709_v39  ;;  %v6506_v39 = vld [vmem:[%s7630_s17 + $0xb4] sm:$0xf0] }
 0x36e   : > { %v4443_v43 = vmax.f32 %v8873_v8, %v4358_v31  ;;  %4102 = vmatmul.bf16.gmra.mxu3 %v6040_v61  ;;  %v3840_v50 = vpop.f32.mrf.mxu2  ;;  %v6504_v8 = vld [vmem:[%s7630_s17 + $0xa4] sm:$0xf0]  ;;  %v8874_v61 = vmax.f32 %v6966_v23, %v6970_v27  ;;  %v6044_v31 = vor.u32 %v6588_v46, %v6043_v5  ;;  %v6048_v23 = vor.u32 %v6587_v24, %v6045_v63  ;;  %v6505_v5 = vld [vmem:[%s7630_s17 + $0xb4] sm:$0xf]  ;;  %v5717_v63 = vld [vmem:[%s7630_s17 + $0xb8] sm:$0xf0] }
 0x36f   : > { %v5708_v16 = vor.u32 %v6504_v8, %v5707_v18  ;;  %v8876_v46 = vmax.f32 %v6986_v49, %v6990_v53 }
 0x370   : > { %v4532_v12 = vadd.f32 %v7811_v7, %v4443_v43  ;;  %v2884_v34 = vpop.f32.mrf.mxu0 }
 0x371   : > { %v4063_v57 = vpop.f32.mrf.mxu3  ;;  %v3107_v59 = vpop.f32.mrf.mxu1 }
 0x372   : > { %v4617_v41 = vmax.f32 %v4532_v12, 0.0  ;;  %v4064_v19 = vadd.f32 %v4063_v57, %v3840_v50  ;;  %v3108_v12 = vadd.f32 %v3107_v59, %v2884_v34 }
 0x374   : > { %4703 = vst.msk [vmem:[%s7829_s28 + $0x8] sm:$0xff] %vm4701_vm0, %v4617_v41  ;;  %v4359_v4 = vmax.f32 %v3106_v36, %v4064_v19  ;;  %v8875_v41 = vmax.f32 %v6972_v30, %v6984_v44  ;;  %v5715_v44 = vld [vmem:[%s7630_s17 + $0xb0] sm:$0xf] }
 0x376   : > { %v4444_v32 = vmax.f32 %v8874_v61, %v4359_v4  ;;  %v3842_v62 = vpop.f32.mrf.mxu2 }
 0x378   : > { %v4533_v26 = vadd.f32 %v7811_v7, %v4444_v32  ;;  %v2887_v50 = vpop.f32.mrf.mxu0 }
 0x379   : > { %v4065_v1 = vpop.f32.mrf.mxu3  ;;  %v3110_v57 = vpop.f32.mrf.mxu1 }
 0x37a   : > { %v4618_v43 = vmax.f32 %v4533_v26, 0.0  ;;  %v4066_v36 = vadd.f32 %v4065_v1, %v3842_v62  ;;  %v3111_v59 = vadd.f32 %v3110_v57, %v2887_v50  ;;  %v6051_v26 = vld [vmem:[%s7638_s20 + $0xb0] sm:$0xf]  ;;  %v6590_v62 = vld [vmem:[%s7638_s20 + $0xb4] sm:$0xf0] }
 0x37b   : > { %2926 = vmatmul.bf16.gmra.mxu0 %v5708_v16  ;;  %3884 = vmatmul.bf16.gmra.mxu2 %v6044_v31  ;;  %v6589_v1 = vld [vmem:[%s7638_s20 + $0xb4] sm:$0xf]  ;;  %v6053_v16 = vld [vmem:[%s7638_s20 + $0xb8] sm:$0xf0]  ;;  %v6052_v50 = vor.u32 %v6590_v62, %v6051_v26  ;;  %v6059_v26 = vld [vmem:[%s7638_s20 + $0xc0] sm:$0xf] }
 0x37c   : > { %4704 = vst.msk [vmem:[%s7829_s28 + $0x10] sm:$0xff] %vm4701_vm0, %v4618_v43  ;;  %v4360_v27 = vmax.f32 %v3108_v12, %v4066_v36  ;;  %3149 = vmatmul.bf16.gmra.mxu1 %v5712_v3  ;;  %v5716_v12 = vor.u32 %v6506_v39, %v5715_v44  ;;  %v5720_v36 = vor.u32 %v6505_v5, %v5717_v63  ;;  %v6508_v39 = vld [vmem:[%s7630_s17 + $0xc4] sm:$0xf0]  ;;  %v6507_v5 = vld [vmem:[%s7630_s17 + $0xc4] sm:$0xf] }
 0x37d   : > { %v6056_v49 = vor.u32 %v6589_v1, %v6053_v16  ;;  %v5725_v63 = vld [vmem:[%s7630_s17 + $0xc8] sm:$0xf0]  ;;  %v6592_v62 = vld [vmem:[%s7638_s20 + $0xc4] sm:$0xf0]  ;;  %v6591_v1 = vld [vmem:[%s7638_s20 + $0xc4] sm:$0xf] }
 0x37e   : > { %v4445_v19 = vmax.f32 %v8875_v41, %v4360_v27  ;;  %4107 = vmatmul.bf16.gmra.mxu3 %v6048_v23  ;;  %v3845_v4 = vpop.f32.mrf.mxu2  ;;  %v6061_v16 = vld [vmem:[%s7638_s20 + $0xc8] sm:$0xf0] }
 0x380   : > { %v4534_v34 = vadd.f32 %v7811_v7, %v4445_v19  ;;  %v2889_v61 = vpop.f32.mrf.mxu0 }
 0x381   : > { %v4068_v18 = vpop.f32.mrf.mxu3  ;;  %v3112_v32 = vpop.f32.mrf.mxu1 }
 0x382   : > { %v4619_v8 = vmax.f32 %v4534_v34, 0.0  ;;  %v4069_v54 = vadd.f32 %v4068_v18, %v3845_v4  ;;  %v3113_v23 = vadd.f32 %v3112_v32, %v2889_v61  ;;  %v8877_v34 = vmax.f32 %v6992_v56, %v7004_v10  ;;  %v5723_v10 = vld [vmem:[%s7630_s17 + $0xc0] sm:$0xf] }
 0x384   : > { %4705 = vst.msk [vmem:[%s7829_s28 + $0x18] sm:$0xff] %vm4701_vm0, %v4619_v8  ;;  %v4361_v30 = vmax.f32 %v3111_v59, %v4069_v54 }
 0x386   : > { %v4446_v24 = vmax.f32 %v8876_v46, %v4361_v30  ;;  %v3847_v31 = vpop.f32.mrf.mxu2  ;;  %v8878_v46 = vmax.f32 %v7006_v15, %v7010_v20  ;;  %v6064_v15 = vor.u32 %v6591_v1, %v6061_v16 }
 0x388   : > { %v4535_v3 = vadd.f32 %v7811_v7, %v4446_v24  ;;  %v2892_v41 = vpop.f32.mrf.mxu0 }
 0x389   : > { %v4070_v43 = vpop.f32.mrf.mxu3  ;;  %v3115_v19 = vpop.f32.mrf.mxu1 }
 0x38a   : > { %v4620_v57 = vmax.f32 %v4535_v3, 0.0  ;;  %v4071_v27 = vadd.f32 %v4070_v43, %v3847_v31  ;;  %v3116_v18 = vadd.f32 %v3115_v19, %v2892_v41 }
 0x38b   : > { %2931 = vmatmul.bf16.gmra.mxu0 %v5716_v12  ;;  %3889 = vmatmul.bf16.gmra.mxu2 %v6052_v50  ;;  %v5724_v12 = vor.u32 %v6508_v39, %v5723_v10  ;;  %v6060_v50 = vor.u32 %v6592_v62, %v6059_v26  ;;  %v5733_v39 = vld [vmem:[%s7630_s17 + $0xd8] sm:$0xf0] }
 0x38c   : > { %4706 = vst.msk [vmem:[%s7829_s28 + $0x20] sm:$0xff] %vm4701_vm0, %v4620_v57  ;;  %v4362_v53 = vmax.f32 %v3113_v23, %v4071_v27  ;;  %3154 = vmatmul.bf16.gmra.mxu1 %v5720_v36  ;;  %v5728_v36 = vor.u32 %v6507_v5, %v5725_v63  ;;  %v6067_v5 = vld [vmem:[%s7638_s20 + $0xd0] sm:$0xf]  ;;  %v6069_v63 = vld [vmem:[%s7638_s20 + $0xd8] sm:$0xf0] }
 0x38e   : > { %v4447_v59 = vmax.f32 %v8877_v34, %v4362_v53  ;;  %4112 = vmatmul.bf16.gmra.mxu3 %v6056_v49  ;;  %v3850_v8 = vpop.f32.mrf.mxu2  ;;  %v8879_v49 = vmax.f32 %v7012_v25, %v7024_v42  ;;  %v5731_v42 = vld [vmem:[%s7630_s17 + $0xd0] sm:$0xf] }
 0x390   : > { %v4536_v4 = vadd.f32 %v7811_v7, %v4447_v59  ;;  %v2894_v30 = vpop.f32.mrf.mxu0 }
 0x391   : > { %v4073_v54 = vpop.f32.mrf.mxu3  ;;  %v3117_v44 = vpop.f32.mrf.mxu1 }
 0x392   : > { %v4621_v61 = vmax.f32 %v4536_v4, 0.0  ;;  %v4074_v32 = vadd.f32 %v4073_v54, %v3850_v8  ;;  %v3118_v23 = vadd.f32 %v3117_v44, %v2894_v30  ;;  %v6510_v30 = vld [vmem:[%s7630_s17 + $0xd4] sm:$0xf0]  ;;  %v6509_v44 = vld [vmem:[%s7630_s17 + $0xd4] sm:$0xf] }
 0x393   : > { %v5732_v16 = vor.u32 %v6510_v30, %v5731_v42  ;;  %v6595_v42 = vld [vmem:[%s7638_s20 + $0xe4] sm:$0xf]  ;;  %v6077_v30 = vld [vmem:[%s7638_s20 + $0xe8] sm:$0xf0] }
 0x394   : > { %4707 = vst.msk [vmem:[%s7829_s28 + $0x28] sm:$0xff] %vm4701_vm0, %v4621_v61  ;;  %v4363_v56 = vmax.f32 %v3116_v18, %v4074_v32 }
 0x396   : > { %v4448_v24 = vmax.f32 %v8878_v46, %v4363_v56  ;;  %v3852_v31 = vpop.f32.mrf.mxu2  ;;  %v8880_v56 = vmax.f32 %v7026_v48, %v7030_v55  ;;  %v6594_v46 = vld [vmem:[%s7638_s20 + $0xd4] sm:$0xf0] }
 0x398   : > { %v4537_v3 = vadd.f32 %v7811_v7, %v4448_v24  ;;  %v2897_v41 = vpop.f32.mrf.mxu0  ;;  %v6593_v24 = vld [vmem:[%s7638_s20 + $0xd4] sm:$0xf] }
 0x399   : > { %v4075_v43 = vpop.f32.mrf.mxu3  ;;  %v3120_v19 = vpop.f32.mrf.mxu1  ;;  %v6072_v48 = vor.u32 %v6593_v24, %v6069_v63 }
 0x39a   : > { %v4622_v57 = vmax.f32 %v4537_v3, 0.0  ;;  %v4076_v27 = vadd.f32 %v4075_v43, %v3852_v31  ;;  %v3121_v59 = vadd.f32 %v3120_v19, %v2897_v41  ;;  %v5736_v3 = vor.u32 %v6509_v44, %v5733_v39 }
 0x39b   : > { %2936 = vmatmul.bf16.gmra.mxu0 %v5724_v12  ;;  %3894 = vmatmul.bf16.gmra.mxu2 %v6060_v50  ;;  %v6068_v31 = vor.u32 %v6594_v46, %v6067_v5 }
 0x39c   : > { %4708 = vst.msk [vmem:[%s7829_s28 + $0x30] sm:$0xff] %vm4701_vm0, %v4622_v57  ;;  %v4364_v20 = vmax.f32 %v3118_v23, %v4076_v27  ;;  %3159 = vmatmul.bf16.gmra.mxu1 %v5728_v36  ;;  %v8881_v23 = vmax.f32 %v7032_v60, %v7044_v17  ;;  %v5739_v17 = vld [vmem:[%s7630_s17 + $0xe0] sm:$0xf] }
 0x39e   : > { %v4449_v53 = vmax.f32 %v8879_v49, %v4364_v20  ;;  %4117 = vmatmul.bf16.gmra.mxu3 %v6064_v15  ;;  %v3855_v4 = vpop.f32.mrf.mxu2 }
 0x3a0   : > { %v4538_v34 = vadd.f32 %v7811_v7, %v4449_v53  ;;  %v2899_v61 = vpop.f32.mrf.mxu0 }
 0x3a1   : > { %v4078_v18 = vpop.f32.mrf.mxu3  ;;  %v3122_v32 = vpop.f32.mrf.mxu1 }
 0x3a2   : > { %v4623_v8 = vmax.f32 %v4538_v34, 0.0  ;;  %v4079_v54 = vadd.f32 %v4078_v18, %v3855_v4  ;;  %v3123_v12 = vadd.f32 %v3122_v32, %v2899_v61  ;;  %v6512_v4 = vld [vmem:[%s7630_s17 + $0xe4] sm:$0xf0]  ;;  %v6511_v18 = vld [vmem:[%s7630_s17 + $0xe4] sm:$0xf] }
 0x3a3   : > { %v5741_v61 = vld [vmem:[%s7630_s17 + $0xe8] sm:$0xf0]  ;;  %v6075_v32 = vld [vmem:[%s7638_s20 + $0xe0] sm:$0xf]  ;;  %v5740_v39 = vor.u32 %v6512_v4, %v5739_v17 }
 0x3a4   : > { %4709 = vst.msk [vmem:[%s7829_s28 + $0x38] sm:$0xff] %vm4701_vm0, %v4623_v8  ;;  %v4365_v25 = vmax.f32 %v3121_v59, %v4079_v54  ;;  %v8882_v8 = vmax.f32 %v7046_v29, %v7050_v35  ;;  %v5744_v5 = vor.u32 %v6511_v18, %v5741_v61  ;;  %v6080_v29 = vor.u32 %v6595_v42, %v6077_v30 }
 0x3a5   : > { %v8885_v30 = vmax.f32 %v7072_v22, %v7084_v58  ;;  %v5755_v58 = vld [vmem:[%s7630_s17 + $0x100] sm:$0xf] }
 0x3a6   : > { %v4450_v10 = vmax.f32 %v8880_v56, %v4365_v25  ;;  %v3857_v62 = vpop.f32.mrf.mxu2  ;;  %v6596_v25 = vld [vmem:[%s7638_s20 + $0xe4] sm:$0xf0] }
 0x3a7   : > { %v6076_v46 = vor.u32 %v6596_v25, %v6075_v32 }
 0x3a8   : > { %v4539_v26 = vadd.f32 %v7811_v7, %v4450_v10  ;;  %v2902_v50 = vpop.f32.mrf.mxu0 }
 0x3a9   : > { %v4080_v1 = vpop.f32.mrf.mxu3  ;;  %v3125_v57 = vpop.f32.mrf.mxu1 }
 0x3aa   : > { %v4624_v43 = vmax.f32 %v4539_v26, 0.0  ;;  %v4081_v36 = vadd.f32 %v4080_v1, %v3857_v62  ;;  %v3126_v19 = vadd.f32 %v3125_v57, %v2902_v50 }
 0x3ab   : > { %2941 = vmatmul.bf16.gmra.mxu0 %v5732_v16  ;;  %3899 = vmatmul.bf16.gmra.mxu2 %v6068_v31  ;;  %v8883_v16 = vmax.f32 %v7052_v38, %v7064_v2  ;;  %v5747_v2 = vld [vmem:[%s7630_s17 + $0xf0] sm:$0xf] }
 0x3ac   : > { %4710 = vst.msk [vmem:[%s7829_s28 + $0x40] sm:$0xff] %vm4701_vm0, %v4624_v43  ;;  %v4366_v55 = vmax.f32 %v3123_v12, %v4081_v36  ;;  %3164 = vmatmul.bf16.gmra.mxu1 %v5736_v3 }
 0x3ae   : > { %v4451_v27 = vmax.f32 %v8881_v23, %v4366_v55  ;;  %4122 = vmatmul.bf16.gmra.mxu3 %v6072_v48  ;;  %v3860_v15 = vpop.f32.mrf.mxu2  ;;  %v6514_v23 = vld [vmem:[%s7630_s17 + $0xf4] sm:$0xf0] }
 0x3af   : > { %v5748_v4 = vor.u32 %v6514_v23, %v5747_v2 }
 0x3b0   : > { %v4540_v41 = vadd.f32 %v7811_v7, %v4451_v27  ;;  %v2904_v34 = vpop.f32.mrf.mxu0  ;;  %v6513_v27 = vld [vmem:[%s7630_s17 + $0xf4] sm:$0xf] }
 0x3b1   : > { %v4083_v20 = vpop.f32.mrf.mxu3  ;;  %v3127_v59 = vpop.f32.mrf.mxu1 }
 0x3b2   : > { %v4625_v49 = vmax.f32 %v4540_v41, 0.0  ;;  %v4084_v53 = vadd.f32 %v4083_v20, %v3860_v15  ;;  %v3128_v63 = vadd.f32 %v3127_v59, %v2904_v34  ;;  %v8884_v41 = vmax.f32 %v7066_v9, %v7070_v14  ;;  %v5749_v15 = vld [vmem:[%s7630_s17 + $0xf8] sm:$0xf0]  ;;  %v6083_v20 = vld [vmem:[%s7638_s20 + $0xf0] sm:$0xf] }
 0x3b3   : > { %v6085_v34 = vld [vmem:[%s7638_s20 + $0xf8] sm:$0xf0]  ;;  %v5752_v18 = vor.u32 %v6513_v27, %v5749_v15  ;;  %v8887_v15 = vmax.f32 %v7092_v33, %v7104_v0  ;;  %v5763_v0 = vld [vmem:[%s7630_s17 + $0x110] sm:$0xf] }
 0x3b4   : > { %4711 = vst.msk [vmem:[%s7829_s28 + $0x48] sm:$0xff] %vm4701_vm0, %v4625_v49  ;;  %v4367_v60 = vmax.f32 %v3126_v19, %v4084_v53  ;;  %v6598_v49 = vld [vmem:[%s7638_s20 + $0xf4] sm:$0xf0]  ;;  %v6597_v53 = vld [vmem:[%s7638_s20 + $0xf4] sm:$0xf] }
 0x3b5   : > { %v6088_v9 = vor.u32 %v6597_v53, %v6085_v34 }
 0x3b6   : > { %v4452_v54 = vmax.f32 %v8882_v8, %v4367_v60  ;;  %v3862_v56 = vpop.f32.mrf.mxu2  ;;  %v6084_v8 = vor.u32 %v6598_v49, %v6083_v20 }
 0x3b8   : > { %v4541_v44 = vadd.f32 %v7811_v7, %v4452_v54  ;;  %v2907_v62 = vpop.f32.mrf.mxu0 }
 0x3b9   : > { %v4085_v10 = vpop.f32.mrf.mxu3  ;;  %v3130_v1 = vpop.f32.mrf.mxu1 }
 0x3ba   : > { %v4626_v24 = vmax.f32 %v4541_v44, 0.0  ;;  %v4086_v26 = vadd.f32 %v4085_v10, %v3862_v56  ;;  %v3131_v43 = vadd.f32 %v3130_v1, %v2907_v62  ;;  %v6516_v62 = vld [vmem:[%s7630_s17 + $0x104] sm:$0xf0]  ;;  %v6515_v1 = vld [vmem:[%s7630_s17 + $0x104] sm:$0xf] }
 0x3bb   : > { %2946 = vmatmul.bf16.gmra.mxu0 %v5740_v39  ;;  %3904 = vmatmul.bf16.gmra.mxu2 %v6076_v46 }
 0x3bc   : > { %4712 = vst.msk [vmem:[%s7829_s28 + $0x50] sm:$0xff] %vm4701_vm0, %v4626_v24  ;;  %v4368_v35 = vmax.f32 %v3128_v63, %v4086_v26  ;;  %3169 = vmatmul.bf16.gmra.mxu1 %v5744_v5 }
 0x3be   : > { %v4453_v3 = vmax.f32 %v8883_v16, %v4368_v35  ;;  %4127 = vmatmul.bf16.gmra.mxu3 %v6080_v29  ;;  %v3865_v12 = vpop.f32.mrf.mxu2  ;;  %v8886_v29 = vmax.f32 %v7086_v6, %v7090_v13  ;;  %v5757_v16 = vld [vmem:[%s7630_s17 + $0x108] sm:$0xf0] }
 0x3c0   : > { %v4542_v31 = vadd.f32 %v7811_v7, %v4453_v3  ;;  %v2909_v48 = vpop.f32.mrf.mxu0  ;;  %v6091_v3 = vld [vmem:[%s7638_s20 + $0x100] sm:$0xf] }
 0x3c1   : > { %v4088_v36 = vpop.f32.mrf.mxu3  ;;  %v3132_v55 = vpop.f32.mrf.mxu1 }
 0x3c2   : > { %v4627_v50 = vmax.f32 %v4542_v31, 0.0  ;;  %v4089_v57 = vadd.f32 %v4088_v36, %v3865_v12  ;;  %v3133_v61 = vadd.f32 %v3132_v55, %v2909_v48  ;;  %v6600_v31 = vld [vmem:[%s7638_s20 + $0x104] sm:$0xf0]  ;;  %v6093_v12 = vld [vmem:[%s7638_s20 + $0x108] sm:$0xf0]  ;;  %v5756_v48 = vor.u32 %v6516_v62, %v5755_v58 }
 0x3c3   : > { %v5760_v55 = vor.u32 %v6515_v1, %v5757_v16  ;;  %v8889_v62 = vmax.f32 %v7112_v45, %v7124_v37  ;;  %v5771_v37 = vld [vmem:[%s7630_s17 + $0x120] sm:$0xf] }
 0x3c4   : > { %4713 = vst.msk [vmem:[%s7829_s28 + $0x58] sm:$0xff] %vm4701_vm0, %v4627_v50  ;;  %v4369_v38 = vmax.f32 %v3131_v43, %v4089_v57  ;;  %v6599_v43 = vld [vmem:[%s7638_s20 + $0x104] sm:$0xf] }
 0x3c5   : > { %v6096_v6 = vor.u32 %v6599_v43, %v6093_v12 }
 0x3c6   : > { %v4454_v19 = vmax.f32 %v8884_v41, %v4369_v38  ;;  %v3867_v60 = vpop.f32.mrf.mxu2  ;;  %v6092_v38 = vor.u32 %v6600_v31, %v6091_v3 }
 0x3c8   : > { %v4543_v59 = vadd.f32 %v7811_v7, %v4454_v19  ;;  %v2912_v25 = vpop.f32.mrf.mxu0 }
 0x3c9   : > { %v4090_v17 = vpop.f32.mrf.mxu3  ;;  %v3135_v42 = vpop.f32.mrf.mxu1 }
 0x3ca   : > { %v4628_v54 = vmax.f32 %v4543_v59, 0.0  ;;  %v4091_v32 = vadd.f32 %v4090_v17, %v3867_v60  ;;  %v3136_v10 = vadd.f32 %v3135_v42, %v2912_v25  ;;  %v5765_v25 = vld [vmem:[%s7630_s17 + $0x118] sm:$0xf0]  ;;  %v6099_v42 = vld [vmem:[%s7638_s20 + $0x110] sm:$0xf] }
 0x3cb   : > { %2951 = vmatmul.bf16.gmra.mxu0 %v5748_v4  ;;  %3909 = vmatmul.bf16.gmra.mxu2 %v6084_v8  ;;  %v6518_v8 = vld [vmem:[%s7630_s17 + $0x114] sm:$0xf0] }
 0x3cc   : > { %4714 = vst.msk [vmem:[%s7829_s28 + $0x60] sm:$0xff] %vm4701_vm0, %v4628_v54  ;;  %v4370_v14 = vmax.f32 %v3133_v61, %v4091_v32  ;;  %3174 = vmatmul.bf16.gmra.mxu1 %v5752_v18  ;;  %v6517_v54 = vld [vmem:[%s7630_s17 + $0x114] sm:$0xf]  ;;  %v8888_v61 = vmax.f32 %v7106_v21, %v7110_v40 }
 0x3ce   : > { %v4455_v44 = vmax.f32 %v8885_v30, %v4370_v14  ;;  %4132 = vmatmul.bf16.gmra.mxu3 %v6088_v9  ;;  %v3870_v39 = vpop.f32.mrf.mxu2  ;;  %v6602_v9 = vld [vmem:[%s7638_s20 + $0x114] sm:$0xf0]  ;;  %v6601_v14 = vld [vmem:[%s7638_s20 + $0x114] sm:$0xf]  ;;  %v6101_v30 = vld [vmem:[%s7638_s20 + $0x118] sm:$0xf0] }
 0x3cf   : > { %v6104_v21 = vor.u32 %v6601_v14, %v6101_v30  ;;  %v6521_v14 = vld [vmem:[%s7630_s17 + $0x134] sm:$0xf]  ;;  %v8892_v30 = vld [vmem:[#allocation2_spill] sm:$0xff] }
 0x3d0   : > { %v4544_v56 = vadd.f32 %v7811_v7, %v4455_v44  ;;  %v2914_v63 = vpop.f32.mrf.mxu0 }
 0x3d1   : > { %v4093_v5 = vpop.f32.mrf.mxu3  ;;  %v3137_v26 = vpop.f32.mrf.mxu1 }
 0x3d2   : > { %v4629_v46 = vmax.f32 %v4544_v56, 0.0  ;;  %v4094_v24 = vadd.f32 %v4093_v5, %v3870_v39  ;;  %v3138_v23 = vadd.f32 %v3137_v26, %v2914_v63  ;;  %v5764_v39 = vor.u32 %v6518_v8, %v5763_v0 }
 0x3d3   : > { %v5768_v5 = vor.u32 %v6517_v54, %v5765_v25 }
 0x3d4   : > { %4715 = vst.msk [vmem:[%s7829_s28 + $0x68] sm:$0xff] %vm4701_vm0, %v4629_v46  ;;  %v4371_v22 = vmax.f32 %v3136_v10, %v4094_v24  ;;  %v6100_v46 = vor.u32 %v6602_v9, %v6099_v42  ;;  %v6522_v9 = vld [vmem:[%s7630_s17 + $0x134] sm:$0xf0] }
 0x3d6   : > { %v4456_v35 = vmax.f32 %v8886_v29, %v4371_v22  ;;  %v3872_v50 = vpop.f32.mrf.mxu2 }
 0x3d8   : > { %v4545_v36 = vadd.f32 %v7811_v7, %v4456_v35  ;;  %v2917_v41 = vpop.f32.mrf.mxu0 }
 0x3d9   : > { %v4095_v57 = vpop.f32.mrf.mxu3  ;;  %v3140_v19 = vpop.f32.mrf.mxu1 }
 0x3da   : > { %v4630_v2 = vmax.f32 %v4545_v36, 0.0  ;;  %v4096_v27 = vadd.f32 %v4095_v57, %v3872_v50  ;;  %v3141_v53 = vadd.f32 %v3140_v19, %v2917_v41  ;;  %v6520_v50 = vld [vmem:[%s7630_s17 + $0x124] sm:$0xf0]  ;;  %v6519_v57 = vld [vmem:[%s7630_s17 + $0x124] sm:$0xf] }
 0x3db   : > { %2956 = vmatmul.bf16.gmra.mxu0 %v5756_v48  ;;  %3914 = vmatmul.bf16.gmra.mxu2 %v6092_v38  ;;  %v8890_v48 = vmax.f32 %v7126_v11, %v7130_v52  ;;  %v5773_v38 = vld [vmem:[%s7630_s17 + $0x128] sm:$0xf0] }
 0x3dc   : > { %4716 = vst.msk [vmem:[%s7829_s28 + $0x70] sm:$0xff] %vm4701_vm0, %v4630_v2  ;;  %v4372_v13 = vmax.f32 %v3138_v23, %v4096_v27  ;;  %3179 = vmatmul.bf16.gmra.mxu1 %v5760_v55  ;;  %v6107_v2 = vld [vmem:[%s7638_s20 + $0x120] sm:$0xf]  ;;  %v6604_v23 = vld [vmem:[%s7638_s20 + $0x124] sm:$0xf0] }
 0x3dd   : > { %v6603_v27 = vld [vmem:[%s7638_s20 + $0x124] sm:$0xf]  ;;  %v6109_v41 = vld [vmem:[%s7638_s20 + $0x128] sm:$0xf0] }
 0x3de   : > { %v4457_v20 = vmax.f32 %v8887_v15, %v4372_v13  ;;  %4137 = vmatmul.bf16.gmra.mxu3 %v6096_v6  ;;  %v3875_v34 = vpop.f32.mrf.mxu2  ;;  %v5772_v15 = vor.u32 %v6520_v50, %v5771_v37  ;;  %v6112_v11 = vor.u32 %v6603_v27, %v6109_v41  ;;  %v5787_v27 = vld [vmem:[%s7630_s17 + $0x140] sm:$0xf]  ;;  %v6524_v41 = vld [vmem:[%s7630_s17 + $0x144] sm:$0xf0] }
 0x3e0   : > { %v4546_v49 = vadd.f32 %v7811_v7, %v4457_v20  ;;  %v2919_v4 = vpop.f32.mrf.mxu0  ;;  %v5776_v20 = vor.u32 %v6519_v57, %v5773_v38 }
 0x3e1   : > { %v4098_v59 = vpop.f32.mrf.mxu3  ;;  %v3142_v18 = vpop.f32.mrf.mxu1 }
 0x3e2   : > { %v4631_v60 = vmax.f32 %v4546_v49, 0.0  ;;  %v4099_v17 = vadd.f32 %v4098_v59, %v3875_v34  ;;  %v3143_v63 = vadd.f32 %v3142_v18, %v2919_v4  ;;  %v6108_v49 = vor.u32 %v6604_v23, %v6107_v2 }
 0x3e3   : > { %v8891_v4 = vmax.f32 %v7132_v28, %v7144_v47  ;;  %v5779_v47 = vld [vmem:[%s7630_s17 + $0x130] sm:$0xf] }
 0x3e4   : > { %4717 = vst.msk [vmem:[%s7829_s28 + $0x78] sm:$0xff] %vm4701_vm0, %v4631_v60  ;;  %v4373_v33 = vmax.f32 %v3141_v53, %v4099_v17 }
 0x3e6   : > { %v4458_v32 = vmax.f32 %v8888_v61, %v4373_v33  ;;  %v3877_v56 = vpop.f32.mrf.mxu2 }
 0x3e8   : > { %v4547_v44 = vadd.f32 %v7811_v7, %v4458_v32  ;;  %v2922_v22 = vpop.f32.mrf.mxu0 }
 0x3e9   : > { %v4100_v10 = vpop.f32.mrf.mxu3  ;;  %v3145_v58 = vpop.f32.mrf.mxu1 }
 0x3ea   : > { %v4632_v24 = vmax.f32 %v4547_v44, 0.0  ;;  %v4101_v26 = vadd.f32 %v4100_v10, %v3877_v56  ;;  %v3146_v35 = vadd.f32 %v3145_v58, %v2922_v22  ;;  %v8893_v44 = vmax.f32 %v7146_v51, %v8892_v30  ;;  %v5781_v10 = vld [vmem:[%s7630_s17 + $0x138] sm:$0xf0] }
 0x3eb   : > { %2961 = vmatmul.bf16.gmra.mxu0 %v5764_v39  ;;  %3919 = vmatmul.bf16.gmra.mxu2 %v6100_v46  ;;  %v6115_v39 = vld [vmem:[%s7638_s20 + $0x130] sm:$0xf]  ;;  %v6605_v46 = vld [vmem:[%s7638_s20 + $0x134] sm:$0xf]  ;;  %v5780_v58 = vor.u32 %v6522_v9, %v5779_v47 }
 0x3ec   : > { %4718 = vst.msk [vmem:[%s7829_s28 + $0x80] sm:$0xff] %vm4701_vm0, %v4632_v24  ;;  %v4374_v40 = vmax.f32 %v3143_v63, %v4101_v26  ;;  %3184 = vmatmul.bf16.gmra.mxu1 %v5768_v5  ;;  %v6606_v5 = vld [vmem:[%s7638_s20 + $0x134] sm:$0xf0]  ;;  %v6117_v24 = vld [vmem:[%s7638_s20 + $0x138] sm:$0xf0]  ;;  %v8901_v47 = vld [vmem:[#allocation8_spill] sm:$0xff] }
 0x3ed   : > { %v6120_v51 = vor.u32 %v6605_v46, %v6117_v24 }
 0x3ee   : > { %v4459_v1 = vmax.f32 %v8889_v62, %v4374_v40  ;;  %4142 = vmatmul.bf16.gmra.mxu3 %v6104_v21  ;;  %v3880_v16 = vpop.f32.mrf.mxu2  ;;  %v5784_v21 = vor.u32 %v6521_v14, %v5781_v10  ;;  %v6116_v40 = vor.u32 %v6606_v5, %v6115_v39 }
 0x3f0   : > { %v4548_v29 = vadd.f32 %v7811_v7, %v4459_v1  ;;  %v2924_v12 = vpop.f32.mrf.mxu0 }
 0x3f1   : > { %v4103_v3 = vpop.f32.mrf.mxu3  ;;  %v3147_v36 = vpop.f32.mrf.mxu1 }
 0x3f2   : > { %v4633_v31 = vmax.f32 %v4548_v29, 0.0  ;;  %v4104_v43 = vadd.f32 %v4103_v3, %v3880_v16  ;;  %v3148_v34 = vadd.f32 %v3147_v36, %v2924_v12 }
 0x3f4   : > { %4719 = vst.msk [vmem:[%s7829_s28 + $0x88] sm:$0xff] %vm4701_vm0, %v4633_v31  ;;  %v4375_v45 = vmax.f32 %v3146_v35, %v4104_v43  ;;  %v8894_v31 = vld [vmem:[#allocation3_spill] sm:$0xff]  ;;  %v8895_v43 = vld [vmem:[#allocation4_spill] sm:$0xff] }
 0x3f5   : > { %v8896_v12 = vmax.f32 %v8894_v31, %v8895_v43 }
 0x3f6   : > { %v4460_v55 = vmax.f32 %v8890_v48, %v4375_v45  ;;  %v3882_v6 = vpop.f32.mrf.mxu2 }
 0x3f8   : > { %v4549_v19 = vadd.f32 %v7811_v7, %v4460_v55  ;;  %v2927_v60 = vpop.f32.mrf.mxu0 }
 0x3f9   : > { %v4105_v13 = vpop.f32.mrf.mxu3  ;;  %v3150_v17 = vpop.f32.mrf.mxu1 }
 0x3fa   : > { %v4634_v53 = vmax.f32 %v4549_v19, 0.0  ;;  %v4106_v59 = vadd.f32 %v4105_v13, %v3882_v6  ;;  %v3151_v0 = vadd.f32 %v3150_v17, %v2927_v60  ;;  %v6523_v19 = vld [vmem:[%s7630_s17 + $0x144] sm:$0xf]  ;;  %v8897_v6 = vld [vmem:[#allocation5_spill] sm:$0xff]  ;;  %v6125_v60 = vld [vmem:[%s7638_s20 + $0x148] sm:$0xf0] }
 0x3fb   : > { %2966 = vmatmul.bf16.gmra.mxu0 %v5772_v15  ;;  %3924 = vmatmul.bf16.gmra.mxu2 %v6108_v49  ;;  %v8898_v13 = vld [vmem:[#allocation6_spill] sm:$0xff]  ;;  %v5789_v49 = vld [vmem:[%s7630_s17 + $0x148] sm:$0xf0] }
 0x3fc   : > { %4720 = vst.msk [vmem:[%s7829_s28 + $0x90] sm:$0xff] %vm4701_vm0, %v4634_v53  ;;  %v4376_v52 = vmax.f32 %v3148_v34, %v4106_v59  ;;  %3189 = vmatmul.bf16.gmra.mxu1 %v5776_v20  ;;  %v8899_v15 = vmax.f32 %v8897_v6, %v8898_v13  ;;  %v6123_v53 = vld [vmem:[%s7638_s20 + $0x140] sm:$0xf]  ;;  %v6608_v34 = vld [vmem:[%s7638_s20 + $0x144] sm:$0xf0] }
 0x3fd   : > { %v6607_v59 = vld [vmem:[%s7638_s20 + $0x144] sm:$0xf] }
 0x3fe   : > { %v4461_v18 = vmax.f32 %v8891_v4, %v4376_v52  ;;  %4147 = vmatmul.bf16.gmra.mxu3 %v6112_v11  ;;  %v3885_v8 = vpop.f32.mrf.mxu2  ;;  %v5788_v4 = vor.u32 %v6524_v41, %v5787_v27  ;;  %v8906_v27 = vld [vmem:[#allocation11_spill] sm:$0xff]  ;;  %v8907_v41 = vld [vmem:[#allocation12_spill] sm:$0xff] }
 0x400   : > { %v4550_v33 = vadd.f32 %v7811_v7, %v4461_v18  ;;  %v2929_v25 = vpop.f32.mrf.mxu0  ;;  %v5792_v18 = vor.u32 %v6523_v19, %v5789_v49  ;;  %v8908_v19 = vmax.f32 %v8906_v27, %v8907_v41 }
 0x401   : > { %v4108_v54 = vpop.f32.mrf.mxu3  ;;  %v3152_v42 = vpop.f32.mrf.mxu1 }
 0x402   : > { %v4635_v61 = vmax.f32 %v4550_v33, 0.0  ;;  %v4109_v32 = vadd.f32 %v4108_v54, %v3885_v8  ;;  %v3153_v1 = vadd.f32 %v3152_v42, %v2929_v25  ;;  %v6124_v33 = vor.u32 %v6608_v34, %v6123_v53 }
 0x403   : > { %v6128_v25 = vor.u32 %v6607_v59, %v6125_v60 }
 0x404   : > { %4721 = vst.msk [vmem:[%s7829_s28 + $0x98] sm:$0xff] %vm4701_vm0, %v4635_v61  ;;  %v4377_v28 = vmax.f32 %v3151_v0, %v4109_v32 }
 0x406   : > { %v4462_v56 = vmax.f32 %v8893_v44, %v4377_v28  ;;  %v3887_v26 = vpop.f32.mrf.mxu2  ;;  %v8900_v28 = vld [vmem:[#allocation7_spill] sm:$0xff] }
 0x407   : > { %v8902_v9 = vmax.f32 %v8900_v28, %v8901_v47 }
 0x408   : > { %v4551_v63 = vadd.f32 %v7811_v7, %v4462_v56  ;;  %v2932_v35 = vpop.f32.mrf.mxu0 }
 0x409   : > { %v4110_v22 = vpop.f32.mrf.mxu3  ;;  %v3155_v16 = vpop.f32.mrf.mxu1 }
 0x40a   : > { %v4636_v62 = vmax.f32 %v4551_v63, 0.0  ;;  %v4111_v29 = vadd.f32 %v4110_v22, %v3887_v26  ;;  %v3156_v37 = vadd.f32 %v3155_v16, %v2932_v35  ;;  %v5795_v26 = vld [vmem:[%s7630_s17 + $0x150] sm:$0xf]  ;;  %v6526_v22 = vld [vmem:[%s7630_s17 + $0x154] sm:$0xf0] }
 0x40b   : > { %2971 = vmatmul.bf16.gmra.mxu0 %v5780_v58  ;;  %3929 = vmatmul.bf16.gmra.mxu2 %v6116_v40  ;;  %v6525_v58 = vld [vmem:[%s7630_s17 + $0x154] sm:$0xf]  ;;  %v8904_v40 = vld [vmem:[#allocation10_spill] sm:$0xff]  ;;  %v6131_v35 = vld [vmem:[%s7638_s20 + $0x150] sm:$0xf] }
 0x40c   : > { %4722 = vst.msk [vmem:[%s7829_s28 + $0xa0] sm:$0xff] %vm4701_vm0, %v4636_v62  ;;  %v4378_v3 = vmax.f32 %v3153_v1, %v4111_v29  ;;  %3194 = vmatmul.bf16.gmra.mxu1 %v5784_v21  ;;  %v8903_v21 = vld [vmem:[#allocation9_spill] sm:$0xff] }
 0x40d   : > { %v8905_v62 = vmax.f32 %v8903_v21, %v8904_v40  ;;  %v5797_v29 = vld [vmem:[%s7630_s17 + $0x158] sm:$0xf0]  ;;  %v6610_v16 = vld [vmem:[%s7638_s20 + $0x154] sm:$0xf0]  ;;  %v8099_v21 = vld [vmem:[%s8612_s5] ss:$0 sm:$0xff] }
 0x40e   : > { %v4463_v36 = vmax.f32 %v8896_v12, %v4378_v3  ;;  %4152 = vmatmul.bf16.gmra.mxu3 %v6120_v51  ;;  %v3890_v50 = vpop.f32.mrf.mxu2  ;;  %v6609_v51 = vld [vmem:[%s7638_s20 + $0x154] sm:$0xf]  ;;  %v6133_v3 = vld [vmem:[%s7638_s20 + $0x158] sm:$0xf0] }
 0x410   : > { %v4552_v45 = vadd.f32 %v7811_v7, %v4463_v36  ;;  %v2934_v38 = vpop.f32.mrf.mxu0  ;;  %v5796_v36 = vor.u32 %v6526_v22, %v5795_v26  ;;  %v8912_v26 = vld [vmem:[#allocation15_spill] sm:$0xff] }
 0x411   : > { %v4113_v57 = vpop.f32.mrf.mxu3  ;;  %v3157_v2 = vpop.f32.mrf.mxu1 }
 0x412   : > { %v4637_v48 = vmax.f32 %v4552_v45, 0.0  ;;  %v4114_v55 = vadd.f32 %v4113_v57, %v3890_v50  ;;  %v3158_v8 = vadd.f32 %v3157_v2, %v2934_v38  ;;  %v5800_v45 = vor.u32 %v6525_v58, %v5797_v29 }
 0x413   : > { %v6136_v2 = vor.u32 %v6609_v51, %v6133_v3 }
 0x414   : > { %4723 = vst.msk [vmem:[%s7829_s28 + $0xa8] sm:$0xff] %vm4701_vm0, %v4637_v48  ;;  %v4379_v23 = vmax.f32 %v3156_v37, %v4114_v55  ;;  %v6132_v37 = vor.u32 %v6610_v16, %v6131_v35 }
 0x416   : > { %v4464_v20 = vmax.f32 %v8899_v15, %v4379_v23  ;;  %v3892_v11 = vpop.f32.mrf.mxu2 }
 0x418   : > { %v4553_v17 = vadd.f32 %v7811_v7, %v4464_v20  ;;  %v2937_v61 = vpop.f32.mrf.mxu0 }
 0x419   : > { %v4115_v52 = vpop.f32.mrf.mxu3  ;;  %v3160_v32 = vpop.f32.mrf.mxu1 }
 0x41a   : > { %v4638_v0 = vmax.f32 %v4553_v17, 0.0  ;;  %v4116_v54 = vadd.f32 %v4115_v52, %v3892_v11  ;;  %v3161_v44 = vadd.f32 %v3160_v32, %v2937_v61  ;;  %v5803_v11 = vld [vmem:[%s7630_s17 + $0x160] sm:$0xf]  ;;  %v6528_v52 = vld [vmem:[%s7630_s17 + $0x164] sm:$0xf0] }
 0x41b   : > { %2976 = vmatmul.bf16.gmra.mxu0 %v5788_v4  ;;  %3934 = vmatmul.bf16.gmra.mxu2 %v6124_v33  ;;  %v6527_v4 = vld [vmem:[%s7630_s17 + $0x164] sm:$0xf]  ;;  %v6139_v61 = vld [vmem:[%s7638_s20 + $0x160] sm:$0xf]  ;;  %v6612_v32 = vld [vmem:[%s7638_s20 + $0x164] sm:$0xf0] }
 0x41c   : > { %4724 = vst.msk [vmem:[%s7829_s28 + $0xb0] sm:$0xff] %vm4701_vm0, %v4638_v0  ;;  %v4380_v42 = vmax.f32 %v3158_v8, %v4116_v54  ;;  %3199 = vmatmul.bf16.gmra.mxu1 %v5792_v18  ;;  %v8909_v18 = vld [vmem:[#allocation13_spill] sm:$0xff]  ;;  %v8910_v33 = vld [vmem:[#allocation14_spill] sm:$0xff]  ;;  %v5805_v54 = vld [vmem:[%s7630_s17 + $0x168] sm:$0xf0] }
 0x41d   : > { %v8911_v0 = vmax.f32 %v8909_v18, %v8910_v33 }
 0x41e   : > { %v4465_v14 = vmax.f32 %v8902_v9, %v4380_v42  ;;  %4157 = vmatmul.bf16.gmra.mxu3 %v6128_v25  ;;  %v3895_v56 = vpop.f32.mrf.mxu2  ;;  %v6611_v25 = vld [vmem:[%s7638_s20 + $0x164] sm:$0xf]  ;;  %v6141_v42 = vld [vmem:[%s7638_s20 + $0x168] sm:$0xf0] }
 0x420   : > { %v4554_v30 = vadd.f32 %v7811_v7, %v4465_v14  ;;  %v2939_v46 = vpop.f32.mrf.mxu0  ;;  %v5804_v14 = vor.u32 %v6528_v52, %v5803_v11  ;;  %v8918_v11 = vld [vmem:[#allocation19_spill] sm:$0xff]  ;;  %v8919_v52 = vld [vmem:[#allocation20_spill] sm:$0xff] }
 0x421   : > { %v4118_v10 = vpop.f32.mrf.mxu3  ;;  %v3162_v24 = vpop.f32.mrf.mxu1 }
 0x422   : > { %v4639_v39 = vmax.f32 %v4554_v30, 0.0  ;;  %v4119_v5 = vadd.f32 %v4118_v10, %v3895_v56  ;;  %v3163_v57 = vadd.f32 %v3162_v24, %v2939_v46  ;;  %v5808_v30 = vor.u32 %v6527_v4, %v5805_v54 }
 0x423   : > { %v6144_v24 = vor.u32 %v6611_v25, %v6141_v42  ;;  %v8920_v4 = vmax.f32 %v8918_v11, %v8919_v52 }
 0x424   : > { %4725 = vst.msk [vmem:[%s7829_s28 + $0xb8] sm:$0xff] %vm4701_vm0, %v4639_v39  ;;  %v4381_v63 = vmax.f32 %v3161_v44, %v4119_v5  ;;  %v6140_v44 = vor.u32 %v6612_v32, %v6139_v61 }
 0x426   : > { %v4466_v1 = vmax.f32 %v8905_v62, %v4381_v63  ;;  %v3897_v43 = vpop.f32.mrf.mxu2 }
 0x428   : > { %v4555_v31 = vadd.f32 %v7811_v7, %v4466_v1  ;;  %v2942_v55 = vpop.f32.mrf.mxu0 }
 0x429   : > { %v4120_v12 = vpop.f32.mrf.mxu3  ;;  %v3165_v38 = vpop.f32.mrf.mxu1 }
 0x42a   : > { %v4640_v50 = vmax.f32 %v4555_v31, 0.0  ;;  %v4121_v48 = vadd.f32 %v4120_v12, %v3897_v43  ;;  %v3166_v15 = vadd.f32 %v3165_v38, %v2942_v55  ;;  %v5811_v43 = vld [vmem:[%s7630_s17 + $0x170] sm:$0xf]  ;;  %v6530_v12 = vld [vmem:[%s7630_s17 + $0x174] sm:$0xf0] }
 0x42b   : > { %2981 = vmatmul.bf16.gmra.mxu0 %v5796_v36  ;;  %3939 = vmatmul.bf16.gmra.mxu2 %v6132_v37  ;;  %v6529_v36 = vld [vmem:[%s7630_s17 + $0x174] sm:$0xf]  ;;  %v8916_v37 = vld [vmem:[#allocation18_spill] sm:$0xff]  ;;  %v6147_v55 = vld [vmem:[%s7638_s20 + $0x170] sm:$0xf] }
 0x42c   : > { %4726 = vst.msk [vmem:[%s7829_s28 + $0xc0] sm:$0xff] %vm4701_vm0, %v4640_v50  ;;  %v4382_v23 = vmax.f32 %v3163_v57, %v4121_v48  ;;  %3204 = vmatmul.bf16.gmra.mxu1 %v5800_v45  ;;  %v8915_v45 = vld [vmem:[#allocation17_spill] sm:$0xff] }
 0x42d   : > { %v8917_v50 = vmax.f32 %v8915_v45, %v8916_v37  ;;  %v5813_v48 = vld [vmem:[%s7630_s17 + $0x178] sm:$0xf0]  ;;  %v6614_v38 = vld [vmem:[%s7638_s20 + $0x174] sm:$0xf0] }
 0x42e   : > { %v4467_v6 = vmax.f32 %v8908_v19, %v4382_v23  ;;  %4162 = vmatmul.bf16.gmra.mxu3 %v6136_v2  ;;  %v3900_v20 = vpop.f32.mrf.mxu2  ;;  %v6613_v2 = vld [vmem:[%s7638_s20 + $0x174] sm:$0xf]  ;;  %v6149_v23 = vld [vmem:[%s7638_s20 + $0x178] sm:$0xf0] }
 0x430   : > { %v4556_v13 = vadd.f32 %v7811_v7, %v4467_v6  ;;  %v2944_v59 = vpop.f32.mrf.mxu0  ;;  %v5812_v6 = vor.u32 %v6530_v12, %v5811_v43  ;;  %v8924_v43 = vld [vmem:[#allocation23_spill] sm:$0xff]  ;;  %v8925_v12 = vld [vmem:[#allocation24_spill] sm:$0xff] }
 0x431   : > { %v4123_v49 = vpop.f32.mrf.mxu3  ;;  %v3167_v60 = vpop.f32.mrf.mxu1 }
 0x432   : > { %v4641_v53 = vmax.f32 %v4556_v13, 0.0  ;;  %v4124_v34 = vadd.f32 %v4123_v49, %v3900_v20  ;;  %v3168_v10 = vadd.f32 %v3167_v60, %v2944_v59  ;;  %v5816_v13 = vor.u32 %v6529_v36, %v5813_v48 }
 0x433   : > { %v6152_v60 = vor.u32 %v6613_v2, %v6149_v23  ;;  %v8926_v36 = vmax.f32 %v8924_v43, %v8925_v12 }
 0x434   : > { %4727 = vst.msk [vmem:[%s7829_s28 + $0xc8] sm:$0xff] %vm4701_vm0, %v4641_v53  ;;  %v4383_v17 = vmax.f32 %v3166_v15, %v4124_v34  ;;  %v6148_v15 = vor.u32 %v6614_v38, %v6147_v55 }
 0x436   : > { %v4468_v8 = vmax.f32 %v8911_v0, %v4383_v17  ;;  %v3902_v47 = vpop.f32.mrf.mxu2 }
 0x438   : > { %v4557_v28 = vadd.f32 %v7811_v7, %v4468_v8  ;;  %v2947_v5 = vpop.f32.mrf.mxu0  ;;  %v8913_v7 = vld [vmem:[#allocation16_spill] sm:$0xff] }
 0x439   : > { %v4125_v9 = vpop.f32.mrf.mxu3  ;;  %v3170_v46 = vpop.f32.mrf.mxu1  ;;  %v8914_v22 = vmax.f32 %v8912_v26, %v8913_v7 }
 0x43a   : > { %v4642_v56 = vmax.f32 %v4557_v28, 0.0  ;;  %v4126_v39 = vadd.f32 %v4125_v9, %v3902_v47  ;;  %v3171_v62 = vadd.f32 %v3170_v46, %v2947_v5  ;;  %v5819_v47 = vld [vmem:[%s7630_s17 + $0x180] sm:$0xf]  ;;  %v6532_v9 = vld [vmem:[%s7630_s17 + $0x184] sm:$0xf0] }
 0x43b   : > { %2986 = vmatmul.bf16.gmra.mxu0 %v5804_v14  ;;  %3944 = vmatmul.bf16.gmra.mxu2 %v6140_v44  ;;  %v6531_v14 = vld [vmem:[%s7630_s17 + $0x184] sm:$0xf]  ;;  %v6155_v5 = vld [vmem:[%s7638_s20 + $0x180] sm:$0xf]  ;;  %v6616_v46 = vld [vmem:[%s7638_s20 + $0x184] sm:$0xf0] }
 0x43c   : > { %4728 = vst.msk [vmem:[%s7829_s28 + $0xd0] sm:$0xff] %vm4701_vm0, %v4642_v56  ;;  %v4384_v63 = vmax.f32 %v3168_v10, %v4126_v39  ;;  %3209 = vmatmul.bf16.gmra.mxu1 %v5808_v30  ;;  %v8921_v30 = vld [vmem:[#allocation21_spill] sm:$0xff]  ;;  %v8922_v44 = vld [vmem:[#allocation22_spill] sm:$0xff]  ;;  %v5821_v39 = vld [vmem:[%s7630_s17 + $0x188] sm:$0xf0] }
 0x43d   : > { %v8923_v56 = vmax.f32 %v8921_v30, %v8922_v44 }
 0x43e   : > { %v4469_v58 = vmax.f32 %v8914_v22, %v4384_v63  ;;  %4167 = vmatmul.bf16.gmra.mxu3 %v6144_v24  ;;  %v3905_v1 = vpop.f32.mrf.mxu2  ;;  %v6615_v24 = vld [vmem:[%s7638_s20 + $0x184] sm:$0xf]  ;;  %v6157_v63 = vld [vmem:[%s7638_s20 + $0x188] sm:$0xf0] }
 0x440   : > { %v4558_v40 = vadd.f32 %v8099_v21, %v4469_v58  ;;  %v2949_v51 = vpop.f32.mrf.mxu0  ;;  %v5820_v58 = vor.u32 %v6532_v9, %v5819_v47  ;;  %v8930_v47 = vld [vmem:[#allocation27_spill] sm:$0xff]  ;;  %v8931_v9 = vld [vmem:[#allocation28_spill] sm:$0xff] }
 0x441   : > { %v4128_v29 = vpop.f32.mrf.mxu3  ;;  %v3172_v3 = vpop.f32.mrf.mxu1 }
 0x442   : > { %v4643_v35 = vmax.f32 %v4558_v40, 0.0  ;;  %v4129_v16 = vadd.f32 %v4128_v29, %v3905_v1  ;;  %v3173_v49 = vadd.f32 %v3172_v3, %v2949_v51  ;;  %v5824_v40 = vor.u32 %v6531_v14, %v5821_v39 }
 0x443   : > { %v6160_v3 = vor.u32 %v6615_v24, %v6157_v63  ;;  %v8932_v14 = vmax.f32 %v8930_v47, %v8931_v9 }
 0x444   : > { %4729 = vst.msk [vmem:[%s7829_s28 + $0xd8] sm:$0xff] %vm4701_vm0, %v4643_v35  ;;  %v4385_v31 = vmax.f32 %v3171_v62, %v4129_v16  ;;  %v6156_v62 = vor.u32 %v6616_v46, %v6155_v5 }
 0x446   : > { %v4470_v57 = vmax.f32 %v8917_v50, %v4385_v31  ;;  %v3907_v41 = vpop.f32.mrf.mxu2 }
 0x448   : > { %v4559_v27 = vadd.f32 %v8099_v21, %v4470_v57  ;;  %v2952_v34 = vpop.f32.mrf.mxu0 }
 0x449   : > { %v4130_v19 = vpop.f32.mrf.mxu3  ;;  %v3175_v59 = vpop.f32.mrf.mxu1 }
 0x44a   : > { %v4644_v20 = vmax.f32 %v4559_v27, 0.0  ;;  %v4131_v53 = vadd.f32 %v4130_v19, %v3907_v41  ;;  %v3176_v0 = vadd.f32 %v3175_v59, %v2952_v34  ;;  %v5827_v41 = vld [vmem:[%s7630_s17 + $0x190] sm:$0xf]  ;;  %v6534_v19 = vld [vmem:[%s7630_s17 + $0x194] sm:$0xf0] }
 0x44b   : > { %2991 = vmatmul.bf16.gmra.mxu0 %v5812_v6  ;;  %3949 = vmatmul.bf16.gmra.mxu2 %v6148_v15  ;;  %v6533_v6 = vld [vmem:[%s7630_s17 + $0x194] sm:$0xf]  ;;  %v8928_v15 = vld [vmem:[#allocation26_spill] sm:$0xff]  ;;  %v6163_v34 = vld [vmem:[%s7638_s20 + $0x190] sm:$0xf] }
 0x44c   : > { %4730 = vst.msk [vmem:[%s7829_s28 + $0xe0] sm:$0xff] %vm4701_vm0, %v4644_v20  ;;  %v4386_v17 = vmax.f32 %v3173_v49, %v4131_v53  ;;  %3214 = vmatmul.bf16.gmra.mxu1 %v5816_v13  ;;  %v8927_v13 = vld [vmem:[#allocation25_spill] sm:$0xff] }
 0x44d   : > { %v8929_v20 = vmax.f32 %v8927_v13, %v8928_v15  ;;  %v5829_v53 = vld [vmem:[%s7630_s17 + $0x198] sm:$0xf0]  ;;  %v6618_v59 = vld [vmem:[%s7638_s20 + $0x194] sm:$0xf0] }
 0x44e   : > { %v4471_v18 = vmax.f32 %v8920_v4, %v4386_v17  ;;  %4172 = vmatmul.bf16.gmra.mxu3 %v6152_v60  ;;  %v3910_v8 = vpop.f32.mrf.mxu2  ;;  %v6617_v60 = vld [vmem:[%s7638_s20 + $0x194] sm:$0xf]  ;;  %v6165_v17 = vld [vmem:[%s7638_s20 + $0x198] sm:$0xf0] }
 0x450   : > { %v4560_v33 = vadd.f32 %v8099_v21, %v4471_v18  ;;  %v2954_v25 = vpop.f32.mrf.mxu0  ;;  %v5828_v18 = vor.u32 %v6534_v19, %v5827_v41  ;;  %v8936_v41 = vld [vmem:[#allocation31_spill] sm:$0xff]  ;;  %v8937_v19 = vld [vmem:[#allocation32_spill] sm:$0xff] }
 0x451   : > { %v4133_v54 = vpop.f32.mrf.mxu3  ;;  %v3177_v42 = vpop.f32.mrf.mxu1 }
 0x452   : > { %v4645_v61 = vmax.f32 %v4560_v33, 0.0  ;;  %v4134_v32 = vadd.f32 %v4133_v54, %v3910_v8  ;;  %v3178_v29 = vadd.f32 %v3177_v42, %v2954_v25  ;;  %v5832_v33 = vor.u32 %v6533_v6, %v5829_v53 }
 0x453   : > { %v6168_v42 = vor.u32 %v6617_v60, %v6165_v17  ;;  %v8938_v6 = vmax.f32 %v8936_v41, %v8937_v19 }
 0x454   : > { %4731 = vst.msk [vmem:[%s7829_s28 + $0xe8] sm:$0xff] %vm4701_vm0, %v4645_v61  ;;  %v4387_v28 = vmax.f32 %v3176_v0, %v4134_v32  ;;  %v6164_v0 = vor.u32 %v6618_v59, %v6163_v34 }
 0x456   : > { %v4472_v10 = vmax.f32 %v8923_v56, %v4387_v28  ;;  %v3912_v7 = vpop.f32.mrf.mxu2 }
 0x458   : > { %v4561_v26 = vadd.f32 %v8099_v21, %v4472_v10  ;;  %v2957_v16 = vpop.f32.mrf.mxu0 }
 0x459   : > { %v4135_v22 = vpop.f32.mrf.mxu3  ;;  %v3180_v51 = vpop.f32.mrf.mxu1 }
 0x45a   : > { %v4646_v1 = vmax.f32 %v4561_v26, 0.0  ;;  %v4136_v35 = vadd.f32 %v4135_v22, %v3912_v7  ;;  %v3181_v50 = vadd.f32 %v3180_v51, %v2957_v16  ;;  %v5835_v7 = vld [vmem:[%s7630_s17 + $0x1a0] sm:$0xf]  ;;  %v6536_v22 = vld [vmem:[%s7630_s17 + $0x1a4] sm:$0xf0] }
 0x45b   : > { %2996 = vmatmul.bf16.gmra.mxu0 %v5820_v58  ;;  %3954 = vmatmul.bf16.gmra.mxu2 %v6156_v62  ;;  %v6535_v58 = vld [vmem:[%s7630_s17 + $0x1a4] sm:$0xf]  ;;  %v6171_v16 = vld [vmem:[%s7638_s20 + $0x1a0] sm:$0xf]  ;;  %v6620_v51 = vld [vmem:[%s7638_s20 + $0x1a4] sm:$0xf0] }
 0x45c   : > { %4732 = vst.msk [vmem:[%s7829_s28 + $0xf0] sm:$0xff] %vm4701_vm0, %v4646_v1  ;;  %v4388_v31 = vmax.f32 %v3178_v29, %v4136_v35  ;;  %3219 = vmatmul.bf16.gmra.mxu1 %v5824_v40  ;;  %v8933_v40 = vld [vmem:[#allocation29_spill] sm:$0xff]  ;;  %v8934_v62 = vld [vmem:[#allocation30_spill] sm:$0xff]  ;;  %v5837_v35 = vld [vmem:[%s7630_s17 + $0x1a8] sm:$0xf0] }
 0x45d   : > { %v8935_v1 = vmax.f32 %v8933_v40, %v8934_v62 }
 0x45e   : > { %v4473_v45 = vmax.f32 %v8926_v36, %v4388_v31  ;;  %4177 = vmatmul.bf16.gmra.mxu3 %v6160_v3  ;;  %v3915_v57 = vpop.f32.mrf.mxu2  ;;  %v6619_v3 = vld [vmem:[%s7638_s20 + $0x1a4] sm:$0xf]  ;;  %v6173_v31 = vld [vmem:[%s7638_s20 + $0x1a8] sm:$0xf0] }
 0x460   : > { %v4562_v37 = vadd.f32 %v8099_v21, %v4473_v45  ;;  %v2959_v2 = vpop.f32.mrf.mxu0  ;;  %v5836_v45 = vor.u32 %v6536_v22, %v5835_v7  ;;  %v8942_v7 = vld [vmem:[#allocation35_spill] sm:$0xff]  ;;  %v8943_v22 = vld [vmem:[#allocation36_spill] sm:$0xff] }
 0x461   : > { %v4138_v48 = vpop.f32.mrf.mxu3  ;;  %v3182_v23 = vpop.f32.mrf.mxu1 }
 0x462   : > { %v4647_v55 = vmax.f32 %v4562_v37, 0.0  ;;  %v4139_v38 = vadd.f32 %v4138_v48, %v3915_v57  ;;  %v3183_v54 = vadd.f32 %v3182_v23, %v2959_v2  ;;  %v5840_v37 = vor.u32 %v6535_v58, %v5837_v35 }
 0x463   : > { %v6176_v23 = vor.u32 %v6619_v3, %v6173_v31  ;;  %v8944_v58 = vmax.f32 %v8942_v7, %v8943_v22 }
 0x464   : > { %4733 = vst.msk [vmem:[%s7829_s28 + $0xf8] sm:$0xff] %vm4701_vm0, %v4647_v55  ;;  %v4389_v27 = vmax.f32 %v3181_v50, %v4139_v38  ;;  %v6172_v50 = vor.u32 %v6620_v51, %v6171_v16 }
 0x466   : > { %v4474_v49 = vmax.f32 %v8929_v20, %v4389_v27  ;;  %v3917_v52 = vpop.f32.mrf.mxu2 }
 0x468   : > { %v4563_v11 = vadd.f32 %v8099_v21, %v4474_v49  ;;  %v2962_v32 = vpop.f32.mrf.mxu0 }
 0x469   : > { %v4140_v4 = vpop.f32.mrf.mxu3  ;;  %v3185_v25 = vpop.f32.mrf.mxu1 }
 0x46a   : > { %v4648_v8 = vmax.f32 %v4563_v11, 0.0  ;;  %v4141_v61 = vadd.f32 %v4140_v4, %v3917_v52  ;;  %v3186_v56 = vadd.f32 %v3185_v25, %v2962_v32  ;;  %v5843_v52 = vld [vmem:[%s7630_s17 + $0x1b0] sm:$0xf]  ;;  %v6538_v4 = vld [vmem:[%s7630_s17 + $0x1b4] sm:$0xf0] }
 0x46b   : > { %3001 = vmatmul.bf16.gmra.mxu0 %v5828_v18  ;;  %3959 = vmatmul.bf16.gmra.mxu2 %v6164_v0  ;;  %v6537_v18 = vld [vmem:[%s7630_s17 + $0x1b4] sm:$0xf]  ;;  %v8940_v0 = vld [vmem:[#allocation34_spill] sm:$0xff]  ;;  %v6179_v32 = vld [vmem:[%s7638_s20 + $0x1b0] sm:$0xf] }
 0x46c   : > { %4734 = vst.msk [vmem:[%s7829_s28 + $0x100] sm:$0xff] %vm4701_vm0, %v4648_v8  ;;  %v4390_v28 = vmax.f32 %v3183_v54, %v4141_v61  ;;  %3224 = vmatmul.bf16.gmra.mxu1 %v5832_v33  ;;  %v8939_v33 = vld [vmem:[#allocation33_spill] sm:$0xff] }
 0x46d   : > { %v8941_v8 = vmax.f32 %v8939_v33, %v8940_v0  ;;  %v5845_v61 = vld [vmem:[%s7630_s17 + $0x1b8] sm:$0xf0]  ;;  %v6622_v25 = vld [vmem:[%s7638_s20 + $0x1b4] sm:$0xf0] }
 0x46e   : > { %v4475_v30 = vmax.f32 %v8932_v14, %v4390_v28  ;;  %4182 = vmatmul.bf16.gmra.mxu3 %v6168_v42  ;;  %v3920_v10 = vpop.f32.mrf.mxu2  ;;  %v6621_v42 = vld [vmem:[%s7638_s20 + $0x1b4] sm:$0xf]  ;;  %v6181_v28 = vld [vmem:[%s7638_s20 + $0x1b8] sm:$0xf0] }
 0x470   : > { %v4564_v44 = vadd.f32 %v8099_v21, %v4475_v30  ;;  %v2964_v24 = vpop.f32.mrf.mxu0  ;;  %v5844_v30 = vor.u32 %v6538_v4, %v5843_v52  ;;  %v8948_v52 = vld [vmem:[#allocation39_spill] sm:$0xff]  ;;  %v8949_v4 = vld [vmem:[#allocation40_spill] sm:$0xff] }
 0x471   : > { %v4143_v39 = vpop.f32.mrf.mxu3  ;;  %v3187_v63 = vpop.f32.mrf.mxu1 }
 0x472   : > { %v4649_v5 = vmax.f32 %v4564_v44, 0.0  ;;  %v4144_v46 = vadd.f32 %v4143_v39, %v3920_v10  ;;  %v3188_v48 = vadd.f32 %v3187_v63, %v2964_v24  ;;  %v5848_v44 = vor.u32 %v6537_v18, %v5845_v61 }
 0x473   : > { %v6184_v63 = vor.u32 %v6621_v42, %v6181_v28  ;;  %v8950_v18 = vmax.f32 %v8948_v52, %v8949_v4 }
 0x474   : > { %4735 = vst.msk [vmem:[%s7829_s28 + $0x108] sm:$0xff] %vm4701_vm0, %v4649_v5  ;;  %v4391_v26 = vmax.f32 %v3186_v56, %v4144_v46  ;;  %v6180_v56 = vor.u32 %v6622_v25, %v6179_v32 }
 0x476   : > { %v4476_v29 = vmax.f32 %v8935_v1, %v4391_v26  ;;  %v3922_v12 = vpop.f32.mrf.mxu2 }
 0x478   : > { %v4565_v43 = vadd.f32 %v8099_v21, %v4476_v29  ;;  %v2967_v38 = vpop.f32.mrf.mxu0 }
 0x479   : > { %v4145_v36 = vpop.f32.mrf.mxu3  ;;  %v3190_v2 = vpop.f32.mrf.mxu1 }
 0x47a   : > { %v4650_v57 = vmax.f32 %v4565_v43, 0.0  ;;  %v4146_v55 = vadd.f32 %v4145_v36, %v3922_v12  ;;  %v3191_v20 = vadd.f32 %v3190_v2, %v2967_v38  ;;  %v5851_v12 = vld [vmem:[%s7630_s17 + $0x1c0] sm:$0xf]  ;;  %v6540_v36 = vld [vmem:[%s7630_s17 + $0x1c4] sm:$0xf0] }
 0x47b   : > { %3006 = vmatmul.bf16.gmra.mxu0 %v5836_v45  ;;  %3964 = vmatmul.bf16.gmra.mxu2 %v6172_v50  ;;  %v6539_v45 = vld [vmem:[%s7630_s17 + $0x1c4] sm:$0xf]  ;;  %v6187_v38 = vld [vmem:[%s7638_s20 + $0x1c0] sm:$0xf]  ;;  %v6624_v2 = vld [vmem:[%s7638_s20 + $0x1c4] sm:$0xf0] }
 0x47c   : > { %4736 = vst.msk [vmem:[%s7829_s28 + $0x110] sm:$0xff] %vm4701_vm0, %v4650_v57  ;;  %v4392_v27 = vmax.f32 %v3188_v48, %v4146_v55  ;;  %3229 = vmatmul.bf16.gmra.mxu1 %v5840_v37  ;;  %v8945_v37 = vld [vmem:[#allocation37_spill] sm:$0xff]  ;;  %v8946_v50 = vld [vmem:[#allocation38_spill] sm:$0xff]  ;;  %v5853_v55 = vld [vmem:[%s7630_s17 + $0x1c8] sm:$0xf0] }
 0x47d   : > { %v8947_v57 = vmax.f32 %v8945_v37, %v8946_v50 }
 0x47e   : > { %v4477_v13 = vmax.f32 %v8938_v6, %v4392_v27  ;;  %4187 = vmatmul.bf16.gmra.mxu3 %v6176_v23  ;;  %v3925_v49 = vpop.f32.mrf.mxu2  ;;  %v6623_v23 = vld [vmem:[%s7638_s20 + $0x1c4] sm:$0xf]  ;;  %v6189_v27 = vld [vmem:[%s7638_s20 + $0x1c8] sm:$0xf0] }
 0x480   : > { %v4566_v15 = vadd.f32 %v8099_v21, %v4477_v13  ;;  %v2969_v60 = vpop.f32.mrf.mxu0  ;;  %v5852_v13 = vor.u32 %v6540_v36, %v5851_v12  ;;  %v8954_v12 = vld [vmem:[#allocation43_spill] sm:$0xff]  ;;  %v8955_v36 = vld [vmem:[#allocation44_spill] sm:$0xff] }
 0x481   : > { %v4148_v53 = vpop.f32.mrf.mxu3  ;;  %v3192_v17 = vpop.f32.mrf.mxu1 }
 0x482   : > { %v4651_v34 = vmax.f32 %v4566_v15, 0.0  ;;  %v4149_v59 = vadd.f32 %v4148_v53, %v3925_v49  ;;  %v3193_v39 = vadd.f32 %v3192_v17, %v2969_v60  ;;  %v5856_v15 = vor.u32 %v6539_v45, %v5853_v55 }
 0x483   : > { %v6192_v17 = vor.u32 %v6623_v23, %v6189_v27  ;;  %v8956_v45 = vmax.f32 %v8954_v12, %v8955_v36 }
 0x484   : > { %4737 = vst.msk [vmem:[%s7829_s28 + $0x118] sm:$0xff] %vm4701_vm0, %v4651_v34  ;;  %v4393_v11 = vmax.f32 %v3191_v20, %v4149_v59  ;;  %v6188_v20 = vor.u32 %v6624_v2, %v6187_v38 }
 0x486   : > { %v4478_v54 = vmax.f32 %v8941_v8, %v4393_v11  ;;  %v3927_v9 = vpop.f32.mrf.mxu2 }
 0x488   : > { %v4567_v47 = vadd.f32 %v8099_v21, %v4478_v54  ;;  %v2972_v46 = vpop.f32.mrf.mxu0 }
 0x489   : > { %v4150_v14 = vpop.f32.mrf.mxu3  ;;  %v3195_v24 = vpop.f32.mrf.mxu1 }
 0x48a   : > { %v4652_v10 = vmax.f32 %v4567_v47, 0.0  ;;  %v4151_v5 = vadd.f32 %v4150_v14, %v3927_v9  ;;  %v3196_v1 = vadd.f32 %v3195_v24, %v2972_v46  ;;  %v5859_v9 = vld [vmem:[%s7630_s17 + $0x1d0] sm:$0xf]  ;;  %v6542_v14 = vld [vmem:[%s7630_s17 + $0x1d4] sm:$0xf0] }
 0x48b   : > { %3011 = vmatmul.bf16.gmra.mxu0 %v5844_v30  ;;  %3969 = vmatmul.bf16.gmra.mxu2 %v6180_v56  ;;  %v6541_v30 = vld [vmem:[%s7630_s17 + $0x1d4] sm:$0xf]  ;;  %v8952_v56 = vld [vmem:[#allocation42_spill] sm:$0xff]  ;;  %v6195_v46 = vld [vmem:[%s7638_s20 + $0x1d0] sm:$0xf] }
 0x48c   : > { %4738 = vst.msk [vmem:[%s7829_s28 + $0x120] sm:$0xff] %vm4701_vm0, %v4652_v10  ;;  %v4394_v26 = vmax.f32 %v3193_v39, %v4151_v5  ;;  %3234 = vmatmul.bf16.gmra.mxu1 %v5848_v44  ;;  %v8951_v44 = vld [vmem:[#allocation41_spill] sm:$0xff] }
 0x48d   : > { %v8953_v10 = vmax.f32 %v8951_v44, %v8952_v56  ;;  %v5861_v5 = vld [vmem:[%s7630_s17 + $0x1d8] sm:$0xf0]  ;;  %v6626_v24 = vld [vmem:[%s7638_s20 + $0x1d4] sm:$0xf0] }
 0x48e   : > { %v4479_v40 = vmax.f32 %v8944_v58, %v4394_v26  ;;  %4192 = vmatmul.bf16.gmra.mxu3 %v6184_v63  ;;  %v3930_v29 = vpop.f32.mrf.mxu2  ;;  %v6625_v63 = vld [vmem:[%s7638_s20 + $0x1d4] sm:$0xf]  ;;  %v6197_v26 = vld [vmem:[%s7638_s20 + $0x1d8] sm:$0xf0] }
 0x490   : > { %v4568_v62 = vadd.f32 %v8099_v21, %v4479_v40  ;;  %v2974_v3 = vpop.f32.mrf.mxu0  ;;  %v5860_v40 = vor.u32 %v6542_v14, %v5859_v9  ;;  %v8960_v9 = vld [vmem:[#allocation47_spill] sm:$0xff]  ;;  %v8961_v14 = vld [vmem:[#allocation48_spill] sm:$0xff] }
 0x491   : > { %v4153_v35 = vpop.f32.mrf.mxu3  ;;  %v3197_v31 = vpop.f32.mrf.mxu1 }
 0x492   : > { %v4653_v16 = vmax.f32 %v4568_v62, 0.0  ;;  %v4154_v51 = vadd.f32 %v4153_v35, %v3930_v29  ;;  %v3198_v53 = vadd.f32 %v3197_v31, %v2974_v3  ;;  %v5864_v62 = vor.u32 %v6541_v30, %v5861_v5 }
 0x493   : > { %v6200_v31 = vor.u32 %v6625_v63, %v6197_v26  ;;  %v8962_v30 = vmax.f32 %v8960_v9, %v8961_v14 }
 0x494   : > { %4739 = vst.msk [vmem:[%s7829_s28 + $0x128] sm:$0xff] %vm4701_vm0, %v4653_v16  ;;  %v4395_v43 = vmax.f32 %v3196_v1, %v4154_v51  ;;  %v6196_v1 = vor.u32 %v6626_v24, %v6195_v46 }
 0x496   : > { %v4480_v48 = vmax.f32 %v8947_v57, %v4395_v43  ;;  %v3932_v19 = vpop.f32.mrf.mxu2 }
 0x498   : > { %v4569_v41 = vadd.f32 %v8099_v21, %v4480_v48  ;;  %v2977_v59 = vpop.f32.mrf.mxu0 }
 0x499   : > { %v4155_v6 = vpop.f32.mrf.mxu3  ;;  %v3200_v60 = vpop.f32.mrf.mxu1 }
 0x49a   : > { %v4654_v49 = vmax.f32 %v4569_v41, 0.0  ;;  %v4156_v34 = vadd.f32 %v4155_v6, %v3932_v19  ;;  %v3201_v8 = vadd.f32 %v3200_v60, %v2977_v59  ;;  %v5867_v19 = vld [vmem:[%s7630_s17 + $0x1e0] sm:$0xf]  ;;  %v6544_v6 = vld [vmem:[%s7630_s17 + $0x1e4] sm:$0xf0] }
 0x49b   : > { %3016 = vmatmul.bf16.gmra.mxu0 %v5852_v13  ;;  %3974 = vmatmul.bf16.gmra.mxu2 %v6188_v20  ;;  %v6543_v13 = vld [vmem:[%s7630_s17 + $0x1e4] sm:$0xf]  ;;  %v6203_v59 = vld [vmem:[%s7638_s20 + $0x1e0] sm:$0xf]  ;;  %v6628_v60 = vld [vmem:[%s7638_s20 + $0x1e4] sm:$0xf0] }
 0x49c   : > { %4740 = vst.msk [vmem:[%s7829_s28 + $0x130] sm:$0xff] %vm4701_vm0, %v4654_v49  ;;  %v4396_v11 = vmax.f32 %v3198_v53, %v4156_v34  ;;  %3239 = vmatmul.bf16.gmra.mxu1 %v5856_v15  ;;  %v8957_v15 = vld [vmem:[#allocation45_spill] sm:$0xff]  ;;  %v8958_v20 = vld [vmem:[#allocation46_spill] sm:$0xff]  ;;  %v5869_v34 = vld [vmem:[%s7630_s17 + $0x1e8] sm:$0xf0] }
 0x49d   : > { %v8959_v49 = vmax.f32 %v8957_v15, %v8958_v20 }
 0x49e   : > { %v4481_v33 = vmax.f32 %v8950_v18, %v4396_v11  ;;  %4197 = vmatmul.bf16.gmra.mxu3 %v6192_v17  ;;  %v3935_v54 = vpop.f32.mrf.mxu2  ;;  %v6627_v17 = vld [vmem:[%s7638_s20 + $0x1e4] sm:$0xf]  ;;  %v6205_v11 = vld [vmem:[%s7638_s20 + $0x1e8] sm:$0xf0] }
 0x4a0   : > { %v4570_v0 = vadd.f32 %v8099_v21, %v4481_v33  ;;  %v2979_v42 = vpop.f32.mrf.mxu0  ;;  %v5868_v33 = vor.u32 %v6544_v6, %v5867_v19  ;;  %v8966_v19 = vld [vmem:[#allocation51_spill] sm:$0xff]  ;;  %v8967_v6 = vld [vmem:[#allocation52_spill] sm:$0xff] }
 0x4a1   : > { %v4158_v61 = vpop.f32.mrf.mxu3  ;;  %v3202_v28 = vpop.f32.mrf.mxu1 }
 0x4a2   : > { %v4655_v32 = vmax.f32 %v4570_v0, 0.0  ;;  %v4159_v25 = vadd.f32 %v4158_v61, %v3935_v54  ;;  %v3203_v35 = vadd.f32 %v3202_v28, %v2979_v42  ;;  %v5872_v0 = vor.u32 %v6543_v13, %v5869_v34 }
 0x4a3   : > { %v6208_v28 = vor.u32 %v6627_v17, %v6205_v11  ;;  %v8968_v13 = vmax.f32 %v8966_v19, %v8967_v6 }
 0x4a4   : > { %4741 = vst.msk [vmem:[%s7829_s28 + $0x138] sm:$0xff] %vm4701_vm0, %v4655_v32  ;;  %v4397_v47 = vmax.f32 %v3201_v8, %v4159_v25  ;;  %v6204_v8 = vor.u32 %v6628_v60, %v6203_v59 }
 0x4a6   : > { %v4482_v39 = vmax.f32 %v8953_v10, %v4397_v47  ;;  %v3937_v22 = vpop.f32.mrf.mxu2 }
 0x4a8   : > { %v4571_v7 = vadd.f32 %v8099_v21, %v4482_v39  ;;  %v2982_v51 = vpop.f32.mrf.mxu0 }
 0x4a9   : > { %v4160_v58 = vpop.f32.mrf.mxu3  ;;  %v3205_v3 = vpop.f32.mrf.mxu1 }
 0x4aa   : > { %v4656_v29 = vmax.f32 %v4571_v7, 0.0  ;;  %v4161_v16 = vadd.f32 %v4160_v58, %v3937_v22  ;;  %v3206_v57 = vadd.f32 %v3205_v3, %v2982_v51  ;;  %v5875_v22 = vld [vmem:[%s7630_s17 + $0x1f0] sm:$0xf]  ;;  %v6546_v58 = vld [vmem:[%s7630_s17 + $0x1f4] sm:$0xf0] }
 0x4ab   : > { %3021 = vmatmul.bf16.gmra.mxu0 %v5860_v40  ;;  %3979 = vmatmul.bf16.gmra.mxu2 %v6196_v1  ;;  %v6545_v40 = vld [vmem:[%s7630_s17 + $0x1f4] sm:$0xf]  ;;  %v8964_v1 = vld [vmem:[#allocation50_spill] sm:$0xff]  ;;  %v6211_v51 = vld [vmem:[%s7638_s20 + $0x1f0] sm:$0xf] }
 0x4ac   : > { %4742 = vst.msk [vmem:[%s7829_s28 + $0x140] sm:$0xff] %vm4701_vm0, %v4656_v29  ;;  %v4398_v43 = vmax.f32 %v3203_v35, %v4161_v16  ;;  %3244 = vmatmul.bf16.gmra.mxu1 %v5864_v62  ;;  %v8963_v62 = vld [vmem:[#allocation49_spill] sm:$0xff] }
 0x4ad   : > { %v8965_v29 = vmax.f32 %v8963_v62, %v8964_v1  ;;  %v5877_v16 = vld [vmem:[%s7630_s17 + $0x1f8] sm:$0xf0]  ;;  %v6630_v3 = vld [vmem:[%s7638_s20 + $0x1f4] sm:$0xf0] }
 0x4ae   : > { %v4483_v37 = vmax.f32 %v8956_v45, %v4398_v43  ;;  %4202 = vmatmul.bf16.gmra.mxu3 %v6200_v31  ;;  %v3940_v48 = vpop.f32.mrf.mxu2  ;;  %v6629_v31 = vld [vmem:[%s7638_s20 + $0x1f4] sm:$0xf]  ;;  %v6213_v43 = vld [vmem:[%s7638_s20 + $0x1f8] sm:$0xf0] }
 0x4b0   : > { %v4572_v50 = vadd.f32 %v8099_v21, %v4483_v37  ;;  %v2984_v23 = vpop.f32.mrf.mxu0  ;;  %v5876_v37 = vor.u32 %v6546_v58, %v5875_v22  ;;  %v8972_v22 = vld [vmem:[#allocation55_spill] sm:$0xff]  ;;  %v8973_v58 = vld [vmem:[#allocation56_spill] sm:$0xff] }
 0x4b1   : > { %v4163_v55 = vpop.f32.mrf.mxu3  ;;  %v3207_v27 = vpop.f32.mrf.mxu1 }
 0x4b2   : > { %v4657_v38 = vmax.f32 %v4572_v50, 0.0  ;;  %v4164_v2 = vadd.f32 %v4163_v55, %v3940_v48  ;;  %v3208_v61 = vadd.f32 %v3207_v27, %v2984_v23  ;;  %v5880_v50 = vor.u32 %v6545_v40, %v5877_v16 }
 0x4b3   : > { %v6216_v27 = vor.u32 %v6629_v31, %v6213_v43  ;;  %v8974_v40 = vmax.f32 %v8972_v22, %v8973_v58 }
 0x4b4   : > { %4743 = vst.msk [vmem:[%s7829_s28 + $0x148] sm:$0xff] %vm4701_vm0, %v4657_v38  ;;  %v4399_v41 = vmax.f32 %v3206_v57, %v4164_v2  ;;  %v6212_v57 = vor.u32 %v6630_v3, %v6211_v51 }
 0x4b6   : > { %v4484_v53 = vmax.f32 %v8959_v49, %v4399_v41  ;;  %v3942_v4 = vpop.f32.mrf.mxu2 }
 0x4b8   : > { %v4573_v52 = vadd.f32 %v8099_v21, %v4484_v53  ;;  %v2987_v25 = vpop.f32.mrf.mxu0 }
 0x4b9   : > { %v4165_v18 = vpop.f32.mrf.mxu3  ;;  %v3210_v42 = vpop.f32.mrf.mxu1 }
 0x4ba   : > { %v4658_v54 = vmax.f32 %v4573_v52, 0.0  ;;  %v4166_v32 = vadd.f32 %v4165_v18, %v3942_v4  ;;  %v3211_v10 = vadd.f32 %v3210_v42, %v2987_v25  ;;  %v5883_v4 = vld [vmem:[%s7630_s17 + $0x200] sm:$0xf]  ;;  %v6548_v18 = vld [vmem:[%s7630_s17 + $0x204] sm:$0xf0] }
 0x4bb   : > { %3026 = vmatmul.bf16.gmra.mxu0 %v5868_v33  ;;  %3984 = vmatmul.bf16.gmra.mxu2 %v6204_v8  ;;  %v6547_v33 = vld [vmem:[%s7630_s17 + $0x204] sm:$0xf]  ;;  %v6219_v25 = vld [vmem:[%s7638_s20 + $0x200] sm:$0xf]  ;;  %v6632_v42 = vld [vmem:[%s7638_s20 + $0x204] sm:$0xf0] }
 0x4bc   : > { %4744 = vst.msk [vmem:[%s7829_s28 + $0x150] sm:$0xff] %vm4701_vm0, %v4658_v54  ;;  %v4400_v47 = vmax.f32 %v3208_v61, %v4166_v32  ;;  %3249 = vmatmul.bf16.gmra.mxu1 %v5872_v0  ;;  %v8969_v0 = vld [vmem:[#allocation53_spill] sm:$0xff]  ;;  %v8970_v8 = vld [vmem:[#allocation54_spill] sm:$0xff]  ;;  %v5885_v32 = vld [vmem:[%s7630_s17 + $0x208] sm:$0xf0] }
 0x4bd   : > { %v8971_v54 = vmax.f32 %v8969_v0, %v8970_v8 }
 0x4be   : > { %v4485_v44 = vmax.f32 %v8962_v30, %v4400_v47  ;;  %4207 = vmatmul.bf16.gmra.mxu3 %v6208_v28  ;;  %v3945_v39 = vpop.f32.mrf.mxu2  ;;  %v6631_v28 = vld [vmem:[%s7638_s20 + $0x204] sm:$0xf]  ;;  %v6221_v47 = vld [vmem:[%s7638_s20 + $0x208] sm:$0xf0] }
 0x4c0   : > { %v4574_v56 = vadd.f32 %v8099_v21, %v4485_v44  ;;  %v2989_v63 = vpop.f32.mrf.mxu0  ;;  %v5884_v44 = vor.u32 %v6548_v18, %v5883_v4  ;;  %v8978_v4 = vld [vmem:[#allocation59_spill] sm:$0xff]  ;;  %v8979_v18 = vld [vmem:[#allocation60_spill] sm:$0xff] }
 0x4c1   : > { %v4168_v5 = vpop.f32.mrf.mxu3  ;;  %v3212_v26 = vpop.f32.mrf.mxu1 }
 0x4c2   : > { %v4659_v46 = vmax.f32 %v4574_v56, 0.0  ;;  %v4169_v24 = vadd.f32 %v4168_v5, %v3945_v39  ;;  %v3213_v55 = vadd.f32 %v3212_v26, %v2989_v63  ;;  %v5888_v56 = vor.u32 %v6547_v33, %v5885_v32 }
 0x4c3   : > { %v6224_v26 = vor.u32 %v6631_v28, %v6221_v47  ;;  %v8980_v33 = vmax.f32 %v8978_v4, %v8979_v18 }
 0x4c4   : > { %4745 = vst.msk [vmem:[%s7829_s28 + $0x158] sm:$0xff] %vm4701_vm0, %v4659_v46  ;;  %v4401_v7 = vmax.f32 %v3211_v10, %v4169_v24  ;;  %v6220_v10 = vor.u32 %v6632_v42, %v6219_v25 }
 0x4c6   : > { %v4486_v35 = vmax.f32 %v8965_v29, %v4401_v7  ;;  %v3947_v36 = vpop.f32.mrf.mxu2 }
 0x4c8   : > { %v4575_v12 = vadd.f32 %v8099_v21, %v4486_v35  ;;  %v2992_v2 = vpop.f32.mrf.mxu0 }
 0x4c9   : > { %v4170_v45 = vpop.f32.mrf.mxu3  ;;  %v3215_v23 = vpop.f32.mrf.mxu1 }
 0x4ca   : > { %v4660_v48 = vmax.f32 %v4575_v12, 0.0  ;;  %v4171_v38 = vadd.f32 %v4170_v45, %v3947_v36  ;;  %v3216_v49 = vadd.f32 %v3215_v23, %v2992_v2  ;;  %v5891_v36 = vld [vmem:[%s7630_s17 + $0x210] sm:$0xf]  ;;  %v6550_v45 = vld [vmem:[%s7630_s17 + $0x214] sm:$0xf0] }
 0x4cb   : > { %3031 = vmatmul.bf16.gmra.mxu0 %v5876_v37  ;;  %3989 = vmatmul.bf16.gmra.mxu2 %v6212_v57  ;;  %v6549_v37 = vld [vmem:[%s7630_s17 + $0x214] sm:$0xf]  ;;  %v8976_v57 = vld [vmem:[#allocation58_spill] sm:$0xff]  ;;  %v6227_v2 = vld [vmem:[%s7638_s20 + $0x210] sm:$0xf] }
 0x4cc   : > { %4746 = vst.msk [vmem:[%s7829_s28 + $0x160] sm:$0xff] %vm4701_vm0, %v4660_v48  ;;  %v4402_v41 = vmax.f32 %v3213_v55, %v4171_v38  ;;  %3254 = vmatmul.bf16.gmra.mxu1 %v5880_v50  ;;  %v8975_v50 = vld [vmem:[#allocation57_spill] sm:$0xff] }
 0x4cd   : > { %v8977_v48 = vmax.f32 %v8975_v50, %v8976_v57  ;;  %v5893_v38 = vld [vmem:[%s7630_s17 + $0x218] sm:$0xf0]  ;;  %v6634_v23 = vld [vmem:[%s7638_s20 + $0x214] sm:$0xf0] }
 0x4ce   : > { %v4487_v15 = vmax.f32 %v8968_v13, %v4402_v41  ;;  %4212 = vmatmul.bf16.gmra.mxu3 %v6216_v27  ;;  %v3950_v53 = vpop.f32.mrf.mxu2  ;;  %v6633_v27 = vld [vmem:[%s7638_s20 + $0x214] sm:$0xf]  ;;  %v6229_v41 = vld [vmem:[%s7638_s20 + $0x218] sm:$0xf0] }
 0x4d0   : > { %v4576_v20 = vadd.f32 %v8099_v21, %v4487_v15  ;;  %v2994_v17 = vpop.f32.mrf.mxu0  ;;  %v5892_v15 = vor.u32 %v6550_v45, %v5891_v36  ;;  %v8984_v36 = vld [vmem:[#allocation63_spill] sm:$0xff]  ;;  %v8985_v45 = vld [vmem:[#allocation64_spill] sm:$0xff] }
 0x4d1   : > { %v4173_v34 = vpop.f32.mrf.mxu3  ;;  %v3217_v11 = vpop.f32.mrf.mxu1 }
 0x4d2   : > { %v4661_v59 = vmax.f32 %v4576_v20, 0.0  ;;  %v4174_v60 = vadd.f32 %v4173_v34, %v3950_v53  ;;  %v3218_v5 = vadd.f32 %v3217_v11, %v2994_v17  ;;  %v5896_v20 = vor.u32 %v6549_v37, %v5893_v38 }
 0x4d3   : > { %v6232_v11 = vor.u32 %v6633_v27, %v6229_v41  ;;  %v8986_v37 = vmax.f32 %v8984_v36, %v8985_v45 }
 0x4d4   : > { %4747 = vst.msk [vmem:[%s7829_s28 + $0x168] sm:$0xff] %vm4701_vm0, %v4661_v59  ;;  %v4403_v52 = vmax.f32 %v3216_v49, %v4174_v60  ;;  %v6228_v49 = vor.u32 %v6634_v23, %v6227_v2 }
 0x4d6   : > { %v4488_v61 = vmax.f32 %v8971_v54, %v4403_v52  ;;  %v3952_v14 = vpop.f32.mrf.mxu2 }
 0x4d8   : > { %v4577_v9 = vadd.f32 %v8099_v21, %v4488_v61  ;;  %v2997_v24 = vpop.f32.mrf.mxu0 }
 0x4d9   : > { %v4175_v30 = vpop.f32.mrf.mxu3  ;;  %v3220_v63 = vpop.f32.mrf.mxu1 }
 0x4da   : > { %v4662_v39 = vmax.f32 %v4577_v9, 0.0  ;;  %v4176_v46 = vadd.f32 %v4175_v30, %v3952_v14  ;;  %v3221_v29 = vadd.f32 %v3220_v63, %v2997_v24  ;;  %v5899_v14 = vld [vmem:[%s7630_s17 + $0x220] sm:$0xf]  ;;  %v6552_v30 = vld [vmem:[%s7630_s17 + $0x224] sm:$0xf0] }
 0x4db   : > { %3036 = vmatmul.bf16.gmra.mxu0 %v5884_v44  ;;  %3994 = vmatmul.bf16.gmra.mxu2 %v6220_v10  ;;  %v6551_v44 = vld [vmem:[%s7630_s17 + $0x224] sm:$0xf]  ;;  %v6235_v24 = vld [vmem:[%s7638_s20 + $0x220] sm:$0xf]  ;;  %v6636_v63 = vld [vmem:[%s7638_s20 + $0x224] sm:$0xf0] }
 0x4dc   : > { %4748 = vst.msk [vmem:[%s7829_s28 + $0x170] sm:$0xff] %vm4701_vm0, %v4662_v39  ;;  %v4404_v7 = vmax.f32 %v3218_v5, %v4176_v46  ;;  %3259 = vmatmul.bf16.gmra.mxu1 %v5888_v56  ;;  %v8981_v56 = vld [vmem:[#allocation61_spill] sm:$0xff]  ;;  %v8982_v10 = vld [vmem:[#allocation62_spill] sm:$0xff]  ;;  %v5901_v46 = vld [vmem:[%s7630_s17 + $0x228] sm:$0xf0] }
 0x4dd   : > { %v8983_v39 = vmax.f32 %v8981_v56, %v8982_v10 }
 0x4de   : > { %v4489_v62 = vmax.f32 %v8974_v40, %v4404_v7  ;;  %4217 = vmatmul.bf16.gmra.mxu3 %v6224_v26  ;;  %v3955_v35 = vpop.f32.mrf.mxu2  ;;  %v6635_v26 = vld [vmem:[%s7638_s20 + $0x224] sm:$0xf]  ;;  %v6237_v7 = vld [vmem:[%s7638_s20 + $0x228] sm:$0xf0] }
 0x4e0   : > { %v4578_v1 = vadd.f32 %v8099_v21, %v4489_v62  ;;  %v2999_v31 = vpop.f32.mrf.mxu0  ;;  %v5900_v62 = vor.u32 %v6552_v30, %v5899_v14  ;;  %v8990_v14 = vld [vmem:[#allocation67_spill] sm:$0xff]  ;;  %v8991_v30 = vld [vmem:[#allocation68_spill] sm:$0xff] }
 0x4e1   : > { %v4178_v16 = vpop.f32.mrf.mxu3  ;;  %v3222_v43 = vpop.f32.mrf.mxu1 }
 0x4e2   : > { %v4663_v51 = vmax.f32 %v4578_v1, 0.0  ;;  %v4179_v3 = vadd.f32 %v4178_v16, %v3955_v35  ;;  %v3223_v34 = vadd.f32 %v3222_v43, %v2999_v31  ;;  %v5904_v1 = vor.u32 %v6551_v44, %v5901_v46 }
 0x4e3   : > { %v6240_v43 = vor.u32 %v6635_v26, %v6237_v7  ;;  %v8992_v44 = vmax.f32 %v8990_v14, %v8991_v30 }
 0x4e4   : > { %4749 = vst.msk [vmem:[%s7829_s28 + $0x178] sm:$0xff] %vm4701_vm0, %v4663_v51  ;;  %v4405_v12 = vmax.f32 %v3221_v29, %v4179_v3  ;;  %v6236_v29 = vor.u32 %v6636_v63, %v6235_v24 }
 0x4e6   : > { %v4490_v55 = vmax.f32 %v8977_v48, %v4405_v12  ;;  %v3957_v6 = vpop.f32.mrf.mxu2 }
 0x4e8   : > { %v4579_v19 = vadd.f32 %v8099_v21, %v4490_v55  ;;  %v3002_v60 = vpop.f32.mrf.mxu0 }
 0x4e9   : > { %v4180_v13 = vpop.f32.mrf.mxu3  ;;  %v3225_v17 = vpop.f32.mrf.mxu1 }
 0x4ea   : > { %v4664_v53 = vmax.f32 %v4579_v19, 0.0  ;;  %v4181_v59 = vadd.f32 %v4180_v13, %v3957_v6  ;;  %v3226_v54 = vadd.f32 %v3225_v17, %v3002_v60  ;;  %v5907_v6 = vld [vmem:[%s7630_s17 + $0x230] sm:$0xf]  ;;  %v6554_v13 = vld [vmem:[%s7630_s17 + $0x234] sm:$0xf0] }
 0x4eb   : > { %3041 = vmatmul.bf16.gmra.mxu0 %v5892_v15  ;;  %3999 = vmatmul.bf16.gmra.mxu2 %v6228_v49  ;;  %v6553_v15 = vld [vmem:[%s7630_s17 + $0x234] sm:$0xf]  ;;  %v8988_v49 = vld [vmem:[#allocation66_spill] sm:$0xff]  ;;  %v6243_v60 = vld [vmem:[%s7638_s20 + $0x230] sm:$0xf] }
 0x4ec   : > { %4750 = vst.msk [vmem:[%s7829_s28 + $0x180] sm:$0xff] %vm4701_vm0, %v4664_v53  ;;  %v4406_v52 = vmax.f32 %v3223_v34, %v4181_v59  ;;  %3264 = vmatmul.bf16.gmra.mxu1 %v5896_v20  ;;  %v8987_v20 = vld [vmem:[#allocation65_spill] sm:$0xff] }
 0x4ed   : > { %v8989_v53 = vmax.f32 %v8987_v20, %v8988_v49  ;;  %v5909_v59 = vld [vmem:[%s7630_s17 + $0x238] sm:$0xf0]  ;;  %v6638_v17 = vld [vmem:[%s7638_s20 + $0x234] sm:$0xf0] }
 0x4ee   : > { %v4491_v0 = vmax.f32 %v8980_v33, %v4406_v52  ;;  %4222 = vmatmul.bf16.gmra.mxu3 %v6232_v11  ;;  %v3960_v61 = vpop.f32.mrf.mxu2  ;;  %v6637_v11 = vld [vmem:[%s7638_s20 + $0x234] sm:$0xf]  ;;  %v6245_v52 = vld [vmem:[%s7638_s20 + $0x238] sm:$0xf0] }
 0x4f0   : > { %v4580_v8 = vadd.f32 %v8099_v21, %v4491_v0  ;;  %v3004_v28 = vpop.f32.mrf.mxu0  ;;  %v5908_v0 = vor.u32 %v6554_v13, %v5907_v6  ;;  %v8996_v6 = vld [vmem:[#allocation71_spill] sm:$0xff]  ;;  %v8997_v13 = vld [vmem:[#allocation72_spill] sm:$0xff] }
 0x4f1   : > { %v4183_v32 = vpop.f32.mrf.mxu3  ;;  %v3227_v47 = vpop.f32.mrf.mxu1 }
 0x4f2   : > { %v4665_v25 = vmax.f32 %v4580_v8, 0.0  ;;  %v4184_v42 = vadd.f32 %v4183_v32, %v3960_v61  ;;  %v3228_v16 = vadd.f32 %v3227_v47, %v3004_v28  ;;  %v5912_v8 = vor.u32 %v6553_v15, %v5909_v59 }
 0x4f3   : > { %v6248_v47 = vor.u32 %v6637_v11, %v6245_v52  ;;  %v8998_v15 = vmax.f32 %v8996_v6, %v8997_v13 }
 0x4f4   : > { %4751 = vst.msk [vmem:[%s7829_s28 + $0x188] sm:$0xff] %vm4701_vm0, %v4665_v25  ;;  %v4407_v9 = vmax.f32 %v3226_v54, %v4184_v42  ;;  %v6244_v54 = vor.u32 %v6638_v17, %v6243_v60 }
 0x4f6   : > { %v4492_v5 = vmax.f32 %v8983_v39, %v4407_v9  ;;  %v3962_v58 = vpop.f32.mrf.mxu2 }
 0x4f8   : > { %v4581_v22 = vadd.f32 %v8099_v21, %v4492_v5  ;;  %v3007_v3 = vpop.f32.mrf.mxu0 }
 0x4f9   : > { %v4185_v40 = vpop.f32.mrf.mxu3  ;;  %v3230_v31 = vpop.f32.mrf.mxu1 }
 0x4fa   : > { %v4666_v35 = vmax.f32 %v4581_v22, 0.0  ;;  %v4186_v51 = vadd.f32 %v4185_v40, %v3962_v58  ;;  %v3231_v48 = vadd.f32 %v3230_v31, %v3007_v3  ;;  %v5915_v58 = vld [vmem:[%s7630_s17 + $0x240] sm:$0xf]  ;;  %v6556_v40 = vld [vmem:[%s7630_s17 + $0x244] sm:$0xf0] }
 0x4fb   : > { %3046 = vmatmul.bf16.gmra.mxu0 %v5900_v62  ;;  %4004 = vmatmul.bf16.gmra.mxu2 %v6236_v29  ;;  %v6555_v62 = vld [vmem:[%s7630_s17 + $0x244] sm:$0xf]  ;;  %v6640_v3 = vld [vmem:[%s7638_s20 + $0x244] sm:$0xf0] }
 0x4fc   : > { %4752 = vst.msk [vmem:[%s7829_s28 + $0x190] sm:$0xff] %vm4701_vm0, %v4666_v35  ;;  %v4408_v12 = vmax.f32 %v3228_v16, %v4186_v51  ;;  %3269 = vmatmul.bf16.gmra.mxu1 %v5904_v1  ;;  %v8993_v1 = vld [vmem:[#allocation69_spill] sm:$0xff]  ;;  %v8994_v29 = vld [vmem:[#allocation70_spill] sm:$0xff]  ;;  %v5917_v16 = vld [vmem:[%s7630_s17 + $0x248] sm:$0xf0] }
 0x4fd   : > { %v8995_v35 = vmax.f32 %v8993_v1, %v8994_v29  ;;  %v6251_v51 = vld [vmem:[%s7638_s20 + $0x240] sm:$0xf]  ;;  %v6639_v31 = vld [vmem:[%s7638_s20 + $0x244] sm:$0xf] }
 0x4fe   : > { %v4493_v50 = vmax.f32 %v8986_v37, %v4408_v12  ;;  %4227 = vmatmul.bf16.gmra.mxu3 %v6240_v43  ;;  %v3965_v55 = vpop.f32.mrf.mxu2  ;;  %v6253_v43 = vld [vmem:[%s7638_s20 + $0x248] sm:$0xf0]  ;;  %v8378_v12 = vld [vmem:[%s8612_s5] ss:$0 sm:$0xff] }
 0x500   : > { %v4582_v57 = vadd.f32 %v8099_v21, %v4493_v50  ;;  %v3009_v27 = vpop.f32.mrf.mxu0  ;;  %v5916_v50 = vor.u32 %v6556_v40, %v5915_v58  ;;  %v9002_v58 = vld [vmem:[#allocation75_spill] sm:$0xff]  ;;  %v9003_v40 = vld [vmem:[#allocation76_spill] sm:$0xff] }
 0x501   : > { %v4188_v38 = vpop.f32.mrf.mxu3  ;;  %v3232_v41 = vpop.f32.mrf.mxu1 }
 0x502   : > { %v4667_v2 = vmax.f32 %v4582_v57, 0.0  ;;  %v4189_v23 = vadd.f32 %v4188_v38, %v3965_v55  ;;  %v3233_v32 = vadd.f32 %v3232_v41, %v3009_v27  ;;  %v5920_v57 = vor.u32 %v6555_v62, %v5917_v16 }
 0x503   : > { %v6256_v41 = vor.u32 %v6639_v31, %v6253_v43  ;;  %v9004_v62 = vmax.f32 %v9002_v58, %v9003_v40 }
 0x504   : > { %4753 = vst.msk [vmem:[%s7829_s28 + $0x198] sm:$0xff] %vm4701_vm0, %v4667_v2  ;;  %v4409_v19 = vmax.f32 %v3231_v48, %v4189_v23  ;;  %v6252_v48 = vor.u32 %v6640_v3, %v6251_v51 }
 0x506   : > { %v4494_v34 = vmax.f32 %v8989_v53, %v4409_v19  ;;  %v3967_v18 = vpop.f32.mrf.mxu2 }
 0x508   : > { %v4583_v4 = vadd.f32 %v8099_v21, %v4494_v34  ;;  %v3012_v42 = vpop.f32.mrf.mxu0 }
 0x509   : > { %v4190_v33 = vpop.f32.mrf.mxu3  ;;  %v3235_v28 = vpop.f32.mrf.mxu1 }
 0x50a   : > { %v4668_v61 = vmax.f32 %v4583_v4, 0.0  ;;  %v4191_v25 = vadd.f32 %v4190_v33, %v3967_v18  ;;  %v3236_v39 = vadd.f32 %v3235_v28, %v3012_v42  ;;  %v5923_v18 = vld [vmem:[%s7630_s17 + $0x250] sm:$0xf]  ;;  %v6558_v33 = vld [vmem:[%s7630_s17 + $0x254] sm:$0xf0] }
 0x50b   : > { %3051 = vmatmul.bf16.gmra.mxu0 %v5908_v0  ;;  %4009 = vmatmul.bf16.gmra.mxu2 %v6244_v54  ;;  %v6557_v0 = vld [vmem:[%s7630_s17 + $0x254] sm:$0xf]  ;;  %v9000_v54 = vld [vmem:[#allocation74_spill] sm:$0xff]  ;;  %v6259_v42 = vld [vmem:[%s7638_s20 + $0x250] sm:$0xf] }
 0x50c   : > { %4754 = vst.msk [vmem:[%s7829_s28 + $0x1a0] sm:$0xff] %vm4701_vm0, %v4668_v61  ;;  %v4410_v9 = vmax.f32 %v3233_v32, %v4191_v25  ;;  %3274 = vmatmul.bf16.gmra.mxu1 %v5912_v8  ;;  %v8999_v8 = vld [vmem:[#allocation73_spill] sm:$0xff] }
 0x50d   : > { %v9001_v61 = vmax.f32 %v8999_v8, %v9000_v54  ;;  %v5925_v25 = vld [vmem:[%s7630_s17 + $0x258] sm:$0xf0]  ;;  %v6642_v28 = vld [vmem:[%s7638_s20 + $0x254] sm:$0xf0] }
 0x50e   : > { %v4495_v56 = vmax.f32 %v8992_v44, %v4410_v9  ;;  %4232 = vmatmul.bf16.gmra.mxu3 %v6248_v47  ;;  %v3970_v5 = vpop.f32.mrf.mxu2  ;;  %v6641_v47 = vld [vmem:[%s7638_s20 + $0x254] sm:$0xf]  ;;  %v6261_v9 = vld [vmem:[%s7638_s20 + $0x258] sm:$0xf0] }
 0x510   : > { %v4584_v10 = vadd.f32 %v8099_v21, %v4495_v56  ;;  %v3014_v26 = vpop.f32.mrf.mxu0  ;;  %v5924_v56 = vor.u32 %v6558_v33, %v5923_v18  ;;  %v9008_v18 = vld [vmem:[#allocation79_spill] sm:$0xff]  ;;  %v9009_v33 = vld [vmem:[#allocation80_spill] sm:$0xff] }
 0x511   : > { %v4193_v46 = vpop.f32.mrf.mxu3  ;;  %v3237_v7 = vpop.f32.mrf.mxu1 }
 0x512   : > { %v4669_v24 = vmax.f32 %v4584_v10, 0.0  ;;  %v4194_v63 = vadd.f32 %v4193_v46, %v3970_v5  ;;  %v3238_v38 = vadd.f32 %v3237_v7, %v3014_v26  ;;  %v5928_v10 = vor.u32 %v6557_v0, %v5925_v25 }
 0x513   : > { %v6264_v7 = vor.u32 %v6641_v47, %v6261_v9  ;;  %v9010_v0 = vmax.f32 %v9008_v18, %v9009_v33 }
 0x514   : > { %4755 = vst.msk [vmem:[%s7829_s28 + $0x1a8] sm:$0xff] %vm4701_vm0, %v4669_v24  ;;  %v4411_v22 = vmax.f32 %v3236_v39, %v4194_v63  ;;  %v6260_v39 = vor.u32 %v6642_v28, %v6259_v42 }
 0x516   : > { %v4496_v21 = vmax.f32 %v8995_v35, %v4411_v22  ;;  %v3972_v45 = vpop.f32.mrf.mxu2 }
 0x518   : > { %v4585_v36 = vadd.f32 %v8378_v12, %v4496_v21  ;;  %v3017_v23 = vpop.f32.mrf.mxu0 }
 0x519   : > { %v4195_v37 = vpop.f32.mrf.mxu3  ;;  %v3240_v27 = vpop.f32.mrf.mxu1 }
 0x51a   : > { %v4670_v55 = vmax.f32 %v4585_v36, 0.0  ;;  %v4196_v2 = vadd.f32 %v4195_v37, %v3972_v45  ;;  %v3241_v53 = vadd.f32 %v3240_v27, %v3017_v23  ;;  %v5931_v45 = vld [vmem:[%s7630_s17 + $0x260] sm:$0xf]  ;;  %v6560_v37 = vld [vmem:[%s7630_s17 + $0x264] sm:$0xf0] }
 0x51b   : > { %3056 = vmatmul.bf16.gmra.mxu0 %v5916_v50  ;;  %4014 = vmatmul.bf16.gmra.mxu2 %v6252_v48  ;;  %v6559_v50 = vld [vmem:[%s7630_s17 + $0x264] sm:$0xf]  ;;  %v6267_v23 = vld [vmem:[%s7638_s20 + $0x260] sm:$0xf]  ;;  %v6644_v27 = vld [vmem:[%s7638_s20 + $0x264] sm:$0xf0] }
 0x51c   : > { %4756 = vst.msk [vmem:[%s7829_s28 + $0x1b0] sm:$0xff] %vm4701_vm0, %v4670_v55  ;;  %v4412_v19 = vmax.f32 %v3238_v38, %v4196_v2  ;;  %3279 = vmatmul.bf16.gmra.mxu1 %v5920_v57  ;;  %v9005_v57 = vld [vmem:[#allocation77_spill] sm:$0xff]  ;;  %v9006_v48 = vld [vmem:[#allocation78_spill] sm:$0xff]  ;;  %v5933_v2 = vld [vmem:[%s7630_s17 + $0x268] sm:$0xf0] }
 0x51d   : > { %v9007_v55 = vmax.f32 %v9005_v57, %v9006_v48 }
 0x51e   : > { %v4497_v20 = vmax.f32 %v8998_v15, %v4412_v19  ;;  %4237 = vmatmul.bf16.gmra.mxu3 %v6256_v41  ;;  %v3975_v34 = vpop.f32.mrf.mxu2  ;;  %v6643_v41 = vld [vmem:[%s7638_s20 + $0x264] sm:$0xf]  ;;  %v6269_v19 = vld [vmem:[%s7638_s20 + $0x268] sm:$0xf0] }
 0x520   : > { %v4586_v49 = vadd.f32 %v8378_v12, %v4497_v20  ;;  %v3019_v11 = vpop.f32.mrf.mxu0  ;;  %v5932_v20 = vor.u32 %v6560_v37, %v5931_v45  ;;  %v9014_v45 = vld [vmem:[#allocation83_spill] sm:$0xff]  ;;  %v9015_v37 = vld [vmem:[#allocation84_spill] sm:$0xff] }
 0x521   : > { %v4198_v59 = vpop.f32.mrf.mxu3  ;;  %v3242_v52 = vpop.f32.mrf.mxu1 }
 0x522   : > { %v4671_v60 = vmax.f32 %v4586_v49, 0.0  ;;  %v4199_v17 = vadd.f32 %v4198_v59, %v3975_v34  ;;  %v3243_v46 = vadd.f32 %v3242_v52, %v3019_v11  ;;  %v5936_v49 = vor.u32 %v6559_v50, %v5933_v2 }
 0x523   : > { %v6272_v52 = vor.u32 %v6643_v41, %v6269_v19  ;;  %v9016_v50 = vmax.f32 %v9014_v45, %v9015_v37 }
 0x524   : > { %4757 = vst.msk [vmem:[%s7829_s28 + $0x1b8] sm:$0xff] %vm4701_vm0, %v4671_v60  ;;  %v4413_v4 = vmax.f32 %v3241_v53, %v4199_v17  ;;  %v6268_v53 = vor.u32 %v6644_v27, %v6267_v23 }
 0x526   : > { %v4498_v32 = vmax.f32 %v9001_v61, %v4413_v4  ;;  %v3977_v30 = vpop.f32.mrf.mxu2 }
 0x528   : > { %v4587_v14 = vadd.f32 %v8378_v12, %v4498_v32  ;;  %v3022_v63 = vpop.f32.mrf.mxu0 }
 0x529   : > { %v4200_v44 = vpop.f32.mrf.mxu3  ;;  %v3245_v26 = vpop.f32.mrf.mxu1 }
 0x52a   : > { %v4672_v5 = vmax.f32 %v4587_v14, 0.0  ;;  %v4201_v24 = vadd.f32 %v4200_v44, %v3977_v30  ;;  %v3246_v35 = vadd.f32 %v3245_v26, %v3022_v63  ;;  %v5939_v30 = vld [vmem:[%s7630_s17 + $0x270] sm:$0xf]  ;;  %v6562_v44 = vld [vmem:[%s7630_s17 + $0x274] sm:$0xf0] }
 0x52b   : > { %3061 = vmatmul.bf16.gmra.mxu0 %v5924_v56  ;;  %4019 = vmatmul.bf16.gmra.mxu2 %v6260_v39  ;;  %v6561_v56 = vld [vmem:[%s7630_s17 + $0x274] sm:$0xf]  ;;  %v9012_v39 = vld [vmem:[#allocation82_spill] sm:$0xff]  ;;  %v6275_v63 = vld [vmem:[%s7638_s20 + $0x270] sm:$0xf] }
 0x52c   : > { %4758 = vst.msk [vmem:[%s7829_s28 + $0x1c0] sm:$0xff] %vm4701_vm0, %v4672_v5  ;;  %v4414_v22 = vmax.f32 %v3243_v46, %v4201_v24  ;;  %3284 = vmatmul.bf16.gmra.mxu1 %v5928_v10  ;;  %v9011_v10 = vld [vmem:[#allocation81_spill] sm:$0xff] }
 0x52d   : > { %v9013_v5 = vmax.f32 %v9011_v10, %v9012_v39  ;;  %v5941_v24 = vld [vmem:[%s7630_s17 + $0x278] sm:$0xf0]  ;;  %v6646_v26 = vld [vmem:[%s7638_s20 + $0x274] sm:$0xf0] }
 0x52e   : > { %v4499_v1 = vmax.f32 %v9004_v62, %v4414_v22  ;;  %4242 = vmatmul.bf16.gmra.mxu3 %v6264_v7  ;;  %v3980_v21 = vpop.f32.mrf.mxu2  ;;  %v6645_v7 = vld [vmem:[%s7638_s20 + $0x274] sm:$0xf]  ;;  %v6277_v22 = vld [vmem:[%s7638_s20 + $0x278] sm:$0xf0] }
 0x530   : > { %v4588_v29 = vadd.f32 %v8378_v12, %v4499_v1  ;;  %v3024_v31 = vpop.f32.mrf.mxu0  ;;  %v5940_v1 = vor.u32 %v6562_v44, %v5939_v30  ;;  %v9020_v30 = vld [vmem:[#allocation87_spill] sm:$0xff]  ;;  %v9021_v44 = vld [vmem:[#allocation88_spill] sm:$0xff] }
 0x531   : > { %v4203_v16 = vpop.f32.mrf.mxu3  ;;  %v3247_v43 = vpop.f32.mrf.mxu1 }
 0x532   : > { %v4673_v51 = vmax.f32 %v4588_v29, 0.0  ;;  %v4204_v3 = vadd.f32 %v4203_v16, %v3980_v21  ;;  %v3248_v59 = vadd.f32 %v3247_v43, %v3024_v31  ;;  %v5944_v29 = vor.u32 %v6561_v56, %v5941_v24 }
 0x533   : > { %v6280_v43 = vor.u32 %v6645_v7, %v6277_v22  ;;  %v9022_v56 = vmax.f32 %v9020_v30, %v9021_v44 }
 0x534   : > { %4759 = vst.msk [vmem:[%s7829_s28 + $0x1c8] sm:$0xff] %vm4701_vm0, %v4673_v51  ;;  %v4415_v36 = vmax.f32 %v3246_v35, %v4204_v3  ;;  %v6276_v35 = vor.u32 %v6646_v26, %v6275_v63 }
 0x536   : > { %v4500_v38 = vmax.f32 %v9007_v55, %v4415_v36  ;;  %v3982_v13 = vpop.f32.mrf.mxu2 }
 0x538   : > { %v4589_v6 = vadd.f32 %v8378_v12, %v4500_v38  ;;  %v3027_v17 = vpop.f32.mrf.mxu0 }
 0x539   : > { %v4205_v15 = vpop.f32.mrf.mxu3  ;;  %v3250_v11 = vpop.f32.mrf.mxu1 }
 0x53a   : > { %v4674_v34 = vmax.f32 %v4589_v6, 0.0  ;;  %v4206_v60 = vadd.f32 %v4205_v15, %v3982_v13  ;;  %v3251_v61 = vadd.f32 %v3250_v11, %v3027_v17  ;;  %v5947_v13 = vld [vmem:[%s7630_s17 + $0x280] sm:$0xf]  ;;  %v6564_v15 = vld [vmem:[%s7630_s17 + $0x284] sm:$0xf0] }
 0x53b   : > { %3066 = vmatmul.bf16.gmra.mxu0 %v5932_v20  ;;  %4024 = vmatmul.bf16.gmra.mxu2 %v6268_v53  ;;  %v6563_v20 = vld [vmem:[%s7630_s17 + $0x284] sm:$0xf]  ;;  %v6283_v17 = vld [vmem:[%s7638_s20 + $0x280] sm:$0xf]  ;;  %v6648_v11 = vld [vmem:[%s7638_s20 + $0x284] sm:$0xf0] }
 0x53c   : > { %4760 = vst.msk [vmem:[%s7829_s28 + $0x1d0] sm:$0xff] %vm4701_vm0, %v4674_v34  ;;  %v4416_v4 = vmax.f32 %v3248_v59, %v4206_v60  ;;  %3289 = vmatmul.bf16.gmra.mxu1 %v5936_v49  ;;  %v9017_v49 = vld [vmem:[#allocation85_spill] sm:$0xff]  ;;  %v9018_v53 = vld [vmem:[#allocation86_spill] sm:$0xff]  ;;  %v5949_v60 = vld [vmem:[%s7630_s17 + $0x288] sm:$0xf0] }
 0x53d   : > { %v9019_v34 = vmax.f32 %v9017_v49, %v9018_v53 }
 0x53e   : > { %v4501_v8 = vmax.f32 %v9010_v0, %v4416_v4  ;;  %4247 = vmatmul.bf16.gmra.mxu3 %v6272_v52  ;;  %v3985_v32 = vpop.f32.mrf.mxu2  ;;  %v6647_v52 = vld [vmem:[%s7638_s20 + $0x284] sm:$0xf]  ;;  %v6285_v4 = vld [vmem:[%s7638_s20 + $0x288] sm:$0xf0] }
 0x540   : > { %v4590_v54 = vadd.f32 %v8378_v12, %v4501_v8  ;;  %v3029_v47 = vpop.f32.mrf.mxu0  ;;  %v5948_v8 = vor.u32 %v6564_v15, %v5947_v13  ;;  %v9026_v13 = vld [vmem:[#allocation91_spill] sm:$0xff]  ;;  %v9027_v15 = vld [vmem:[#allocation92_spill] sm:$0xff] }
 0x541   : > { %v4208_v25 = vpop.f32.mrf.mxu3  ;;  %v3252_v9 = vpop.f32.mrf.mxu1 }
 0x542   : > { %v4675_v42 = vmax.f32 %v4590_v54, 0.0  ;;  %v4209_v28 = vadd.f32 %v4208_v25, %v3985_v32  ;;  %v3253_v16 = vadd.f32 %v3252_v9, %v3029_v47  ;;  %v5952_v54 = vor.u32 %v6563_v20, %v5949_v60 }
 0x543   : > { %v6288_v9 = vor.u32 %v6647_v52, %v6285_v4  ;;  %v9028_v20 = vmax.f32 %v9026_v13, %v9027_v15  ;;  %v9039_v13 = vld [vmem:[#allocation100_spill] sm:$0xff] }
 0x544   : > { %4761 = vst.msk [vmem:[%s7829_s28 + $0x1d8] sm:$0xff] %vm4701_vm0, %v4675_v42  ;;  %v4417_v14 = vmax.f32 %v3251_v61, %v4209_v28  ;;  %v6284_v61 = vor.u32 %v6648_v11, %v6283_v17 }
 0x546   : > { %v4502_v46 = vmax.f32 %v9013_v5, %v4417_v14  ;;  %v3987_v40 = vpop.f32.mrf.mxu2 }
 0x548   : > { %v4591_v58 = vadd.f32 %v8378_v12, %v4502_v46  ;;  %v3032_v3 = vpop.f32.mrf.mxu0 }
 0x549   : > { %v4210_v62 = vpop.f32.mrf.mxu3  ;;  %v3255_v31 = vpop.f32.mrf.mxu1 }
 0x54a   : > { %v4676_v21 = vmax.f32 %v4591_v58, 0.0  ;;  %v4211_v51 = vadd.f32 %v4210_v62, %v3987_v40  ;;  %v3256_v55 = vadd.f32 %v3255_v31, %v3032_v3  ;;  %v5955_v40 = vld [vmem:[%s7630_s17 + $0x290] sm:$0xf]  ;;  %v6566_v62 = vld [vmem:[%s7630_s17 + $0x294] sm:$0xf0] }
 0x54b   : > { %3071 = vmatmul.bf16.gmra.mxu0 %v5940_v1  ;;  %4029 = vmatmul.bf16.gmra.mxu2 %v6276_v35  ;;  %v6565_v1 = vld [vmem:[%s7630_s17 + $0x294] sm:$0xf]  ;;  %v9024_v35 = vld [vmem:[#allocation90_spill] sm:$0xff]  ;;  %v6291_v3 = vld [vmem:[%s7638_s20 + $0x290] sm:$0xf] }
 0x54c   : > { %4762 = vst.msk [vmem:[%s7829_s28 + $0x1e0] sm:$0xff] %vm4701_vm0, %v4676_v21  ;;  %v4418_v36 = vmax.f32 %v3253_v16, %v4211_v51  ;;  %3294 = vmatmul.bf16.gmra.mxu1 %v5944_v29  ;;  %v9023_v29 = vld [vmem:[#allocation89_spill] sm:$0xff] }
 0x54d   : > { %v9025_v21 = vmax.f32 %v9023_v29, %v9024_v35  ;;  %v5957_v51 = vld [vmem:[%s7630_s17 + $0x298] sm:$0xf0]  ;;  %v6650_v31 = vld [vmem:[%s7638_s20 + $0x294] sm:$0xf0] }
 0x54e   : > { %v4503_v57 = vmax.f32 %v9016_v50, %v4418_v36  ;;  %4252 = vmatmul.bf16.gmra.mxu3 %v6280_v43  ;;  %v3990_v38 = vpop.f32.mrf.mxu2  ;;  %v6649_v43 = vld [vmem:[%s7638_s20 + $0x294] sm:$0xf]  ;;  %v6293_v36 = vld [vmem:[%s7638_s20 + $0x298] sm:$0xf0] }
 0x550   : > { %v4592_v48 = vadd.f32 %v8378_v12, %v4503_v57  ;;  %v3034_v41 = vpop.f32.mrf.mxu0  ;;  %v5956_v57 = vor.u32 %v6566_v62, %v5955_v40 }
 0x551   : > { %v4213_v2 = vpop.f32.mrf.mxu3  ;;  %v3257_v19 = vpop.f32.mrf.mxu1 }
 0x552   : > { %v4677_v23 = vmax.f32 %v4592_v48, 0.0  ;;  %v4214_v27 = vadd.f32 %v4213_v2, %v3990_v38  ;;  %v3258_v25 = vadd.f32 %v3257_v19, %v3034_v41  ;;  %v5960_v48 = vor.u32 %v6565_v1, %v5957_v51 }
 0x553   : > { %v6296_v19 = vor.u32 %v6649_v43, %v6293_v36  ;;  %v9035_v36 = vld [vmem:[#allocation97_spill] sm:$0xff] }
 0x554   : > { %4763 = vst.msk [vmem:[%s7829_s28 + $0x1e8] sm:$0xff] %vm4701_vm0, %v4677_v23  ;;  %v4419_v6 = vmax.f32 %v3256_v55, %v4214_v27  ;;  %v6292_v55 = vor.u32 %v6650_v31, %v6291_v3 }
 0x556   : > { %v4504_v59 = vmax.f32 %v9019_v34, %v4419_v6  ;;  %v3992_v33 = vpop.f32.mrf.mxu2 }
 0x558   : > { %v4593_v18 = vadd.f32 %v8378_v12, %v4504_v59  ;;  %v3037_v28 = vpop.f32.mrf.mxu0 }
 0x559   : > { %v4215_v0 = vpop.f32.mrf.mxu3  ;;  %v3260_v47 = vpop.f32.mrf.mxu1 }
 0x55a   : > { %v4678_v32 = vmax.f32 %v4593_v18, 0.0  ;;  %v4216_v42 = vadd.f32 %v4215_v0, %v3992_v33  ;;  %v3261_v5 = vadd.f32 %v3260_v47, %v3037_v28  ;;  %v2440_v18 = vld [vmem:[%s7630_s17 + $0x2a0] sm:$0x33] }
 0x55b   : > { %3076 = vmatmul.bf16.gmra.mxu0 %v5948_v8  ;;  %4034 = vmatmul.bf16.gmra.mxu2 %v6284_v61  ;;  %v3398_v33 = vld [vmem:[%s7638_s20 + $0x2a0] sm:$0x33]  ;;  %v2694_v8 = vunpack.c.l.b16 %v2440_v18 }
 0x55c   : > { %4764 = vst.msk [vmem:[%s7829_s28 + $0x1f0] sm:$0xff] %vm4701_vm0, %v4678_v32  ;;  %v4420_v14 = vmax.f32 %v3258_v25, %v4216_v42  ;;  %3299 = vmatmul.bf16.gmra.mxu1 %v5952_v54  ;;  %v2695_v54 = vunpack.c.h.b16 %v2440_v18  ;;  %v3652_v61 = vunpack.c.l.b16 %v3398_v33  ;;  %v9029_v32 = vld [vmem:[#allocation93_spill] sm:$0xff]  ;;  %v9030_v25 = vld [vmem:[#allocation94_spill] sm:$0xff]  ;;  %v3653_v47 = vunpack.c.h.b16 %v3398_v33 }
 0x55d   : > { %v9031_v42 = vmax.f32 %v9029_v32, %v9030_v25  ;;  %v2780_v44 = vpack.c.b16 %v2694_v8, %v2694_v8  ;;  %v9041_v18 = vld [vmem:[#allocation101_spill] sm:$0xff]  ;;  %v9042_v33 = vld [vmem:[#allocation102_spill] sm:$0xff] }
 0x55e   : > { %v4505_v10 = vmax.f32 %v9022_v56, %v4420_v14  ;;  %4257 = vmatmul.bf16.gmra.mxu3 %v6288_v9  ;;  %v3995_v46 = vpop.f32.mrf.mxu2  ;;  %v2781_v56 = vpack.c.b16 %v2695_v54, %v2695_v54 }
 0x560   : > { %v4594_v39 = vadd.f32 %v8378_v12, %v4505_v10  ;;  %v3039_v7 = vpop.f32.mrf.mxu0  ;;  %v3738_v10 = vpack.c.b16 %v3652_v61, %v3652_v61 }
 0x561   : > { %v4218_v24 = vpop.f32.mrf.mxu3  ;;  %v3262_v22 = vpop.f32.mrf.mxu1 }
 0x562   : > { %v4679_v63 = vmax.f32 %v4594_v39, 0.0  ;;  %v4219_v26 = vadd.f32 %v4218_v24, %v3995_v46  ;;  %v3263_v2 = vadd.f32 %v3262_v22, %v3039_v7  ;;  %v9032_v22 = vld [vmem:[#allocation95_spill] sm:$0xff] }
 0x564   : > { %4765 = vst.msk [vmem:[%s7829_s28 + $0x1f8] sm:$0xff] %vm4701_vm0, %v4679_v63  ;;  %v4421_v58 = vmax.f32 %v3261_v5, %v4219_v26  ;;  %v3739_v26 = vpack.c.b16 %v3653_v47, %v3653_v47 }
 0x566   : > { %v4506_v16 = vmax.f32 %v9025_v21, %v4421_v58  ;;  %v3997_v37 = vpop.f32.mrf.mxu2  ;;  %v9033_v58 = vld [vmem:[#allocation96_spill] sm:$0xff] }
 0x567   : > { %v9034_v40 = vmax.f32 %v9032_v22, %v9033_v58 }
 0x568   : > { %v4595_v45 = vadd.f32 %v8378_v12, %v4506_v16  ;;  %v3042_v27 = vpop.f32.mrf.mxu0 }
 0x569   : > { %v4220_v50 = vpop.f32.mrf.mxu3  ;;  %v3265_v41 = vpop.f32.mrf.mxu1 }
 0x56a   : > { %v4680_v38 = vmax.f32 %v4595_v45, 0.0  ;;  %v4221_v23 = vadd.f32 %v4220_v50, %v3997_v37  ;;  %v3266_v34 = vadd.f32 %v3265_v41, %v3042_v27  ;;  %v9036_v45 = vld [vmem:[#allocation98_spill] sm:$0xff] }
 0x56b   : > { %3081 = vmatmul.bf16.gmra.mxu0 %v5956_v57  ;;  %4039 = vmatmul.bf16.gmra.mxu2 %v6292_v55  ;;  %v9037_v37 = vmax.f32 %v9035_v36, %v9036_v45 }
 0x56c   : > { %4766 = vst.msk [vmem:[%s7829_s28 + $0x200] sm:$0xff] %vm4701_vm0, %v4680_v38  ;;  %v4422_v6 = vmax.f32 %v3263_v2, %v4221_v23  ;;  %3304 = vmatmul.bf16.gmra.mxu1 %v5960_v48 }
 0x56e   : > { %v4507_v49 = vmax.f32 %v9028_v20, %v4422_v6  ;;  %4262 = vmatmul.bf16.gmra.mxu3 %v6296_v19  ;;  %v4000_v59 = vpop.f32.mrf.mxu2  ;;  %v9038_v6 = vld [vmem:[#allocation99_spill] sm:$0xff] }
 0x56f   : > { %v9040_v15 = vmax.f32 %v9038_v6, %v9039_v13 }
 0x570   : > { %v4596_v53 = vadd.f32 %v8378_v12, %v4507_v49  ;;  %v3044_v52 = vpop.f32.mrf.mxu0 }
 0x571   : > { %v4223_v60 = vpop.f32.mrf.mxu3  ;;  %v3267_v4 = vpop.f32.mrf.mxu1 }
 0x572   : > { %v4681_v17 = vmax.f32 %v4596_v53, 0.0  ;;  %v4224_v11 = vadd.f32 %v4223_v60, %v4000_v59  ;;  %v3268_v5 = vadd.f32 %v3267_v4, %v3044_v52 }
 0x574   : > { %4767 = vst.msk [vmem:[%s7829_s28 + $0x208] sm:$0xff] %vm4701_vm0, %v4681_v17  ;;  %v4423_v0 = vmax.f32 %v3266_v34, %v4224_v11 }
 0x576   : > { %v4508_v28 = vmax.f32 %v9031_v42, %v4423_v0  ;;  %v4002_v14 = vpop.f32.mrf.mxu2  ;;  %v9043_v0 = vmax.f32 %v9041_v18, %v9042_v33 }
 0x578   : > { %v4597_v9 = vadd.f32 %v8378_v12, %v4508_v28  ;;  %v3047_v24 = vpop.f32.mrf.mxu0 }
 0x579   : > { %v4225_v30 = vpop.f32.mrf.mxu3  ;;  %v3270_v63 = vpop.f32.mrf.mxu1 }
 0x57a   : > { %v4682_v39 = vmax.f32 %v4597_v9, 0.0  ;;  %v4226_v46 = vadd.f32 %v4225_v30, %v4002_v14  ;;  %v3271_v29 = vadd.f32 %v3270_v63, %v3047_v24  ;;  %v9044_v30 = vld [vmem:[#allocation103_spill] sm:$0xff] }
 0x57b   : > { %3086 = vmatmul.bf16.gmra.mxu0 %v2780_v44  ;;  %4044 = vmatmul.bf16.gmra.mxu2 %v3738_v10  ;;  %v9045_v44 = vld [vmem:[#allocation104_spill] sm:$0xff] }
 0x57c   : > { %4768 = vst.msk [vmem:[%s7829_s28 + $0x210] sm:$0xff] %vm4701_vm0, %v4682_v39  ;;  %v4424_v7 = vmax.f32 %v3268_v5, %v4226_v46  ;;  %3309 = vmatmul.bf16.gmra.mxu1 %v2781_v56  ;;  %v9046_v56 = vmax.f32 %v9044_v30, %v9045_v44 }
 0x57e   : > { %v4509_v62 = vmax.f32 %v9034_v40, %v4424_v7  ;;  %4267 = vmatmul.bf16.gmra.mxu3 %v3739_v26  ;;  %v4005_v35 = vpop.f32.mrf.mxu2  ;;  %v9047_v40 = vld [vmem:[#allocation105_spill] sm:$0xff] }
 0x580   : > { %v4598_v1 = vadd.f32 %v8378_v12, %v4509_v62  ;;  %v3049_v3 = vpop.f32.mrf.mxu0  ;;  %v9048_v62 = vld [vmem:[#allocation106_spill] sm:$0xff] }
 0x581   : > { %v4228_v21 = vpop.f32.mrf.mxu3  ;;  %v3272_v31 = vpop.f32.mrf.mxu1 }
 0x582   : > { %v4683_v16 = vmax.f32 %v4598_v1, 0.0  ;;  %v4229_v51 = vadd.f32 %v4228_v21, %v4005_v35  ;;  %v3273_v2 = vadd.f32 %v3272_v31, %v3049_v3  ;;  %v9049_v1 = vmax.f32 %v9047_v40, %v9048_v62 }
 0x584   : > { %4769 = vst.msk [vmem:[%s7829_s28 + $0x218] sm:$0xff] %vm4701_vm0, %v4683_v16  ;;  %v4425_v43 = vmax.f32 %v3271_v29, %v4229_v51 }
 0x586   : > { %v4510_v50 = vmax.f32 %v9037_v37, %v4425_v43  ;;  %v4007_v48 = vpop.f32.mrf.mxu2  ;;  %v9050_v37 = vld [vmem:[#allocation107_spill] sm:$0xff] }
 0x588   : > { %v4599_v57 = vadd.f32 %v8378_v12, %v4510_v50  ;;  %v3052_v27 = vpop.f32.mrf.mxu0  ;;  %v9051_v50 = vld [vmem:[#allocation108_spill] sm:$0xff] }
 0x589   : > { %v4230_v55 = vpop.f32.mrf.mxu3  ;;  %v3275_v41 = vpop.f32.mrf.mxu1 }
 0x58a   : > { %v4684_v38 = vmax.f32 %v4599_v57, 0.0  ;;  %v4231_v23 = vadd.f32 %v4230_v55, %v4007_v48  ;;  %v3276_v53 = vadd.f32 %v3275_v41, %v3052_v27  ;;  %v9052_v57 = vmax.f32 %v9050_v37, %v9051_v50 }
 0x58c   : > { %4770 = vst.msk [vmem:[%s7829_s28 + $0x220] sm:$0xff] %vm4701_vm0, %v4684_v38  ;;  %v4426_v19 = vmax.f32 %v3273_v2, %v4231_v23 }
 0x58e   : > { %v4511_v20 = vmax.f32 %v9040_v15, %v4426_v19  ;;  %v4010_v34 = vpop.f32.mrf.mxu2  ;;  %v9053_v15 = vld [vmem:[#allocation109_spill] sm:$0xff] }
 0x590   : > { %v4600_v49 = vadd.f32 %v8378_v12, %v4511_v20  ;;  %v3054_v11 = vpop.f32.mrf.mxu0  ;;  %v9054_v20 = vld [vmem:[#allocation110_spill] sm:$0xff] }
 0x591   : > { %v4233_v59 = vpop.f32.mrf.mxu3  ;;  %v3277_v52 = vpop.f32.mrf.mxu1 }
 0x592   : > { %v4685_v60 = vmax.f32 %v4600_v49, 0.0  ;;  %v4234_v17 = vadd.f32 %v4233_v59, %v4010_v34  ;;  %v3278_v42 = vadd.f32 %v3277_v52, %v3054_v11  ;;  %v9055_v49 = vmax.f32 %v9053_v15, %v9054_v20 }
 0x594   : > { %4771 = vst.msk [vmem:[%s7829_s28 + $0x228] sm:$0xff] %vm4701_vm0, %v4685_v60  ;;  %v4427_v4 = vmax.f32 %v3276_v53, %v4234_v17 }
 0x596   : > { %v4512_v8 = vmax.f32 %v9043_v0, %v4427_v4  ;;  %v4012_v61 = vpop.f32.mrf.mxu2  ;;  %v9056_v0 = vld [vmem:[#allocation111_spill] sm:$0xff] }
 0x598   : > { %v4601_v54 = vadd.f32 %v8378_v12, %v4512_v8  ;;  %v3057_v47 = vpop.f32.mrf.mxu0  ;;  %v9057_v8 = vld [vmem:[#allocation112_spill] sm:$0xff] }
 0x599   : > { %v4235_v32 = vpop.f32.mrf.mxu3  ;;  %v3280_v9 = vpop.f32.mrf.mxu1 }
 0x59a   : > { %v4686_v25 = vmax.f32 %v4601_v54, 0.0  ;;  %v4236_v28 = vadd.f32 %v4235_v32, %v4012_v61  ;;  %v3281_v5 = vadd.f32 %v3280_v9, %v3057_v47  ;;  %v9058_v54 = vmax.f32 %v9056_v0, %v9057_v8 }
 0x59c   : > { %4772 = vst.msk [vmem:[%s7829_s28 + $0x230] sm:$0xff] %vm4701_vm0, %v4686_v25  ;;  %v4428_v14 = vmax.f32 %v3278_v42, %v4236_v28 }
 0x59e   : > { %v4513_v10 = vmax.f32 %v9046_v56, %v4428_v14  ;;  %v4015_v46 = vpop.f32.mrf.mxu2  ;;  %v9059_v56 = vld [vmem:[#allocation113_spill] sm:$0xff] }
 0x5a0   : > { %v4602_v39 = vadd.f32 %v8378_v12, %v4513_v10  ;;  %v3059_v7 = vpop.f32.mrf.mxu0  ;;  %v9060_v10 = vld [vmem:[#allocation114_spill] sm:$0xff] }
 0x5a1   : > { %v4238_v24 = vpop.f32.mrf.mxu3  ;;  %v3282_v22 = vpop.f32.mrf.mxu1 }
 0x5a2   : > { %v4687_v63 = vmax.f32 %v4602_v39, 0.0  ;;  %v4239_v26 = vadd.f32 %v4238_v24, %v4015_v46  ;;  %v3283_v3 = vadd.f32 %v3282_v22, %v3059_v7  ;;  %v9061_v39 = vmax.f32 %v9059_v56, %v9060_v10 }
 0x5a4   : > { %4773 = vst.msk [vmem:[%s7829_s28 + $0x238] sm:$0xff] %vm4701_vm0, %v4687_v63  ;;  %v4429_v58 = vmax.f32 %v3281_v5, %v4239_v26 }
 0x5a6   : > { %v4514_v29 = vmax.f32 %v9049_v1, %v4429_v58  ;;  %v4017_v21 = vpop.f32.mrf.mxu2  ;;  %v9062_v1 = vld [vmem:[#allocation115_spill] sm:$0xff] }
 0x5a8   : > { %v4603_v35 = vadd.f32 %v8378_v12, %v4514_v29  ;;  %v3062_v43 = vpop.f32.mrf.mxu0  ;;  %v9063_v29 = vld [vmem:[#allocation116_spill] sm:$0xff] }
 0x5a9   : > { %v4240_v16 = vpop.f32.mrf.mxu3  ;;  %v3285_v36 = vpop.f32.mrf.mxu1 }
 0x5aa   : > { %v4688_v51 = vmax.f32 %v4603_v35, 0.0  ;;  %v4241_v31 = vadd.f32 %v4240_v16, %v4017_v21  ;;  %v3286_v38 = vadd.f32 %v3285_v36, %v3062_v43  ;;  %v9064_v35 = vmax.f32 %v9062_v1, %v9063_v29 }
 0x5ac   : > { %4774 = vst.msk [vmem:[%s7829_s28 + $0x240] sm:$0xff] %vm4701_vm0, %v4688_v51  ;;  %v4430_v45 = vmax.f32 %v3283_v3, %v4241_v31 }
 0x5ae   : > { %v4515_v48 = vmax.f32 %v9052_v57, %v4430_v45  ;;  %v4020_v2 = vpop.f32.mrf.mxu2  ;;  %v9065_v57 = vld [vmem:[#allocation117_spill] sm:$0xff] }
 0x5b0   : > { %v4604_v55 = vadd.f32 %v8378_v12, %v4515_v48  ;;  %v3064_v19 = vpop.f32.mrf.mxu0  ;;  %v9066_v48 = vld [vmem:[#allocation118_spill] sm:$0xff] }
 0x5b1   : > { %v4243_v23 = vpop.f32.mrf.mxu3  ;;  %v3287_v6 = vpop.f32.mrf.mxu1 }
 0x5b2   : > { %v4689_v27 = vmax.f32 %v4604_v55, 0.0  ;;  %v4244_v41 = vadd.f32 %v4243_v23, %v4020_v2  ;;  %v3288_v11 = vadd.f32 %v3287_v6, %v3064_v19  ;;  %v9067_v55 = vmax.f32 %v9065_v57, %v9066_v48 }
 0x5b4   : > { %4775 = vst.msk [vmem:[%s7829_s28 + $0x248] sm:$0xff] %vm4701_vm0, %v4689_v27  ;;  %v4431_v13 = vmax.f32 %v3286_v38, %v4244_v41 }
 0x5b6   : > { %v4516_v53 = vmax.f32 %v9055_v49, %v4431_v13  ;;  %v4022_v59 = vpop.f32.mrf.mxu2  ;;  %v9068_v49 = vld [vmem:[#allocation119_spill] sm:$0xff] }
 0x5b8   : > { %v4605_v34 = vadd.f32 %v8378_v12, %v4516_v53  ;;  %v3067_v4 = vpop.f32.mrf.mxu0  ;;  %v9069_v53 = vld [vmem:[#allocation120_spill] sm:$0xff] }
 0x5b9   : > { %v4245_v60 = vpop.f32.mrf.mxu3  ;;  %v3290_v18 = vpop.f32.mrf.mxu1 }
 0x5ba   : > { %v4690_v17 = vmax.f32 %v4605_v34, 0.0  ;;  %v4246_v52 = vadd.f32 %v4245_v60, %v4022_v59  ;;  %v3291_v25 = vadd.f32 %v3290_v18, %v3067_v4  ;;  %v9070_v34 = vmax.f32 %v9068_v49, %v9069_v53 }
 0x5bc   : > { %4776 = vst.msk [vmem:[%s7829_s28 + $0x250] sm:$0xff] %vm4701_vm0, %v4690_v17  ;;  %v4432_v33 = vmax.f32 %v3288_v11, %v4246_v52 }
 0x5be   : > { %v4517_v61 = vmax.f32 %v9058_v54, %v4432_v33  ;;  %v4025_v42 = vpop.f32.mrf.mxu2  ;;  %v9071_v54 = vld [vmem:[#allocation121_spill] sm:$0xff] }
 0x5c0   : > { %v4606_v32 = vadd.f32 %v8378_v12, %v4517_v61  ;;  %v3069_v14 = vpop.f32.mrf.mxu0  ;;  %v9072_v61 = vld [vmem:[#allocation122_spill] sm:$0xff] }
 0x5c1   : > { %v4248_v28 = vpop.f32.mrf.mxu3  ;;  %v3292_v30 = vpop.f32.mrf.mxu1 }
 0x5c2   : > { %v4691_v47 = vmax.f32 %v4606_v32, 0.0  ;;  %v4249_v9 = vadd.f32 %v4248_v28, %v4025_v42  ;;  %v3293_v7 = vadd.f32 %v3292_v30, %v3069_v14  ;;  %v9073_v32 = vmax.f32 %v9071_v54, %v9072_v61 }
 0x5c4   : > { %4777 = vst.msk [vmem:[%s7829_s28 + $0x258] sm:$0xff] %vm4701_vm0, %v4691_v47  ;;  %v4433_v44 = vmax.f32 %v3291_v25, %v4249_v9 }
 0x5c6   : > { %v4518_v5 = vmax.f32 %v9061_v39, %v4433_v44  ;;  %v4027_v24 = vpop.f32.mrf.mxu2  ;;  %v9074_v39 = vld [vmem:[#allocation123_spill] sm:$0xff] }
 0x5c8   : > { %v4607_v46 = vadd.f32 %v8378_v12, %v4518_v5  ;;  %v3072_v58 = vpop.f32.mrf.mxu0  ;;  %v9075_v5 = vld [vmem:[#allocation124_spill] sm:$0xff] }
 0x5c9   : > { %v4250_v63 = vpop.f32.mrf.mxu3  ;;  %v3295_v40 = vpop.f32.mrf.mxu1 }
 0x5ca   : > { %v4692_v26 = vmax.f32 %v4607_v46, 0.0  ;;  %v4251_v22 = vadd.f32 %v4250_v63, %v4027_v24  ;;  %v3296_v51 = vadd.f32 %v3295_v40, %v3072_v58  ;;  %v9076_v46 = vmax.f32 %v9074_v39, %v9075_v5 }
 0x5cc   : > { %4778 = vst.msk [vmem:[%s7829_s28 + $0x260] sm:$0xff] %vm4701_vm0, %v4692_v26  ;;  %v4434_v62 = vmax.f32 %v3293_v7, %v4251_v22 }
 0x5ce   : > { %v4519_v21 = vmax.f32 %v9064_v35, %v4434_v62  ;;  %v4030_v3 = vpop.f32.mrf.mxu2  ;;  %v9077_v35 = vld [vmem:[#allocation125_spill] sm:$0xff] }
 0x5d0   : > { %v4608_v16 = vadd.f32 %v8378_v12, %v4519_v21  ;;  %v3074_v45 = vpop.f32.mrf.mxu0  ;;  %v9078_v21 = vld [vmem:[#allocation126_spill] sm:$0xff] }
 0x5d1   : > { %v4253_v31 = vpop.f32.mrf.mxu3  ;;  %v3297_v37 = vpop.f32.mrf.mxu1 }
 0x5d2   : > { %v4693_v43 = vmax.f32 %v4608_v16, 0.0  ;;  %v4254_v36 = vadd.f32 %v4253_v31, %v4030_v3  ;;  %v3298_v19 = vadd.f32 %v3297_v37, %v3074_v45  ;;  %v9079_v16 = vmax.f32 %v9077_v35, %v9078_v21 }
 0x5d4   : > { %4779 = vst.msk [vmem:[%s7829_s28 + $0x268] sm:$0xff] %vm4701_vm0, %v4693_v43  ;;  %v4435_v50 = vmax.f32 %v3296_v51, %v4254_v36 }
 0x5d6   : > { %v4520_v38 = vmax.f32 %v9067_v55, %v4435_v50  ;;  %v4032_v23 = vpop.f32.mrf.mxu2  ;;  %v9080_v55 = vld [vmem:[#allocation127_spill] sm:$0xff] }
 0x5d8   : > { %v4609_v2 = vadd.f32 %v8378_v12, %v4520_v38  ;;  %v3077_v13 = vpop.f32.mrf.mxu0  ;;  %v9081_v38 = vld [vmem:[#allocation128_spill] sm:$0xff] }
 0x5d9   : > { %v4255_v27 = vpop.f32.mrf.mxu3  ;;  %v3300_v15 = vpop.f32.mrf.mxu1 }
 0x5da   : > { %v4694_v41 = vmax.f32 %v4609_v2, 0.0  ;;  %v4256_v6 = vadd.f32 %v4255_v27, %v4032_v23  ;;  %v3301_v17 = vadd.f32 %v3300_v15, %v3077_v13  ;;  %v9082_v2 = vmax.f32 %v9080_v55, %v9081_v38 }
 0x5dc   : > { %4780 = vst.msk [vmem:[%s7829_s28 + $0x270] sm:$0xff] %vm4701_vm0, %v4694_v41  ;;  %v4436_v20 = vmax.f32 %v3298_v19, %v4256_v6 }
 0x5de   : > { %v4521_v59 = vmax.f32 %v9070_v34, %v4436_v20  ;;  %v4035_v11 = vpop.f32.mrf.mxu2  ;;  %v9083_v34 = vld [vmem:[#allocation129_spill] sm:$0xff] }
 0x5e0   : > { %v4610_v60 = vadd.f32 %v8378_v12, %v4521_v59  ;;  %v3079_v33 = vpop.f32.mrf.mxu0  ;;  %v9084_v59 = vld [vmem:[#allocation130_spill] sm:$0xff] }
 0x5e1   : > { %v4258_v52 = vpop.f32.mrf.mxu3  ;;  %v3302_v0 = vpop.f32.mrf.mxu1 }
 0x5e2   : > { %v4695_v4 = vmax.f32 %v4610_v60, 0.0  ;;  %v4259_v18 = vadd.f32 %v4258_v52, %v4035_v11  ;;  %v3303_v14 = vadd.f32 %v3302_v0, %v3079_v33  ;;  %v9085_v60 = vmax.f32 %v9083_v34, %v9084_v59 }
 0x5e4   : > { %4781 = vst.msk [vmem:[%s7829_s28 + $0x278] sm:$0xff] %vm4701_vm0, %v4695_v4  ;;  %v4437_v8 = vmax.f32 %v3301_v17, %v4259_v18 }
 0x5e6   : > { %v4522_v25 = vmax.f32 %v9073_v32, %v4437_v8  ;;  %v4037_v28 = vpop.f32.mrf.mxu2 }
 0x5e8   : > { %v4611_v42 = vadd.f32 %v8378_v12, %v4522_v25  ;;  %v3082_v44 = vpop.f32.mrf.mxu0 }
 0x5e9   : > { %v4260_v47 = vpop.f32.mrf.mxu3  ;;  %v3305_v56 = vpop.f32.mrf.mxu1 }
 0x5ea   : > { %v4696_v9 = vmax.f32 %v4611_v42, 0.0  ;;  %v4261_v30 = vadd.f32 %v4260_v47, %v4037_v28  ;;  %v3306_v26 = vadd.f32 %v3305_v56, %v3082_v44 }
 0x5ec   : > { %4782 = vst.msk [vmem:[%s7829_s28 + $0x280] sm:$0xff] %vm4701_vm0, %v4696_v9  ;;  %v4438_v10 = vmax.f32 %v3303_v14, %v4261_v30 }
 0x5ee   : > { %v4523_v24 = vmax.f32 %v9076_v46, %v4438_v10  ;;  %v4040_v7 = vpop.f32.mrf.mxu2 }
 0x5f0   : > { %v4612_v63 = vadd.f32 %v8378_v12, %v4523_v24  ;;  %v3084_v62 = vpop.f32.mrf.mxu0 }
 0x5f1   : > { %v4263_v22 = vpop.f32.mrf.mxu3  ;;  %v3307_v1 = vpop.f32.mrf.mxu1 }
 0x5f2   : > { %v4697_v58 = vmax.f32 %v4612_v63, 0.0  ;;  %v4264_v40 = vadd.f32 %v4263_v22, %v4040_v7  ;;  %v3308_v45 = vadd.f32 %v3307_v1, %v3084_v62 }
 0x5f4   : > { %4783 = vst.msk [vmem:[%s7829_s28 + $0x288] sm:$0xff] %vm4701_vm0, %v4697_v58  ;;  %v4439_v29 = vmax.f32 %v3306_v26, %v4264_v40 }
 0x5f6   : > { %v4524_v51 = vmax.f32 %v9079_v16, %v4439_v29  ;;  %v4042_v31 = vpop.f32.mrf.mxu2 }
 0x5f8   : > { %v4613_v3 = vadd.f32 %v8378_v12, %v4524_v51  ;;  %v3087_v50 = vpop.f32.mrf.mxu0 }
 0x5f9   : > { %v4265_v43 = vpop.f32.mrf.mxu3  ;;  %v3310_v57 = vpop.f32.mrf.mxu1 }
 0x5fa   : > { %v4698_v36 = vmax.f32 %v4613_v3, 0.0  ;;  %v4266_v37 = vadd.f32 %v4265_v43, %v4042_v31  ;;  %v3311_v41 = vadd.f32 %v3310_v57, %v3087_v50 }
 0x5fc   : > { %4784 = vst.msk [vmem:[%s7829_s28 + $0x290] sm:$0xff] %vm4701_vm0, %v4698_v36  ;;  %v4440_v48 = vmax.f32 %v3308_v45, %v4266_v37 }
 0x5fe   : > { %v4525_v23 = vmax.f32 %v9082_v2, %v4440_v48  ;;  %v4045_v19 = vpop.f32.mrf.mxu2 }
 0x600   : > { %v4614_v27 = vadd.f32 %v8378_v12, %v4525_v23  ;;  %v3089_v20 = vpop.f32.mrf.mxu0 }
 0x601   : > { %v4268_v6 = vpop.f32.mrf.mxu3  ;;  %v3312_v49 = vpop.f32.mrf.mxu1 }
 0x602   : > { %v4699_v13 = vmax.f32 %v4614_v27, 0.0  ;;  %v4269_v15 = vadd.f32 %v4268_v6, %v4045_v19 }
 0x604   : > { %4785 = vst.msk [vmem:[%s7829_s28 + $0x298] sm:$0xff] %vm4701_vm0, %v4699_v13  ;;  %v4441_v53 = vmax.f32 %v3311_v41, %v4269_v15 }
 0x606   : > { %v4526_v17 = vmax.f32 %v9085_v60, %v4441_v53  ;;  %v4047_v52 = vpop.f32.mrf.mxu2 }
 0x608   : > { %v4615_v11 = vadd.f32 %v8378_v12, %v4526_v17 }
 0x609   : > { %v4270_v4 = vpop.f32.mrf.mxu3 }
 0x60a   : > { %v4700_v18 = vmax.f32 %v4615_v11, 0.0 }
 0x60c   : > { %4787 = vst.msk [vmem:[%s7829_s28 + $0x2a0] sm:$0xf] %vm4786_vm1, %v4700_v18 }
 0x60d PF: > { %s16_s21 = sadd.s32 1, %s6669_s21  }
 0x60e   : > { %p13_p4 = scmp.ge.s32.totalorder %s16_s21, 4  }
 0x610   :  { %15 = sbr.rel (!%p13_p4) target bundleno = 1 (0x1), region = 83 }

// kernel: nav_base_forward.5
= control target key start
LH: loop header
LB: loop body
LE: loop exit
PB: predicated region body
PF: predicated region fallthrough
CT: control target
= control target key end

     0   :  { %s1705_s21 = smov 0   ;;  %s2194_s0 = inlined_call_operand.vmem [shape: bf16[2,36,512], index: 0, kind: input, shape index: {}]   ;;  %s2195_s1 = inlined_call_operand.vmem [shape: bf16[2,36,512], index: 1, kind: input, shape index: {}]   ;;  %s2196_s2 = inlined_call_operand.vmem [shape: bf16[2,36,512], index: 2, kind: input, shape index: {}]   ;;  %s2197_s3 = inlined_call_operand.vmem [shape: bf16[2,36,512], index: 3, kind: input, shape index: {}]   ;;  %s2198_s4 = inlined_call_operand.vmem [shape: bf16[512,64], index: 4, kind: input, shape index: {}]   ;;  %s2199_s5 = inlined_call_operand.vmem [shape: f32[1,64], index: 5, kind: input, shape index: {}]   ;;  %s2200_s6 = inlined_call_operand.vmem [shape: f32[2,36,64], index: 6, kind: output, shape index: {}]  }
   0x1 LB: > { %s1319_s22 = sadd.s32 4294967295, %s1668_s21   ;;  %p1323_p0 = scmp.ge.s32.totalorder %s1668_s21, 1  ;;  %s1668_s21 = sphi %s1705_s21, %s16_s21  }
   0x2   : > { %p242_p1 = scmp.lt.s32.totalorder %s1668_s21, 3 }
   0x4   : > { %p243_p2 = pnand %p1323_p0, %p242_p1 }
   0x5   : > { %p287_p3 = scmp.lt.s32.totalorder (!%p243_p2), %s1319_s22, 1 }
   0x6   : > { %246 = sbr.rel (%p243_p2) target bundleno = 366 (0x16e), region = 44 }
   0xb   : > { %v1716_v0 = vld [vmem:[%s2198_s4 + $0x38] sm:$0xff]  ;;  %v1738_v4 = vld [vmem:[%s2198_s4 + $0x30] sm:$0xff]  ;;  %v1762_v8 = vld [vmem:[%s2198_s4 + $0x28] sm:$0xff]  ;;  %s2202_s22 = smov (!%p287_p3, %s1319_s22), 1  ;;  %vm1221_vm0 = vcmask 523264   ;;  %vm1226_vm1 = vcmask 519168  }
   0xc   : > { %v1721_v1 = vld [vmem:[%s2198_s4 + $0x78] sm:$0xff]  ;;  %632 = vmatpush.bf16.msra.mxu0 %v1716_v0  ;;  %v1743_v5 = vld [vmem:[%s2198_s4 + $0x70] sm:$0xff]  ;;  %v1767_v9 = vld [vmem:[%s2198_s4 + $0x68] sm:$0xff]  ;;  %s1848_s23 = smul.u32 80, %s2202_s22 }
   0xd   : > { %v1726_v2 = vld [vmem:[%s2198_s4 + $0xb8] sm:$0xff]  ;;  %655 = vmatpush.bf16.msra.mxu1 %v1721_v1  ;;  %v1750_v6 = vld [vmem:[%s2198_s4 + $0xb0] sm:$0xff]  ;;  %v1774_v10 = vld [vmem:[%s2198_s4 + $0xa8] sm:$0xff]  ;;  %s1652_s12 = smul.u32 40, %s2202_s22 }
   0xe   : > { %v1731_v3 = vld [vmem:[%s2198_s4 + $0xf8] sm:$0xff]  ;;  %678 = vmatpush.bf16.msra.mxu2 %v1726_v2  ;;  %v1755_v7 = vld [vmem:[%s2198_s4 + $0xf0] sm:$0xff]  ;;  %v1779_v11 = vld [vmem:[%s2198_s4 + $0xe8] sm:$0xff]  ;;  %s1878_s10 = scalar_lea.vmem %s2194_s0, %s1848_s23  ;;  %s1982_s28 = scalar_lea.vmem %s2195_s1, %s1848_s23 }
   0xf   : > { %701 = vmatpush.bf16.msra.mxu3 %v1731_v3  ;;  %v1786_v12 = vld [vmem:[%s2198_s4 + $0x20] sm:$0xff]  ;;  %v1812_v16 = vld [vmem:[%s2198_s4 + $0x18] sm:$0xff]  ;;  %v1840_v20 = vld [vmem:[%s2198_s4 + $0x10] sm:$0xff]  ;;  %s2054_s7 = scalar_lea.vmem %s2196_s2, %s1848_s23  ;;  %s2159_s15 = scalar_lea.vmem %s2200_s6, %s1652_s12 }
  0x10   : > { %633 = vmatpush.bf16.msra.mxu0 %v1738_v4  ;;  %v1791_v13 = vld [vmem:[%s2198_s4 + $0x60] sm:$0xff]  ;;  %v1817_v17 = vld [vmem:[%s2198_s4 + $0x58] sm:$0xff]  ;;  %v1845_v21 = vld [vmem:[%s2198_s4 + $0x50] sm:$0xff] }
  0x11   : > { %656 = vmatpush.bf16.msra.mxu1 %v1743_v5  ;;  %v1800_v14 = vld [vmem:[%s2198_s4 + $0xa0] sm:$0xff]  ;;  %v1828_v18 = vld [vmem:[%s2198_s4 + $0x98] sm:$0xff]  ;;  %v1855_v22 = vld [vmem:[%s2198_s4 + $0x90] sm:$0xff] }
  0x12   : > { %679 = vmatpush.bf16.msra.mxu2 %v1750_v6  ;;  %v1805_v15 = vld [vmem:[%s2198_s4 + $0xe0] sm:$0xff]  ;;  %v1833_v19 = vld [vmem:[%s2198_s4 + $0xd8] sm:$0xff]  ;;  %v1860_v23 = vld [vmem:[%s2198_s4 + $0xd0] sm:$0xff] }
  0x13   : > { %702 = vmatpush.bf16.msra.mxu3 %v1755_v7  ;;  %v1867_v24 = vld [vmem:[%s2198_s4 + $0x8] sm:$0xff]  ;;  %v1895_v28 = vld [vmem:[%s2198_s4] sm:$0xff]  ;;  %v1621_v33 = vld [vmem:[%s1878_s10 + $0xc] sm:$0xf0] }
  0x14   : > { %634 = vmatpush.bf16.msra.mxu0 %v1762_v8  ;;  %v1872_v25 = vld [vmem:[%s2198_s4 + $0x48] sm:$0xff]  ;;  %v1900_v29 = vld [vmem:[%s2198_s4 + $0x40] sm:$0xff]  ;;  %v1333_v35 = vld [vmem:[%s1878_s10 + $0x10] sm:$0xf0] }
  0x15   : > { %657 = vmatpush.bf16.msra.mxu1 %v1767_v9  ;;  %v1885_v26 = vld [vmem:[%s2198_s4 + $0x88] sm:$0xff]  ;;  %v1905_v30 = vld [vmem:[%s2198_s4 + $0x80] sm:$0xff]  ;;  %v1622_v37 = vld [vmem:[%s1878_s10 + $0x14] sm:$0xf0] }
  0x16   : > { %680 = vmatpush.bf16.msra.mxu2 %v1774_v10  ;;  %v1890_v27 = vld [vmem:[%s2198_s4 + $0xc8] sm:$0xff]  ;;  %v1910_v31 = vld [vmem:[%s2198_s4 + $0xc0] sm:$0xff]  ;;  %v1341_v39 = vld [vmem:[%s1878_s10 + $0x18] sm:$0xf0] }
  0x17   : > { %703 = vmatpush.bf16.msra.mxu3 %v1779_v11  ;;  %v1331_v32 = vld [vmem:[%s1878_s10] sm:$0xf]  ;;  %v1619_v34 = vld [vmem:[%s1878_s10 + $0x4] sm:$0xf]  ;;  %v1339_v36 = vld [vmem:[%s1878_s10 + $0x8] sm:$0xf] }
  0x18   : > { %635 = vmatpush.bf16.msra.mxu0 %v1786_v12  ;;  %v1620_v38 = vld [vmem:[%s1878_s10 + $0xc] sm:$0xf]  ;;  %v1332_v40 = vor.u32 %v1621_v33, %v1331_v32  ;;  %v1336_v41 = vor.u32 %v1619_v34, %v1333_v35  ;;  %v1340_v42 = vor.u32 %v1622_v37, %v1339_v36  ;;  %v1347_v44 = vld [vmem:[%s1878_s10 + $0x20] sm:$0xf]  ;;  %v1625_v45 = vld [vmem:[%s1878_s10 + $0x2c] sm:$0xf0] }
  0x19   : > { %658 = vmatpush.bf16.msra.mxu1 %v1791_v13  ;;  %v1344_v43 = vor.u32 %v1620_v38, %v1341_v39  ;;  %v1623_v46 = vld [vmem:[%s1878_s10 + $0x24] sm:$0xf]  ;;  %v1349_v47 = vld [vmem:[%s1878_s10 + $0x30] sm:$0xf0]  ;;  %v1355_v48 = vld [vmem:[%s1878_s10 + $0x28] sm:$0xf]  ;;  %v1348_v52 = vor.u32 %v1625_v45, %v1347_v44 }
  0x1a   : > { %681 = vmatpush.bf16.msra.mxu2 %v1800_v14  ;;  %v1626_v49 = vld [vmem:[%s1878_s10 + $0x34] sm:$0xf0]  ;;  %v1624_v50 = vld [vmem:[%s1878_s10 + $0x2c] sm:$0xf]  ;;  %v1357_v51 = vld [vmem:[%s1878_s10 + $0x38] sm:$0xf0]  ;;  %v1352_v53 = vor.u32 %v1623_v46, %v1349_v47 }
  0x1b   : > { %704 = vmatpush.bf16.msra.mxu3 %v1805_v15  ;;  %v1356_v54 = vor.u32 %v1626_v49, %v1355_v48  ;;  %v1360_v55 = vor.u32 %v1624_v50, %v1357_v51  ;;  %v384_v56 = vld [vmem:[%s1878_s10 + $0x40] sm:$0x33]  ;;  %v385_v57 = vld [vmem:[%s1878_s10 + $0x48] sm:$0x33]  ;;  %v1629_v35 = vld [vmem:[%s1982_s28 + $0xc] sm:$0xf0]  ;;  %s2086_s10 = scalar_lea.vmem %s2197_s3, %s1848_s23 }
  0x1c   : > { %636 = vmatpush.bf16.msra.mxu0 %v1812_v16  ;;  %v412_v58 = vunpack.c.l.b16 %v384_v56  ;;  %v413_v59 = vunpack.c.h.b16 %v384_v56  ;;  %v414_v60 = vunpack.c.l.b16 %v385_v57  ;;  %v415_v61 = vunpack.c.h.b16 %v385_v57  ;;  %v1491_v34 = vld [vmem:[%s1982_s28] sm:$0xf]  ;;  %v1627_v36 = vld [vmem:[%s1982_s28 + $0x4] sm:$0xf]  ;;  %v1493_v37 = vld [vmem:[%s1982_s28 + $0x10] sm:$0xf0] }
  0x1d   : > { %659 = vmatpush.bf16.msra.mxu1 %v1817_v17  ;;  %v1499_v38 = vld [vmem:[%s1982_s28 + $0x8] sm:$0xf]  ;;  %v1630_v39 = vld [vmem:[%s1982_s28 + $0x14] sm:$0xf0]  ;;  %v1507_v46 = vld [vmem:[%s1982_s28 + $0x20] sm:$0xf] }
  0x1e   : > { %682 = vmatpush.bf16.msra.mxu2 %v1828_v18  ;;  %v424_v62 = vpack.c.b16 %v412_v58, %v412_v58  ;;  %v425_v63 = vpack.c.b16 %v413_v59, %v413_v59  ;;  %v426_v32 = vpack.c.b16 %v414_v60, %v414_v60  ;;  %v427_v33 = vpack.c.b16 %v415_v61, %v415_v61  ;;  %v1633_v47 = vld [vmem:[%s1982_s28 + $0x2c] sm:$0xf0]  ;;  %v1631_v48 = vld [vmem:[%s1982_s28 + $0x24] sm:$0xf]  ;;  %v1509_v49 = vld [vmem:[%s1982_s28 + $0x30] sm:$0xf0] }
  0x1f   : > { %705 = vmatpush.bf16.msra.mxu3 %v1833_v19  ;;  %v1500_v44 = vor.u32 %v1630_v39, %v1499_v38  ;;  %v1515_v50 = vld [vmem:[%s1982_s28 + $0x28] sm:$0xf]  ;;  %v1634_v51 = vld [vmem:[%s1982_s28 + $0x34] sm:$0xf0]  ;;  %v888_v60 = vld [vmem:[%s2054_s7 + $0x40] sm:$0x33] }
  0x20   : > { %637 = vmatpush.bf16.msra.mxu0 %v1840_v20  ;;  %v1516_v56 = vor.u32 %v1634_v51, %v1515_v50  ;;  %v889_v61 = vld [vmem:[%s2054_s7 + $0x48] sm:$0x33]  ;;  %v1643_v50 = vld [vmem:[%s2086_s10 + $0x4] sm:$0xf]  ;;  %v1557_v51 = vld [vmem:[%s2086_s10 + $0x10] sm:$0xf0] }
  0x21   : > { %660 = vmatpush.bf16.msra.mxu1 %v1845_v21 }
  0x22   : > { %683 = vmatpush.bf16.msra.mxu2 %v1855_v22 }
  0x23   : > { %706 = vmatpush.bf16.msra.mxu3 %v1860_v23 }
  0x24   : > { %638 = vmatpush.bf16.msra.mxu0 %v1867_v24 }
  0x25   : > { %661 = vmatpush.bf16.msra.mxu1 %v1872_v25 }
  0x26   : > { %684 = vmatpush.bf16.msra.mxu2 %v1885_v26 }
  0x27   : > { %707 = vmatpush.bf16.msra.mxu3 %v1890_v27 }
  0x28   : > { %639 = vmatpush.bf16.msra.mxu0 %v1895_v28 }
  0x29   : > { %662 = vmatpush.bf16.msra.mxu1 %v1900_v29 }
  0x2a   : > { %685 = vmatpush.bf16.msra.mxu2 %v1905_v30 }
  0x2b   : > { %708 = vmatpush.bf16.msra.mxu3 %v1910_v31  ;;  %640 = vmatmul.bf16.vlgmr.msra.gmra.mxu0 %v1332_v40  ;;  %v1628_v40 = vld [vmem:[%s1982_s28 + $0xc] sm:$0xf] }
  0x2c   : > { %663 = vmatmul.bf16.vlgmr.msra.gmra.mxu1 %v1336_v41  ;;  %788 = vmatpush.bf16.msrb.mxu0 %v1716_v0  ;;  %v1501_v41 = vld [vmem:[%s1982_s28 + $0x18] sm:$0xf0] }
  0x2d   : > { %686 = vmatmul.bf16.vlgmr.msra.gmra.mxu2 %v1340_v42  ;;  %811 = vmatpush.bf16.msrb.mxu1 %v1721_v1  ;;  %v1492_v42 = vor.u32 %v1629_v35, %v1491_v34  ;;  %v1504_v45 = vor.u32 %v1628_v40, %v1501_v41 }
  0x2e   : > { %834 = vmatpush.bf16.msrb.mxu2 %v1726_v2  ;;  %709 = vmatmul.bf16.vlgmr.msra.gmra.mxu3 %v1344_v43  ;;  %v1496_v43 = vor.u32 %v1627_v36, %v1493_v37 }
  0x2f   : > { %857 = vmatpush.bf16.msrb.mxu3 %v1731_v3 }
  0x30   : > { %789 = vmatpush.bf16.msrb.mxu0 %v1738_v4 }
  0x31   : > { %812 = vmatpush.bf16.msrb.mxu1 %v1743_v5 }
  0x32   : > { %835 = vmatpush.bf16.msrb.mxu2 %v1750_v6 }
  0x33   : > { %858 = vmatpush.bf16.msrb.mxu3 %v1755_v7 }
  0x34   : > { %790 = vmatpush.bf16.msrb.mxu0 %v1762_v8 }
  0x35   : > { %813 = vmatpush.bf16.msrb.mxu1 %v1767_v9 }
  0x36   : > { %836 = vmatpush.bf16.msrb.mxu2 %v1774_v10 }
  0x37   : > { %859 = vmatpush.bf16.msrb.mxu3 %v1779_v11 }
  0x38   : > { %791 = vmatpush.bf16.msrb.mxu0 %v1786_v12 }
  0x39   : > { %814 = vmatpush.bf16.msrb.mxu1 %v1791_v13 }
  0x3a   : > { %837 = vmatpush.bf16.msrb.mxu2 %v1800_v14 }
  0x3b   : > { %860 = vmatpush.bf16.msrb.mxu3 %v1805_v15  ;;  %645 = vmatmul.bf16.gmra.mxu0 %v1348_v52  ;;  %v1632_v52 = vld [vmem:[%s1982_s28 + $0x2c] sm:$0xf] }
  0x3c   : > { %668 = vmatmul.bf16.gmra.mxu1 %v1352_v53  ;;  %792 = vmatpush.bf16.msrb.mxu0 %v1812_v16  ;;  %v1517_v53 = vld [vmem:[%s1982_s28 + $0x38] sm:$0xf0] }
  0x3d   : > { %691 = vmatmul.bf16.gmra.mxu2 %v1356_v54  ;;  %815 = vmatpush.bf16.msrb.mxu1 %v1817_v17  ;;  %v1508_v54 = vor.u32 %v1633_v47, %v1507_v46  ;;  %v1520_v57 = vor.u32 %v1632_v52, %v1517_v53  ;;  %v1563_v52 = vld [vmem:[%s2086_s10 + $0x8] sm:$0xf]  ;;  %v1646_v53 = vld [vmem:[%s2086_s10 + $0x14] sm:$0xf0] }
  0x3e   : > { %838 = vmatpush.bf16.msrb.mxu2 %v1828_v18  ;;  %714 = vmatmul.bf16.gmra.mxu3 %v1360_v55  ;;  %v1512_v55 = vor.u32 %v1631_v48, %v1509_v49  ;;  %v1555_v48 = vld [vmem:[%s2086_s10] sm:$0xf]  ;;  %v1645_v49 = vld [vmem:[%s2086_s10 + $0xc] sm:$0xf0] }
  0x3f   : > { %861 = vmatpush.bf16.msrb.mxu3 %v1833_v19 }
  0x40   : > { %793 = vmatpush.bf16.msrb.mxu0 %v1840_v20 }
  0x41   : > { %816 = vmatpush.bf16.msrb.mxu1 %v1845_v21 }
  0x42   : > { %839 = vmatpush.bf16.msrb.mxu2 %v1855_v22 }
  0x43   : > { %862 = vmatpush.bf16.msrb.mxu3 %v1860_v23 }
  0x44   : > { %794 = vmatpush.bf16.msrb.mxu0 %v1867_v24 }
  0x45   : > { %817 = vmatpush.bf16.msrb.mxu1 %v1872_v25 }
  0x46   : > { %840 = vmatpush.bf16.msrb.mxu2 %v1885_v26 }
  0x47   : > { %863 = vmatpush.bf16.msrb.mxu3 %v1890_v27 }
  0x48   : > { %795 = vmatpush.bf16.msrb.mxu0 %v1895_v28 }
  0x49   : > { %818 = vmatpush.bf16.msrb.mxu1 %v1900_v29 }
  0x4a   : > { %841 = vmatpush.bf16.msrb.mxu2 %v1905_v30 }
  0x4b   : > { %864 = vmatpush.bf16.msrb.mxu3 %v1910_v31  ;;  %650 = vmatmul.bf16.gmra.mxu0 %v424_v62  ;;  %v916_v62 = vunpack.c.l.b16 %v888_v60 }
  0x4c   : > { %944 = vmatpush.bf16.msra.mxu0 %v1716_v0  ;;  %673 = vmatmul.bf16.gmra.mxu1 %v425_v63  ;;  %v917_v63 = vunpack.c.h.b16 %v888_v60 }
  0x4d   : > { %967 = vmatpush.bf16.msra.mxu1 %v1721_v1  ;;  %696 = vmatmul.bf16.gmra.mxu2 %v426_v32  ;;  %v918_v32 = vunpack.c.l.b16 %v889_v61  ;;  %v928_v34 = vpack.c.b16 %v916_v62, %v916_v62 }
  0x4e   : > { %990 = vmatpush.bf16.msra.mxu2 %v1726_v2  ;;  %719 = vmatmul.bf16.gmra.mxu3 %v427_v33  ;;  %v919_v33 = vunpack.c.h.b16 %v889_v61  ;;  %v929_v35 = vpack.c.b16 %v917_v63, %v917_v63 }
  0x4f   : > { %1013 = vmatpush.bf16.msra.mxu3 %v1731_v3  ;;  %v930_v38 = vpack.c.b16 %v918_v32, %v918_v32 }
  0x50   : > { %945 = vmatpush.bf16.msra.mxu0 %v1738_v4  ;;  %v931_v39 = vpack.c.b16 %v919_v33, %v919_v33 }
  0x51   : > { %968 = vmatpush.bf16.msra.mxu1 %v1743_v5 }
  0x52   : > { %991 = vmatpush.bf16.msra.mxu2 %v1750_v6 }
  0x53   : > { %1014 = vmatpush.bf16.msra.mxu3 %v1755_v7 }
  0x54   : > { %946 = vmatpush.bf16.msra.mxu0 %v1762_v8 }
  0x55   : > { %969 = vmatpush.bf16.msra.mxu1 %v1767_v9 }
  0x56   : > { %992 = vmatpush.bf16.msra.mxu2 %v1774_v10 }
  0x57   : > { %1015 = vmatpush.bf16.msra.mxu3 %v1779_v11 }
  0x58   : > { %947 = vmatpush.bf16.msra.mxu0 %v1786_v12 }
  0x59   : > { %970 = vmatpush.bf16.msra.mxu1 %v1791_v13 }
  0x5a   : > { %993 = vmatpush.bf16.msra.mxu2 %v1800_v14 }
  0x5b   : > { %1016 = vmatpush.bf16.msra.mxu3 %v1805_v15  ;;  %796 = vmatmul.bf16.vlgmr.msrb.gmra.mxu0 %v1492_v42 }
  0x5c   : > { %948 = vmatpush.bf16.msra.mxu0 %v1812_v16  ;;  %819 = vmatmul.bf16.vlgmr.msrb.gmra.mxu1 %v1496_v43 }
  0x5d   : > { %971 = vmatpush.bf16.msra.mxu1 %v1817_v17  ;;  %842 = vmatmul.bf16.vlgmr.msrb.gmra.mxu2 %v1500_v44 }
  0x5e   : > { %994 = vmatpush.bf16.msra.mxu2 %v1828_v18  ;;  %865 = vmatmul.bf16.vlgmr.msrb.gmra.mxu3 %v1504_v45 }
  0x5f   : > { %1017 = vmatpush.bf16.msra.mxu3 %v1833_v19 }
  0x60   : > { %949 = vmatpush.bf16.msra.mxu0 %v1840_v20 }
  0x61   : > { %972 = vmatpush.bf16.msra.mxu1 %v1845_v21 }
  0x62   : > { %995 = vmatpush.bf16.msra.mxu2 %v1855_v22 }
  0x63   : > { %1018 = vmatpush.bf16.msra.mxu3 %v1860_v23 }
  0x64   : > { %950 = vmatpush.bf16.msra.mxu0 %v1867_v24 }
  0x65   : > { %973 = vmatpush.bf16.msra.mxu1 %v1872_v25 }
  0x66   : > { %996 = vmatpush.bf16.msra.mxu2 %v1885_v26 }
  0x67   : > { %1019 = vmatpush.bf16.msra.mxu3 %v1890_v27 }
  0x68   : > { %951 = vmatpush.bf16.msra.mxu0 %v1895_v28 }
  0x69   : > { %974 = vmatpush.bf16.msra.mxu1 %v1900_v29 }
  0x6a   : > { %997 = vmatpush.bf16.msra.mxu2 %v1905_v30 }
  0x6b   : > { %1020 = vmatpush.bf16.msra.mxu3 %v1910_v31  ;;  %801 = vmatmul.bf16.gmra.mxu0 %v1508_v54  ;;  %v1644_v54 = vld [vmem:[%s2086_s10 + $0xc] sm:$0xf] }
  0x6c   : > { %1100 = vmatpush.bf16.msrb.mxu0 %v1716_v0  ;;  %824 = vmatmul.bf16.gmra.mxu1 %v1512_v55  ;;  %v1565_v55 = vld [vmem:[%s2086_s10 + $0x18] sm:$0xf0] }
  0x6d   : > { %1123 = vmatpush.bf16.msrb.mxu1 %v1721_v1  ;;  %847 = vmatmul.bf16.gmra.mxu2 %v1516_v56 }
  0x6e   : > { %1146 = vmatpush.bf16.msrb.mxu2 %v1726_v2  ;;  %870 = vmatmul.bf16.gmra.mxu3 %v1520_v57  ;;  %v732_v2 = vld [vmem:[%s1982_s28 + $0x40] sm:$0x33] }
  0x6f   : > { %1169 = vmatpush.bf16.msrb.mxu3 %v1731_v3  ;;  %v733_v3 = vld [vmem:[%s1982_s28 + $0x48] sm:$0x33]  ;;  %v760_v0 = vunpack.c.l.b16 %v732_v2  ;;  %v761_v1 = vunpack.c.h.b16 %v732_v2  ;;  %v1556_v2 = vor.u32 %v1645_v49, %v1555_v48 }
  0x70   : > { %1101 = vmatpush.bf16.msrb.mxu0 %v1738_v4  ;;  %v762_v58 = vunpack.c.l.b16 %v733_v3 }
  0x71   : > { %1124 = vmatpush.bf16.msrb.mxu1 %v1743_v5  ;;  %v772_v4 = vpack.c.b16 %v760_v0, %v760_v0  ;;  %v773_v5 = vpack.c.b16 %v761_v1, %v761_v1 }
  0x72   : > { %1147 = vmatpush.bf16.msrb.mxu2 %v1750_v6  ;;  %v763_v6 = vunpack.c.h.b16 %v733_v3  ;;  %v1560_v3 = vor.u32 %v1643_v50, %v1557_v51 }
  0x73   : > { %1170 = vmatpush.bf16.msrb.mxu3 %v1755_v7  ;;  %v774_v7 = vpack.c.b16 %v762_v58, %v762_v58 }
  0x74   : > { %1102 = vmatpush.bf16.msrb.mxu0 %v1762_v8  ;;  %v1523_v8 = vld [vmem:[%s2054_s7] sm:$0xf] }
  0x75   : > { %1125 = vmatpush.bf16.msrb.mxu1 %v1767_v9  ;;  %v1637_v9 = vld [vmem:[%s2054_s7 + $0xc] sm:$0xf0] }
  0x76   : > { %1148 = vmatpush.bf16.msrb.mxu2 %v1774_v10  ;;  %v775_v10 = vpack.c.b16 %v763_v6, %v763_v6  ;;  %v1564_v6 = vor.u32 %v1646_v53, %v1563_v52 }
  0x77   : > { %1171 = vmatpush.bf16.msrb.mxu3 %v1779_v11  ;;  %v1635_v11 = vld [vmem:[%s2054_s7 + $0x4] sm:$0xf] }
  0x78   : > { %1103 = vmatpush.bf16.msrb.mxu0 %v1786_v12  ;;  %v1525_v12 = vld [vmem:[%s2054_s7 + $0x10] sm:$0xf0] }
  0x79   : > { %1126 = vmatpush.bf16.msrb.mxu1 %v1791_v13  ;;  %v1531_v13 = vld [vmem:[%s2054_s7 + $0x8] sm:$0xf] }
  0x7a   : > { %1149 = vmatpush.bf16.msrb.mxu2 %v1800_v14  ;;  %v1638_v14 = vld [vmem:[%s2054_s7 + $0x14] sm:$0xf0] }
  0x7b   : > { %1172 = vmatpush.bf16.msrb.mxu3 %v1805_v15  ;;  %806 = vmatmul.bf16.gmra.mxu0 %v772_v4  ;;  %v1636_v15 = vld [vmem:[%s2054_s7 + $0xc] sm:$0xf]  ;;  %v1568_v4 = vor.u32 %v1644_v54, %v1565_v55 }
  0x7c   : > { %1104 = vmatpush.bf16.msrb.mxu0 %v1812_v16  ;;  %829 = vmatmul.bf16.gmra.mxu1 %v773_v5  ;;  %v1533_v16 = vld [vmem:[%s2054_s7 + $0x18] sm:$0xf0] }
  0x7d   : > { %1127 = vmatpush.bf16.msrb.mxu1 %v1817_v17  ;;  %852 = vmatmul.bf16.gmra.mxu2 %v774_v7  ;;  %v1524_v17 = vor.u32 %v1637_v9, %v1523_v8 }
  0x7e   : > { %1150 = vmatpush.bf16.msrb.mxu2 %v1828_v18  ;;  %875 = vmatmul.bf16.gmra.mxu3 %v775_v10  ;;  %v1528_v18 = vor.u32 %v1635_v11, %v1525_v12 }
  0x7f   : > { %1173 = vmatpush.bf16.msrb.mxu3 %v1833_v19  ;;  %v1532_v19 = vor.u32 %v1638_v14, %v1531_v13 }
  0x80   : > { %1105 = vmatpush.bf16.msrb.mxu0 %v1840_v20  ;;  %v1536_v20 = vor.u32 %v1636_v15, %v1533_v16  ;;  %v1571_v15 = vld [vmem:[%s2086_s10 + $0x20] sm:$0xf]  ;;  %v1649_v16 = vld [vmem:[%s2086_s10 + $0x2c] sm:$0xf0] }
  0x81   : > { %1128 = vmatpush.bf16.msrb.mxu1 %v1845_v21  ;;  %v1539_v21 = vld [vmem:[%s2054_s7 + $0x20] sm:$0xf] }
  0x82   : > { %1151 = vmatpush.bf16.msrb.mxu2 %v1855_v22  ;;  %v1641_v22 = vld [vmem:[%s2054_s7 + $0x2c] sm:$0xf0] }
  0x83   : > { %1174 = vmatpush.bf16.msrb.mxu3 %v1860_v23  ;;  %v1639_v23 = vld [vmem:[%s2054_s7 + $0x24] sm:$0xf] }
  0x84   : > { %1106 = vmatpush.bf16.msrb.mxu0 %v1867_v24  ;;  %v1541_v24 = vld [vmem:[%s2054_s7 + $0x30] sm:$0xf0] }
  0x85   : > { %1129 = vmatpush.bf16.msrb.mxu1 %v1872_v25  ;;  %v1547_v25 = vld [vmem:[%s2054_s7 + $0x28] sm:$0xf] }
  0x86   : > { %1152 = vmatpush.bf16.msrb.mxu2 %v1885_v26  ;;  %v1642_v26 = vld [vmem:[%s2054_s7 + $0x34] sm:$0xf0] }
  0x87   : > { %1175 = vmatpush.bf16.msrb.mxu3 %v1890_v27  ;;  %v1640_v27 = vld [vmem:[%s2054_s7 + $0x2c] sm:$0xf] }
  0x88   : > { %1107 = vmatpush.bf16.msrb.mxu0 %v1895_v28  ;;  %v1549_v28 = vld [vmem:[%s2054_s7 + $0x38] sm:$0xf0] }
  0x89   : > { %1130 = vmatpush.bf16.msrb.mxu1 %v1900_v29  ;;  %v1540_v29 = vor.u32 %v1641_v22, %v1539_v21  ;;  %v1552_v59 = vor.u32 %v1640_v27, %v1549_v28  ;;  %v1648_v21 = vld [vmem:[%s2086_s10 + $0x2c] sm:$0xf]  ;;  %v1581_v22 = vld [vmem:[%s2086_s10 + $0x38] sm:$0xf0] }
  0x8a   : > { %1153 = vmatpush.bf16.msrb.mxu2 %v1905_v30  ;;  %v1544_v30 = vor.u32 %v1639_v23, %v1541_v24 }
  0x8b   : > { %1176 = vmatpush.bf16.msrb.mxu3 %v1910_v31  ;;  %952 = vmatmul.bf16.vlgmr.msra.gmra.mxu0 %v1524_v17  ;;  %v1548_v31 = vor.u32 %v1642_v26, %v1547_v25  ;;  %v1647_v17 = vld [vmem:[%s2086_s10 + $0x24] sm:$0xf]  ;;  %v1572_v25 = vor.u32 %v1649_v16, %v1571_v15 }
  0x8c   : > { %975 = vmatmul.bf16.vlgmr.msra.gmra.mxu1 %v1528_v18  ;;  %v1573_v18 = vld [vmem:[%s2086_s10 + $0x30] sm:$0xf0] }
  0x8d   : > { %998 = vmatmul.bf16.vlgmr.msra.gmra.mxu2 %v1532_v19  ;;  %v1579_v19 = vld [vmem:[%s2086_s10 + $0x28] sm:$0xf]  ;;  %v1576_v26 = vor.u32 %v1647_v17, %v1573_v18 }
  0x8e   : > { %1021 = vmatmul.bf16.vlgmr.msra.gmra.mxu3 %v1536_v20  ;;  %v1650_v20 = vld [vmem:[%s2086_s10 + $0x34] sm:$0xf0] }
  0x9b   : > { %957 = vmatmul.bf16.gmra.mxu0 %v1540_v29 }
  0x9c   : > { %980 = vmatmul.bf16.gmra.mxu1 %v1544_v30  ;;  %v1580_v30 = vor.u32 %v1650_v20, %v1579_v19 }
  0x9d   : > { %1003 = vmatmul.bf16.gmra.mxu2 %v1548_v31  ;;  %v1584_v31 = vor.u32 %v1648_v21, %v1581_v22 }
  0x9e   : > { %1026 = vmatmul.bf16.gmra.mxu3 %v1552_v59 }
  0xa8   : > { %v641_v36 = vpop.f32.mrf.mxu0 }
  0xa9   : > { %v664_v37 = vpop.f32.mrf.mxu1 }
  0xaa   : > { %v665_v40 = vadd.f32 %v664_v37, %v641_v36 }
  0xab   : > { %962 = vmatmul.bf16.gmra.mxu0 %v928_v34  ;;  %v1044_v34 = vld [vmem:[%s2086_s10 + $0x40] sm:$0x33] }
  0xac   : > { %985 = vmatmul.bf16.gmra.mxu1 %v929_v35  ;;  %v1045_v35 = vld [vmem:[%s2086_s10 + $0x48] sm:$0x33]  ;;  %v1072_v37 = vunpack.c.l.b16 %v1044_v34 }
  0xad   : > { %1008 = vmatmul.bf16.gmra.mxu2 %v930_v38  ;;  %v1073_v38 = vunpack.c.h.b16 %v1044_v34 }
  0xae   : > { %1031 = vmatmul.bf16.gmra.mxu3 %v931_v39  ;;  %v1074_v39 = vunpack.c.l.b16 %v1045_v35 }
  0xb0   : > { %v687_v41 = vpop.f32.mrf.mxu2  ;;  %v643_v44 = vpop.f32.mrf.mxu0  ;;  %v1086_v48 = vpack.c.b16 %v1074_v39, %v1074_v39 }
  0xb1   : > { %v710_v42 = vpop.f32.mrf.mxu3  ;;  %v688_v43 = vadd.f32 %v687_v41, %v665_v40  ;;  %v666_v45 = vpop.f32.mrf.mxu1  ;;  %v1075_v40 = vunpack.c.h.b16 %v1045_v35 }
  0xb2   : > { %v667_v46 = vadd.f32 %v666_v45, %v643_v44  ;;  %v1085_v44 = vpack.c.b16 %v1073_v38, %v1073_v38 }
  0xb3   : > { %v2088_v47 = vadd.f32 %v710_v42, %v688_v43  ;;  %v1084_v43 = vpack.c.b16 %v1072_v37, %v1072_v37  ;;  %v1087_v49 = vpack.c.b16 %v1075_v40, %v1075_v40 }
  0xb8   : > { %v689_v56 = vpop.f32.mrf.mxu2  ;;  %v646_v1 = vpop.f32.mrf.mxu0 }
  0xb9   : > { %v712_v57 = vpop.f32.mrf.mxu3  ;;  %v690_v0 = vadd.f32 %v689_v56, %v667_v46  ;;  %v669_v58 = vpop.f32.mrf.mxu1 }
  0xba   : > { %v670_v5 = vadd.f32 %v669_v58, %v646_v1 }
  0xbb   : > { %v2098_v7 = vadd.f32 %v712_v57, %v690_v0  ;;  %1108 = vmatmul.bf16.vlgmr.msrb.gmra.mxu0 %v1556_v2 }
  0xbc   : > { %1131 = vmatmul.bf16.vlgmr.msrb.gmra.mxu1 %v1560_v3 }
  0xbd   : > { %1154 = vmatmul.bf16.vlgmr.msrb.gmra.mxu2 %v1564_v6 }
  0xbe   : > { %1177 = vmatmul.bf16.vlgmr.msrb.gmra.mxu3 %v1568_v4 }
  0xc0   : > { %v692_v10 = vpop.f32.mrf.mxu2  ;;  %v648_v11 = vpop.f32.mrf.mxu0 }
  0xc1   : > { %v715_v8 = vpop.f32.mrf.mxu3  ;;  %v693_v9 = vadd.f32 %v692_v10, %v670_v5  ;;  %v671_v12 = vpop.f32.mrf.mxu1 }
  0xc2   : > { %v672_v13 = vadd.f32 %v671_v12, %v648_v11 }
  0xc3   : > { %v2100_v14 = vadd.f32 %v715_v8, %v693_v9 }
  0xc8   : > { %v694_v23 = vpop.f32.mrf.mxu2  ;;  %v651_v28 = vpop.f32.mrf.mxu0 }
  0xc9   : > { %v717_v24 = vpop.f32.mrf.mxu3  ;;  %v695_v27 = vadd.f32 %v694_v23, %v672_v13  ;;  %v674_v29 = vpop.f32.mrf.mxu1 }
  0xca   : > { %v675_v59 = vadd.f32 %v674_v29, %v651_v28 }
  0xcb   : > { %v2110_v60 = vadd.f32 %v717_v24, %v695_v27  ;;  %1113 = vmatmul.bf16.gmra.mxu0 %v1572_v25 }
  0xcc   : > { %1136 = vmatmul.bf16.gmra.mxu1 %v1576_v26 }
  0xcd   : > { %1159 = vmatmul.bf16.gmra.mxu2 %v1580_v30 }
  0xce   : > { %1182 = vmatmul.bf16.gmra.mxu3 %v1584_v31 }
  0xd0   : > { %v697_v61 = vpop.f32.mrf.mxu2  ;;  %v653_v32 = vpop.f32.mrf.mxu0 }
  0xd1   : > { %v720_v62 = vpop.f32.mrf.mxu3  ;;  %v698_v63 = vadd.f32 %v697_v61, %v675_v59  ;;  %v676_v33 = vpop.f32.mrf.mxu1 }
  0xd3   : > { %v2114_v36 = vadd.f32 %v720_v62, %v698_v63 }
  0xd8   : > { %v699_v41 = vpop.f32.mrf.mxu2  ;;  %v797_v45 = vpop.f32.mrf.mxu0 }
  0xd9   : > { %v722_v42 = vpop.f32.mrf.mxu3  ;;  %v820_v46 = vpop.f32.mrf.mxu1 }
  0xda   : > { %v821_v50 = vadd.f32 %v820_v46, %v797_v45 }
  0xdb   : > { %1118 = vmatmul.bf16.gmra.mxu0 %v1084_v43 }
  0xdc   : > { %1141 = vmatmul.bf16.gmra.mxu1 %v1085_v44 }
  0xdd   : > { %1164 = vmatmul.bf16.gmra.mxu2 %v1086_v48 }
  0xde   : > { %1187 = vmatmul.bf16.gmra.mxu3 %v1087_v49 }
  0xe0   : > { %v843_v51 = vpop.f32.mrf.mxu2  ;;  %v799_v54 = vpop.f32.mrf.mxu0 }
  0xe1   : > { %v866_v52 = vpop.f32.mrf.mxu3  ;;  %v844_v53 = vadd.f32 %v843_v51, %v821_v50  ;;  %v822_v55 = vpop.f32.mrf.mxu1 }
  0xe2   : > { %v823_v56 = vadd.f32 %v822_v55, %v799_v54 }
  0xe3   : > { %v2116_v57 = vadd.f32 %v866_v52, %v844_v53 }
  0xe5   : > { %v1192_v2 = vmax.f32 %v2088_v47, %v2116_v57 }
  0xe8   : > { %v845_v3 = vpop.f32.mrf.mxu2  ;;  %v802_v58 = vpop.f32.mrf.mxu0 }
  0xe9   : > { %v868_v0 = vpop.f32.mrf.mxu3  ;;  %v846_v1 = vadd.f32 %v845_v3, %v823_v56  ;;  %v825_v6 = vpop.f32.mrf.mxu1 }
  0xea   : > { %v826_v4 = vadd.f32 %v825_v6, %v802_v58 }
  0xeb   : > { %v2120_v5 = vadd.f32 %v868_v0, %v846_v1 }
  0xed   : > { %v1193_v10 = vmax.f32 %v2098_v7, %v2120_v5 }
  0xf0   : > { %v848_v8 = vpop.f32.mrf.mxu2  ;;  %v804_v12 = vpop.f32.mrf.mxu0 }
  0xf1   : > { %v871_v9 = vpop.f32.mrf.mxu3  ;;  %v849_v11 = vadd.f32 %v848_v8, %v826_v4  ;;  %v827_v13 = vpop.f32.mrf.mxu1 }
  0xf2   : > { %v828_v15 = vadd.f32 %v827_v13, %v804_v12 }
  0xf3   : > { %v2124_v16 = vadd.f32 %v871_v9, %v849_v11 }
  0xf5   : > { %v1194_v17 = vmax.f32 %v2100_v14, %v2124_v16 }
  0xf8   : > { %v850_v18 = vpop.f32.mrf.mxu2  ;;  %v807_v21 = vpop.f32.mrf.mxu0 }
  0xf9   : > { %v873_v19 = vpop.f32.mrf.mxu3  ;;  %v851_v20 = vadd.f32 %v850_v18, %v828_v15  ;;  %v830_v22 = vpop.f32.mrf.mxu1 }
  0xfa   : > { %v831_v23 = vadd.f32 %v830_v22, %v807_v21 }
  0xfb   : > { %v2128_v24 = vadd.f32 %v873_v19, %v851_v20  ;;  %v2149_v20 = vld [vmem:[%s2199_s5] ss:$0 sm:$0xff] }
  0xfd   : > { %v1195_v25 = vmax.f32 %v2110_v60, %v2128_v24 }
 0x100   : > { %v853_v26 = vpop.f32.mrf.mxu2  ;;  %v809_v29 = vpop.f32.mrf.mxu0 }
 0x101   : > { %v876_v27 = vpop.f32.mrf.mxu3  ;;  %v854_v28 = vadd.f32 %v853_v26, %v831_v23  ;;  %v832_v30 = vpop.f32.mrf.mxu1 }
 0x103   : > { %v2132_v31 = vadd.f32 %v876_v27, %v854_v28 }
 0x105   : > { %v1196_v59 = vmax.f32 %v2114_v36, %v2132_v31 }
 0x108   : > { %v855_v61 = vpop.f32.mrf.mxu2  ;;  %v953_v63 = vpop.f32.mrf.mxu0 }
 0x109   : > { %v878_v62 = vpop.f32.mrf.mxu3  ;;  %v976_v32 = vpop.f32.mrf.mxu1 }
 0x10a   : > { %v977_v1 = vadd.f32 %v976_v32, %v953_v63 }
 0x110   : > { %v999_v33 = vpop.f32.mrf.mxu2  ;;  %v955_v35 = vpop.f32.mrf.mxu0 }
 0x111   : > { %v1022_v34 = vpop.f32.mrf.mxu3  ;;  %v978_v37 = vpop.f32.mrf.mxu1  ;;  %v1000_v6 = vadd.f32 %v999_v33, %v977_v1 }
 0x112   : > { %v979_v18 = vadd.f32 %v978_v37, %v955_v35 }
 0x113   : > { %v1023_v13 = vadd.f32 %v1022_v34, %v1000_v6 }
 0x118   : > { %v1001_v38 = vpop.f32.mrf.mxu2  ;;  %v958_v40 = vpop.f32.mrf.mxu0 }
 0x119   : > { %v1024_v39 = vpop.f32.mrf.mxu3  ;;  %v981_v41 = vpop.f32.mrf.mxu1  ;;  %v1002_v21 = vadd.f32 %v1001_v38, %v979_v18 }
 0x11a   : > { %v982_v63 = vadd.f32 %v981_v41, %v958_v40 }
 0x11b   : > { %v1025_v62 = vadd.f32 %v1024_v39, %v1002_v21 }
 0x120   : > { %v1004_v42 = vpop.f32.mrf.mxu2  ;;  %v960_v44 = vpop.f32.mrf.mxu0 }
 0x121   : > { %v1027_v43 = vpop.f32.mrf.mxu3  ;;  %v983_v45 = vpop.f32.mrf.mxu1  ;;  %v1005_v33 = vadd.f32 %v1004_v42, %v982_v63 }
 0x123   : > { %v1028_v40 = vadd.f32 %v1027_v43, %v1005_v33 }
 0x128   : > { %v1006_v46 = vpop.f32.mrf.mxu2  ;;  %v2138_v49 = vpop.f32.mrf.mxu0 }
 0x129   : > { %v2136_v48 = vpop.f32.mrf.mxu3  ;;  %v2140_v50 = vpop.f32.mrf.mxu1 }
 0x130   : > { %v2142_v51 = vpop.f32.mrf.mxu2  ;;  %v965_v53 = vpop.f32.mrf.mxu0 }
 0x131   : > { %v2144_v52 = vpop.f32.mrf.mxu3  ;;  %v988_v54 = vpop.f32.mrf.mxu1 }
 0x138   : > { %v1011_v55 = vpop.f32.mrf.mxu2  ;;  %v1109_v3 = vpop.f32.mrf.mxu0 }
 0x139   : > { %v1034_v56 = vpop.f32.mrf.mxu3  ;;  %v1132_v0 = vpop.f32.mrf.mxu1 }
 0x13a   : > { %v1133_v58 = vadd.f32 %v1132_v0, %v1109_v3  ;;  %v984_v56 = vadd.f32 %v983_v45, %v960_v44  ;;  %v987_v44 = vadd.f32 %v2140_v50, %v2138_v49 }
 0x13c   : > { %v1007_v42 = vadd.f32 %v1006_v46, %v984_v56 }
 0x140   : > { %v1155_v4 = vpop.f32.mrf.mxu2  ;;  %v1111_v11 = vpop.f32.mrf.mxu0 }
 0x141   : > { %v1178_v8 = vpop.f32.mrf.mxu3  ;;  %v1156_v9 = vadd.f32 %v1155_v4, %v1133_v58  ;;  %v1134_v12 = vpop.f32.mrf.mxu1  ;;  %v1030_v4 = vadd.f32 %v2136_v48, %v1007_v42 }
 0x142   : > { %v1135_v23 = vadd.f32 %v1134_v12, %v1111_v11 }
 0x143   : > { %v1179_v15 = vadd.f32 %v1178_v8, %v1156_v9 }
 0x145   : > { %v1197_v19 = vmax.f32 %v1023_v13, %v1179_v15 }
 0x147   : > { %v1202_v22 = vmax.f32 %v1192_v2, %v1197_v19 }
 0x148   : > { %v1157_v26 = vpop.f32.mrf.mxu2  ;;  %v1114_v30 = vpop.f32.mrf.mxu0 }
 0x149   : > { %v1180_v27 = vpop.f32.mrf.mxu3  ;;  %v1211_v28 = vadd.f32 %v2149_v20, %v1202_v22  ;;  %v1158_v29 = vadd.f32 %v1157_v26, %v1135_v23  ;;  %v1137_v61 = vpop.f32.mrf.mxu1 }
 0x14a   : > { %v1138_v2 = vadd.f32 %v1137_v61, %v1114_v30 }
 0x14b   : > { %v1216_v32 = vmax.f32 %v1211_v28, 0.0  ;;  %v1181_v47 = vadd.f32 %v1180_v27, %v1158_v29 }
 0x14d   : > { %1222 = vst.msk [vmem:[%s2159_s15] sm:$0xff] %vm1221_vm0, %v1216_v32  ;;  %v1198_v57 = vmax.f32 %v1025_v62, %v1181_v47 }
 0x14f   : > { %v1203_v34 = vmax.f32 %v1193_v10, %v1198_v57 }
 0x150   : > { %v1160_v35 = vpop.f32.mrf.mxu2  ;;  %v1116_v54 = vpop.f32.mrf.mxu0 }
 0x151   : > { %v1183_v37 = vpop.f32.mrf.mxu3  ;;  %v1212_v38 = vadd.f32 %v2149_v20, %v1203_v34  ;;  %v1161_v53 = vadd.f32 %v1160_v35, %v1138_v2  ;;  %v1139_v39 = vpop.f32.mrf.mxu1 }
 0x152   : > { %v1140_v5 = vadd.f32 %v1139_v39, %v1116_v54 }
 0x153   : > { %v1217_v41 = vmax.f32 %v1212_v38, 0.0  ;;  %v1184_v55 = vadd.f32 %v1183_v37, %v1161_v53 }
 0x155   : > { %1223 = vst.msk [vmem:[%s2159_s15 + $0x8] sm:$0xff] %vm1221_vm0, %v1217_v41  ;;  %v1199_v3 = vmax.f32 %v1028_v40, %v1184_v55 }
 0x157   : > { %v1204_v7 = vmax.f32 %v1194_v17, %v1199_v3  ;;  %v1010_v17 = vadd.f32 %v2142_v51, %v987_v44 }
 0x158   : > { %v1162_v10 = vpop.f32.mrf.mxu2  ;;  %v1119_v6 = vpop.f32.mrf.mxu0 }
 0x159   : > { %v1185_v0 = vpop.f32.mrf.mxu3  ;;  %v1213_v1 = vadd.f32 %v2149_v20, %v1204_v7  ;;  %v1163_v58 = vadd.f32 %v1162_v10, %v1140_v5  ;;  %v1142_v43 = vpop.f32.mrf.mxu1  ;;  %v1033_v13 = vadd.f32 %v2144_v52, %v1010_v17 }
 0x15a   : > { %v1143_v16 = vadd.f32 %v1142_v43, %v1119_v6 }
 0x15b   : > { %v1218_v45 = vmax.f32 %v1213_v1, 0.0  ;;  %v1186_v46 = vadd.f32 %v1185_v0, %v1163_v58 }
 0x15d   : > { %1224 = vst.msk [vmem:[%s2159_s15 + $0x10] sm:$0xff] %vm1221_vm0, %v1218_v45  ;;  %v1200_v14 = vmax.f32 %v1030_v4, %v1186_v46 }
 0x15f   : > { %v1205_v8 = vmax.f32 %v1195_v25, %v1200_v14 }
 0x160   : > { %v1165_v9 = vpop.f32.mrf.mxu2  ;;  %v1121_v49 = vpop.f32.mrf.mxu0 }
 0x161   : > { %v1188_v11 = vpop.f32.mrf.mxu3  ;;  %v1214_v48 = vadd.f32 %v2149_v20, %v1205_v8  ;;  %v1166_v12 = vadd.f32 %v1165_v9, %v1143_v16  ;;  %v1144_v50 = vpop.f32.mrf.mxu1 }
 0x163   : > { %v1219_v15 = vmax.f32 %v1214_v48, 0.0  ;;  %v1189_v18 = vadd.f32 %v1188_v11, %v1166_v12 }
 0x165   : > { %1225 = vst.msk [vmem:[%s2159_s15 + $0x18] sm:$0xff] %vm1221_vm0, %v1219_v15  ;;  %v1201_v19 = vmax.f32 %v1033_v13, %v1189_v18 }
 0x167   : > { %v1206_v60 = vmax.f32 %v1196_v59, %v1201_v19 }
 0x168   : > { %v1167_v24 = vpop.f32.mrf.mxu2 }
 0x169   : > { %v1190_v25 = vpop.f32.mrf.mxu3  ;;  %v1215_v51 = vadd.f32 %v2149_v20, %v1206_v60 }
 0x16b   : > { %v1220_v21 = vmax.f32 %v1215_v51, 0.0 }
 0x16d   : > { %1227 = vst.msk [vmem:[%s2159_s15 + $0x20] sm:$0xf] %vm1226_vm1, %v1220_v21 }
 0x16e PF: > { %s16_s21 = sadd.s32 1, %s1668_s21  }
 0x16f   : > { %p13_p4 = scmp.ge.s32.totalorder %s16_s21, 4  }
 0x171   :  { %15 = sbr.rel (!%p13_p4) target bundleno = 1 (0x1), region = 83 }

// kernel: nav_base_forward.6
= control target key start
LH: loop header
LB: loop body
LE: loop exit
PB: predicated region body
PF: predicated region fallthrough
CT: control target
= control target key end

     0   :  { %s1323_s21 = smov 0   ;;  %s1726_s0 = inlined_call_operand.vmem [shape: bf16[2,4,640], index: 0, kind: input, shape index: {}]   ;;  %s1727_s1 = inlined_call_operand.vmem [shape: bf16[2,4,640], index: 1, kind: input, shape index: {}]   ;;  %s1728_s2 = inlined_call_operand.vmem [shape: bf16[2,4,640], index: 2, kind: input, shape index: {}]   ;;  %s1729_s3 = inlined_call_operand.vmem [shape: bf16[2,4,640], index: 3, kind: input, shape index: {}]   ;;  %s1730_s4 = inlined_call_operand.vmem [shape: bf16[640,32], index: 4, kind: input, shape index: {}]   ;;  %s1731_s5 = inlined_call_operand.vmem [shape: f32[1,32], index: 5, kind: input, shape index: {}]   ;;  %s1732_s6 = inlined_call_operand.vmem [shape: f32[2,4,32], index: 6, kind: output, shape index: {}]  }
   0x1 LB: > { %s1058_s22 = sadd.s32 4294967295, %s1286_s21   ;;  %p1062_p0 = scmp.ge.s32.totalorder %s1286_s21, 1  ;;  %s1286_s21 = sphi %s1323_s21, %s16_s21  }
   0x2   : > { %p242_p1 = scmp.lt.s32.totalorder %s1286_s21, 3 }
   0x4   : > { %p243_p2 = pnand %p1062_p0, %p242_p1 }
   0x5   : > { %p286_p3 = scmp.lt.s32.totalorder (!%p243_p2), %s1058_s22, 1 }
   0x6   : > { %246 = sbr.rel (%p243_p2) target bundleno = 318 (0x13e), region = 44 }
   0xb   : > { %v1334_v0 = vld [vmem:[%s1730_s4 + $0x38] sm:$0xff]  ;;  %v1356_v4 = vld [vmem:[%s1730_s4 + $0x30] sm:$0xff]  ;;  %s1734_s22 = smov (!%p286_p3, %s1058_s22), 1  ;;  %v1382_v8 = vld [vmem:[%s1730_s4 + $0x28] sm:$0xff]  ;;  %vm967_vm0 = vcmask 257024  }
   0xc   : > { %v1339_v1 = vld [vmem:[%s1730_s4 + $0x78] sm:$0xff]  ;;  %647 = vmatpush.bf16.msra.mxu0 %v1334_v0  ;;  %v1361_v5 = vld [vmem:[%s1730_s4 + $0x70] sm:$0xff]  ;;  %v1387_v9 = vld [vmem:[%s1730_s4 + $0x68] sm:$0xff]  ;;  %s1390_s19 = smul.u32 10, %s1734_s22  ;;  %s1067_s10 = sshll.u32 %s1734_s22, 2 }
   0xd   : > { %v1344_v2 = vld [vmem:[%s1730_s4 + $0xb8] sm:$0xff]  ;;  %660 = vmatpush.bf16.msra.mxu1 %v1339_v1  ;;  %v1370_v6 = vld [vmem:[%s1730_s4 + $0xb0] sm:$0xff]  ;;  %v1397_v10 = vld [vmem:[%s1730_s4 + $0xa8] sm:$0xff]  ;;  %s309_s12 = scalar_lea.vmem %s1732_s6, %s1067_s10 }
   0xe   : > { %v1349_v3 = vld [vmem:[%s1730_s4 + $0xf8] sm:$0xff]  ;;  %673 = vmatpush.bf16.msra.mxu2 %v1344_v2  ;;  %v1375_v7 = vld [vmem:[%s1730_s4 + $0xf0] sm:$0xff]  ;;  %v1402_v11 = vld [vmem:[%s1730_s4 + $0xe8] sm:$0xff]  ;;  %s1420_s8 = scalar_lea.vmem %s1726_s0, %s1390_s19  ;;  %s300_s28 = scalar_lea.vmem %s1728_s2, %s1390_s19 }
   0xf   : > { %686 = vmatpush.bf16.msra.mxu3 %v1349_v3  ;;  %v1409_v12 = vld [vmem:[%s1730_s4 + $0x20] sm:$0xff]  ;;  %v1440_v17 = vld [vmem:[%s1730_s4 + $0x18] sm:$0xff]  ;;  %v1464_v21 = vld [vmem:[%s1730_s4 + $0x10] sm:$0xff]  ;;  %s305_s7 = scalar_lea.vmem %s1729_s3, %s1390_s19 }
  0x10   : > { %648 = vmatpush.bf16.msra.mxu0 %v1356_v4  ;;  %v1414_v13 = vld [vmem:[%s1730_s4 + $0x60] sm:$0xff]  ;;  %v1445_v18 = vld [vmem:[%s1730_s4 + $0x58] sm:$0xff]  ;;  %v1469_v22 = vld [vmem:[%s1730_s4 + $0x50] sm:$0xff] }
  0x11   : > { %661 = vmatpush.bf16.msra.mxu1 %v1361_v5  ;;  %v1427_v14 = vld [vmem:[%s1730_s4 + $0xa0] sm:$0xff]  ;;  %v1452_v19 = vld [vmem:[%s1730_s4 + $0x98] sm:$0xff]  ;;  %v1476_v23 = vld [vmem:[%s1730_s4 + $0x90] sm:$0xff] }
  0x12   : > { %674 = vmatpush.bf16.msra.mxu2 %v1370_v6  ;;  %v1432_v15 = vld [vmem:[%s1730_s4 + $0xe0] sm:$0xff]  ;;  %v1457_v20 = vld [vmem:[%s1730_s4 + $0xd8] sm:$0xff]  ;;  %v1481_v24 = vld [vmem:[%s1730_s4 + $0xd0] sm:$0xff] }
  0x13   : > { %687 = vmatpush.bf16.msra.mxu3 %v1375_v7  ;;  %v390_v16 = vld [vmem:[%s1420_s8] sm:$0xff]  ;;  %v1488_v25 = vld [vmem:[%s1730_s4 + $0x8] sm:$0xff]  ;;  %v1534_v33 = vld [vmem:[%s1730_s4 + $0x138] sm:$0xff] }
  0x14   : > { %649 = vmatpush.bf16.msra.mxu0 %v1382_v8  ;;  %393 = vst [vmem:[#allocation1] ss:$4 sm:$0xff] %v390_v16  ;;  %v1493_v26 = vld [vmem:[%s1730_s4 + $0x48] sm:$0xff]  ;;  %v1512_v29 = vld [vmem:[%s1730_s4] sm:$0xff]  ;;  %v1544_v36 = vld [vmem:[%s1730_s4 + $0x130] sm:$0xff] }
  0x15   : > { %662 = vmatpush.bf16.msra.mxu1 %v1387_v9  ;;  %v1500_v27 = vld [vmem:[%s1730_s4 + $0x88] sm:$0xff]  ;;  %v1517_v30 = vld [vmem:[%s1730_s4 + $0x40] sm:$0xff]  ;;  %v1577_v45 = vld [vmem:[%s1730_s4 + $0x118] sm:$0xff] }
  0x16   : > { %675 = vmatpush.bf16.msra.mxu2 %v1397_v10  ;;  %v1505_v28 = vld [vmem:[%s1730_s4 + $0xc8] sm:$0xff]  ;;  %v1524_v31 = vld [vmem:[%s1730_s4 + $0x80] sm:$0xff]  ;;  %v1586_v46 = vld [vmem:[%s1730_s4 + $0x110] sm:$0xff] }
  0x17   : > { %688 = vmatpush.bf16.msra.mxu3 %v1402_v11  ;;  %v1529_v32 = vld [vmem:[%s1730_s4 + $0xc0] sm:$0xff]  ;;  %v391_v35 = vld [vmem:[%s1420_s8 + $0x8] sm:$0x3]  ;;  %s295_s8 = scalar_lea.vmem %s1727_s1, %s1390_s19 }
  0x18   : > { %650 = vmatpush.bf16.msra.mxu0 %v1409_v12  ;;  %396 = vst [vmem:[#allocation1 + $0x20] ss:$4 sm:$0xff] %v391_v35  ;;  %v712_v40 = vld [vmem:[%s295_s8] sm:$0xff]  ;;  %v1559_v41 = vld [vmem:[%s1730_s4 + $0x128] sm:$0xff] }
  0x19   : > { %663 = vmatpush.bf16.msra.mxu1 %v1414_v13  ;;  %v713_v42 = vld [vmem:[%s295_s8 + $0x8] sm:$0x3]  ;;  %v1568_v44 = vld [vmem:[%s1730_s4 + $0x120] sm:$0xff] }
  0x1a   : > { %676 = vmatpush.bf16.msra.mxu2 %v1427_v14  ;;  %v1595_v47 = vld [vmem:[%s1730_s4 + $0x108] sm:$0xff]  ;;  %v1604_v48 = vld [vmem:[%s1730_s4 + $0x100] sm:$0xff] }
  0x1b   : > { %689 = vmatpush.bf16.msra.mxu3 %v1432_v15  ;;  %v397_v34 = vld.sshfl [vmem:[#allocation1] sm:$0xff pattern:$0x73625140]  ;;  %v399_v37 = vld.sshfl [vmem:[#allocation1 + $0x10] sm:$0xff pattern:$0x73625140] }
  0x1c   : > { %651 = vmatpush.bf16.msra.mxu0 %v1440_v17  ;;  %v400_v38 = vld.sshfl [vmem:[#allocation1 + $0x18] sm:$0xff pattern:$0x73625140]  ;;  %v398_v39 = vld.sshfl [vmem:[#allocation1 + $0x8] sm:$0xff pattern:$0x73625140] }
  0x1d   : > { %664 = vmatpush.bf16.msra.mxu1 %v1445_v18  ;;  %715 = vst [vmem:[#allocation1] ss:$4 sm:$0xff] %v712_v40  ;;  %v794_v53 = vld [vmem:[%s300_s28] sm:$0xff]  ;;  %v795_v54 = vld [vmem:[%s300_s28 + $0x8] sm:$0x3] }
  0x1e   : > { %677 = vmatpush.bf16.msra.mxu2 %v1452_v19  ;;  %v876_v57 = vld [vmem:[%s305_s7] sm:$0xff]  ;;  %v877_v62 = vld [vmem:[%s305_s7 + $0x8] sm:$0x3] }
  0x1f   : > { %690 = vmatpush.bf16.msra.mxu3 %v1457_v20  ;;  %v401_v43 = vld.sshfl [vmem:[#allocation1 + $0x20] sm:$0xff pattern:$0x73625140] }
  0x20   : > { %652 = vmatpush.bf16.msra.mxu0 %v1464_v21  ;;  %718 = vst [vmem:[#allocation1 + $0x20] ss:$4 sm:$0xff] %v713_v42 }
  0x21   : > { %665 = vmatpush.bf16.msra.mxu1 %v1469_v22 }
  0x22   : > { %678 = vmatpush.bf16.msra.mxu2 %v1476_v23 }
  0x23   : > { %691 = vmatpush.bf16.msra.mxu3 %v1481_v24 }
  0x24   : > { %653 = vmatpush.bf16.msra.mxu0 %v1488_v25  ;;  %v719_v49 = vld.sshfl [vmem:[#allocation1] sm:$0xff pattern:$0x73625140]  ;;  %v720_v50 = vld.sshfl [vmem:[#allocation1 + $0x8] sm:$0xff pattern:$0x73625140] }
  0x25   : > { %666 = vmatpush.bf16.msra.mxu1 %v1493_v26  ;;  %v721_v51 = vld.sshfl [vmem:[#allocation1 + $0x10] sm:$0xff pattern:$0x73625140]  ;;  %v722_v55 = vld.sshfl [vmem:[#allocation1 + $0x18] sm:$0xff pattern:$0x73625140] }
  0x26   : > { %679 = vmatpush.bf16.msra.mxu2 %v1500_v27  ;;  %797 = vst [vmem:[#allocation1] ss:$4 sm:$0xff] %v794_v53 }
  0x27   : > { %692 = vmatpush.bf16.msra.mxu3 %v1505_v28  ;;  %v723_v52 = vld.sshfl [vmem:[#allocation1 + $0x20] sm:$0xff pattern:$0x73625140] }
  0x28   : > { %654 = vmatpush.bf16.msra.mxu0 %v1512_v29  ;;  %800 = vst [vmem:[#allocation1 + $0x20] ss:$4 sm:$0xff] %v795_v54 }
  0x29   : > { %667 = vmatpush.bf16.msra.mxu1 %v1517_v30 }
  0x2a   : > { %680 = vmatpush.bf16.msra.mxu2 %v1524_v31 }
  0x2b   : > { %693 = vmatpush.bf16.msra.mxu3 %v1529_v32  ;;  %655 = vmatmul.bf16.vlgmr.msra.gmra.mxu0 %v397_v34 }
  0x2c   : > { %699 = vmatpush.bf16.msrb.mxu0 %v1534_v33  ;;  %668 = vmatmul.bf16.vlgmr.msra.gmra.mxu1 %v398_v39 }
  0x2d   : > { %729 = vmatpush.bf16.msrb.mxu1 %v1334_v0  ;;  %681 = vmatmul.bf16.vlgmr.msra.gmra.mxu2 %v399_v37  ;;  %v801_v56 = vld.sshfl [vmem:[#allocation1] sm:$0xff pattern:$0x73625140]  ;;  %v803_v58 = vld.sshfl [vmem:[#allocation1 + $0x10] sm:$0xff pattern:$0x73625140] }
  0x2e   : > { %742 = vmatpush.bf16.msrb.mxu2 %v1339_v1  ;;  %694 = vmatmul.bf16.vlgmr.msra.gmra.mxu3 %v400_v38  ;;  %v802_v59 = vld.sshfl [vmem:[#allocation1 + $0x8] sm:$0xff pattern:$0x73625140]  ;;  %v804_v60 = vld.sshfl [vmem:[#allocation1 + $0x18] sm:$0xff pattern:$0x73625140] }
  0x2f   : > { %755 = vmatpush.bf16.msrb.mxu3 %v1344_v2  ;;  %879 = vst [vmem:[#allocation1] ss:$4 sm:$0xff] %v876_v57  ;;  %v805_v61 = vld.sshfl [vmem:[#allocation1 + $0x20] sm:$0xff pattern:$0x73625140] }
  0x30   : > { %700 = vmatpush.bf16.msrb.mxu0 %v1544_v36  ;;  %882 = vst [vmem:[#allocation1 + $0x20] ss:$4 sm:$0xff] %v877_v62 }
  0x31   : > { %730 = vmatpush.bf16.msrb.mxu1 %v1356_v4 }
  0x32   : > { %743 = vmatpush.bf16.msrb.mxu2 %v1361_v5 }
  0x33   : > { %756 = vmatpush.bf16.msrb.mxu3 %v1370_v6 }
  0x34   : > { %701 = vmatpush.bf16.msrb.mxu0 %v1559_v41 }
  0x35   : > { %731 = vmatpush.bf16.msrb.mxu1 %v1382_v8 }
  0x36   : > { %744 = vmatpush.bf16.msrb.mxu2 %v1387_v9  ;;  %v883_v63 = vld.sshfl [vmem:[#allocation1] sm:$0xff pattern:$0x73625140] }
  0x37   : > { %757 = vmatpush.bf16.msrb.mxu3 %v1397_v10 }
  0x38   : > { %702 = vmatpush.bf16.msrb.mxu0 %v1568_v44 }
  0x39   : > { %732 = vmatpush.bf16.msrb.mxu1 %v1409_v12 }
  0x3a   : > { %745 = vmatpush.bf16.msrb.mxu2 %v1414_v13 }
  0x3b   : > { %758 = vmatpush.bf16.msrb.mxu3 %v1427_v14 }
  0x3c   : > { %703 = vmatpush.bf16.msrb.mxu0 %v1577_v45 }
  0x3d   : > { %733 = vmatpush.bf16.msrb.mxu1 %v1440_v17 }
  0x3e   : > { %746 = vmatpush.bf16.msrb.mxu2 %v1445_v18 }
  0x3f   : > { %759 = vmatpush.bf16.msrb.mxu3 %v1452_v19 }
  0x40   : > { %704 = vmatpush.bf16.msrb.mxu0 %v1586_v46 }
  0x41   : > { %734 = vmatpush.bf16.msrb.mxu1 %v1464_v21 }
  0x42   : > { %747 = vmatpush.bf16.msrb.mxu2 %v1469_v22 }
  0x43   : > { %760 = vmatpush.bf16.msrb.mxu3 %v1476_v23 }
  0x44   : > { %705 = vmatpush.bf16.msrb.mxu0 %v1595_v47 }
  0x45   : > { %735 = vmatpush.bf16.msrb.mxu1 %v1488_v25 }
  0x46   : > { %748 = vmatpush.bf16.msrb.mxu2 %v1493_v26 }
  0x47   : > { %761 = vmatpush.bf16.msrb.mxu3 %v1500_v27 }
  0x48   : > { %706 = vmatpush.bf16.msrb.mxu0 %v1604_v48 }
  0x49   : > { %736 = vmatpush.bf16.msrb.mxu1 %v1512_v29 }
  0x4a   : > { %749 = vmatpush.bf16.msrb.mxu2 %v1517_v30 }
  0x4b   : > { %762 = vmatpush.bf16.msrb.mxu3 %v1524_v31  ;;  %707 = vmatmul.bf16.vlgmr.msrb.gmra.mxu0 %v401_v43 }
  0x4c   : > { %768 = vmatpush.bf16.msra.mxu0 %v1349_v3  ;;  %737 = vmatmul.bf16.vlgmr.msrb.gmra.mxu1 %v719_v49 }
  0x4d   : > { %781 = vmatpush.bf16.msra.mxu1 %v1534_v33  ;;  %750 = vmatmul.bf16.vlgmr.msrb.gmra.mxu2 %v720_v50 }
  0x4e   : > { %811 = vmatpush.bf16.msra.mxu2 %v1334_v0  ;;  %763 = vmatmul.bf16.vlgmr.msrb.gmra.mxu3 %v721_v51 }
  0x4f   : > { %824 = vmatpush.bf16.msra.mxu3 %v1339_v1 }
  0x50   : > { %769 = vmatpush.bf16.msra.mxu0 %v1375_v7 }
  0x51   : > { %782 = vmatpush.bf16.msra.mxu1 %v1544_v36 }
  0x52   : > { %812 = vmatpush.bf16.msra.mxu2 %v1356_v4 }
  0x53   : > { %825 = vmatpush.bf16.msra.mxu3 %v1361_v5 }
  0x54   : > { %770 = vmatpush.bf16.msra.mxu0 %v1402_v11 }
  0x55   : > { %783 = vmatpush.bf16.msra.mxu1 %v1559_v41 }
  0x56   : > { %813 = vmatpush.bf16.msra.mxu2 %v1382_v8 }
  0x57   : > { %826 = vmatpush.bf16.msra.mxu3 %v1387_v9 }
  0x58   : > { %771 = vmatpush.bf16.msra.mxu0 %v1432_v15 }
  0x59   : > { %784 = vmatpush.bf16.msra.mxu1 %v1568_v44 }
  0x5a   : > { %814 = vmatpush.bf16.msra.mxu2 %v1409_v12 }
  0x5b   : > { %827 = vmatpush.bf16.msra.mxu3 %v1414_v13 }
  0x5c   : > { %772 = vmatpush.bf16.msra.mxu0 %v1457_v20 }
  0x5d   : > { %785 = vmatpush.bf16.msra.mxu1 %v1577_v45 }
  0x5e   : > { %815 = vmatpush.bf16.msra.mxu2 %v1440_v17 }
  0x5f   : > { %828 = vmatpush.bf16.msra.mxu3 %v1445_v18 }
  0x60   : > { %773 = vmatpush.bf16.msra.mxu0 %v1481_v24 }
  0x61   : > { %786 = vmatpush.bf16.msra.mxu1 %v1586_v46 }
  0x62   : > { %816 = vmatpush.bf16.msra.mxu2 %v1464_v21 }
  0x63   : > { %829 = vmatpush.bf16.msra.mxu3 %v1469_v22 }
  0x64   : > { %774 = vmatpush.bf16.msra.mxu0 %v1505_v28 }
  0x65   : > { %787 = vmatpush.bf16.msra.mxu1 %v1595_v47 }
  0x66   : > { %817 = vmatpush.bf16.msra.mxu2 %v1488_v25 }
  0x67   : > { %830 = vmatpush.bf16.msra.mxu3 %v1493_v26 }
  0x68   : > { %775 = vmatpush.bf16.msra.mxu0 %v1529_v32 }
  0x69   : > { %788 = vmatpush.bf16.msra.mxu1 %v1604_v48 }
  0x6a   : > { %818 = vmatpush.bf16.msra.mxu2 %v1512_v29 }
  0x6b   : > { %831 = vmatpush.bf16.msra.mxu3 %v1517_v30  ;;  %776 = vmatmul.bf16.vlgmr.msra.gmra.mxu0 %v722_v55 }
  0x6c   : > { %837 = vmatpush.bf16.msrb.mxu0 %v1344_v2  ;;  %789 = vmatmul.bf16.vlgmr.msra.gmra.mxu1 %v723_v52 }
  0x6d   : > { %850 = vmatpush.bf16.msrb.mxu1 %v1349_v3  ;;  %819 = vmatmul.bf16.vlgmr.msra.gmra.mxu2 %v801_v56 }
  0x6e   : > { %863 = vmatpush.bf16.msrb.mxu2 %v1534_v33  ;;  %832 = vmatmul.bf16.vlgmr.msra.gmra.mxu3 %v802_v59 }
  0x6f   : > { %893 = vmatpush.bf16.msrb.mxu3 %v1334_v0  ;;  %v884_v0 = vld.sshfl [vmem:[#allocation1 + $0x8] sm:$0xff pattern:$0x73625140] }
  0x70   : > { %838 = vmatpush.bf16.msrb.mxu0 %v1370_v6 }
  0x71   : > { %851 = vmatpush.bf16.msrb.mxu1 %v1375_v7 }
  0x72   : > { %864 = vmatpush.bf16.msrb.mxu2 %v1544_v36 }
  0x73   : > { %894 = vmatpush.bf16.msrb.mxu3 %v1356_v4 }
  0x74   : > { %839 = vmatpush.bf16.msrb.mxu0 %v1397_v10 }
  0x75   : > { %852 = vmatpush.bf16.msrb.mxu1 %v1402_v11 }
  0x76   : > { %865 = vmatpush.bf16.msrb.mxu2 %v1559_v41 }
  0x77   : > { %895 = vmatpush.bf16.msrb.mxu3 %v1382_v8 }
  0x78   : > { %840 = vmatpush.bf16.msrb.mxu0 %v1427_v14 }
  0x79   : > { %853 = vmatpush.bf16.msrb.mxu1 %v1432_v15 }
  0x7a   : > { %866 = vmatpush.bf16.msrb.mxu2 %v1568_v44 }
  0x7b   : > { %896 = vmatpush.bf16.msrb.mxu3 %v1409_v12 }
  0x7c   : > { %841 = vmatpush.bf16.msrb.mxu0 %v1452_v19 }
  0x7d   : > { %854 = vmatpush.bf16.msrb.mxu1 %v1457_v20 }
  0x7e   : > { %867 = vmatpush.bf16.msrb.mxu2 %v1577_v45 }
  0x7f   : > { %897 = vmatpush.bf16.msrb.mxu3 %v1440_v17 }
  0x80   : > { %842 = vmatpush.bf16.msrb.mxu0 %v1476_v23 }
  0x81   : > { %855 = vmatpush.bf16.msrb.mxu1 %v1481_v24 }
  0x82   : > { %868 = vmatpush.bf16.msrb.mxu2 %v1586_v46 }
  0x83   : > { %898 = vmatpush.bf16.msrb.mxu3 %v1464_v21 }
  0x84   : > { %843 = vmatpush.bf16.msrb.mxu0 %v1500_v27 }
  0x85   : > { %856 = vmatpush.bf16.msrb.mxu1 %v1505_v28 }
  0x86   : > { %869 = vmatpush.bf16.msrb.mxu2 %v1595_v47 }
  0x87   : > { %899 = vmatpush.bf16.msrb.mxu3 %v1488_v25 }
  0x88   : > { %844 = vmatpush.bf16.msrb.mxu0 %v1524_v31 }
  0x89   : > { %857 = vmatpush.bf16.msrb.mxu1 %v1529_v32 }
  0x8a   : > { %870 = vmatpush.bf16.msrb.mxu2 %v1604_v48 }
  0x8b   : > { %900 = vmatpush.bf16.msrb.mxu3 %v1512_v29  ;;  %845 = vmatmul.bf16.vlgmr.msrb.gmra.mxu0 %v803_v58 }
  0x8c   : > { %906 = vmatpush.bf16.msra.mxu0 %v1339_v1  ;;  %858 = vmatmul.bf16.vlgmr.msrb.gmra.mxu1 %v804_v60  ;;  %v885_v1 = vld.sshfl [vmem:[#allocation1 + $0x10] sm:$0xff pattern:$0x73625140]  ;;  %v1279_v60 = vld [vmem:[%s1731_s5] ss:$0 sm:$0xff] }
  0x8d   : > { %919 = vmatpush.bf16.msra.mxu1 %v1344_v2  ;;  %871 = vmatmul.bf16.vlgmr.msrb.gmra.mxu2 %v805_v61  ;;  %v886_v2 = vld.sshfl [vmem:[#allocation1 + $0x18] sm:$0xff pattern:$0x73625140] }
  0x8e   : > { %932 = vmatpush.bf16.msra.mxu2 %v1349_v3  ;;  %901 = vmatmul.bf16.vlgmr.msrb.gmra.mxu3 %v883_v63  ;;  %v887_v3 = vld.sshfl [vmem:[#allocation1 + $0x20] sm:$0xff pattern:$0x73625140] }
  0x8f   : > { %945 = vmatpush.bf16.msra.mxu3 %v1534_v33 }
  0x90   : > { %907 = vmatpush.bf16.msra.mxu0 %v1361_v5 }
  0x91   : > { %920 = vmatpush.bf16.msra.mxu1 %v1370_v6 }
  0x92   : > { %933 = vmatpush.bf16.msra.mxu2 %v1375_v7 }
  0x93   : > { %946 = vmatpush.bf16.msra.mxu3 %v1544_v36 }
  0x94   : > { %908 = vmatpush.bf16.msra.mxu0 %v1387_v9 }
  0x95   : > { %921 = vmatpush.bf16.msra.mxu1 %v1397_v10 }
  0x96   : > { %934 = vmatpush.bf16.msra.mxu2 %v1402_v11 }
  0x97   : > { %947 = vmatpush.bf16.msra.mxu3 %v1559_v41 }
  0x98   : > { %909 = vmatpush.bf16.msra.mxu0 %v1414_v13 }
  0x99   : > { %922 = vmatpush.bf16.msra.mxu1 %v1427_v14 }
  0x9a   : > { %935 = vmatpush.bf16.msra.mxu2 %v1432_v15 }
  0x9b   : > { %948 = vmatpush.bf16.msra.mxu3 %v1568_v44 }
  0x9c   : > { %910 = vmatpush.bf16.msra.mxu0 %v1445_v18 }
  0x9d   : > { %923 = vmatpush.bf16.msra.mxu1 %v1452_v19 }
  0x9e   : > { %936 = vmatpush.bf16.msra.mxu2 %v1457_v20 }
  0x9f   : > { %949 = vmatpush.bf16.msra.mxu3 %v1577_v45 }
  0xa0   : > { %911 = vmatpush.bf16.msra.mxu0 %v1469_v22 }
  0xa1   : > { %924 = vmatpush.bf16.msra.mxu1 %v1476_v23 }
  0xa2   : > { %937 = vmatpush.bf16.msra.mxu2 %v1481_v24 }
  0xa3   : > { %950 = vmatpush.bf16.msra.mxu3 %v1586_v46 }
  0xa4   : > { %912 = vmatpush.bf16.msra.mxu0 %v1493_v26 }
  0xa5   : > { %925 = vmatpush.bf16.msra.mxu1 %v1500_v27 }
  0xa6   : > { %938 = vmatpush.bf16.msra.mxu2 %v1505_v28 }
  0xa7   : > { %951 = vmatpush.bf16.msra.mxu3 %v1595_v47 }
  0xa8   : > { %913 = vmatpush.bf16.msra.mxu0 %v1517_v30  ;;  %v656_v4 = vpop.f32.mrf.mxu0 }
  0xa9   : > { %926 = vmatpush.bf16.msra.mxu1 %v1524_v31  ;;  %v669_v5 = vpop.f32.mrf.mxu1 }
  0xaa   : > { %939 = vmatpush.bf16.msra.mxu2 %v1529_v32  ;;  %v670_v6 = vadd.f32 %v669_v5, %v656_v4 }
  0xab   : > { %952 = vmatpush.bf16.msra.mxu3 %v1604_v48  ;;  %914 = vmatmul.bf16.vlgmr.msra.gmra.mxu0 %v884_v0 }
  0xac   : > { %927 = vmatmul.bf16.vlgmr.msra.gmra.mxu1 %v885_v1 }
  0xad   : > { %940 = vmatmul.bf16.vlgmr.msra.gmra.mxu2 %v886_v2 }
  0xae   : > { %953 = vmatmul.bf16.vlgmr.msra.gmra.mxu3 %v887_v3 }
  0xb0   : > { %v682_v7 = vpop.f32.mrf.mxu2  ;;  %v658_v10 = vpop.f32.mrf.mxu0 }
  0xb1   : > { %v683_v8 = vadd.f32 %v682_v7, %v670_v6  ;;  %v695_v9 = vpop.f32.mrf.mxu3  ;;  %v671_v12 = vpop.f32.mrf.mxu1 }
  0xb3   : > { %v696_v11 = vadd.f32 %v695_v9, %v683_v8 }
  0xb8   : > { %v684_v13 = vpop.f32.mrf.mxu2 }
  0xb9   : > { %v697_v14 = vpop.f32.mrf.mxu3 }
  0xc8   : > { %v708_v15 = vpop.f32.mrf.mxu0 }
  0xc9   : > { %v738_v16 = vpop.f32.mrf.mxu1  ;;  %v709_v17 = vadd.f32 %v708_v15, %v696_v11 }
  0xd0   : > { %v751_v18 = vpop.f32.mrf.mxu2  ;;  %v710_v20 = vpop.f32.mrf.mxu0 }
  0xd1   : > { %v764_v19 = vpop.f32.mrf.mxu3  ;;  %v740_v21 = vpop.f32.mrf.mxu1  ;;  %v752_v22 = vadd.f32 %v751_v18, %v738_v16 }
  0xd3   : > { %v765_v23 = vadd.f32 %v764_v19, %v752_v22 }
  0xd8   : > { %v753_v24 = vpop.f32.mrf.mxu2 }
  0xd9   : > { %v766_v25 = vpop.f32.mrf.mxu3 }
  0xe8   : > { %v777_v26 = vpop.f32.mrf.mxu0 }
  0xe9   : > { %v790_v27 = vpop.f32.mrf.mxu1  ;;  %v778_v28 = vadd.f32 %v777_v26, %v765_v23 }
  0xeb   : > { %v791_v29 = vadd.f32 %v790_v27, %v778_v28 }
  0xed   : > { %v958_v30 = vmax.f32 %v709_v17, %v791_v29 }
  0xf0   : > { %v820_v31 = vpop.f32.mrf.mxu2  ;;  %v779_v33 = vpop.f32.mrf.mxu0 }
  0xf1   : > { %v833_v32 = vpop.f32.mrf.mxu3  ;;  %v792_v34 = vpop.f32.mrf.mxu1 }
  0xf2   : > { %v834_v45 = vadd.f32 %v833_v32, %v820_v31 }
  0xf8   : > { %v822_v35 = vpop.f32.mrf.mxu2 }
  0xf9   : > { %v835_v36 = vpop.f32.mrf.mxu3 }
 0x108   : > { %v846_v37 = vpop.f32.mrf.mxu0 }
 0x109   : > { %v859_v38 = vpop.f32.mrf.mxu1  ;;  %v847_v48 = vadd.f32 %v846_v37, %v834_v45 }
 0x10b   : > { %v860_v50 = vadd.f32 %v859_v38, %v847_v48 }
 0x110   : > { %v872_v39 = vpop.f32.mrf.mxu2  ;;  %v848_v41 = vpop.f32.mrf.mxu0 }
 0x111   : > { %v902_v40 = vpop.f32.mrf.mxu3  ;;  %v861_v42 = vpop.f32.mrf.mxu1  ;;  %v873_v57 = vadd.f32 %v872_v39, %v860_v50 }
 0x118   : > { %v874_v43 = vpop.f32.mrf.mxu2 }
 0x119   : > { %v904_v44 = vpop.f32.mrf.mxu3 }
 0x128   : > { %v915_v46 = vpop.f32.mrf.mxu0 }
 0x129   : > { %v928_v47 = vpop.f32.mrf.mxu1  ;;  %v916_v49 = vadd.f32 %v915_v46, %v902_v40 }
 0x12b   : > { %v929_v51 = vadd.f32 %v928_v47, %v916_v49 }
 0x130   : > { %v941_v52 = vpop.f32.mrf.mxu2  ;;  %v917_v55 = vpop.f32.mrf.mxu0 }
 0x131   : > { %v954_v53 = vpop.f32.mrf.mxu3  ;;  %v942_v54 = vadd.f32 %v941_v52, %v929_v51  ;;  %v930_v56 = vpop.f32.mrf.mxu1 }
 0x133   : > { %v955_v58 = vadd.f32 %v954_v53, %v942_v54 }
 0x135   : > { %v959_v59 = vmax.f32 %v873_v57, %v955_v58 }
 0x137   : > { %v960_v61 = vmax.f32 %v958_v30, %v959_v59 }
 0x138   : > { %v943_v62 = vpop.f32.mrf.mxu2 }
 0x139   : > { %v956_v63 = vpop.f32.mrf.mxu3  ;;  %v965_v0 = vadd.f32 %v1279_v60, %v960_v61 }
 0x13b   : > { %v966_v1 = vmax.f32 %v965_v0, 0.0 }
 0x13d   : > { %968 = vst.msk [vmem:[%s309_s12] sm:$0xf] %vm967_vm0, %v966_v1 }
 0x13e PF: > { %s16_s21 = sadd.s32 1, %s1286_s21  }
 0x13f   : > { %p13_p4 = scmp.ge.s32.totalorder %s16_s21, 4  }
 0x141   :  { %15 = sbr.rel (!%p13_p4) target bundleno = 1 (0x1), region = 87 }

// kernel: nav_base_forward.7
= control target key start
LH: loop header
LB: loop body
LE: loop exit
PB: predicated region body
PF: predicated region fallthrough
CT: control target
= control target key end

     0   :  { %vm504_vm0 = vcmask 261120   ;;  %vm510_vm1 = vcmask 523520   ;;  %vm525_vm2 = vcmask 7168   ;;  %s1085_s4 = inlined_call_operand.vmem [shape: bf16[128,128], index: 4, kind: input, shape index: {}]   ;;  %s1086_s6 = inlined_call_operand.vmem [shape: bf16[128,256], index: 6, kind: input, shape index: {}]   ;;  %s1087_s5 = inlined_call_operand.vmem [shape: f32[1,128], index: 5, kind: input, shape index: {}]   ;;  %s1088_s1 = inlined_call_operand.vmem [shape: bf16[8,128], index: 1, kind: input, shape index: {}]   ;;  %s1089_s2 = inlined_call_operand.vmem [shape: bf16[128,32], index: 2, kind: input, shape index: {}]   ;;  %s1090_s8 = inlined_call_operand.vmem [shape: bf16[256,32], index: 8, kind: input, shape index: {}]   ;;  %s1091_s0 = inlined_call_operand.vmem [shape: bf16[8,128], index: 0, kind: input, shape index: {}]   ;;  %s1092_s3 = inlined_call_operand.vmem [shape: f32[1,32], index: 3, kind: input, shape index: {}]   ;;  %s1093_s9 = inlined_call_operand.vmem [shape: f32[1,32], index: 9, kind: input, shape index: {}]   ;;  %s1094_s7 = inlined_call_operand.vmem [shape: f32[1,256], index: 7, kind: input, shape index: {}]   ;;  %s1095_s12 = inlined_call_operand.vmem [shape: f32[8,128], index: 12, kind: output, shape index: {0}]   ;;  %s1096_s10 = inlined_call_operand.vmem [shape: f32[1,128], index: 10, kind: input, shape index: {}]   ;;  %s1097_s11 = inlined_call_operand.<no memory space> [shape: f32[1,1], index: 11, kind: input, shape index: {}]   ;;  %s1098_s13 = inlined_call_operand.vmem [shape: f32[8,1], index: 13, kind: output, shape index: {1}]  }
   0x1   :  { %v742_v0 = vld [vmem:[%s1085_s4 + $0x38] sm:$0xff]  ;;  %v741_v1 = vld [vmem:[%s1085_s4 + $0x30] sm:$0xff]  ;;  %v649_v7 = vld [vmem:[%s1086_s6 + $0x60] sm:$0xf] }
   0x2   :  { %197 = vmatpush.bf16.msra.mxu1 %v742_v0  ;;  %v657_v2 = vld [vmem:[%s1086_s6 + $0x70] sm:$0xf]  ;;  %v758_v3 = vld [vmem:[%s1086_s6 + $0x74] sm:$0xf0]  ;;  %v757_v4 = vld [vmem:[%s1086_s6 + $0x74] sm:$0xf] }
   0x3   :  { %v658_v5 = vor.u32 %v758_v3, %v657_v2  ;;  %v659_v6 = vld [vmem:[%s1086_s6 + $0x78] sm:$0xf0]  ;;  %v756_v8 = vld [vmem:[%s1086_s6 + $0x64] sm:$0xf0]  ;;  %v755_v10 = vld [vmem:[%s1086_s6 + $0x64] sm:$0xf] }
   0x4   :  { %v662_v9 = vor.u32 %v757_v4, %v659_v6  ;;  %v651_v11 = vld [vmem:[%s1086_s6 + $0x68] sm:$0xf0]  ;;  %v650_v13 = vor.u32 %v756_v8, %v649_v7  ;;  %v641_v15 = vld [vmem:[%s1086_s6 + $0x50] sm:$0xf]  ;;  %v754_v16 = vld [vmem:[%s1086_s6 + $0x54] sm:$0xf0] }
   0x5   :  { %v740_v12 = vld [vmem:[%s1085_s4 + $0x28] sm:$0xff]  ;;  %314 = vmatpush.bf16.msra.mxu2 %v658_v5  ;;  %v654_v14 = vor.u32 %v755_v10, %v651_v11  ;;  %v753_v17 = vld [vmem:[%s1086_s6 + $0x54] sm:$0xf]  ;;  %v643_v18 = vld [vmem:[%s1086_s6 + $0x58] sm:$0xf0]  ;;  %v642_v20 = vor.u32 %v754_v16, %v641_v15 }
   0x6   :  { %198 = vmatpush.bf16.msra.mxu1 %v741_v1  ;;  %327 = vmatpush.bf16.msra.mxu3 %v662_v9  ;;  %v739_v19 = vld [vmem:[%s1085_s4 + $0x20] sm:$0xff]  ;;  %v646_v21 = vor.u32 %v753_v17, %v643_v18  ;;  %v752_v23 = vld [vmem:[%s1086_s6 + $0x44] sm:$0xf0]  ;;  %v635_v25 = vld [vmem:[%s1086_s6 + $0x48] sm:$0xf0] }
   0x7   :  { %v633_v22 = vld [vmem:[%s1086_s6 + $0x40] sm:$0xf]  ;;  %v751_v24 = vld [vmem:[%s1086_s6 + $0x44] sm:$0xf]  ;;  %v738_v26 = vld [vmem:[%s1085_s4 + $0x18] sm:$0xff] }
   0x8   :  { %v634_v27 = vor.u32 %v752_v23, %v633_v22  ;;  %v638_v28 = vor.u32 %v751_v24, %v635_v25  ;;  %v625_v29 = vld [vmem:[%s1086_s6 + $0x30] sm:$0xf]  ;;  %v750_v30 = vld [vmem:[%s1086_s6 + $0x34] sm:$0xf0]  ;;  %v749_v31 = vld [vmem:[%s1086_s6 + $0x34] sm:$0xf] }
   0x9   :  { %315 = vmatpush.bf16.msra.mxu2 %v650_v13  ;;  %v627_v32 = vld [vmem:[%s1086_s6 + $0x38] sm:$0xf0]  ;;  %v737_v33 = vld [vmem:[%s1085_s4 + $0x10] sm:$0xff]  ;;  %v626_v34 = vor.u32 %v750_v30, %v625_v29  ;;  %v617_v36 = vld [vmem:[%s1086_s6 + $0x20] sm:$0xf] }
   0xa   :  { %199 = vmatpush.bf16.msra.mxu1 %v740_v12  ;;  %328 = vmatpush.bf16.msra.mxu3 %v654_v14  ;;  %v630_v35 = vor.u32 %v749_v31, %v627_v32  ;;  %v748_v37 = vld [vmem:[%s1086_s6 + $0x24] sm:$0xf0]  ;;  %v747_v38 = vld [vmem:[%s1086_s6 + $0x24] sm:$0xf]  ;;  %v619_v39 = vld [vmem:[%s1086_s6 + $0x28] sm:$0xf0] }
   0xb   :  { %v736_v40 = vld [vmem:[%s1085_s4 + $0x8] sm:$0xff]  ;;  %v618_v41 = vor.u32 %v748_v37, %v617_v36  ;;  %v622_v42 = vor.u32 %v747_v38, %v619_v39  ;;  %v735_v43 = vld [vmem:[%s1085_s4] sm:$0xff]  ;;  %v609_v45 = vld [vmem:[%s1086_s6 + $0x10] sm:$0xf] }
   0xc   :  { %v128_v44 = vld [vmem:[%s1088_s1] sm:$0xf]  ;;  %v746_v46 = vld [vmem:[%s1086_s6 + $0x14] sm:$0xf0]  ;;  %v745_v47 = vld [vmem:[%s1086_s6 + $0x14] sm:$0xf] }
   0xd   :  { %316 = vmatpush.bf16.msra.mxu2 %v642_v20  ;;  %v610_v48 = vor.u32 %v746_v46, %v609_v45  ;;  %v611_v49 = vld [vmem:[%s1086_s6 + $0x18] sm:$0xf0]  ;;  %v601_v51 = vld [vmem:[%s1086_s6] sm:$0xf]  ;;  %v744_v52 = vld [vmem:[%s1086_s6 + $0x4] sm:$0xf0] }
   0xe   :  { %200 = vmatpush.bf16.msra.mxu1 %v739_v19  ;;  %329 = vmatpush.bf16.msra.mxu3 %v646_v21  ;;  %v614_v50 = vor.u32 %v745_v47, %v611_v49  ;;  %v743_v53 = vld [vmem:[%s1086_s6 + $0x4] sm:$0xf]  ;;  %v602_v54 = vor.u32 %v744_v52, %v601_v51  ;;  %v603_v55 = vld [vmem:[%s1086_s6 + $0x8] sm:$0xf0]  ;;  %v734_v57 = vld [vmem:[%s1089_s2 + $0x38] sm:$0xff]  ;;  %v19_v51 = vstv %s1097_s11 }
   0xf   :  { %v606_v56 = vor.u32 %v743_v53, %v603_v55  ;;  %114 = vmatpush.bf16.msra.mxu0 %v734_v57  ;;  %v733_v58 = vld [vmem:[%s1089_s2 + $0x30] sm:$0xff]  ;;  %v774_v59 = vld [vmem:[%s1090_s8 + $0x78] sm:$0xff]  ;;  %v732_v61 = vld [vmem:[%s1089_s2 + $0x28] sm:$0xff]  ;;  %20 = vst [vmem:[#allocation2] sm:$0x1] %v19_v51 }
  0x10   :  { %v773_v60 = vld [vmem:[%s1090_s8 + $0x70] sm:$0xff]  ;;  %v772_v62 = vld [vmem:[%s1090_s8 + $0x68] sm:$0xff]  ;;  %v731_v63 = vld [vmem:[%s1089_s2 + $0x20] sm:$0xff] }
  0x11   :  { %317 = vmatpush.bf16.msra.mxu2 %v634_v27  ;;  %v771_v0 = vld [vmem:[%s1090_s8 + $0x60] sm:$0xff]  ;;  %v730_v1 = vld [vmem:[%s1089_s2 + $0x18] sm:$0xff]  ;;  %v729_v3 = vld [vmem:[%s1089_s2 + $0x10] sm:$0xff] }
  0x12   :  { %201 = vmatpush.bf16.msra.mxu1 %v738_v26  ;;  %330 = vmatpush.bf16.msra.mxu3 %v638_v28  ;;  %v770_v2 = vld [vmem:[%s1090_s8 + $0x58] sm:$0xff]  ;;  %v777_v4 = vld [vmem:[%s1087_s5] ss:$0 sm:$0xff]  ;;  %v769_v5 = vld [vmem:[%s1090_s8 + $0x50] sm:$0xff] }
  0x13   :  { %115 = vmatpush.bf16.msra.mxu0 %v733_v58  ;;  %v728_v6 = vld [vmem:[%s1089_s2 + $0x8] sm:$0xff]  ;;  %v727_v9 = vld [vmem:[%s1089_s2] sm:$0xff]  ;;  %v766_v11 = vld [vmem:[%s1090_s8 + $0x38] sm:$0xff] }
  0x14   :  { %v45_v13 = vld [vmem:[%s1091_s0] sm:$0xf]  ;;  %v765_v15 = vld [vmem:[%s1090_s8 + $0x30] sm:$0xff]  ;;  %v764_v16 = vld [vmem:[%s1090_s8 + $0x28] sm:$0xff] }
  0x15   :  { %318 = vmatpush.bf16.msra.mxu2 %v626_v34  ;;  %v763_v17 = vld [vmem:[%s1090_s8 + $0x20] sm:$0xff]  ;;  %v762_v18 = vld [vmem:[%s1090_s8 + $0x18] sm:$0xff]  ;;  %v761_v19 = vld [vmem:[%s1090_s8 + $0x10] sm:$0xff] }
  0x16   :  { %202 = vmatpush.bf16.msra.mxu1 %v737_v33  ;;  %331 = vmatpush.bf16.msra.mxu3 %v630_v35  ;;  %v760_v20 = vld [vmem:[%s1090_s8 + $0x8] sm:$0xff]  ;;  %v759_v22 = vld [vmem:[%s1090_s8] sm:$0xff] }
  0x17   :  { %116 = vmatpush.bf16.msra.mxu0 %v732_v61  ;;  %v768_v21 = vld [vmem:[%s1090_s8 + $0x48] sm:$0xff]  ;;  %v767_v23 = vld [vmem:[%s1090_s8 + $0x40] sm:$0xff] }
  0x18   :  { %v228_v24 = vld [vmem:[%s1094_s7] sm:$0x3] }
  0x19   :  { %319 = vmatpush.bf16.msra.mxu2 %v618_v41  ;;  %v230_v26 = vperm.slane %v228_v24, 0  ;;  %v231_v27 = vperm.slane %v228_v24, 1  ;;  %v778_v39 = vld [vmem:[%s1092_s3] ss:$0 sm:$0xff]  ;;  %s783_s3 = smov 32  }
  0x1a   :  { %203 = vmatpush.bf16.msra.mxu1 %v736_v40  ;;  %332 = vmatpush.bf16.msra.mxu3 %v622_v42  ;;  %v782_v42 = vmov 0.0   ;;  %v780_v53 = vld [vmem:[%s1096_s10] ss:$0 sm:$0xff] }
  0x1b   :  { %117 = vmatpush.bf16.msra.mxu0 %v731_v63  ;;  %503 = vst [vmem:[%s1095_s12] sm:$0xff] %v782_v42 }
  0x1d   :  { %320 = vmatpush.bf16.msra.mxu2 %v610_v48 }
  0x1e   :  { %204 = vmatpush.bf16.msra.mxu1 %v735_v43  ;;  %333 = vmatpush.bf16.msra.mxu3 %v614_v50  ;;  %v779_v43 = vld [vmem:[%s1093_s9] ss:$0 sm:$0xff] }
  0x1f   :  { %118 = vmatpush.bf16.msra.mxu0 %v730_v1 }
  0x21   :  { %205 = vmatmul.bf16.vlgmr.msra.gmra.mxu1 %v128_v44  ;;  %321 = vmatpush.bf16.msra.mxu2 %v602_v54 }
  0x22   :  { %334 = vmatpush.bf16.msra.mxu3 %v606_v56  ;;  %489 = vmatpush.bf16.msrb.mxu1 %v774_v59  ;;  %v781_v56 = vld [vmem:[#allocation2] ss:$0 sm:$0xff] }
  0x23   :  { %119 = vmatpush.bf16.msra.mxu0 %v729_v3 }
  0x26   :  { %490 = vmatpush.bf16.msrb.mxu1 %v773_v60 }
  0x27   :  { %120 = vmatpush.bf16.msra.mxu0 %v728_v6 }
  0x2a   :  { %491 = vmatpush.bf16.msrb.mxu1 %v772_v62 }
  0x2b   :  { %121 = vmatpush.bf16.msra.mxu0 %v727_v9 }
  0x2e   :  { %492 = vmatpush.bf16.msrb.mxu1 %v771_v0  ;;  %122 = vmatmul.bf16.vlgmr.msra.gmra.mxu0 %v45_v13 }
  0x2f   :  { %476 = vmatpush.bf16.msrb.mxu0 %v766_v11 }
  0x32   :  { %493 = vmatpush.bf16.msrb.mxu1 %v770_v2 }
  0x33   :  { %477 = vmatpush.bf16.msrb.mxu0 %v765_v15 }
  0x36   :  { %494 = vmatpush.bf16.msrb.mxu1 %v769_v5 }
  0x37   :  { %478 = vmatpush.bf16.msrb.mxu0 %v764_v16 }
  0x3a   :  { %495 = vmatpush.bf16.msrb.mxu1 %v768_v21 }
  0x3b   :  { %479 = vmatpush.bf16.msrb.mxu0 %v763_v17 }
  0x3e   :  { %496 = vmatpush.bf16.msrb.mxu1 %v767_v23 }
  0x3f   :  { %480 = vmatpush.bf16.msrb.mxu0 %v762_v18 }
  0x43   :  { %481 = vmatpush.bf16.msrb.mxu0 %v761_v19 }
  0x47   :  { %482 = vmatpush.bf16.msrb.mxu0 %v760_v20 }
  0x4b   :  { %483 = vmatpush.bf16.msrb.mxu0 %v759_v22 }
  0x9e   :  { %v206_v7 = vpop.f32.mrf.mxu1 }
  0x9f   :  { %v207_v8 = vadd.f32 %v777_v4, %v206_v7 }
  0xa1   :  { %v210_v10 = vmax.f32 %v207_v8, 0.0 }
  0xa3   :  { %v211_v12 = vpack.c.bf16 %v210_v10, %v210_v10 }
  0xa5   :  { %322 = vmatmul.bf16.vlgmr.msra.gmra.mxu2 %v211_v12  ;;  %335 = vmatmul.bf16.vlgmr.msra.gmra.mxu3 %v211_v12 }
  0xa6   :  { %v208_v14 = vpop.f32.mrf.mxu1 }
  0xab   :  { %v123_v25 = vpop.f32.mrf.mxu0 }
  0xac   :  { %v124_v40 = vadd.f32 %v778_v39, %v123_v25 }
  0xae   :  { %v127_v41 = vmax.f32 %v124_v40, 0.0 }
  0xb0   :  { %505 = vst.msk [vmem:[%s1095_s12] sm:$0xff] %vm504_vm0, %v127_v41 }
  0xb3   :  { %v125_v34 = vpop.f32.mrf.mxu0 }
 0x128   :  { %v323_v28 = vpop.f32.mrf.mxu2  ;;  %v336_v29 = vpop.f32.mrf.mxu3 }
 0x129   :  { %v324_v30 = vadd.f32 %v323_v28, %v230_v26  ;;  %v337_v31 = vadd.f32 %v336_v29, %v231_v27 }
 0x12b   :  { %v340_v32 = vmax.f32 %v324_v30, 0.0  ;;  %v341_v33 = vmax.f32 %v337_v31, 0.0 }
 0x12d   :  { %v342_v35 = vpack.c.bf16 %v340_v32, %v340_v32  ;;  %v343_v36 = vpack.c.bf16 %v341_v33, %v341_v33 }
 0x12f   :  { %484 = vmatmul.bf16.vlgmr.msrb.gmra.mxu0 %v342_v35  ;;  %497 = vmatmul.bf16.vlgmr.msrb.gmra.mxu1 %v343_v36 }
 0x130   :  { %v325_v37 = vpop.f32.mrf.mxu2  ;;  %v338_v38 = vpop.f32.mrf.mxu3 }
 0x1ac   :  { %v485_v44 = vpop.f32.mrf.mxu0  ;;  %v498_v45 = vpop.f32.mrf.mxu1 }
 0x1ad   :  { %v486_v46 = vadd.f32 %v779_v43, %v485_v44 }
 0x1af   :  { %v499_v47 = vadd.f32 %v498_v45, %v486_v46 }
 0x1b1   :  { %v502_v48 = vmax.f32 %v499_v47, 0.0 }
 0x1b3   :  { %507 = vrot.lane.b32.xlu0 %v502_v48, %s783_s3 }
 0x1b4   :  { %v487_v49 = vpop.f32.mrf.mxu0  ;;  %v500_v50 = vpop.f32.mrf.mxu1 }
 0x225   :  { %v508_v52 = vpop.permute.xlu0 %507 }
 0x226   :  { %511 = vst.msk [vmem:[%s1095_s12] sm:$0xff] %vm510_vm1, %v508_v52 }
 0x22d   :  { %v512_v54 = vld [vmem:[%s1095_s12] sm:$0xff] }
 0x22e   :  { %v517_v55 = vmul.f32 %v780_v53, %v512_v54 }
 0x230   :  { %518 = vadd.xlane.f32.xlu0 %v517_v55 }
 0x2a3   :  { %v519_v57 = vpop.xlane.xlu0 %518 }
 0x2a4   :  { %v524_v58 = vadd.f32 %v781_v56, %v519_v57 }
 0x2a6   :  { %526 = vst.msk [vmem:[%s1098_s13] sm:$0xff] %vm525_vm2, %v524_v58 }

</bundles_post_ra>
